<compile_context>
chip_gen: v7x
topology: tpu7x:2x2x1
jax: 0.10.0
libtpu: 0.0.40
codegen_flags: <defaults>
</compile_context>

<pallas_src>
import functools
import math

import numpy as np
import jax
import jax.numpy as jnp
from jax import lax
from jax.experimental import pallas as pl
from jax.experimental.pallas import tpu as pltpu  # noqa: F401  (TPU backend assumed)


# Canonical ordering of the stacked per-layer weight tensors (shared by fuse_params,
# the pallas_call argument list, and the in-kernel unpacking).
_ENC_KEYS = ("ln1_g", "ln1_b", "wqkv", "bqkv", "wo", "bo",
             "ln2_g", "ln2_b", "w1", "b1", "w2", "b2")
_DEC_KEYS = ("wqkv1", "bqkv1", "wo1", "bo1", "ln1_g", "ln1_b",
             "wq2", "bq2", "wkv2", "bkv2", "wo2", "bo2",
             "ln2_g", "ln2_b", "w1", "b1", "w2", "b2", "ln3_g", "ln3_b")
# misc inputs: enc_x, dec_ids, pe, emb_pad, mask_enc, mask_dec, mask_cross, dense_w, dense_b
_N_MISC = 9


# ----------------------- in-kernel building blocks (f32 elementwise, bf16 matmuls) ------------

def _bf16(x):
    return x.astype(jnp.bfloat16)


def _layernorm(z, g, b, eps):
    """LayerNorm over the last axis.  z: (M, D) f32; g/b: (1, D) f32."""
    mu = jnp.mean(z, axis=-1, keepdims=True)
    var = jnp.mean(jnp.square(z - mu), axis=-1, keepdims=True)
    return (z - mu) * lax.rsqrt(var + eps) * g + b


def _gelu_tanh(x):
    # TODO(synk): HF ViT's default activation is exact (erf) GELU; tanh approximation
    # deviates at ~1e-3 from the PyTorch reference.
    c = jnp.float32(0.7978845608028654)  # sqrt(2/pi)
    return 0.5 * x * (1.0 + jnp.tanh(c * (x + 0.044715 * (x * x * x))))


def _mh_attention(q, k, v, wo, num_heads, mask_add):
    """Multi-head attention with the head-concat folded into the W_o projection.

    q: (Mq, D) f32, already scaled by 1/sqrt(Dh) (folded into the Q weights).
    k, v: (Mk, D) f32.  wo: (D, D) bf16.  mask_add: (Mq, Mk) f32 additive mask
    (0 keep / -1e9 drop) carrying both the causal structure and the batch
    block-diagonal structure (batch is flattened into the M dimension).
    Returns concat_h(softmax_h(Q_h K_h^T) V_h) @ W_o without materialising the concat.
    """
    Mq, D = q.shape
    Dh = D // num_heads
    out = None
    for h in range(num_heads):                       # unrolled; everything stays on-chip
        sl = slice(h * Dh, (h + 1) * Dh)
        s = jnp.einsum("qd,kd->qk", _bf16(q[:, sl]), _bf16(k[:, sl]),
                       preferred_element_type=jnp.float32) + mask_add
        s = s - jnp.max(s, axis=-1, keepdims=True)   # softmax kept in f32
        e = jnp.exp(s)
        p = e * pl.reciprocal(jnp.sum(e, axis=-1, keepdims=True), approx=True)
        ctx = jnp.dot(_bf16(p), _bf16(v[:, sl]), preferred_element_type=jnp.float32)
        contrib = jnp.dot(_bf16(ctx), wo[sl, :], preferred_element_type=jnp.float32)
        out = contrib if out is None else out + contrib
    return out                                       # (Mq, D) f32  (bias added by caller)


def _vit_layer(x, p, mask_add, num_heads, eps):
    """HF-ViT layer (pre-LN): x + Attn(LN1(x)); h + GELU-MLP(LN2(h)).  x: (B*S, D) f32."""
    D = x.shape[-1]
    xn = _layernorm(x, p["ln1_g"], p["ln1_b"], eps)
    qkv = jnp.dot(_bf16(xn), p["wqkv"], preferred_element_type=jnp.float32) + p["bqkv"]
    att = _mh_attention(qkv[:, :D], qkv[:, D:2 * D], qkv[:, 2 * D:],
                        p["wo"], num_heads, mask_add)
    h = att + p["bo"] + x
    hn = _layernorm(h, p["ln2_g"], p["ln2_b"], eps)
    mid = _gelu_tanh(jnp.dot(_bf16(hn), p["w1"], preferred_element_type=jnp.float32)
                     + p["b1"])
    return jnp.dot(_bf16(mid), p["w2"], preferred_element_type=jnp.float32) + p["b2"] + h


def _decoder_block(x, enc_b16, p, self_mask, cross_mask, num_heads, eps):
    """DecoderBlock: causal self-attn + AddNorm, cross-attn + AddNorm, ReLU-FFN + AddNorm."""
    D = x.shape[-1]
    # causal self-attention (training-mode semantics: state cache None -> key_values == X)
    qkv = jnp.dot(_bf16(x), p["wqkv1"], preferred_element_type=jnp.float32) + p["bqkv1"]
    a1 = _mh_attention(qkv[:, :D], qkv[:, D:2 * D], qkv[:, 2 * D:],
                       p["wo1"], num_heads, self_mask) + p["bo1"]
    y = _layernorm(x + a1, p["ln1_g"], p["ln1_b"], eps)
    # cross-attention against encoder outputs (enc_valid_lens is None -> only batch blocking)
    q2 = jnp.dot(_bf16(y), p["wq2"], preferred_element_type=jnp.float32) + p["bq2"]
    kv = jnp.dot(enc_b16, p["wkv2"], preferred_element_type=jnp.float32) + p["bkv2"]
    a2 = _mh_attention(q2, kv[:, :D], kv[:, D:], p["wo2"],
                       num_heads, cross_mask) + p["bo2"]
    z = _layernorm(y + a2, p["ln2_g"], p["ln2_b"], eps)
    # position-wise FFN (ReLU)
    f = jnp.maximum(jnp.dot(_bf16(z), p["w1"], preferred_element_type=jnp.float32)
                    + p["b1"], 0.0)
    f = jnp.dot(_bf16(f), p["w2"], preferred_element_type=jnp.float32) + p["b2"]
    return _layernorm(z + f, p["ln3_g"], p["ln3_b"], eps)


# --------------------------------- the single fused kernel ------------------------------------

def _cptr_kernel(*refs, num_heads, enc_layers, dec_layers, eps_enc, eps_dec, sqrt_d):
    assert len(refs) == _N_MISC + len(_ENC_KEYS) + len(_DEC_KEYS) + 1
    (enc_x_ref, ids_ref, pe_ref, emb_ref, m_enc_ref, m_dec_ref, m_x_ref,
     dense_w_ref, dense_b_ref) = refs[:_N_MISC]
    enc_w = dict(zip(_ENC_KEYS, refs[_N_MISC:_N_MISC + len(_ENC_KEYS)]))
    dec_w = dict(zip(_DEC_KEYS, refs[_N_MISC + len(_ENC_KEYS):
                                     _N_MISC + len(_ENC_KEYS) + len(_DEC_KEYS)]))
    o_ref = refs[-1]

    m_enc = m_enc_ref[...]          # (B*S_enc, B*S_enc) additive mask
    m_dec = m_dec_ref[...]          # (B*S_dec, B*S_dec) additive causal mask
    m_x = m_x_ref[...]              # (B*S_dec, B*S_enc) additive mask

    # ---- ViT encoder stack (unrolled over layers; activations never leave VMEM) ----
    h = enc_x_ref[...]                                           # (B*S_enc, D) f32
    for l in range(enc_layers):
        p = {k: enc_w[k][l] for k in _ENC_KEYS}
        h = _vit_layer(h, p, m_enc, num_heads, eps_enc)
    enc_b16 = _bf16(h)
    # TODO(synk): enc_valid_lens is never supplied in CPTR.forward; treated as None (no mask).

    # ---- decoder input: embedding lookup via one-hot matmul (vocab padded to 128) + PE ----
    ids = ids_ref[...]                                           # (B*S_dec, 1) int32
    Vp = emb_ref.shape[0]
    eq = ids == lax.broadcasted_iota(jnp.int32, (ids.shape[0], Vp), 1)
    onehot = jnp.where(eq, 1.0, 0.0)                             # (B*S_dec, Vp) f32
    x = (jnp.dot(onehot, emb_ref[...], preferred_element_type=jnp.float32) * sqrt_d
         + pe_ref[...])                                          # (B*S_dec, D) f32

    # ---- Transformer decoder stack (unrolled) ----
    for l in range(dec_layers):
        p = {k: dec_w[k][l] for k in _DEC_KEYS}
        x = _decoder_block(x, enc_b16, p, m_dec, m_x, num_heads, eps_dec)

    # ---- fused final vocab projection; Vp=128 -> lane-dense (unmasked) output store ----
    o_ref[...] = (jnp.dot(_bf16(x), dense_w_ref[...],
                          preferred_element_type=jnp.float32)
                  + dense_b_ref[...]).astype(o_ref.dtype)


# --------------------------------- driver (JAX glue only) -------------------------------------

def cptr_forward(params, enc_X, dec_X, cfg):
    """CPTR.forward: ViT-encoder(enc_X) -> TransformerDecoder(dec_X, state) -> logits."""
    B, S_enc, D = enc_X.shape
    S_dec = dec_X.shape[1]
    V = cfg["vocab"]
    Vp = params["dense_w_pad"].shape[1]

    args = [enc_X.reshape(B * S_enc, D).astype(jnp.float32),
            dec_X.reshape(B * S_dec, 1).astype(jnp.int32),
            params["pe_flat"], params["emb_pad"],
            params["mask_enc"], params["mask_dec"], params["mask_cross"],
            params["dense_w_pad"], params["dense_b_pad"]]
    args += [params["encoder"][k] for k in _ENC_KEYS]
    args += [params["decoder"][k] for k in _DEC_KEYS]

    kernel = functools.partial(
        _cptr_kernel,
        num_heads=cfg["num_heads"],
        enc_layers=cfg["enc_layers"],
        dec_layers=cfg["dec_layers"],
        eps_enc=1e-12,                 # HF ViT LayerNorm eps
        eps_dec=1e-5,                  # torch.nn.LayerNorm default
        sqrt_d=math.sqrt(D))

    # Single launch, no grid: every operand is a whole-array VMEM block (everything is tiny).
    logits_pad = pl.pallas_call(
        kernel,
        out_shape=jax.ShapeDtypeStruct((B * S_dec, Vp), jnp.float32),
    )(*args)
    return logits_pad.reshape(B, S_dec, Vp)[:, :, :V]   # strip lane-dense vocab padding


# ------------------------ parameter init + host-side fusion / precomputation ------------------

def positional_encoding_table(S, D):
    """d2l PositionalEncoding table, precomputed on host (outside jit)."""
    pos = np.arange(S, dtype=np.float32)[:, None]
    div = np.power(10000.0, np.arange(0, D, 2, dtype=np.float32) / D)
    X = pos / div
    P = np.zeros((S, D), np.float32)
    P[:, 0::2] = np.sin(X)
    P[:, 1::2] = np.cos(X)
    return P


def _batch_block_mask(B, sq, sk, causal):
    """Additive mask (0 keep / -1e9 drop) for batch-flattened attention rows/cols."""
    r = np.arange(B * sq)
    c = np.arange(B * sk)
    keep = (r[:, None] // sq) == (c[None, :] // sk)        # same batch element only
    if causal:
        keep &= (c[None, :] % sk) <= (r[:, None] % sq)     # dec_valid_lens = arange(1, S+1)
    return jnp.asarray(np.where(keep, 0.0, -1e9), jnp.float32)


def init_params(key, cfg):
    D, F, V = cfg["num_hiddens"], cfg["ffn_hiddens"], cfg["vocab"]
    keys = iter(jax.random.split(key, 256))

    def dense(nin, nout):
        w = jax.random.normal(next(keys), (nin, nout), jnp.float32) * 0.02
        return w, jnp.zeros((nout,), jnp.float32)

    def mha():
        wq, bq = dense(D, D); wk, bk = dense(D, D)
        wv, bv = dense(D, D); wo, bo = dense(D, D)
        return dict(wq=wq, bq=bq, wk=wk, bk=bk, wv=wv, bv=bv, wo=wo, bo=bo)

    ones = jnp.ones((D,), jnp.float32)
    zeros = jnp.zeros((D,), jnp.float32)

    enc = []
    for _ in range(cfg["enc_layers"]):
        w1, b1 = dense(D, F); w2, b2 = dense(F, D)
        enc.append(dict(ln1_g=ones, ln1_b=zeros, ln2_g=ones, ln2_b=zeros,
                        attn=mha(), w1=w1, b1=b1, w2=w2, b2=b2))
    dec = []
    for _ in range(cfg["dec_layers"]):
        w1, b1 = dense(D, F); w2, b2 = dense(F, D)
        dec.append(dict(ln1_g=ones, ln1_b=zeros, ln2_g=ones, ln2_b=zeros,
                        ln3_g=ones, ln3_b=zeros,
                        attn1=mha(), attn2=mha(), w1=w1, b1=b1, w2=w2, b2=b2))
    dense_w, dense_b = dense(D, V)
    emb = jax.random.normal(next(keys), (V, D), jnp.float32) * 0.02
    return dict(encoder=enc, decoder=dec, embedding=emb,
                dense_w=dense_w, dense_b=dense_b)


def fuse_params(params, cfg, B, S_enc, S_dec):
    """Stack per-layer weights on a leading layer axis, fuse Wq/Wk/Wv, fold 1/sqrt(Dh) into Q,
    cast matmul weights to bf16, pad vocab to 128, and precompute PE / embedding / masks."""
    D, H, V = cfg["num_hiddens"], cfg["num_heads"], cfg["vocab"]
    scale = 1.0 / math.sqrt(D // H)
    wdt = jnp.bfloat16          # MXU-native weight storage; activations cast at the dot

    def row(v):
        return v.reshape(1, -1)

    enc_layers = []
    for lp in params["encoder"]:
        a = lp["attn"]
        enc_layers.append(dict(
            ln1_g=row(lp["ln1_g"]), ln1_b=row(lp["ln1_b"]),
            wqkv=jnp.concatenate([a["wq"] * scale, a["wk"], a["wv"]], axis=1).astype(wdt),
            bqkv=row(jnp.concatenate([a["bq"] * scale, a["bk"], a["bv"]])),
            wo=a["wo"].astype(wdt), bo=row(a["bo"]),
            ln2_g=row(lp["ln2_g"]), ln2_b=row(lp["ln2_b"]),
            w1=lp["w1"].astype(wdt), b1=row(lp["b1"]),
            w2=lp["w2"].astype(wdt), b2=row(lp["b2"])))
    enc = {k: jnp.stack([l[k] for l in enc_layers]) for k in _ENC_KEYS}

    dec_layers = []
    for lp in params["decoder"]:
        a1, a2 = lp["attn1"], lp["attn2"]
        dec_layers.append(dict(
            wqkv1=jnp.concatenate([a1["wq"] * scale, a1["wk"], a1["wv"]], axis=1).astype(wdt),
            bqkv1=row(jnp.concatenate([a1["bq"] * scale, a1["bk"], a1["bv"]])),
            wo1=a1["wo"].astype(wdt), bo1=row(a1["bo"]),
            ln1_g=row(lp["ln1_g"]), ln1_b=row(lp["ln1_b"]),
            wq2=(a2["wq"] * scale).astype(wdt), bq2=row(a2["bq"] * scale),
            wkv2=jnp.concatenate([a2["wk"], a2["wv"]], axis=1).astype(wdt),
            bkv2=row(jnp.concatenate([a2["bk"], a2["bv"]])),
            wo2=a2["wo"].astype(wdt), bo2=row(a2["bo"]),
            ln2_g=row(lp["ln2_g"]), ln2_b=row(lp["ln2_b"]),
            w1=lp["w1"].astype(wdt), b1=row(lp["b1"]),
            w2=lp["w2"].astype(wdt), b2=row(lp["b2"]),
            ln3_g=row(lp["ln3_g"]), ln3_b=row(lp["ln3_b"])))
    dec = {k: jnp.stack([l[k] for l in dec_layers]) for k in _DEC_KEYS}

    Vp = ((V + 127) // 128) * 128                       # lane-dense padded vocab (3 -> 128)
    dwp = jnp.zeros((D, Vp), jnp.float32).at[:, :V].set(params["dense_w"]).astype(wdt)
    dbp = jnp.zeros((1, Vp), jnp.float32).at[:, :V].set(params["dense_b"])
    emb_pad = jnp.zeros((Vp, D), jnp.float32).at[:V, :].set(params["embedding"])

    pe = positional_encoding_table(S_dec, D)            # precomputed once, outside jit
    pe_flat = jnp.asarray(np.tile(pe, (B, 1)), jnp.float32)   # (B*S_dec, D)

    return dict(
        encoder=enc, decoder=dec,
        dense_w_pad=dwp, dense_b_pad=dbp,
        emb_pad=emb_pad, pe_flat=pe_flat,
        mask_enc=_batch_block_mask(B, S_enc, S_enc, causal=False),
        mask_dec=_batch_block_mask(B, S_dec, S_dec, causal=True),
        mask_cross=_batch_block_mask(B, S_dec, S_enc, causal=False))


# --------------------------------------------- main -------------------------------------------

if __name__ == "__main__":
    cfg = dict(num_hiddens=64, num_heads=4, ffn_hiddens=128, vocab=3,
               enc_layers=2, dec_layers=2)
    B, S_enc, S_dec = 2, 8, 8

    key = jax.random.PRNGKey(0)
    kp, ke, kd = jax.random.split(key, 3)
    params = fuse_params(init_params(kp, cfg), cfg, B, S_enc, S_dec)

    # encoder input: pre-embedded patch tokens (ViTModel.encoder operates on hidden states)
    enc_X = jax.random.normal(ke, (B, S_enc, cfg["num_hiddens"]), jnp.float32)
    # decoder input: token ids in [0, vocab)
    dec_X = jax.random.randint(kd, (B, S_dec), 0, cfg["vocab"], dtype=jnp.int32)

    fwd = jax.jit(functools.partial(cptr_forward, cfg=cfg))
    out = jax.block_until_ready(fwd(params, enc_X, dec_X))
    assert out.shape == (B, S_dec, cfg["vocab"]), out.shape
    assert bool(jnp.all(jnp.isfinite(out)))
    print("KERNEL_OK")
</pallas_src>

<mosaic_0001>
module attributes {stable_mosaic.version = 11 : i64} {
  func.func @_cptr_kernel(%arg0: memref<16x64xf32, #tpu.memory_space<vmem>>, %arg1: memref<16x1xi32, #tpu.memory_space<vmem>>, %arg2: memref<16x64xf32, #tpu.memory_space<vmem>>, %arg3: memref<128x64xf32, #tpu.memory_space<vmem>>, %arg4: memref<16x16xf32, #tpu.memory_space<vmem>>, %arg5: memref<16x16xf32, #tpu.memory_space<vmem>>, %arg6: memref<16x16xf32, #tpu.memory_space<vmem>>, %arg7: memref<64x128xbf16, #tpu.memory_space<vmem>>, %arg8: memref<1x128xf32, #tpu.memory_space<vmem>>, %arg9: memref<2x1x64xf32, #tpu.memory_space<vmem>>, %arg10: memref<2x1x64xf32, #tpu.memory_space<vmem>>, %arg11: memref<2x64x192xbf16, #tpu.memory_space<vmem>>, %arg12: memref<2x1x192xf32, #tpu.memory_space<vmem>>, %arg13: memref<2x64x64xbf16, #tpu.memory_space<vmem>>, %arg14: memref<2x1x64xf32, #tpu.memory_space<vmem>>, %arg15: memref<2x1x64xf32, #tpu.memory_space<vmem>>, %arg16: memref<2x1x64xf32, #tpu.memory_space<vmem>>, %arg17: memref<2x64x128xbf16, #tpu.memory_space<vmem>>, %arg18: memref<2x1x128xf32, #tpu.memory_space<vmem>>, %arg19: memref<2x128x64xbf16, #tpu.memory_space<vmem>>, %arg20: memref<2x1x64xf32, #tpu.memory_space<vmem>>, %arg21: memref<2x64x192xbf16, #tpu.memory_space<vmem>>, %arg22: memref<2x1x192xf32, #tpu.memory_space<vmem>>, %arg23: memref<2x64x64xbf16, #tpu.memory_space<vmem>>, %arg24: memref<2x1x64xf32, #tpu.memory_space<vmem>>, %arg25: memref<2x1x64xf32, #tpu.memory_space<vmem>>, %arg26: memref<2x1x64xf32, #tpu.memory_space<vmem>>, %arg27: memref<2x64x64xbf16, #tpu.memory_space<vmem>>, %arg28: memref<2x1x64xf32, #tpu.memory_space<vmem>>, %arg29: memref<2x64x128xbf16, #tpu.memory_space<vmem>>, %arg30: memref<2x1x128xf32, #tpu.memory_space<vmem>>, %arg31: memref<2x64x64xbf16, #tpu.memory_space<vmem>>, %arg32: memref<2x1x64xf32, #tpu.memory_space<vmem>>, %arg33: memref<2x1x64xf32, #tpu.memory_space<vmem>>, %arg34: memref<2x1x64xf32, #tpu.memory_space<vmem>>, %arg35: memref<2x64x128xbf16, #tpu.memory_space<vmem>>, %arg36: memref<2x1x128xf32, #tpu.memory_space<vmem>>, %arg37: memref<2x128x64xbf16, #tpu.memory_space<vmem>>, %arg38: memref<2x1x64xf32, #tpu.memory_space<vmem>>, %arg39: memref<2x1x64xf32, #tpu.memory_space<vmem>>, %arg40: memref<2x1x64xf32, #tpu.memory_space<vmem>>, %arg41: memref<16x128xf32, #tpu.memory_space<vmem>>) attributes {dimension_semantics = [], scalar_prefetch = 0 : i64, scratch_operands = 0 : i64, tpu.core_type = #tpu.core_type<tc>} {
    %c0 = arith.constant 0 : index
    %c0_0 = arith.constant 0 : index
    %0 = vector.load %arg4[%c0, %c0_0] : memref<16x16xf32, #tpu.memory_space<vmem>>, vector<16x16xf32>
    %c0_1 = arith.constant 0 : index
    %c0_2 = arith.constant 0 : index
    %1 = vector.load %arg5[%c0_1, %c0_2] : memref<16x16xf32, #tpu.memory_space<vmem>>, vector<16x16xf32>
    %c0_3 = arith.constant 0 : index
    %c0_4 = arith.constant 0 : index
    %2 = vector.load %arg6[%c0_3, %c0_4] : memref<16x16xf32, #tpu.memory_space<vmem>>, vector<16x16xf32>
    %c0_5 = arith.constant 0 : index
    %c0_6 = arith.constant 0 : index
    %3 = vector.load %arg0[%c0_5, %c0_6] : memref<16x64xf32, #tpu.memory_space<vmem>>, vector<16x64xf32>
    %c0_7 = arith.constant 0 : index
    %c0_8 = arith.constant 0 : index
    %c0_9 = arith.constant 0 : index
    %4 = vector.load %arg9[%c0_7, %c0_8, %c0_9] : memref<2x1x64xf32, #tpu.memory_space<vmem>>, vector<1x1x64xf32>
    %5 = vector.shape_cast %4 : vector<1x1x64xf32> to vector<1x64xf32>
    %c0_10 = arith.constant 0 : index
    %c0_11 = arith.constant 0 : index
    %c0_12 = arith.constant 0 : index
    %6 = vector.load %arg10[%c0_10, %c0_11, %c0_12] : memref<2x1x64xf32, #tpu.memory_space<vmem>>, vector<1x1x64xf32>
    %7 = vector.shape_cast %6 : vector<1x1x64xf32> to vector<1x64xf32>
    %c0_13 = arith.constant 0 : index
    %c0_14 = arith.constant 0 : index
    %c0_15 = arith.constant 0 : index
    %8 = vector.load %arg11[%c0_13, %c0_14, %c0_15] : memref<2x64x192xbf16, #tpu.memory_space<vmem>>, vector<1x64x192xbf16>
    %9 = vector.shape_cast %8 : vector<1x64x192xbf16> to vector<64x192xbf16>
    %c0_16 = arith.constant 0 : index
    %c0_17 = arith.constant 0 : index
    %c0_18 = arith.constant 0 : index
    %10 = vector.load %arg12[%c0_16, %c0_17, %c0_18] : memref<2x1x192xf32, #tpu.memory_space<vmem>>, vector<1x1x192xf32>
    %11 = vector.shape_cast %10 : vector<1x1x192xf32> to vector<1x192xf32>
    %c0_19 = arith.constant 0 : index
    %c0_20 = arith.constant 0 : index
    %c0_21 = arith.constant 0 : index
    %12 = vector.load %arg13[%c0_19, %c0_20, %c0_21] : memref<2x64x64xbf16, #tpu.memory_space<vmem>>, vector<1x64x64xbf16>
    %13 = vector.shape_cast %12 : vector<1x64x64xbf16> to vector<64x64xbf16>
    %c0_22 = arith.constant 0 : index
    %c0_23 = arith.constant 0 : index
    %c0_24 = arith.constant 0 : index
    %14 = vector.load %arg14[%c0_22, %c0_23, %c0_24] : memref<2x1x64xf32, #tpu.memory_space<vmem>>, vector<1x1x64xf32>
    %15 = vector.shape_cast %14 : vector<1x1x64xf32> to vector<1x64xf32>
    %c0_25 = arith.constant 0 : index
    %c0_26 = arith.constant 0 : index
    %c0_27 = arith.constant 0 : index
    %16 = vector.load %arg15[%c0_25, %c0_26, %c0_27] : memref<2x1x64xf32, #tpu.memory_space<vmem>>, vector<1x1x64xf32>
    %17 = vector.shape_cast %16 : vector<1x1x64xf32> to vector<1x64xf32>
    %c0_28 = arith.constant 0 : index
    %c0_29 = arith.constant 0 : index
    %c0_30 = arith.constant 0 : index
    %18 = vector.load %arg16[%c0_28, %c0_29, %c0_30] : memref<2x1x64xf32, #tpu.memory_space<vmem>>, vector<1x1x64xf32>
    %19 = vector.shape_cast %18 : vector<1x1x64xf32> to vector<1x64xf32>
    %c0_31 = arith.constant 0 : index
    %c0_32 = arith.constant 0 : index
    %c0_33 = arith.constant 0 : index
    %20 = vector.load %arg17[%c0_31, %c0_32, %c0_33] : memref<2x64x128xbf16, #tpu.memory_space<vmem>>, vector<1x64x128xbf16>
    %21 = vector.shape_cast %20 : vector<1x64x128xbf16> to vector<64x128xbf16>
    %c0_34 = arith.constant 0 : index
    %c0_35 = arith.constant 0 : index
    %c0_36 = arith.constant 0 : index
    %22 = vector.load %arg18[%c0_34, %c0_35, %c0_36] : memref<2x1x128xf32, #tpu.memory_space<vmem>>, vector<1x1x128xf32>
    %23 = vector.shape_cast %22 : vector<1x1x128xf32> to vector<1x128xf32>
    %c0_37 = arith.constant 0 : index
    %c0_38 = arith.constant 0 : index
    %c0_39 = arith.constant 0 : index
    %24 = vector.load %arg19[%c0_37, %c0_38, %c0_39] : memref<2x128x64xbf16, #tpu.memory_space<vmem>>, vector<1x128x64xbf16>
    %25 = vector.shape_cast %24 : vector<1x128x64xbf16> to vector<128x64xbf16>
    %c0_40 = arith.constant 0 : index
    %c0_41 = arith.constant 0 : index
    %c0_42 = arith.constant 0 : index
    %26 = vector.load %arg20[%c0_40, %c0_41, %c0_42] : memref<2x1x64xf32, #tpu.memory_space<vmem>>, vector<1x1x64xf32>
    %27 = vector.shape_cast %26 : vector<1x1x64xf32> to vector<1x64xf32>
    %cst = arith.constant dense<0.000000e+00> : vector<16xf32>
    %28 = vector.multi_reduction <add>, %3, %cst [1] : vector<16x64xf32> to vector<16xf32>
    %29 = vector.shape_cast %28 : vector<16xf32> to vector<16x1xf32>
    %cst_43 = arith.constant 6.400000e+01 : f32
    %30 = vector.broadcast %cst_43 : f32 to vector<16x1xf32>
    %31 = arith.divf %29, %30 : vector<16x1xf32>
    %32 = vector.broadcast %31 : vector<16x1xf32> to vector<16x64xf32>
    %33 = arith.subf %3, %32 : vector<16x64xf32>
    %34 = arith.mulf %33, %33 : vector<16x64xf32>
    %cst_44 = arith.constant dense<0.000000e+00> : vector<16xf32>
    %35 = vector.multi_reduction <add>, %34, %cst_44 [1] : vector<16x64xf32> to vector<16xf32>
    %36 = vector.shape_cast %35 : vector<16xf32> to vector<16x1xf32>
    %cst_45 = arith.constant 6.400000e+01 : f32
    %37 = vector.broadcast %cst_45 : f32 to vector<16x1xf32>
    %38 = arith.divf %36, %37 : vector<16x1xf32>
    %39 = vector.broadcast %31 : vector<16x1xf32> to vector<16x64xf32>
    %40 = arith.subf %3, %39 : vector<16x64xf32>
    %cst_46 = arith.constant 9.99999996E-13 : f32
    %41 = vector.broadcast %cst_46 : f32 to vector<16x1xf32>
    %42 = arith.addf %38, %41 : vector<16x1xf32>
    %43 = math.rsqrt %42 : vector<16x1xf32>
    %44 = vector.broadcast %43 : vector<16x1xf32> to vector<16x64xf32>
    %45 = arith.mulf %40, %44 : vector<16x64xf32>
    %46 = vector.broadcast %5 : vector<1x64xf32> to vector<16x64xf32>
    %47 = arith.mulf %45, %46 : vector<16x64xf32>
    %48 = vector.broadcast %7 : vector<1x64xf32> to vector<16x64xf32>
    %49 = arith.addf %47, %48 : vector<16x64xf32>
    %50 = arith.truncf %49 : vector<16x64xf32> to vector<16x64xbf16>
    %cst_47 = arith.constant dense<0.000000e+00> : vector<16x192xf32>
    %51 = tpu.matmul %50, %9, %cst_47 {dimension_numbers = #tpu.dot_dimension_numbers<[1], [0], [0], [1], [0, 0, 1, 1], [], []>} : vector<16x64xbf16>, vector<64x192xbf16>, vector<16x192xf32> -> vector<16x192xf32>
    %52 = vector.broadcast %11 : vector<1x192xf32> to vector<16x192xf32>
    %53 = arith.addf %51, %52 : vector<16x192xf32>
    %54 = vector.extract_strided_slice %53 {offsets = [0, 0], sizes = [16, 64], strides = [1, 1]} : vector<16x192xf32> to vector<16x64xf32>
    %55 = vector.extract_strided_slice %53 {offsets = [0, 64], sizes = [16, 64], strides = [1, 1]} : vector<16x192xf32> to vector<16x64xf32>
    %56 = vector.extract_strided_slice %53 {offsets = [0, 128], sizes = [16, 64], strides = [1, 1]} : vector<16x192xf32> to vector<16x64xf32>
    %57 = vector.extract_strided_slice %54 {offsets = [0, 0], sizes = [16, 16], strides = [1, 1]} : vector<16x64xf32> to vector<16x16xf32>
    %58 = arith.truncf %57 : vector<16x16xf32> to vector<16x16xbf16>
    %59 = vector.extract_strided_slice %55 {offsets = [0, 0], sizes = [16, 16], strides = [1, 1]} : vector<16x64xf32> to vector<16x16xf32>
    %60 = arith.truncf %59 : vector<16x16xf32> to vector<16x16xbf16>
    "tpu.trace_start"() <{level = 10 : i32, message = "qd,kd->qk"}> : () -> ()
    %cst_48 = arith.constant dense<0.000000e+00> : vector<16x16xf32>
    %61 = tpu.matmul %58, %60, %cst_48 {dimension_numbers = #tpu.dot_dimension_numbers<[1], [1], [0], [0], [0, 0, 1, 0], [], []>} : vector<16x16xbf16>, vector<16x16xbf16>, vector<16x16xf32> -> vector<16x16xf32>
    "tpu.trace_stop"() : () -> ()
    %62 = arith.addf %61, %0 : vector<16x16xf32>
    %cst_49 = arith.constant dense<0xFF800000> : vector<16xf32>
    %63 = vector.multi_reduction <maximumf>, %62, %cst_49 [1] : vector<16x16xf32> to vector<16xf32>
    %64 = vector.shape_cast %63 : vector<16xf32> to vector<16x1xf32>
    %65 = vector.broadcast %64 : vector<16x1xf32> to vector<16x16xf32>
    %66 = arith.subf %62, %65 : vector<16x16xf32>
    %67 = math.exp %66 : vector<16x16xf32>
    %cst_50 = arith.constant dense<0.000000e+00> : vector<16xf32>
    %68 = vector.multi_reduction <add>, %67, %cst_50 [1] : vector<16x16xf32> to vector<16xf32>
    %69 = vector.shape_cast %68 : vector<16xf32> to vector<16x1xf32>
    %70 = tpu.reciprocal %69 {approx = true} : vector<16x1xf32> -> vector<16x1xf32>
    %71 = vector.broadcast %70 : vector<16x1xf32> to vector<16x16xf32>
    %72 = arith.mulf %67, %71 : vector<16x16xf32>
    %73 = arith.truncf %72 : vector<16x16xf32> to vector<16x16xbf16>
    %74 = vector.extract_strided_slice %56 {offsets = [0, 0], sizes = [16, 16], strides = [1, 1]} : vector<16x64xf32> to vector<16x16xf32>
    %75 = arith.truncf %74 : vector<16x16xf32> to vector<16x16xbf16>
    %cst_51 = arith.constant dense<0.000000e+00> : vector<16x16xf32>
    %76 = tpu.matmul %73, %75, %cst_51 {dimension_numbers = #tpu.dot_dimension_numbers<[1], [0], [0], [1], [0, 0, 1, 1], [], []>} : vector<16x16xbf16>, vector<16x16xbf16>, vector<16x16xf32> -> vector<16x16xf32>
    %77 = arith.truncf %76 : vector<16x16xf32> to vector<16x16xbf16>
    %78 = vector.extract_strided_slice %13 {offsets = [0, 0], sizes = [16, 64], strides = [1, 1]} : vector<64x64xbf16> to vector<16x64xbf16>
    %cst_52 = arith.constant dense<0.000000e+00> : vector<16x64xf32>
    %79 = tpu.matmul %77, %78, %cst_52 {dimension_numbers = #tpu.dot_dimension_numbers<[1], [0], [0], [1], [0, 0, 1, 1], [], []>} : vector<16x16xbf16>, vector<16x64xbf16>, vector<16x64xf32> -> vector<16x64xf32>
    %80 = vector.extract_strided_slice %54 {offsets = [0, 16], sizes = [16, 16], strides = [1, 1]} : vector<16x64xf32> to vector<16x16xf32>
    %81 = arith.truncf %80 : vector<16x16xf32> to vector<16x16xbf16>
    %82 = vector.extract_strided_slice %55 {offsets = [0, 16], sizes = [16, 16], strides = [1, 1]} : vector<16x64xf32> to vector<16x16xf32>
    %83 = arith.truncf %82 : vector<16x16xf32> to vector<16x16xbf16>
    "tpu.trace_start"() <{level = 10 : i32, message = "qd,kd->qk"}> : () -> ()
    %cst_53 = arith.constant dense<0.000000e+00> : vector<16x16xf32>
    %84 = tpu.matmul %81, %83, %cst_53 {dimension_numbers = #tpu.dot_dimension_numbers<[1], [1], [0], [0], [0, 0, 1, 0], [], []>} : vector<16x16xbf16>, vector<16x16xbf16>, vector<16x16xf32> -> vector<16x16xf32>
    "tpu.trace_stop"() : () -> ()
    %85 = arith.addf %84, %0 : vector<16x16xf32>
    %cst_54 = arith.constant dense<0xFF800000> : vector<16xf32>
    %86 = vector.multi_reduction <maximumf>, %85, %cst_54 [1] : vector<16x16xf32> to vector<16xf32>
    %87 = vector.shape_cast %86 : vector<16xf32> to vector<16x1xf32>
    %88 = vector.broadcast %87 : vector<16x1xf32> to vector<16x16xf32>
    %89 = arith.subf %85, %88 : vector<16x16xf32>
    %90 = math.exp %89 : vector<16x16xf32>
    %cst_55 = arith.constant dense<0.000000e+00> : vector<16xf32>
    %91 = vector.multi_reduction <add>, %90, %cst_55 [1] : vector<16x16xf32> to vector<16xf32>
    %92 = vector.shape_cast %91 : vector<16xf32> to vector<16x1xf32>
    %93 = tpu.reciprocal %92 {approx = true} : vector<16x1xf32> -> vector<16x1xf32>
    %94 = vector.broadcast %93 : vector<16x1xf32> to vector<16x16xf32>
    %95 = arith.mulf %90, %94 : vector<16x16xf32>
    %96 = arith.truncf %95 : vector<16x16xf32> to vector<16x16xbf16>
    %97 = vector.extract_strided_slice %56 {offsets = [0, 16], sizes = [16, 16], strides = [1, 1]} : vector<16x64xf32> to vector<16x16xf32>
    %98 = arith.truncf %97 : vector<16x16xf32> to vector<16x16xbf16>
    %cst_56 = arith.constant dense<0.000000e+00> : vector<16x16xf32>
    %99 = tpu.matmul %96, %98, %cst_56 {dimension_numbers = #tpu.dot_dimension_numbers<[1], [0], [0], [1], [0, 0, 1, 1], [], []>} : vector<16x16xbf16>, vector<16x16xbf16>, vector<16x16xf32> -> vector<16x16xf32>
    %100 = arith.truncf %99 : vector<16x16xf32> to vector<16x16xbf16>
    %101 = vector.extract_strided_slice %13 {offsets = [16, 0], sizes = [16, 64], strides = [1, 1]} : vector<64x64xbf16> to vector<16x64xbf16>
    %cst_57 = arith.constant dense<0.000000e+00> : vector<16x64xf32>
    %102 = tpu.matmul %100, %101, %cst_57 {dimension_numbers = #tpu.dot_dimension_numbers<[1], [0], [0], [1], [0, 0, 1, 1], [], []>} : vector<16x16xbf16>, vector<16x64xbf16>, vector<16x64xf32> -> vector<16x64xf32>
    %103 = arith.addf %79, %102 : vector<16x64xf32>
    %104 = vector.extract_strided_slice %54 {offsets = [0, 32], sizes = [16, 16], strides = [1, 1]} : vector<16x64xf32> to vector<16x16xf32>
    %105 = arith.truncf %104 : vector<16x16xf32> to vector<16x16xbf16>
    %106 = vector.extract_strided_slice %55 {offsets = [0, 32], sizes = [16, 16], strides = [1, 1]} : vector<16x64xf32> to vector<16x16xf32>
    %107 = arith.truncf %106 : vector<16x16xf32> to vector<16x16xbf16>
    "tpu.trace_start"() <{level = 10 : i32, message = "qd,kd->qk"}> : () -> ()
    %cst_58 = arith.constant dense<0.000000e+00> : vector<16x16xf32>
    %108 = tpu.matmul %105, %107, %cst_58 {dimension_numbers = #tpu.dot_dimension_numbers<[1], [1], [0], [0], [0, 0, 1, 0], [], []>} : vector<16x16xbf16>, vector<16x16xbf16>, vector<16x16xf32> -> vector<16x16xf32>
    "tpu.trace_stop"() : () -> ()
    %109 = arith.addf %108, %0 : vector<16x16xf32>
    %cst_59 = arith.constant dense<0xFF800000> : vector<16xf32>
    %110 = vector.multi_reduction <maximumf>, %109, %cst_59 [1] : vector<16x16xf32> to vector<16xf32>
    %111 = vector.shape_cast %110 : vector<16xf32> to vector<16x1xf32>
    %112 = vector.broadcast %111 : vector<16x1xf32> to vector<16x16xf32>
    %113 = arith.subf %109, %112 : vector<16x16xf32>
    %114 = math.exp %113 : vector<16x16xf32>
    %cst_60 = arith.constant dense<0.000000e+00> : vector<16xf32>
    %115 = vector.multi_reduction <add>, %114, %cst_60 [1] : vector<16x16xf32> to vector<16xf32>
    %116 = vector.shape_cast %115 : vector<16xf32> to vector<16x1xf32>
    %117 = tpu.reciprocal %116 {approx = true} : vector<16x1xf32> -> vector<16x1xf32>
    %118 = vector.broadcast %117 : vector<16x1xf32> to vector<16x16xf32>
    %119 = arith.mulf %114, %118 : vector<16x16xf32>
    %120 = arith.truncf %119 : vector<16x16xf32> to vector<16x16xbf16>
    %121 = vector.extract_strided_slice %56 {offsets = [0, 32], sizes = [16, 16], strides = [1, 1]} : vector<16x64xf32> to vector<16x16xf32>
    %122 = arith.truncf %121 : vector<16x16xf32> to vector<16x16xbf16>
    %cst_61 = arith.constant dense<0.000000e+00> : vector<16x16xf32>
    %123 = tpu.matmul %120, %122, %cst_61 {dimension_numbers = #tpu.dot_dimension_numbers<[1], [0], [0], [1], [0, 0, 1, 1], [], []>} : vector<16x16xbf16>, vector<16x16xbf16>, vector<16x16xf32> -> vector<16x16xf32>
    %124 = arith.truncf %123 : vector<16x16xf32> to vector<16x16xbf16>
    %125 = vector.extract_strided_slice %13 {offsets = [32, 0], sizes = [16, 64], strides = [1, 1]} : vector<64x64xbf16> to vector<16x64xbf16>
    %cst_62 = arith.constant dense<0.000000e+00> : vector<16x64xf32>
    %126 = tpu.matmul %124, %125, %cst_62 {dimension_numbers = #tpu.dot_dimension_numbers<[1], [0], [0], [1], [0, 0, 1, 1], [], []>} : vector<16x16xbf16>, vector<16x64xbf16>, vector<16x64xf32> -> vector<16x64xf32>
    %127 = arith.addf %103, %126 : vector<16x64xf32>
    %128 = vector.extract_strided_slice %54 {offsets = [0, 48], sizes = [16, 16], strides = [1, 1]} : vector<16x64xf32> to vector<16x16xf32>
    %129 = arith.truncf %128 : vector<16x16xf32> to vector<16x16xbf16>
    %130 = vector.extract_strided_slice %55 {offsets = [0, 48], sizes = [16, 16], strides = [1, 1]} : vector<16x64xf32> to vector<16x16xf32>
    %131 = arith.truncf %130 : vector<16x16xf32> to vector<16x16xbf16>
    "tpu.trace_start"() <{level = 10 : i32, message = "qd,kd->qk"}> : () -> ()
    %cst_63 = arith.constant dense<0.000000e+00> : vector<16x16xf32>
    %132 = tpu.matmul %129, %131, %cst_63 {dimension_numbers = #tpu.dot_dimension_numbers<[1], [1], [0], [0], [0, 0, 1, 0], [], []>} : vector<16x16xbf16>, vector<16x16xbf16>, vector<16x16xf32> -> vector<16x16xf32>
    "tpu.trace_stop"() : () -> ()
    %133 = arith.addf %132, %0 : vector<16x16xf32>
    %cst_64 = arith.constant dense<0xFF800000> : vector<16xf32>
    %134 = vector.multi_reduction <maximumf>, %133, %cst_64 [1] : vector<16x16xf32> to vector<16xf32>
    %135 = vector.shape_cast %134 : vector<16xf32> to vector<16x1xf32>
    %136 = vector.broadcast %135 : vector<16x1xf32> to vector<16x16xf32>
    %137 = arith.subf %133, %136 : vector<16x16xf32>
    %138 = math.exp %137 : vector<16x16xf32>
    %cst_65 = arith.constant dense<0.000000e+00> : vector<16xf32>
    %139 = vector.multi_reduction <add>, %138, %cst_65 [1] : vector<16x16xf32> to vector<16xf32>
    %140 = vector.shape_cast %139 : vector<16xf32> to vector<16x1xf32>
    %141 = tpu.reciprocal %140 {approx = true} : vector<16x1xf32> -> vector<16x1xf32>
    %142 = vector.broadcast %141 : vector<16x1xf32> to vector<16x16xf32>
    %143 = arith.mulf %138, %142 : vector<16x16xf32>
    %144 = arith.truncf %143 : vector<16x16xf32> to vector<16x16xbf16>
    %145 = vector.extract_strided_slice %56 {offsets = [0, 48], sizes = [16, 16], strides = [1, 1]} : vector<16x64xf32> to vector<16x16xf32>
    %146 = arith.truncf %145 : vector<16x16xf32> to vector<16x16xbf16>
    %cst_66 = arith.constant dense<0.000000e+00> : vector<16x16xf32>
    %147 = tpu.matmul %144, %146, %cst_66 {dimension_numbers = #tpu.dot_dimension_numbers<[1], [0], [0], [1], [0, 0, 1, 1], [], []>} : vector<16x16xbf16>, vector<16x16xbf16>, vector<16x16xf32> -> vector<16x16xf32>
    %148 = arith.truncf %147 : vector<16x16xf32> to vector<16x16xbf16>
    %149 = vector.extract_strided_slice %13 {offsets = [48, 0], sizes = [16, 64], strides = [1, 1]} : vector<64x64xbf16> to vector<16x64xbf16>
    %cst_67 = arith.constant dense<0.000000e+00> : vector<16x64xf32>
    %150 = tpu.matmul %148, %149, %cst_67 {dimension_numbers = #tpu.dot_dimension_numbers<[1], [0], [0], [1], [0, 0, 1, 1], [], []>} : vector<16x16xbf16>, vector<16x64xbf16>, vector<16x64xf32> -> vector<16x64xf32>
    %151 = arith.addf %127, %150 : vector<16x64xf32>
    %152 = vector.broadcast %15 : vector<1x64xf32> to vector<16x64xf32>
    %153 = arith.addf %151, %152 : vector<16x64xf32>
    %154 = arith.addf %153, %3 : vector<16x64xf32>
    %cst_68 = arith.constant dense<0.000000e+00> : vector<16xf32>
    %155 = vector.multi_reduction <add>, %154, %cst_68 [1] : vector<16x64xf32> to vector<16xf32>
    %156 = vector.shape_cast %155 : vector<16xf32> to vector<16x1xf32>
    %cst_69 = arith.constant 6.400000e+01 : f32
    %157 = vector.broadcast %cst_69 : f32 to vector<16x1xf32>
    %158 = arith.divf %156, %157 : vector<16x1xf32>
    %159 = vector.broadcast %158 : vector<16x1xf32> to vector<16x64xf32>
    %160 = arith.subf %154, %159 : vector<16x64xf32>
    %161 = arith.mulf %160, %160 : vector<16x64xf32>
    %cst_70 = arith.constant dense<0.000000e+00> : vector<16xf32>
    %162 = vector.multi_reduction <add>, %161, %cst_70 [1] : vector<16x64xf32> to vector<16xf32>
    %163 = vector.shape_cast %162 : vector<16xf32> to vector<16x1xf32>
    %cst_71 = arith.constant 6.400000e+01 : f32
    %164 = vector.broadcast %cst_71 : f32 to vector<16x1xf32>
    %165 = arith.divf %163, %164 : vector<16x1xf32>
    %166 = vector.broadcast %158 : vector<16x1xf32> to vector<16x64xf32>
    %167 = arith.subf %154, %166 : vector<16x64xf32>
    %cst_72 = arith.constant 9.99999996E-13 : f32
    %168 = vector.broadcast %cst_72 : f32 to vector<16x1xf32>
    %169 = arith.addf %165, %168 : vector<16x1xf32>
    %170 = math.rsqrt %169 : vector<16x1xf32>
    %171 = vector.broadcast %170 : vector<16x1xf32> to vector<16x64xf32>
    %172 = arith.mulf %167, %171 : vector<16x64xf32>
    %173 = vector.broadcast %17 : vector<1x64xf32> to vector<16x64xf32>
    %174 = arith.mulf %172, %173 : vector<16x64xf32>
    %175 = vector.broadcast %19 : vector<1x64xf32> to vector<16x64xf32>
    %176 = arith.addf %174, %175 : vector<16x64xf32>
    %177 = arith.truncf %176 : vector<16x64xf32> to vector<16x64xbf16>
    %cst_73 = arith.constant dense<0.000000e+00> : vector<16x128xf32>
    %178 = tpu.matmul %177, %21, %cst_73 {dimension_numbers = #tpu.dot_dimension_numbers<[1], [0], [0], [1], [0, 0, 1, 1], [], []>} : vector<16x64xbf16>, vector<64x128xbf16>, vector<16x128xf32> -> vector<16x128xf32>
    %179 = vector.broadcast %23 : vector<1x128xf32> to vector<16x128xf32>
    %180 = arith.addf %178, %179 : vector<16x128xf32>
    %cst_74 = arith.constant 5.000000e-01 : f32
    %181 = vector.broadcast %cst_74 : f32 to vector<16x128xf32>
    %182 = arith.mulf %181, %180 : vector<16x128xf32>
    %183 = arith.mulf %180, %180 : vector<16x128xf32>
    %184 = arith.mulf %183, %180 : vector<16x128xf32>
    %cst_75 = arith.constant 4.471500e-02 : f32
    %185 = vector.broadcast %cst_75 : f32 to vector<16x128xf32>
    %186 = arith.mulf %185, %184 : vector<16x128xf32>
    %187 = arith.addf %180, %186 : vector<16x128xf32>
    %cst_76 = arith.constant 0.797884583 : f32
    %188 = vector.broadcast %cst_76 : f32 to vector<16x128xf32>
    %189 = arith.mulf %188, %187 : vector<16x128xf32>
    %190 = math.tanh %189 : vector<16x128xf32>
    %cst_77 = arith.constant 1.000000e+00 : f32
    %191 = vector.broadcast %cst_77 : f32 to vector<16x128xf32>
    %192 = arith.addf %191, %190 : vector<16x128xf32>
    %193 = arith.mulf %182, %192 : vector<16x128xf32>
    %194 = arith.truncf %193 : vector<16x128xf32> to vector<16x128xbf16>
    %cst_78 = arith.constant dense<0.000000e+00> : vector<16x64xf32>
    %195 = tpu.matmul %194, %25, %cst_78 {dimension_numbers = #tpu.dot_dimension_numbers<[1], [0], [0], [1], [0, 0, 1, 1], [], []>} : vector<16x128xbf16>, vector<128x64xbf16>, vector<16x64xf32> -> vector<16x64xf32>
    %196 = vector.broadcast %27 : vector<1x64xf32> to vector<16x64xf32>
    %197 = arith.addf %195, %196 : vector<16x64xf32>
    %198 = arith.addf %197, %154 : vector<16x64xf32>
    %c1 = arith.constant 1 : index
    %c0_79 = arith.constant 0 : index
    %c0_80 = arith.constant 0 : index
    %199 = vector.load %arg9[%c1, %c0_79, %c0_80] : memref<2x1x64xf32, #tpu.memory_space<vmem>>, vector<1x1x64xf32>
    %200 = vector.shape_cast %199 : vector<1x1x64xf32> to vector<1x64xf32>
    %c1_81 = arith.constant 1 : index
    %c0_82 = arith.constant 0 : index
    %c0_83 = arith.constant 0 : index
    %201 = vector.load %arg10[%c1_81, %c0_82, %c0_83] : memref<2x1x64xf32, #tpu.memory_space<vmem>>, vector<1x1x64xf32>
    %202 = vector.shape_cast %201 : vector<1x1x64xf32> to vector<1x64xf32>
    %c1_84 = arith.constant 1 : index
    %c0_85 = arith.constant 0 : index
    %c0_86 = arith.constant 0 : index
    %203 = vector.load %arg11[%c1_84, %c0_85, %c0_86] : memref<2x64x192xbf16, #tpu.memory_space<vmem>>, vector<1x64x192xbf16>
    %204 = vector.shape_cast %203 : vector<1x64x192xbf16> to vector<64x192xbf16>
    %c1_87 = arith.constant 1 : index
    %c0_88 = arith.constant 0 : index
    %c0_89 = arith.constant 0 : index
    %205 = vector.load %arg12[%c1_87, %c0_88, %c0_89] : memref<2x1x192xf32, #tpu.memory_space<vmem>>, vector<1x1x192xf32>
    %206 = vector.shape_cast %205 : vector<1x1x192xf32> to vector<1x192xf32>
    %c1_90 = arith.constant 1 : index
    %c0_91 = arith.constant 0 : index
    %c0_92 = arith.constant 0 : index
    %207 = vector.load %arg13[%c1_90, %c0_91, %c0_92] : memref<2x64x64xbf16, #tpu.memory_space<vmem>>, vector<1x64x64xbf16>
    %208 = vector.shape_cast %207 : vector<1x64x64xbf16> to vector<64x64xbf16>
    %c1_93 = arith.constant 1 : index
    %c0_94 = arith.constant 0 : index
    %c0_95 = arith.constant 0 : index
    %209 = vector.load %arg14[%c1_93, %c0_94, %c0_95] : memref<2x1x64xf32, #tpu.memory_space<vmem>>, vector<1x1x64xf32>
    %210 = vector.shape_cast %209 : vector<1x1x64xf32> to vector<1x64xf32>
    %c1_96 = arith.constant 1 : index
    %c0_97 = arith.constant 0 : index
    %c0_98 = arith.constant 0 : index
    %211 = vector.load %arg15[%c1_96, %c0_97, %c0_98] : memref<2x1x64xf32, #tpu.memory_space<vmem>>, vector<1x1x64xf32>
    %212 = vector.shape_cast %211 : vector<1x1x64xf32> to vector<1x64xf32>
    %c1_99 = arith.constant 1 : index
    %c0_100 = arith.constant 0 : index
    %c0_101 = arith.constant 0 : index
    %213 = vector.load %arg16[%c1_99, %c0_100, %c0_101] : memref<2x1x64xf32, #tpu.memory_space<vmem>>, vector<1x1x64xf32>
    %214 = vector.shape_cast %213 : vector<1x1x64xf32> to vector<1x64xf32>
    %c1_102 = arith.constant 1 : index
    %c0_103 = arith.constant 0 : index
    %c0_104 = arith.constant 0 : index
    %215 = vector.load %arg17[%c1_102, %c0_103, %c0_104] : memref<2x64x128xbf16, #tpu.memory_space<vmem>>, vector<1x64x128xbf16>
    %216 = vector.shape_cast %215 : vector<1x64x128xbf16> to vector<64x128xbf16>
    %c1_105 = arith.constant 1 : index
    %c0_106 = arith.constant 0 : index
    %c0_107 = arith.constant 0 : index
    %217 = vector.load %arg18[%c1_105, %c0_106, %c0_107] : memref<2x1x128xf32, #tpu.memory_space<vmem>>, vector<1x1x128xf32>
    %218 = vector.shape_cast %217 : vector<1x1x128xf32> to vector<1x128xf32>
    %c1_108 = arith.constant 1 : index
    %c0_109 = arith.constant 0 : index
    %c0_110 = arith.constant 0 : index
    %219 = vector.load %arg19[%c1_108, %c0_109, %c0_110] : memref<2x128x64xbf16, #tpu.memory_space<vmem>>, vector<1x128x64xbf16>
    %220 = vector.shape_cast %219 : vector<1x128x64xbf16> to vector<128x64xbf16>
    %c1_111 = arith.constant 1 : index
    %c0_112 = arith.constant 0 : index
    %c0_113 = arith.constant 0 : index
    %221 = vector.load %arg20[%c1_111, %c0_112, %c0_113] : memref<2x1x64xf32, #tpu.memory_space<vmem>>, vector<1x1x64xf32>
    %222 = vector.shape_cast %221 : vector<1x1x64xf32> to vector<1x64xf32>
    %cst_114 = arith.constant dense<0.000000e+00> : vector<16xf32>
    %223 = vector.multi_reduction <add>, %198, %cst_114 [1] : vector<16x64xf32> to vector<16xf32>
    %224 = vector.shape_cast %223 : vector<16xf32> to vector<16x1xf32>
    %cst_115 = arith.constant 6.400000e+01 : f32
    %225 = vector.broadcast %cst_115 : f32 to vector<16x1xf32>
    %226 = arith.divf %224, %225 : vector<16x1xf32>
    %227 = vector.broadcast %226 : vector<16x1xf32> to vector<16x64xf32>
    %228 = arith.subf %198, %227 : vector<16x64xf32>
    %229 = arith.mulf %228, %228 : vector<16x64xf32>
    %cst_116 = arith.constant dense<0.000000e+00> : vector<16xf32>
    %230 = vector.multi_reduction <add>, %229, %cst_116 [1] : vector<16x64xf32> to vector<16xf32>
    %231 = vector.shape_cast %230 : vector<16xf32> to vector<16x1xf32>
    %cst_117 = arith.constant 6.400000e+01 : f32
    %232 = vector.broadcast %cst_117 : f32 to vector<16x1xf32>
    %233 = arith.divf %231, %232 : vector<16x1xf32>
    %234 = vector.broadcast %226 : vector<16x1xf32> to vector<16x64xf32>
    %235 = arith.subf %198, %234 : vector<16x64xf32>
    %cst_118 = arith.constant 9.99999996E-13 : f32
    %236 = vector.broadcast %cst_118 : f32 to vector<16x1xf32>
    %237 = arith.addf %233, %236 : vector<16x1xf32>
    %238 = math.rsqrt %237 : vector<16x1xf32>
    %239 = vector.broadcast %238 : vector<16x1xf32> to vector<16x64xf32>
    %240 = arith.mulf %235, %239 : vector<16x64xf32>
    %241 = vector.broadcast %200 : vector<1x64xf32> to vector<16x64xf32>
    %242 = arith.mulf %240, %241 : vector<16x64xf32>
    %243 = vector.broadcast %202 : vector<1x64xf32> to vector<16x64xf32>
    %244 = arith.addf %242, %243 : vector<16x64xf32>
    %245 = arith.truncf %244 : vector<16x64xf32> to vector<16x64xbf16>
    %cst_119 = arith.constant dense<0.000000e+00> : vector<16x192xf32>
    %246 = tpu.matmul %245, %204, %cst_119 {dimension_numbers = #tpu.dot_dimension_numbers<[1], [0], [0], [1], [0, 0, 1, 1], [], []>} : vector<16x64xbf16>, vector<64x192xbf16>, vector<16x192xf32> -> vector<16x192xf32>
    %247 = vector.broadcast %206 : vector<1x192xf32> to vector<16x192xf32>
    %248 = arith.addf %246, %247 : vector<16x192xf32>
    %249 = vector.extract_strided_slice %248 {offsets = [0, 0], sizes = [16, 64], strides = [1, 1]} : vector<16x192xf32> to vector<16x64xf32>
    %250 = vector.extract_strided_slice %248 {offsets = [0, 64], sizes = [16, 64], strides = [1, 1]} : vector<16x192xf32> to vector<16x64xf32>
    %251 = vector.extract_strided_slice %248 {offsets = [0, 128], sizes = [16, 64], strides = [1, 1]} : vector<16x192xf32> to vector<16x64xf32>
    %252 = vector.extract_strided_slice %249 {offsets = [0, 0], sizes = [16, 16], strides = [1, 1]} : vector<16x64xf32> to vector<16x16xf32>
    %253 = arith.truncf %252 : vector<16x16xf32> to vector<16x16xbf16>
    %254 = vector.extract_strided_slice %250 {offsets = [0, 0], sizes = [16, 16], strides = [1, 1]} : vector<16x64xf32> to vector<16x16xf32>
    %255 = arith.truncf %254 : vector<16x16xf32> to vector<16x16xbf16>
    "tpu.trace_start"() <{level = 10 : i32, message = "qd,kd->qk"}> : () -> ()
    %cst_120 = arith.constant dense<0.000000e+00> : vector<16x16xf32>
    %256 = tpu.matmul %253, %255, %cst_120 {dimension_numbers = #tpu.dot_dimension_numbers<[1], [1], [0], [0], [0, 0, 1, 0], [], []>} : vector<16x16xbf16>, vector<16x16xbf16>, vector<16x16xf32> -> vector<16x16xf32>
    "tpu.trace_stop"() : () -> ()
    %257 = arith.addf %256, %0 : vector<16x16xf32>
    %cst_121 = arith.constant dense<0xFF800000> : vector<16xf32>
    %258 = vector.multi_reduction <maximumf>, %257, %cst_121 [1] : vector<16x16xf32> to vector<16xf32>
    %259 = vector.shape_cast %258 : vector<16xf32> to vector<16x1xf32>
    %260 = vector.broadcast %259 : vector<16x1xf32> to vector<16x16xf32>
    %261 = arith.subf %257, %260 : vector<16x16xf32>
    %262 = math.exp %261 : vector<16x16xf32>
    %cst_122 = arith.constant dense<0.000000e+00> : vector<16xf32>
    %263 = vector.multi_reduction <add>, %262, %cst_122 [1] : vector<16x16xf32> to vector<16xf32>
    %264 = vector.shape_cast %263 : vector<16xf32> to vector<16x1xf32>
    %265 = tpu.reciprocal %264 {approx = true} : vector<16x1xf32> -> vector<16x1xf32>
    %266 = vector.broadcast %265 : vector<16x1xf32> to vector<16x16xf32>
    %267 = arith.mulf %262, %266 : vector<16x16xf32>
    %268 = arith.truncf %267 : vector<16x16xf32> to vector<16x16xbf16>
    %269 = vector.extract_strided_slice %251 {offsets = [0, 0], sizes = [16, 16], strides = [1, 1]} : vector<16x64xf32> to vector<16x16xf32>
    %270 = arith.truncf %269 : vector<16x16xf32> to vector<16x16xbf16>
    %cst_123 = arith.constant dense<0.000000e+00> : vector<16x16xf32>
    %271 = tpu.matmul %268, %270, %cst_123 {dimension_numbers = #tpu.dot_dimension_numbers<[1], [0], [0], [1], [0, 0, 1, 1], [], []>} : vector<16x16xbf16>, vector<16x16xbf16>, vector<16x16xf32> -> vector<16x16xf32>
    %272 = arith.truncf %271 : vector<16x16xf32> to vector<16x16xbf16>
    %273 = vector.extract_strided_slice %208 {offsets = [0, 0], sizes = [16, 64], strides = [1, 1]} : vector<64x64xbf16> to vector<16x64xbf16>
    %cst_124 = arith.constant dense<0.000000e+00> : vector<16x64xf32>
    %274 = tpu.matmul %272, %273, %cst_124 {dimension_numbers = #tpu.dot_dimension_numbers<[1], [0], [0], [1], [0, 0, 1, 1], [], []>} : vector<16x16xbf16>, vector<16x64xbf16>, vector<16x64xf32> -> vector<16x64xf32>
    %275 = vector.extract_strided_slice %249 {offsets = [0, 16], sizes = [16, 16], strides = [1, 1]} : vector<16x64xf32> to vector<16x16xf32>
    %276 = arith.truncf %275 : vector<16x16xf32> to vector<16x16xbf16>
    %277 = vector.extract_strided_slice %250 {offsets = [0, 16], sizes = [16, 16], strides = [1, 1]} : vector<16x64xf32> to vector<16x16xf32>
    %278 = arith.truncf %277 : vector<16x16xf32> to vector<16x16xbf16>
    "tpu.trace_start"() <{level = 10 : i32, message = "qd,kd->qk"}> : () -> ()
    %cst_125 = arith.constant dense<0.000000e+00> : vector<16x16xf32>
    %279 = tpu.matmul %276, %278, %cst_125 {dimension_numbers = #tpu.dot_dimension_numbers<[1], [1], [0], [0], [0, 0, 1, 0], [], []>} : vector<16x16xbf16>, vector<16x16xbf16>, vector<16x16xf32> -> vector<16x16xf32>
    "tpu.trace_stop"() : () -> ()
    %280 = arith.addf %279, %0 : vector<16x16xf32>
    %cst_126 = arith.constant dense<0xFF800000> : vector<16xf32>
    %281 = vector.multi_reduction <maximumf>, %280, %cst_126 [1] : vector<16x16xf32> to vector<16xf32>
    %282 = vector.shape_cast %281 : vector<16xf32> to vector<16x1xf32>
    %283 = vector.broadcast %282 : vector<16x1xf32> to vector<16x16xf32>
    %284 = arith.subf %280, %283 : vector<16x16xf32>
    %285 = math.exp %284 : vector<16x16xf32>
    %cst_127 = arith.constant dense<0.000000e+00> : vector<16xf32>
    %286 = vector.multi_reduction <add>, %285, %cst_127 [1] : vector<16x16xf32> to vector<16xf32>
    %287 = vector.shape_cast %286 : vector<16xf32> to vector<16x1xf32>
    %288 = tpu.reciprocal %287 {approx = true} : vector<16x1xf32> -> vector<16x1xf32>
    %289 = vector.broadcast %288 : vector<16x1xf32> to vector<16x16xf32>
    %290 = arith.mulf %285, %289 : vector<16x16xf32>
    %291 = arith.truncf %290 : vector<16x16xf32> to vector<16x16xbf16>
    %292 = vector.extract_strided_slice %251 {offsets = [0, 16], sizes = [16, 16], strides = [1, 1]} : vector<16x64xf32> to vector<16x16xf32>
    %293 = arith.truncf %292 : vector<16x16xf32> to vector<16x16xbf16>
    %cst_128 = arith.constant dense<0.000000e+00> : vector<16x16xf32>
    %294 = tpu.matmul %291, %293, %cst_128 {dimension_numbers = #tpu.dot_dimension_numbers<[1], [0], [0], [1], [0, 0, 1, 1], [], []>} : vector<16x16xbf16>, vector<16x16xbf16>, vector<16x16xf32> -> vector<16x16xf32>
    %295 = arith.truncf %294 : vector<16x16xf32> to vector<16x16xbf16>
    %296 = vector.extract_strided_slice %208 {offsets = [16, 0], sizes = [16, 64], strides = [1, 1]} : vector<64x64xbf16> to vector<16x64xbf16>
    %cst_129 = arith.constant dense<0.000000e+00> : vector<16x64xf32>
    %297 = tpu.matmul %295, %296, %cst_129 {dimension_numbers = #tpu.dot_dimension_numbers<[1], [0], [0], [1], [0, 0, 1, 1], [], []>} : vector<16x16xbf16>, vector<16x64xbf16>, vector<16x64xf32> -> vector<16x64xf32>
    %298 = arith.addf %274, %297 : vector<16x64xf32>
    %299 = vector.extract_strided_slice %249 {offsets = [0, 32], sizes = [16, 16], strides = [1, 1]} : vector<16x64xf32> to vector<16x16xf32>
    %300 = arith.truncf %299 : vector<16x16xf32> to vector<16x16xbf16>
    %301 = vector.extract_strided_slice %250 {offsets = [0, 32], sizes = [16, 16], strides = [1, 1]} : vector<16x64xf32> to vector<16x16xf32>
    %302 = arith.truncf %301 : vector<16x16xf32> to vector<16x16xbf16>
    "tpu.trace_start"() <{level = 10 : i32, message = "qd,kd->qk"}> : () -> ()
    %cst_130 = arith.constant dense<0.000000e+00> : vector<16x16xf32>
    %303 = tpu.matmul %300, %302, %cst_130 {dimension_numbers = #tpu.dot_dimension_numbers<[1], [1], [0], [0], [0, 0, 1, 0], [], []>} : vector<16x16xbf16>, vector<16x16xbf16>, vector<16x16xf32> -> vector<16x16xf32>
    "tpu.trace_stop"() : () -> ()
    %304 = arith.addf %303, %0 : vector<16x16xf32>
    %cst_131 = arith.constant dense<0xFF800000> : vector<16xf32>
    %305 = vector.multi_reduction <maximumf>, %304, %cst_131 [1] : vector<16x16xf32> to vector<16xf32>
    %306 = vector.shape_cast %305 : vector<16xf32> to vector<16x1xf32>
    %307 = vector.broadcast %306 : vector<16x1xf32> to vector<16x16xf32>
    %308 = arith.subf %304, %307 : vector<16x16xf32>
    %309 = math.exp %308 : vector<16x16xf32>
    %cst_132 = arith.constant dense<0.000000e+00> : vector<16xf32>
    %310 = vector.multi_reduction <add>, %309, %cst_132 [1] : vector<16x16xf32> to vector<16xf32>
    %311 = vector.shape_cast %310 : vector<16xf32> to vector<16x1xf32>
    %312 = tpu.reciprocal %311 {approx = true} : vector<16x1xf32> -> vector<16x1xf32>
    %313 = vector.broadcast %312 : vector<16x1xf32> to vector<16x16xf32>
    %314 = arith.mulf %309, %313 : vector<16x16xf32>
    %315 = arith.truncf %314 : vector<16x16xf32> to vector<16x16xbf16>
    %316 = vector.extract_strided_slice %251 {offsets = [0, 32], sizes = [16, 16], strides = [1, 1]} : vector<16x64xf32> to vector<16x16xf32>
    %317 = arith.truncf %316 : vector<16x16xf32> to vector<16x16xbf16>
    %cst_133 = arith.constant dense<0.000000e+00> : vector<16x16xf32>
    %318 = tpu.matmul %315, %317, %cst_133 {dimension_numbers = #tpu.dot_dimension_numbers<[1], [0], [0], [1], [0, 0, 1, 1], [], []>} : vector<16x16xbf16>, vector<16x16xbf16>, vector<16x16xf32> -> vector<16x16xf32>
    %319 = arith.truncf %318 : vector<16x16xf32> to vector<16x16xbf16>
    %320 = vector.extract_strided_slice %208 {offsets = [32, 0], sizes = [16, 64], strides = [1, 1]} : vector<64x64xbf16> to vector<16x64xbf16>
    %cst_134 = arith.constant dense<0.000000e+00> : vector<16x64xf32>
    %321 = tpu.matmul %319, %320, %cst_134 {dimension_numbers = #tpu.dot_dimension_numbers<[1], [0], [0], [1], [0, 0, 1, 1], [], []>} : vector<16x16xbf16>, vector<16x64xbf16>, vector<16x64xf32> -> vector<16x64xf32>
    %322 = arith.addf %298, %321 : vector<16x64xf32>
    %323 = vector.extract_strided_slice %249 {offsets = [0, 48], sizes = [16, 16], strides = [1, 1]} : vector<16x64xf32> to vector<16x16xf32>
    %324 = arith.truncf %323 : vector<16x16xf32> to vector<16x16xbf16>
    %325 = vector.extract_strided_slice %250 {offsets = [0, 48], sizes = [16, 16], strides = [1, 1]} : vector<16x64xf32> to vector<16x16xf32>
    %326 = arith.truncf %325 : vector<16x16xf32> to vector<16x16xbf16>
    "tpu.trace_start"() <{level = 10 : i32, message = "qd,kd->qk"}> : () -> ()
    %cst_135 = arith.constant dense<0.000000e+00> : vector<16x16xf32>
    %327 = tpu.matmul %324, %326, %cst_135 {dimension_numbers = #tpu.dot_dimension_numbers<[1], [1], [0], [0], [0, 0, 1, 0], [], []>} : vector<16x16xbf16>, vector<16x16xbf16>, vector<16x16xf32> -> vector<16x16xf32>
    "tpu.trace_stop"() : () -> ()
    %328 = arith.addf %327, %0 : vector<16x16xf32>
    %cst_136 = arith.constant dense<0xFF800000> : vector<16xf32>
    %329 = vector.multi_reduction <maximumf>, %328, %cst_136 [1] : vector<16x16xf32> to vector<16xf32>
    %330 = vector.shape_cast %329 : vector<16xf32> to vector<16x1xf32>
    %331 = vector.broadcast %330 : vector<16x1xf32> to vector<16x16xf32>
    %332 = arith.subf %328, %331 : vector<16x16xf32>
    %333 = math.exp %332 : vector<16x16xf32>
    %cst_137 = arith.constant dense<0.000000e+00> : vector<16xf32>
    %334 = vector.multi_reduction <add>, %333, %cst_137 [1] : vector<16x16xf32> to vector<16xf32>
    %335 = vector.shape_cast %334 : vector<16xf32> to vector<16x1xf32>
    %336 = tpu.reciprocal %335 {approx = true} : vector<16x1xf32> -> vector<16x1xf32>
    %337 = vector.broadcast %336 : vector<16x1xf32> to vector<16x16xf32>
    %338 = arith.mulf %333, %337 : vector<16x16xf32>
    %339 = arith.truncf %338 : vector<16x16xf32> to vector<16x16xbf16>
    %340 = vector.extract_strided_slice %251 {offsets = [0, 48], sizes = [16, 16], strides = [1, 1]} : vector<16x64xf32> to vector<16x16xf32>
    %341 = arith.truncf %340 : vector<16x16xf32> to vector<16x16xbf16>
    %cst_138 = arith.constant dense<0.000000e+00> : vector<16x16xf32>
    %342 = tpu.matmul %339, %341, %cst_138 {dimension_numbers = #tpu.dot_dimension_numbers<[1], [0], [0], [1], [0, 0, 1, 1], [], []>} : vector<16x16xbf16>, vector<16x16xbf16>, vector<16x16xf32> -> vector<16x16xf32>
    %343 = arith.truncf %342 : vector<16x16xf32> to vector<16x16xbf16>
    %344 = vector.extract_strided_slice %208 {offsets = [48, 0], sizes = [16, 64], strides = [1, 1]} : vector<64x64xbf16> to vector<16x64xbf16>
    %cst_139 = arith.constant dense<0.000000e+00> : vector<16x64xf32>
    %345 = tpu.matmul %343, %344, %cst_139 {dimension_numbers = #tpu.dot_dimension_numbers<[1], [0], [0], [1], [0, 0, 1, 1], [], []>} : vector<16x16xbf16>, vector<16x64xbf16>, vector<16x64xf32> -> vector<16x64xf32>
    %346 = arith.addf %322, %345 : vector<16x64xf32>
    %347 = vector.broadcast %210 : vector<1x64xf32> to vector<16x64xf32>
    %348 = arith.addf %346, %347 : vector<16x64xf32>
    %349 = arith.addf %348, %198 : vector<16x64xf32>
    %cst_140 = arith.constant dense<0.000000e+00> : vector<16xf32>
    %350 = vector.multi_reduction <add>, %349, %cst_140 [1] : vector<16x64xf32> to vector<16xf32>
    %351 = vector.shape_cast %350 : vector<16xf32> to vector<16x1xf32>
    %cst_141 = arith.constant 6.400000e+01 : f32
    %352 = vector.broadcast %cst_141 : f32 to vector<16x1xf32>
    %353 = arith.divf %351, %352 : vector<16x1xf32>
    %354 = vector.broadcast %353 : vector<16x1xf32> to vector<16x64xf32>
    %355 = arith.subf %349, %354 : vector<16x64xf32>
    %356 = arith.mulf %355, %355 : vector<16x64xf32>
    %cst_142 = arith.constant dense<0.000000e+00> : vector<16xf32>
    %357 = vector.multi_reduction <add>, %356, %cst_142 [1] : vector<16x64xf32> to vector<16xf32>
    %358 = vector.shape_cast %357 : vector<16xf32> to vector<16x1xf32>
    %cst_143 = arith.constant 6.400000e+01 : f32
    %359 = vector.broadcast %cst_143 : f32 to vector<16x1xf32>
    %360 = arith.divf %358, %359 : vector<16x1xf32>
    %361 = vector.broadcast %353 : vector<16x1xf32> to vector<16x64xf32>
    %362 = arith.subf %349, %361 : vector<16x64xf32>
    %cst_144 = arith.constant 9.99999996E-13 : f32
    %363 = vector.broadcast %cst_144 : f32 to vector<16x1xf32>
    %364 = arith.addf %360, %363 : vector<16x1xf32>
    %365 = math.rsqrt %364 : vector<16x1xf32>
    %366 = vector.broadcast %365 : vector<16x1xf32> to vector<16x64xf32>
    %367 = arith.mulf %362, %366 : vector<16x64xf32>
    %368 = vector.broadcast %212 : vector<1x64xf32> to vector<16x64xf32>
    %369 = arith.mulf %367, %368 : vector<16x64xf32>
    %370 = vector.broadcast %214 : vector<1x64xf32> to vector<16x64xf32>
    %371 = arith.addf %369, %370 : vector<16x64xf32>
    %372 = arith.truncf %371 : vector<16x64xf32> to vector<16x64xbf16>
    %cst_145 = arith.constant dense<0.000000e+00> : vector<16x128xf32>
    %373 = tpu.matmul %372, %216, %cst_145 {dimension_numbers = #tpu.dot_dimension_numbers<[1], [0], [0], [1], [0, 0, 1, 1], [], []>} : vector<16x64xbf16>, vector<64x128xbf16>, vector<16x128xf32> -> vector<16x128xf32>
    %374 = vector.broadcast %218 : vector<1x128xf32> to vector<16x128xf32>
    %375 = arith.addf %373, %374 : vector<16x128xf32>
    %cst_146 = arith.constant 5.000000e-01 : f32
    %376 = vector.broadcast %cst_146 : f32 to vector<16x128xf32>
    %377 = arith.mulf %376, %375 : vector<16x128xf32>
    %378 = arith.mulf %375, %375 : vector<16x128xf32>
    %379 = arith.mulf %378, %375 : vector<16x128xf32>
    %cst_147 = arith.constant 4.471500e-02 : f32
    %380 = vector.broadcast %cst_147 : f32 to vector<16x128xf32>
    %381 = arith.mulf %380, %379 : vector<16x128xf32>
    %382 = arith.addf %375, %381 : vector<16x128xf32>
    %cst_148 = arith.constant 0.797884583 : f32
    %383 = vector.broadcast %cst_148 : f32 to vector<16x128xf32>
    %384 = arith.mulf %383, %382 : vector<16x128xf32>
    %385 = math.tanh %384 : vector<16x128xf32>
    %cst_149 = arith.constant 1.000000e+00 : f32
    %386 = vector.broadcast %cst_149 : f32 to vector<16x128xf32>
    %387 = arith.addf %386, %385 : vector<16x128xf32>
    %388 = arith.mulf %377, %387 : vector<16x128xf32>
    %389 = arith.truncf %388 : vector<16x128xf32> to vector<16x128xbf16>
    %cst_150 = arith.constant dense<0.000000e+00> : vector<16x64xf32>
    %390 = tpu.matmul %389, %220, %cst_150 {dimension_numbers = #tpu.dot_dimension_numbers<[1], [0], [0], [1], [0, 0, 1, 1], [], []>} : vector<16x128xbf16>, vector<128x64xbf16>, vector<16x64xf32> -> vector<16x64xf32>
    %391 = vector.broadcast %222 : vector<1x64xf32> to vector<16x64xf32>
    %392 = arith.addf %390, %391 : vector<16x64xf32>
    %393 = arith.addf %392, %349 : vector<16x64xf32>
    %394 = arith.truncf %393 : vector<16x64xf32> to vector<16x64xbf16>
    %c0_151 = arith.constant 0 : index
    %c0_152 = arith.constant 0 : index
    %395 = vector.load %arg1[%c0_151, %c0_152] : memref<16x1xi32, #tpu.memory_space<vmem>>, vector<16x1xi32>
    %396 = tpu.iota {dimensions = array<i32: 1>} : vector<16x128xi32>
    %397 = vector.broadcast %395 : vector<16x1xi32> to vector<16x128xi32>
    %398 = arith.cmpi eq, %397, %396 : vector<16x128xi32>
    %cst_153 = arith.constant 1.000000e+00 : f32
    %cst_154 = arith.constant 0.000000e+00 : f32
    %399 = vector.broadcast %cst_153 : f32 to vector<16x128xf32>
    %400 = vector.broadcast %cst_154 : f32 to vector<16x128xf32>
    %401 = arith.select %398, %399, %400 : vector<16x128xi1>, vector<16x128xf32>
    %c0_155 = arith.constant 0 : index
    %c0_156 = arith.constant 0 : index
    %402 = vector.load %arg3[%c0_155, %c0_156] : memref<128x64xf32, #tpu.memory_space<vmem>>, vector<128x64xf32>
    %cst_157 = arith.constant dense<0.000000e+00> : vector<16x64xf32>
    %403 = tpu.matmul %401, %402, %cst_157 {dimension_numbers = #tpu.dot_dimension_numbers<[1], [0], [0], [1], [0, 0, 1, 1], [], []>} : vector<16x128xf32>, vector<128x64xf32>, vector<16x64xf32> -> vector<16x64xf32>
    %cst_158 = arith.constant 8.000000e+00 : f32
    %404 = vector.broadcast %cst_158 : f32 to vector<16x64xf32>
    %405 = arith.mulf %403, %404 : vector<16x64xf32>
    %c0_159 = arith.constant 0 : index
    %c0_160 = arith.constant 0 : index
    %406 = vector.load %arg2[%c0_159, %c0_160] : memref<16x64xf32, #tpu.memory_space<vmem>>, vector<16x64xf32>
    %407 = arith.addf %405, %406 : vector<16x64xf32>
    %c0_161 = arith.constant 0 : index
    %c0_162 = arith.constant 0 : index
    %c0_163 = arith.constant 0 : index
    %408 = vector.load %arg21[%c0_161, %c0_162, %c0_163] : memref<2x64x192xbf16, #tpu.memory_space<vmem>>, vector<1x64x192xbf16>
    %409 = vector.shape_cast %408 : vector<1x64x192xbf16> to vector<64x192xbf16>
    %c0_164 = arith.constant 0 : index
    %c0_165 = arith.constant 0 : index
    %c0_166 = arith.constant 0 : index
    %410 = vector.load %arg22[%c0_164, %c0_165, %c0_166] : memref<2x1x192xf32, #tpu.memory_space<vmem>>, vector<1x1x192xf32>
    %411 = vector.shape_cast %410 : vector<1x1x192xf32> to vector<1x192xf32>
    %c0_167 = arith.constant 0 : index
    %c0_168 = arith.constant 0 : index
    %c0_169 = arith.constant 0 : index
    %412 = vector.load %arg23[%c0_167, %c0_168, %c0_169] : memref<2x64x64xbf16, #tpu.memory_space<vmem>>, vector<1x64x64xbf16>
    %413 = vector.shape_cast %412 : vector<1x64x64xbf16> to vector<64x64xbf16>
    %c0_170 = arith.constant 0 : index
    %c0_171 = arith.constant 0 : index
    %c0_172 = arith.constant 0 : index
    %414 = vector.load %arg24[%c0_170, %c0_171, %c0_172] : memref<2x1x64xf32, #tpu.memory_space<vmem>>, vector<1x1x64xf32>
    %415 = vector.shape_cast %414 : vector<1x1x64xf32> to vector<1x64xf32>
    %c0_173 = arith.constant 0 : index
    %c0_174 = arith.constant 0 : index
    %c0_175 = arith.constant 0 : index
    %416 = vector.load %arg25[%c0_173, %c0_174, %c0_175] : memref<2x1x64xf32, #tpu.memory_space<vmem>>, vector<1x1x64xf32>
    %417 = vector.shape_cast %416 : vector<1x1x64xf32> to vector<1x64xf32>
    %c0_176 = arith.constant 0 : index
    %c0_177 = arith.constant 0 : index
    %c0_178 = arith.constant 0 : index
    %418 = vector.load %arg26[%c0_176, %c0_177, %c0_178] : memref<2x1x64xf32, #tpu.memory_space<vmem>>, vector<1x1x64xf32>
    %419 = vector.shape_cast %418 : vector<1x1x64xf32> to vector<1x64xf32>
    %c0_179 = arith.constant 0 : index
    %c0_180 = arith.constant 0 : index
    %c0_181 = arith.constant 0 : index
    %420 = vector.load %arg27[%c0_179, %c0_180, %c0_181] : memref<2x64x64xbf16, #tpu.memory_space<vmem>>, vector<1x64x64xbf16>
    %421 = vector.shape_cast %420 : vector<1x64x64xbf16> to vector<64x64xbf16>
    %c0_182 = arith.constant 0 : index
    %c0_183 = arith.constant 0 : index
    %c0_184 = arith.constant 0 : index
    %422 = vector.load %arg28[%c0_182, %c0_183, %c0_184] : memref<2x1x64xf32, #tpu.memory_space<vmem>>, vector<1x1x64xf32>
    %423 = vector.shape_cast %422 : vector<1x1x64xf32> to vector<1x64xf32>
    %c0_185 = arith.constant 0 : index
    %c0_186 = arith.constant 0 : index
    %c0_187 = arith.constant 0 : index
    %424 = vector.load %arg29[%c0_185, %c0_186, %c0_187] : memref<2x64x128xbf16, #tpu.memory_space<vmem>>, vector<1x64x128xbf16>
    %425 = vector.shape_cast %424 : vector<1x64x128xbf16> to vector<64x128xbf16>
    %c0_188 = arith.constant 0 : index
    %c0_189 = arith.constant 0 : index
    %c0_190 = arith.constant 0 : index
    %426 = vector.load %arg30[%c0_188, %c0_189, %c0_190] : memref<2x1x128xf32, #tpu.memory_space<vmem>>, vector<1x1x128xf32>
    %427 = vector.shape_cast %426 : vector<1x1x128xf32> to vector<1x128xf32>
    %c0_191 = arith.constant 0 : index
    %c0_192 = arith.constant 0 : index
    %c0_193 = arith.constant 0 : index
    %428 = vector.load %arg31[%c0_191, %c0_192, %c0_193] : memref<2x64x64xbf16, #tpu.memory_space<vmem>>, vector<1x64x64xbf16>
    %429 = vector.shape_cast %428 : vector<1x64x64xbf16> to vector<64x64xbf16>
    %c0_194 = arith.constant 0 : index
    %c0_195 = arith.constant 0 : index
    %c0_196 = arith.constant 0 : index
    %430 = vector.load %arg32[%c0_194, %c0_195, %c0_196] : memref<2x1x64xf32, #tpu.memory_space<vmem>>, vector<1x1x64xf32>
    %431 = vector.shape_cast %430 : vector<1x1x64xf32> to vector<1x64xf32>
    %c0_197 = arith.constant 0 : index
    %c0_198 = arith.constant 0 : index
    %c0_199 = arith.constant 0 : index
    %432 = vector.load %arg33[%c0_197, %c0_198, %c0_199] : memref<2x1x64xf32, #tpu.memory_space<vmem>>, vector<1x1x64xf32>
    %433 = vector.shape_cast %432 : vector<1x1x64xf32> to vector<1x64xf32>
    %c0_200 = arith.constant 0 : index
    %c0_201 = arith.constant 0 : index
    %c0_202 = arith.constant 0 : index
    %434 = vector.load %arg34[%c0_200, %c0_201, %c0_202] : memref<2x1x64xf32, #tpu.memory_space<vmem>>, vector<1x1x64xf32>
    %435 = vector.shape_cast %434 : vector<1x1x64xf32> to vector<1x64xf32>
    %c0_203 = arith.constant 0 : index
    %c0_204 = arith.constant 0 : index
    %c0_205 = arith.constant 0 : index
    %436 = vector.load %arg35[%c0_203, %c0_204, %c0_205] : memref<2x64x128xbf16, #tpu.memory_space<vmem>>, vector<1x64x128xbf16>
    %437 = vector.shape_cast %436 : vector<1x64x128xbf16> to vector<64x128xbf16>
    %c0_206 = arith.constant 0 : index
    %c0_207 = arith.constant 0 : index
    %c0_208 = arith.constant 0 : index
    %438 = vector.load %arg36[%c0_206, %c0_207, %c0_208] : memref<2x1x128xf32, #tpu.memory_space<vmem>>, vector<1x1x128xf32>
    %439 = vector.shape_cast %438 : vector<1x1x128xf32> to vector<1x128xf32>
    %c0_209 = arith.constant 0 : index
    %c0_210 = arith.constant 0 : index
    %c0_211 = arith.constant 0 : index
    %440 = vector.load %arg37[%c0_209, %c0_210, %c0_211] : memref<2x128x64xbf16, #tpu.memory_space<vmem>>, vector<1x128x64xbf16>
    %441 = vector.shape_cast %440 : vector<1x128x64xbf16> to vector<128x64xbf16>
    %c0_212 = arith.constant 0 : index
    %c0_213 = arith.constant 0 : index
    %c0_214 = arith.constant 0 : index
    %442 = vector.load %arg38[%c0_212, %c0_213, %c0_214] : memref<2x1x64xf32, #tpu.memory_space<vmem>>, vector<1x1x64xf32>
    %443 = vector.shape_cast %442 : vector<1x1x64xf32> to vector<1x64xf32>
    %c0_215 = arith.constant 0 : index
    %c0_216 = arith.constant 0 : index
    %c0_217 = arith.constant 0 : index
    %444 = vector.load %arg39[%c0_215, %c0_216, %c0_217] : memref<2x1x64xf32, #tpu.memory_space<vmem>>, vector<1x1x64xf32>
    %445 = vector.shape_cast %444 : vector<1x1x64xf32> to vector<1x64xf32>
    %c0_218 = arith.constant 0 : index
    %c0_219 = arith.constant 0 : index
    %c0_220 = arith.constant 0 : index
    %446 = vector.load %arg40[%c0_218, %c0_219, %c0_220] : memref<2x1x64xf32, #tpu.memory_space<vmem>>, vector<1x1x64xf32>
    %447 = vector.shape_cast %446 : vector<1x1x64xf32> to vector<1x64xf32>
    %448 = arith.truncf %407 : vector<16x64xf32> to vector<16x64xbf16>
    %cst_221 = arith.constant dense<0.000000e+00> : vector<16x192xf32>
    %449 = tpu.matmul %448, %409, %cst_221 {dimension_numbers = #tpu.dot_dimension_numbers<[1], [0], [0], [1], [0, 0, 1, 1], [], []>} : vector<16x64xbf16>, vector<64x192xbf16>, vector<16x192xf32> -> vector<16x192xf32>
    %450 = vector.broadcast %411 : vector<1x192xf32> to vector<16x192xf32>
    %451 = arith.addf %449, %450 : vector<16x192xf32>
    %452 = vector.extract_strided_slice %451 {offsets = [0, 0], sizes = [16, 64], strides = [1, 1]} : vector<16x192xf32> to vector<16x64xf32>
    %453 = vector.extract_strided_slice %451 {offsets = [0, 64], sizes = [16, 64], strides = [1, 1]} : vector<16x192xf32> to vector<16x64xf32>
    %454 = vector.extract_strided_slice %451 {offsets = [0, 128], sizes = [16, 64], strides = [1, 1]} : vector<16x192xf32> to vector<16x64xf32>
    %455 = vector.extract_strided_slice %452 {offsets = [0, 0], sizes = [16, 16], strides = [1, 1]} : vector<16x64xf32> to vector<16x16xf32>
    %456 = arith.truncf %455 : vector<16x16xf32> to vector<16x16xbf16>
    %457 = vector.extract_strided_slice %453 {offsets = [0, 0], sizes = [16, 16], strides = [1, 1]} : vector<16x64xf32> to vector<16x16xf32>
    %458 = arith.truncf %457 : vector<16x16xf32> to vector<16x16xbf16>
    "tpu.trace_start"() <{level = 10 : i32, message = "qd,kd->qk"}> : () -> ()
    %cst_222 = arith.constant dense<0.000000e+00> : vector<16x16xf32>
    %459 = tpu.matmul %456, %458, %cst_222 {dimension_numbers = #tpu.dot_dimension_numbers<[1], [1], [0], [0], [0, 0, 1, 0], [], []>} : vector<16x16xbf16>, vector<16x16xbf16>, vector<16x16xf32> -> vector<16x16xf32>
    "tpu.trace_stop"() : () -> ()
    %460 = arith.addf %459, %1 : vector<16x16xf32>
    %cst_223 = arith.constant dense<0xFF800000> : vector<16xf32>
    %461 = vector.multi_reduction <maximumf>, %460, %cst_223 [1] : vector<16x16xf32> to vector<16xf32>
    %462 = vector.shape_cast %461 : vector<16xf32> to vector<16x1xf32>
    %463 = vector.broadcast %462 : vector<16x1xf32> to vector<16x16xf32>
    %464 = arith.subf %460, %463 : vector<16x16xf32>
    %465 = math.exp %464 : vector<16x16xf32>
    %cst_224 = arith.constant dense<0.000000e+00> : vector<16xf32>
    %466 = vector.multi_reduction <add>, %465, %cst_224 [1] : vector<16x16xf32> to vector<16xf32>
    %467 = vector.shape_cast %466 : vector<16xf32> to vector<16x1xf32>
    %468 = tpu.reciprocal %467 {approx = true} : vector<16x1xf32> -> vector<16x1xf32>
    %469 = vector.broadcast %468 : vector<16x1xf32> to vector<16x16xf32>
    %470 = arith.mulf %465, %469 : vector<16x16xf32>
    %471 = arith.truncf %470 : vector<16x16xf32> to vector<16x16xbf16>
    %472 = vector.extract_strided_slice %454 {offsets = [0, 0], sizes = [16, 16], strides = [1, 1]} : vector<16x64xf32> to vector<16x16xf32>
    %473 = arith.truncf %472 : vector<16x16xf32> to vector<16x16xbf16>
    %cst_225 = arith.constant dense<0.000000e+00> : vector<16x16xf32>
    %474 = tpu.matmul %471, %473, %cst_225 {dimension_numbers = #tpu.dot_dimension_numbers<[1], [0], [0], [1], [0, 0, 1, 1], [], []>} : vector<16x16xbf16>, vector<16x16xbf16>, vector<16x16xf32> -> vector<16x16xf32>
    %475 = arith.truncf %474 : vector<16x16xf32> to vector<16x16xbf16>
    %476 = vector.extract_strided_slice %413 {offsets = [0, 0], sizes = [16, 64], strides = [1, 1]} : vector<64x64xbf16> to vector<16x64xbf16>
    %cst_226 = arith.constant dense<0.000000e+00> : vector<16x64xf32>
    %477 = tpu.matmul %475, %476, %cst_226 {dimension_numbers = #tpu.dot_dimension_numbers<[1], [0], [0], [1], [0, 0, 1, 1], [], []>} : vector<16x16xbf16>, vector<16x64xbf16>, vector<16x64xf32> -> vector<16x64xf32>
    %478 = vector.extract_strided_slice %452 {offsets = [0, 16], sizes = [16, 16], strides = [1, 1]} : vector<16x64xf32> to vector<16x16xf32>
    %479 = arith.truncf %478 : vector<16x16xf32> to vector<16x16xbf16>
    %480 = vector.extract_strided_slice %453 {offsets = [0, 16], sizes = [16, 16], strides = [1, 1]} : vector<16x64xf32> to vector<16x16xf32>
    %481 = arith.truncf %480 : vector<16x16xf32> to vector<16x16xbf16>
    "tpu.trace_start"() <{level = 10 : i32, message = "qd,kd->qk"}> : () -> ()
    %cst_227 = arith.constant dense<0.000000e+00> : vector<16x16xf32>
    %482 = tpu.matmul %479, %481, %cst_227 {dimension_numbers = #tpu.dot_dimension_numbers<[1], [1], [0], [0], [0, 0, 1, 0], [], []>} : vector<16x16xbf16>, vector<16x16xbf16>, vector<16x16xf32> -> vector<16x16xf32>
    "tpu.trace_stop"() : () -> ()
    %483 = arith.addf %482, %1 : vector<16x16xf32>
    %cst_228 = arith.constant dense<0xFF800000> : vector<16xf32>
    %484 = vector.multi_reduction <maximumf>, %483, %cst_228 [1] : vector<16x16xf32> to vector<16xf32>
    %485 = vector.shape_cast %484 : vector<16xf32> to vector<16x1xf32>
    %486 = vector.broadcast %485 : vector<16x1xf32> to vector<16x16xf32>
    %487 = arith.subf %483, %486 : vector<16x16xf32>
    %488 = math.exp %487 : vector<16x16xf32>
    %cst_229 = arith.constant dense<0.000000e+00> : vector<16xf32>
    %489 = vector.multi_reduction <add>, %488, %cst_229 [1] : vector<16x16xf32> to vector<16xf32>
    %490 = vector.shape_cast %489 : vector<16xf32> to vector<16x1xf32>
    %491 = tpu.reciprocal %490 {approx = true} : vector<16x1xf32> -> vector<16x1xf32>
    %492 = vector.broadcast %491 : vector<16x1xf32> to vector<16x16xf32>
    %493 = arith.mulf %488, %492 : vector<16x16xf32>
    %494 = arith.truncf %493 : vector<16x16xf32> to vector<16x16xbf16>
    %495 = vector.extract_strided_slice %454 {offsets = [0, 16], sizes = [16, 16], strides = [1, 1]} : vector<16x64xf32> to vector<16x16xf32>
    %496 = arith.truncf %495 : vector<16x16xf32> to vector<16x16xbf16>
    %cst_230 = arith.constant dense<0.000000e+00> : vector<16x16xf32>
    %497 = tpu.matmul %494, %496, %cst_230 {dimension_numbers = #tpu.dot_dimension_numbers<[1], [0], [0], [1], [0, 0, 1, 1], [], []>} : vector<16x16xbf16>, vector<16x16xbf16>, vector<16x16xf32> -> vector<16x16xf32>
    %498 = arith.truncf %497 : vector<16x16xf32> to vector<16x16xbf16>
    %499 = vector.extract_strided_slice %413 {offsets = [16, 0], sizes = [16, 64], strides = [1, 1]} : vector<64x64xbf16> to vector<16x64xbf16>
    %cst_231 = arith.constant dense<0.000000e+00> : vector<16x64xf32>
    %500 = tpu.matmul %498, %499, %cst_231 {dimension_numbers = #tpu.dot_dimension_numbers<[1], [0], [0], [1], [0, 0, 1, 1], [], []>} : vector<16x16xbf16>, vector<16x64xbf16>, vector<16x64xf32> -> vector<16x64xf32>
    %501 = arith.addf %477, %500 : vector<16x64xf32>
    %502 = vector.extract_strided_slice %452 {offsets = [0, 32], sizes = [16, 16], strides = [1, 1]} : vector<16x64xf32> to vector<16x16xf32>
    %503 = arith.truncf %502 : vector<16x16xf32> to vector<16x16xbf16>
    %504 = vector.extract_strided_slice %453 {offsets = [0, 32], sizes = [16, 16], strides = [1, 1]} : vector<16x64xf32> to vector<16x16xf32>
    %505 = arith.truncf %504 : vector<16x16xf32> to vector<16x16xbf16>
    "tpu.trace_start"() <{level = 10 : i32, message = "qd,kd->qk"}> : () -> ()
    %cst_232 = arith.constant dense<0.000000e+00> : vector<16x16xf32>
    %506 = tpu.matmul %503, %505, %cst_232 {dimension_numbers = #tpu.dot_dimension_numbers<[1], [1], [0], [0], [0, 0, 1, 0], [], []>} : vector<16x16xbf16>, vector<16x16xbf16>, vector<16x16xf32> -> vector<16x16xf32>
    "tpu.trace_stop"() : () -> ()
    %507 = arith.addf %506, %1 : vector<16x16xf32>
    %cst_233 = arith.constant dense<0xFF800000> : vector<16xf32>
    %508 = vector.multi_reduction <maximumf>, %507, %cst_233 [1] : vector<16x16xf32> to vector<16xf32>
    %509 = vector.shape_cast %508 : vector<16xf32> to vector<16x1xf32>
    %510 = vector.broadcast %509 : vector<16x1xf32> to vector<16x16xf32>
    %511 = arith.subf %507, %510 : vector<16x16xf32>
    %512 = math.exp %511 : vector<16x16xf32>
    %cst_234 = arith.constant dense<0.000000e+00> : vector<16xf32>
    %513 = vector.multi_reduction <add>, %512, %cst_234 [1] : vector<16x16xf32> to vector<16xf32>
    %514 = vector.shape_cast %513 : vector<16xf32> to vector<16x1xf32>
    %515 = tpu.reciprocal %514 {approx = true} : vector<16x1xf32> -> vector<16x1xf32>
    %516 = vector.broadcast %515 : vector<16x1xf32> to vector<16x16xf32>
    %517 = arith.mulf %512, %516 : vector<16x16xf32>
    %518 = arith.truncf %517 : vector<16x16xf32> to vector<16x16xbf16>
    %519 = vector.extract_strided_slice %454 {offsets = [0, 32], sizes = [16, 16], strides = [1, 1]} : vector<16x64xf32> to vector<16x16xf32>
    %520 = arith.truncf %519 : vector<16x16xf32> to vector<16x16xbf16>
    %cst_235 = arith.constant dense<0.000000e+00> : vector<16x16xf32>
    %521 = tpu.matmul %518, %520, %cst_235 {dimension_numbers = #tpu.dot_dimension_numbers<[1], [0], [0], [1], [0, 0, 1, 1], [], []>} : vector<16x16xbf16>, vector<16x16xbf16>, vector<16x16xf32> -> vector<16x16xf32>
    %522 = arith.truncf %521 : vector<16x16xf32> to vector<16x16xbf16>
    %523 = vector.extract_strided_slice %413 {offsets = [32, 0], sizes = [16, 64], strides = [1, 1]} : vector<64x64xbf16> to vector<16x64xbf16>
    %cst_236 = arith.constant dense<0.000000e+00> : vector<16x64xf32>
    %524 = tpu.matmul %522, %523, %cst_236 {dimension_numbers = #tpu.dot_dimension_numbers<[1], [0], [0], [1], [0, 0, 1, 1], [], []>} : vector<16x16xbf16>, vector<16x64xbf16>, vector<16x64xf32> -> vector<16x64xf32>
    %525 = arith.addf %501, %524 : vector<16x64xf32>
    %526 = vector.extract_strided_slice %452 {offsets = [0, 48], sizes = [16, 16], strides = [1, 1]} : vector<16x64xf32> to vector<16x16xf32>
    %527 = arith.truncf %526 : vector<16x16xf32> to vector<16x16xbf16>
    %528 = vector.extract_strided_slice %453 {offsets = [0, 48], sizes = [16, 16], strides = [1, 1]} : vector<16x64xf32> to vector<16x16xf32>
    %529 = arith.truncf %528 : vector<16x16xf32> to vector<16x16xbf16>
    "tpu.trace_start"() <{level = 10 : i32, message = "qd,kd->qk"}> : () -> ()
    %cst_237 = arith.constant dense<0.000000e+00> : vector<16x16xf32>
    %530 = tpu.matmul %527, %529, %cst_237 {dimension_numbers = #tpu.dot_dimension_numbers<[1], [1], [0], [0], [0, 0, 1, 0], [], []>} : vector<16x16xbf16>, vector<16x16xbf16>, vector<16x16xf32> -> vector<16x16xf32>
    "tpu.trace_stop"() : () -> ()
    %531 = arith.addf %530, %1 : vector<16x16xf32>
    %cst_238 = arith.constant dense<0xFF800000> : vector<16xf32>
    %532 = vector.multi_reduction <maximumf>, %531, %cst_238 [1] : vector<16x16xf32> to vector<16xf32>
    %533 = vector.shape_cast %532 : vector<16xf32> to vector<16x1xf32>
    %534 = vector.broadcast %533 : vector<16x1xf32> to vector<16x16xf32>
    %535 = arith.subf %531, %534 : vector<16x16xf32>
    %536 = math.exp %535 : vector<16x16xf32>
    %cst_239 = arith.constant dense<0.000000e+00> : vector<16xf32>
    %537 = vector.multi_reduction <add>, %536, %cst_239 [1] : vector<16x16xf32> to vector<16xf32>
    %538 = vector.shape_cast %537 : vector<16xf32> to vector<16x1xf32>
    %539 = tpu.reciprocal %538 {approx = true} : vector<16x1xf32> -> vector<16x1xf32>
    %540 = vector.broadcast %539 : vector<16x1xf32> to vector<16x16xf32>
    %541 = arith.mulf %536, %540 : vector<16x16xf32>
    %542 = arith.truncf %541 : vector<16x16xf32> to vector<16x16xbf16>
    %543 = vector.extract_strided_slice %454 {offsets = [0, 48], sizes = [16, 16], strides = [1, 1]} : vector<16x64xf32> to vector<16x16xf32>
    %544 = arith.truncf %543 : vector<16x16xf32> to vector<16x16xbf16>
    %cst_240 = arith.constant dense<0.000000e+00> : vector<16x16xf32>
    %545 = tpu.matmul %542, %544, %cst_240 {dimension_numbers = #tpu.dot_dimension_numbers<[1], [0], [0], [1], [0, 0, 1, 1], [], []>} : vector<16x16xbf16>, vector<16x16xbf16>, vector<16x16xf32> -> vector<16x16xf32>
    %546 = arith.truncf %545 : vector<16x16xf32> to vector<16x16xbf16>
    %547 = vector.extract_strided_slice %413 {offsets = [48, 0], sizes = [16, 64], strides = [1, 1]} : vector<64x64xbf16> to vector<16x64xbf16>
    %cst_241 = arith.constant dense<0.000000e+00> : vector<16x64xf32>
    %548 = tpu.matmul %546, %547, %cst_241 {dimension_numbers = #tpu.dot_dimension_numbers<[1], [0], [0], [1], [0, 0, 1, 1], [], []>} : vector<16x16xbf16>, vector<16x64xbf16>, vector<16x64xf32> -> vector<16x64xf32>
    %549 = arith.addf %525, %548 : vector<16x64xf32>
    %550 = vector.broadcast %415 : vector<1x64xf32> to vector<16x64xf32>
    %551 = arith.addf %549, %550 : vector<16x64xf32>
    %552 = arith.addf %407, %551 : vector<16x64xf32>
    %cst_242 = arith.constant dense<0.000000e+00> : vector<16xf32>
    %553 = vector.multi_reduction <add>, %552, %cst_242 [1] : vector<16x64xf32> to vector<16xf32>
    %554 = vector.shape_cast %553 : vector<16xf32> to vector<16x1xf32>
    %cst_243 = arith.constant 6.400000e+01 : f32
    %555 = vector.broadcast %cst_243 : f32 to vector<16x1xf32>
    %556 = arith.divf %554, %555 : vector<16x1xf32>
    %557 = vector.broadcast %556 : vector<16x1xf32> to vector<16x64xf32>
    %558 = arith.subf %552, %557 : vector<16x64xf32>
    %559 = arith.mulf %558, %558 : vector<16x64xf32>
    %cst_244 = arith.constant dense<0.000000e+00> : vector<16xf32>
    %560 = vector.multi_reduction <add>, %559, %cst_244 [1] : vector<16x64xf32> to vector<16xf32>
    %561 = vector.shape_cast %560 : vector<16xf32> to vector<16x1xf32>
    %cst_245 = arith.constant 6.400000e+01 : f32
    %562 = vector.broadcast %cst_245 : f32 to vector<16x1xf32>
    %563 = arith.divf %561, %562 : vector<16x1xf32>
    %564 = vector.broadcast %556 : vector<16x1xf32> to vector<16x64xf32>
    %565 = arith.subf %552, %564 : vector<16x64xf32>
    %cst_246 = arith.constant 9.99999974E-6 : f32
    %566 = vector.broadcast %cst_246 : f32 to vector<16x1xf32>
    %567 = arith.addf %563, %566 : vector<16x1xf32>
    %568 = math.rsqrt %567 : vector<16x1xf32>
    %569 = vector.broadcast %568 : vector<16x1xf32> to vector<16x64xf32>
    %570 = arith.mulf %565, %569 : vector<16x64xf32>
    %571 = vector.broadcast %417 : vector<1x64xf32> to vector<16x64xf32>
    %572 = arith.mulf %570, %571 : vector<16x64xf32>
    %573 = vector.broadcast %419 : vector<1x64xf32> to vector<16x64xf32>
    %574 = arith.addf %572, %573 : vector<16x64xf32>
    %575 = arith.truncf %574 : vector<16x64xf32> to vector<16x64xbf16>
    %cst_247 = arith.constant dense<0.000000e+00> : vector<16x64xf32>
    %576 = tpu.matmul %575, %421, %cst_247 {dimension_numbers = #tpu.dot_dimension_numbers<[1], [0], [0], [1], [0, 0, 1, 1], [], []>} : vector<16x64xbf16>, vector<64x64xbf16>, vector<16x64xf32> -> vector<16x64xf32>
    %577 = vector.broadcast %423 : vector<1x64xf32> to vector<16x64xf32>
    %578 = arith.addf %576, %577 : vector<16x64xf32>
    %cst_248 = arith.constant dense<0.000000e+00> : vector<16x128xf32>
    %579 = tpu.matmul %394, %425, %cst_248 {dimension_numbers = #tpu.dot_dimension_numbers<[1], [0], [0], [1], [0, 0, 1, 1], [], []>} : vector<16x64xbf16>, vector<64x128xbf16>, vector<16x128xf32> -> vector<16x128xf32>
    %580 = vector.broadcast %427 : vector<1x128xf32> to vector<16x128xf32>
    %581 = arith.addf %579, %580 : vector<16x128xf32>
    %582 = vector.extract_strided_slice %581 {offsets = [0, 0], sizes = [16, 64], strides = [1, 1]} : vector<16x128xf32> to vector<16x64xf32>
    %583 = vector.extract_strided_slice %581 {offsets = [0, 64], sizes = [16, 64], strides = [1, 1]} : vector<16x128xf32> to vector<16x64xf32>
    %584 = vector.extract_strided_slice %578 {offsets = [0, 0], sizes = [16, 16], strides = [1, 1]} : vector<16x64xf32> to vector<16x16xf32>
    %585 = arith.truncf %584 : vector<16x16xf32> to vector<16x16xbf16>
    %586 = vector.extract_strided_slice %582 {offsets = [0, 0], sizes = [16, 16], strides = [1, 1]} : vector<16x64xf32> to vector<16x16xf32>
    %587 = arith.truncf %586 : vector<16x16xf32> to vector<16x16xbf16>
    "tpu.trace_start"() <{level = 10 : i32, message = "qd,kd->qk"}> : () -> ()
    %cst_249 = arith.constant dense<0.000000e+00> : vector<16x16xf32>
    %588 = tpu.matmul %585, %587, %cst_249 {dimension_numbers = #tpu.dot_dimension_numbers<[1], [1], [0], [0], [0, 0, 1, 0], [], []>} : vector<16x16xbf16>, vector<16x16xbf16>, vector<16x16xf32> -> vector<16x16xf32>
    "tpu.trace_stop"() : () -> ()
    %589 = arith.addf %588, %2 : vector<16x16xf32>
    %cst_250 = arith.constant dense<0xFF800000> : vector<16xf32>
    %590 = vector.multi_reduction <maximumf>, %589, %cst_250 [1] : vector<16x16xf32> to vector<16xf32>
    %591 = vector.shape_cast %590 : vector<16xf32> to vector<16x1xf32>
    %592 = vector.broadcast %591 : vector<16x1xf32> to vector<16x16xf32>
    %593 = arith.subf %589, %592 : vector<16x16xf32>
    %594 = math.exp %593 : vector<16x16xf32>
    %cst_251 = arith.constant dense<0.000000e+00> : vector<16xf32>
    %595 = vector.multi_reduction <add>, %594, %cst_251 [1] : vector<16x16xf32> to vector<16xf32>
    %596 = vector.shape_cast %595 : vector<16xf32> to vector<16x1xf32>
    %597 = tpu.reciprocal %596 {approx = true} : vector<16x1xf32> -> vector<16x1xf32>
    %598 = vector.broadcast %597 : vector<16x1xf32> to vector<16x16xf32>
    %599 = arith.mulf %594, %598 : vector<16x16xf32>
    %600 = arith.truncf %599 : vector<16x16xf32> to vector<16x16xbf16>
    %601 = vector.extract_strided_slice %583 {offsets = [0, 0], sizes = [16, 16], strides = [1, 1]} : vector<16x64xf32> to vector<16x16xf32>
    %602 = arith.truncf %601 : vector<16x16xf32> to vector<16x16xbf16>
    %cst_252 = arith.constant dense<0.000000e+00> : vector<16x16xf32>
    %603 = tpu.matmul %600, %602, %cst_252 {dimension_numbers = #tpu.dot_dimension_numbers<[1], [0], [0], [1], [0, 0, 1, 1], [], []>} : vector<16x16xbf16>, vector<16x16xbf16>, vector<16x16xf32> -> vector<16x16xf32>
    %604 = arith.truncf %603 : vector<16x16xf32> to vector<16x16xbf16>
    %605 = vector.extract_strided_slice %429 {offsets = [0, 0], sizes = [16, 64], strides = [1, 1]} : vector<64x64xbf16> to vector<16x64xbf16>
    %cst_253 = arith.constant dense<0.000000e+00> : vector<16x64xf32>
    %606 = tpu.matmul %604, %605, %cst_253 {dimension_numbers = #tpu.dot_dimension_numbers<[1], [0], [0], [1], [0, 0, 1, 1], [], []>} : vector<16x16xbf16>, vector<16x64xbf16>, vector<16x64xf32> -> vector<16x64xf32>
    %607 = vector.extract_strided_slice %578 {offsets = [0, 16], sizes = [16, 16], strides = [1, 1]} : vector<16x64xf32> to vector<16x16xf32>
    %608 = arith.truncf %607 : vector<16x16xf32> to vector<16x16xbf16>
    %609 = vector.extract_strided_slice %582 {offsets = [0, 16], sizes = [16, 16], strides = [1, 1]} : vector<16x64xf32> to vector<16x16xf32>
    %610 = arith.truncf %609 : vector<16x16xf32> to vector<16x16xbf16>
    "tpu.trace_start"() <{level = 10 : i32, message = "qd,kd->qk"}> : () -> ()
    %cst_254 = arith.constant dense<0.000000e+00> : vector<16x16xf32>
    %611 = tpu.matmul %608, %610, %cst_254 {dimension_numbers = #tpu.dot_dimension_numbers<[1], [1], [0], [0], [0, 0, 1, 0], [], []>} : vector<16x16xbf16>, vector<16x16xbf16>, vector<16x16xf32> -> vector<16x16xf32>
    "tpu.trace_stop"() : () -> ()
    %612 = arith.addf %611, %2 : vector<16x16xf32>
    %cst_255 = arith.constant dense<0xFF800000> : vector<16xf32>
    %613 = vector.multi_reduction <maximumf>, %612, %cst_255 [1] : vector<16x16xf32> to vector<16xf32>
    %614 = vector.shape_cast %613 : vector<16xf32> to vector<16x1xf32>
    %615 = vector.broadcast %614 : vector<16x1xf32> to vector<16x16xf32>
    %616 = arith.subf %612, %615 : vector<16x16xf32>
    %617 = math.exp %616 : vector<16x16xf32>
    %cst_256 = arith.constant dense<0.000000e+00> : vector<16xf32>
    %618 = vector.multi_reduction <add>, %617, %cst_256 [1] : vector<16x16xf32> to vector<16xf32>
    %619 = vector.shape_cast %618 : vector<16xf32> to vector<16x1xf32>
    %620 = tpu.reciprocal %619 {approx = true} : vector<16x1xf32> -> vector<16x1xf32>
    %621 = vector.broadcast %620 : vector<16x1xf32> to vector<16x16xf32>
    %622 = arith.mulf %617, %621 : vector<16x16xf32>
    %623 = arith.truncf %622 : vector<16x16xf32> to vector<16x16xbf16>
    %624 = vector.extract_strided_slice %583 {offsets = [0, 16], sizes = [16, 16], strides = [1, 1]} : vector<16x64xf32> to vector<16x16xf32>
    %625 = arith.truncf %624 : vector<16x16xf32> to vector<16x16xbf16>
    %cst_257 = arith.constant dense<0.000000e+00> : vector<16x16xf32>
    %626 = tpu.matmul %623, %625, %cst_257 {dimension_numbers = #tpu.dot_dimension_numbers<[1], [0], [0], [1], [0, 0, 1, 1], [], []>} : vector<16x16xbf16>, vector<16x16xbf16>, vector<16x16xf32> -> vector<16x16xf32>
    %627 = arith.truncf %626 : vector<16x16xf32> to vector<16x16xbf16>
    %628 = vector.extract_strided_slice %429 {offsets = [16, 0], sizes = [16, 64], strides = [1, 1]} : vector<64x64xbf16> to vector<16x64xbf16>
    %cst_258 = arith.constant dense<0.000000e+00> : vector<16x64xf32>
    %629 = tpu.matmul %627, %628, %cst_258 {dimension_numbers = #tpu.dot_dimension_numbers<[1], [0], [0], [1], [0, 0, 1, 1], [], []>} : vector<16x16xbf16>, vector<16x64xbf16>, vector<16x64xf32> -> vector<16x64xf32>
    %630 = arith.addf %606, %629 : vector<16x64xf32>
    %631 = vector.extract_strided_slice %578 {offsets = [0, 32], sizes = [16, 16], strides = [1, 1]} : vector<16x64xf32> to vector<16x16xf32>
    %632 = arith.truncf %631 : vector<16x16xf32> to vector<16x16xbf16>
    %633 = vector.extract_strided_slice %582 {offsets = [0, 32], sizes = [16, 16], strides = [1, 1]} : vector<16x64xf32> to vector<16x16xf32>
    %634 = arith.truncf %633 : vector<16x16xf32> to vector<16x16xbf16>
    "tpu.trace_start"() <{level = 10 : i32, message = "qd,kd->qk"}> : () -> ()
    %cst_259 = arith.constant dense<0.000000e+00> : vector<16x16xf32>
    %635 = tpu.matmul %632, %634, %cst_259 {dimension_numbers = #tpu.dot_dimension_numbers<[1], [1], [0], [0], [0, 0, 1, 0], [], []>} : vector<16x16xbf16>, vector<16x16xbf16>, vector<16x16xf32> -> vector<16x16xf32>
    "tpu.trace_stop"() : () -> ()
    %636 = arith.addf %635, %2 : vector<16x16xf32>
    %cst_260 = arith.constant dense<0xFF800000> : vector<16xf32>
    %637 = vector.multi_reduction <maximumf>, %636, %cst_260 [1] : vector<16x16xf32> to vector<16xf32>
    %638 = vector.shape_cast %637 : vector<16xf32> to vector<16x1xf32>
    %639 = vector.broadcast %638 : vector<16x1xf32> to vector<16x16xf32>
    %640 = arith.subf %636, %639 : vector<16x16xf32>
    %641 = math.exp %640 : vector<16x16xf32>
    %cst_261 = arith.constant dense<0.000000e+00> : vector<16xf32>
    %642 = vector.multi_reduction <add>, %641, %cst_261 [1] : vector<16x16xf32> to vector<16xf32>
    %643 = vector.shape_cast %642 : vector<16xf32> to vector<16x1xf32>
    %644 = tpu.reciprocal %643 {approx = true} : vector<16x1xf32> -> vector<16x1xf32>
    %645 = vector.broadcast %644 : vector<16x1xf32> to vector<16x16xf32>
    %646 = arith.mulf %641, %645 : vector<16x16xf32>
    %647 = arith.truncf %646 : vector<16x16xf32> to vector<16x16xbf16>
    %648 = vector.extract_strided_slice %583 {offsets = [0, 32], sizes = [16, 16], strides = [1, 1]} : vector<16x64xf32> to vector<16x16xf32>
    %649 = arith.truncf %648 : vector<16x16xf32> to vector<16x16xbf16>
    %cst_262 = arith.constant dense<0.000000e+00> : vector<16x16xf32>
    %650 = tpu.matmul %647, %649, %cst_262 {dimension_numbers = #tpu.dot_dimension_numbers<[1], [0], [0], [1], [0, 0, 1, 1], [], []>} : vector<16x16xbf16>, vector<16x16xbf16>, vector<16x16xf32> -> vector<16x16xf32>
    %651 = arith.truncf %650 : vector<16x16xf32> to vector<16x16xbf16>
    %652 = vector.extract_strided_slice %429 {offsets = [32, 0], sizes = [16, 64], strides = [1, 1]} : vector<64x64xbf16> to vector<16x64xbf16>
    %cst_263 = arith.constant dense<0.000000e+00> : vector<16x64xf32>
    %653 = tpu.matmul %651, %652, %cst_263 {dimension_numbers = #tpu.dot_dimension_numbers<[1], [0], [0], [1], [0, 0, 1, 1], [], []>} : vector<16x16xbf16>, vector<16x64xbf16>, vector<16x64xf32> -> vector<16x64xf32>
    %654 = arith.addf %630, %653 : vector<16x64xf32>
    %655 = vector.extract_strided_slice %578 {offsets = [0, 48], sizes = [16, 16], strides = [1, 1]} : vector<16x64xf32> to vector<16x16xf32>
    %656 = arith.truncf %655 : vector<16x16xf32> to vector<16x16xbf16>
    %657 = vector.extract_strided_slice %582 {offsets = [0, 48], sizes = [16, 16], strides = [1, 1]} : vector<16x64xf32> to vector<16x16xf32>
    %658 = arith.truncf %657 : vector<16x16xf32> to vector<16x16xbf16>
    "tpu.trace_start"() <{level = 10 : i32, message = "qd,kd->qk"}> : () -> ()
    %cst_264 = arith.constant dense<0.000000e+00> : vector<16x16xf32>
    %659 = tpu.matmul %656, %658, %cst_264 {dimension_numbers = #tpu.dot_dimension_numbers<[1], [1], [0], [0], [0, 0, 1, 0], [], []>} : vector<16x16xbf16>, vector<16x16xbf16>, vector<16x16xf32> -> vector<16x16xf32>
    "tpu.trace_stop"() : () -> ()
    %660 = arith.addf %659, %2 : vector<16x16xf32>
    %cst_265 = arith.constant dense<0xFF800000> : vector<16xf32>
    %661 = vector.multi_reduction <maximumf>, %660, %cst_265 [1] : vector<16x16xf32> to vector<16xf32>
    %662 = vector.shape_cast %661 : vector<16xf32> to vector<16x1xf32>
    %663 = vector.broadcast %662 : vector<16x1xf32> to vector<16x16xf32>
    %664 = arith.subf %660, %663 : vector<16x16xf32>
    %665 = math.exp %664 : vector<16x16xf32>
    %cst_266 = arith.constant dense<0.000000e+00> : vector<16xf32>
    %666 = vector.multi_reduction <add>, %665, %cst_266 [1] : vector<16x16xf32> to vector<16xf32>
    %667 = vector.shape_cast %666 : vector<16xf32> to vector<16x1xf32>
    %668 = tpu.reciprocal %667 {approx = true} : vector<16x1xf32> -> vector<16x1xf32>
    %669 = vector.broadcast %668 : vector<16x1xf32> to vector<16x16xf32>
    %670 = arith.mulf %665, %669 : vector<16x16xf32>
    %671 = arith.truncf %670 : vector<16x16xf32> to vector<16x16xbf16>
    %672 = vector.extract_strided_slice %583 {offsets = [0, 48], sizes = [16, 16], strides = [1, 1]} : vector<16x64xf32> to vector<16x16xf32>
    %673 = arith.truncf %672 : vector<16x16xf32> to vector<16x16xbf16>
    %cst_267 = arith.constant dense<0.000000e+00> : vector<16x16xf32>
    %674 = tpu.matmul %671, %673, %cst_267 {dimension_numbers = #tpu.dot_dimension_numbers<[1], [0], [0], [1], [0, 0, 1, 1], [], []>} : vector<16x16xbf16>, vector<16x16xbf16>, vector<16x16xf32> -> vector<16x16xf32>
    %675 = arith.truncf %674 : vector<16x16xf32> to vector<16x16xbf16>
    %676 = vector.extract_strided_slice %429 {offsets = [48, 0], sizes = [16, 64], strides = [1, 1]} : vector<64x64xbf16> to vector<16x64xbf16>
    %cst_268 = arith.constant dense<0.000000e+00> : vector<16x64xf32>
    %677 = tpu.matmul %675, %676, %cst_268 {dimension_numbers = #tpu.dot_dimension_numbers<[1], [0], [0], [1], [0, 0, 1, 1], [], []>} : vector<16x16xbf16>, vector<16x64xbf16>, vector<16x64xf32> -> vector<16x64xf32>
    %678 = arith.addf %654, %677 : vector<16x64xf32>
    %679 = vector.broadcast %431 : vector<1x64xf32> to vector<16x64xf32>
    %680 = arith.addf %678, %679 : vector<16x64xf32>
    %681 = arith.addf %574, %680 : vector<16x64xf32>
    %cst_269 = arith.constant dense<0.000000e+00> : vector<16xf32>
    %682 = vector.multi_reduction <add>, %681, %cst_269 [1] : vector<16x64xf32> to vector<16xf32>
    %683 = vector.shape_cast %682 : vector<16xf32> to vector<16x1xf32>
    %cst_270 = arith.constant 6.400000e+01 : f32
    %684 = vector.broadcast %cst_270 : f32 to vector<16x1xf32>
    %685 = arith.divf %683, %684 : vector<16x1xf32>
    %686 = vector.broadcast %685 : vector<16x1xf32> to vector<16x64xf32>
    %687 = arith.subf %681, %686 : vector<16x64xf32>
    %688 = arith.mulf %687, %687 : vector<16x64xf32>
    %cst_271 = arith.constant dense<0.000000e+00> : vector<16xf32>
    %689 = vector.multi_reduction <add>, %688, %cst_271 [1] : vector<16x64xf32> to vector<16xf32>
    %690 = vector.shape_cast %689 : vector<16xf32> to vector<16x1xf32>
    %cst_272 = arith.constant 6.400000e+01 : f32
    %691 = vector.broadcast %cst_272 : f32 to vector<16x1xf32>
    %692 = arith.divf %690, %691 : vector<16x1xf32>
    %693 = vector.broadcast %685 : vector<16x1xf32> to vector<16x64xf32>
    %694 = arith.subf %681, %693 : vector<16x64xf32>
    %cst_273 = arith.constant 9.99999974E-6 : f32
    %695 = vector.broadcast %cst_273 : f32 to vector<16x1xf32>
    %696 = arith.addf %692, %695 : vector<16x1xf32>
    %697 = math.rsqrt %696 : vector<16x1xf32>
    %698 = vector.broadcast %697 : vector<16x1xf32> to vector<16x64xf32>
    %699 = arith.mulf %694, %698 : vector<16x64xf32>
    %700 = vector.broadcast %433 : vector<1x64xf32> to vector<16x64xf32>
    %701 = arith.mulf %699, %700 : vector<16x64xf32>
    %702 = vector.broadcast %435 : vector<1x64xf32> to vector<16x64xf32>
    %703 = arith.addf %701, %702 : vector<16x64xf32>
    %704 = arith.truncf %703 : vector<16x64xf32> to vector<16x64xbf16>
    %cst_274 = arith.constant dense<0.000000e+00> : vector<16x128xf32>
    %705 = tpu.matmul %704, %437, %cst_274 {dimension_numbers = #tpu.dot_dimension_numbers<[1], [0], [0], [1], [0, 0, 1, 1], [], []>} : vector<16x64xbf16>, vector<64x128xbf16>, vector<16x128xf32> -> vector<16x128xf32>
    %706 = vector.broadcast %439 : vector<1x128xf32> to vector<16x128xf32>
    %707 = arith.addf %705, %706 : vector<16x128xf32>
    %cst_275 = arith.constant 0.000000e+00 : f32
    %708 = vector.broadcast %cst_275 : f32 to vector<16x128xf32>
    %709 = arith.maximumf %707, %708 : vector<16x128xf32>
    %710 = arith.truncf %709 : vector<16x128xf32> to vector<16x128xbf16>
    %cst_276 = arith.constant dense<0.000000e+00> : vector<16x64xf32>
    %711 = tpu.matmul %710, %441, %cst_276 {dimension_numbers = #tpu.dot_dimension_numbers<[1], [0], [0], [1], [0, 0, 1, 1], [], []>} : vector<16x128xbf16>, vector<128x64xbf16>, vector<16x64xf32> -> vector<16x64xf32>
    %712 = vector.broadcast %443 : vector<1x64xf32> to vector<16x64xf32>
    %713 = arith.addf %711, %712 : vector<16x64xf32>
    %714 = arith.addf %703, %713 : vector<16x64xf32>
    %cst_277 = arith.constant dense<0.000000e+00> : vector<16xf32>
    %715 = vector.multi_reduction <add>, %714, %cst_277 [1] : vector<16x64xf32> to vector<16xf32>
    %716 = vector.shape_cast %715 : vector<16xf32> to vector<16x1xf32>
    %cst_278 = arith.constant 6.400000e+01 : f32
    %717 = vector.broadcast %cst_278 : f32 to vector<16x1xf32>
    %718 = arith.divf %716, %717 : vector<16x1xf32>
    %719 = vector.broadcast %718 : vector<16x1xf32> to vector<16x64xf32>
    %720 = arith.subf %714, %719 : vector<16x64xf32>
    %721 = arith.mulf %720, %720 : vector<16x64xf32>
    %cst_279 = arith.constant dense<0.000000e+00> : vector<16xf32>
    %722 = vector.multi_reduction <add>, %721, %cst_279 [1] : vector<16x64xf32> to vector<16xf32>
    %723 = vector.shape_cast %722 : vector<16xf32> to vector<16x1xf32>
    %cst_280 = arith.constant 6.400000e+01 : f32
    %724 = vector.broadcast %cst_280 : f32 to vector<16x1xf32>
    %725 = arith.divf %723, %724 : vector<16x1xf32>
    %726 = vector.broadcast %718 : vector<16x1xf32> to vector<16x64xf32>
    %727 = arith.subf %714, %726 : vector<16x64xf32>
    %cst_281 = arith.constant 9.99999974E-6 : f32
    %728 = vector.broadcast %cst_281 : f32 to vector<16x1xf32>
    %729 = arith.addf %725, %728 : vector<16x1xf32>
    %730 = math.rsqrt %729 : vector<16x1xf32>
    %731 = vector.broadcast %730 : vector<16x1xf32> to vector<16x64xf32>
    %732 = arith.mulf %727, %731 : vector<16x64xf32>
    %733 = vector.broadcast %445 : vector<1x64xf32> to vector<16x64xf32>
    %734 = arith.mulf %732, %733 : vector<16x64xf32>
    %735 = vector.broadcast %447 : vector<1x64xf32> to vector<16x64xf32>
    %736 = arith.addf %734, %735 : vector<16x64xf32>
    %c1_282 = arith.constant 1 : index
    %c0_283 = arith.constant 0 : index
    %c0_284 = arith.constant 0 : index
    %737 = vector.load %arg21[%c1_282, %c0_283, %c0_284] : memref<2x64x192xbf16, #tpu.memory_space<vmem>>, vector<1x64x192xbf16>
    %738 = vector.shape_cast %737 : vector<1x64x192xbf16> to vector<64x192xbf16>
    %c1_285 = arith.constant 1 : index
    %c0_286 = arith.constant 0 : index
    %c0_287 = arith.constant 0 : index
    %739 = vector.load %arg22[%c1_285, %c0_286, %c0_287] : memref<2x1x192xf32, #tpu.memory_space<vmem>>, vector<1x1x192xf32>
    %740 = vector.shape_cast %739 : vector<1x1x192xf32> to vector<1x192xf32>
    %c1_288 = arith.constant 1 : index
    %c0_289 = arith.constant 0 : index
    %c0_290 = arith.constant 0 : index
    %741 = vector.load %arg23[%c1_288, %c0_289, %c0_290] : memref<2x64x64xbf16, #tpu.memory_space<vmem>>, vector<1x64x64xbf16>
    %742 = vector.shape_cast %741 : vector<1x64x64xbf16> to vector<64x64xbf16>
    %c1_291 = arith.constant 1 : index
    %c0_292 = arith.constant 0 : index
    %c0_293 = arith.constant 0 : index
    %743 = vector.load %arg24[%c1_291, %c0_292, %c0_293] : memref<2x1x64xf32, #tpu.memory_space<vmem>>, vector<1x1x64xf32>
    %744 = vector.shape_cast %743 : vector<1x1x64xf32> to vector<1x64xf32>
    %c1_294 = arith.constant 1 : index
    %c0_295 = arith.constant 0 : index
    %c0_296 = arith.constant 0 : index
    %745 = vector.load %arg25[%c1_294, %c0_295, %c0_296] : memref<2x1x64xf32, #tpu.memory_space<vmem>>, vector<1x1x64xf32>
    %746 = vector.shape_cast %745 : vector<1x1x64xf32> to vector<1x64xf32>
    %c1_297 = arith.constant 1 : index
    %c0_298 = arith.constant 0 : index
    %c0_299 = arith.constant 0 : index
    %747 = vector.load %arg26[%c1_297, %c0_298, %c0_299] : memref<2x1x64xf32, #tpu.memory_space<vmem>>, vector<1x1x64xf32>
    %748 = vector.shape_cast %747 : vector<1x1x64xf32> to vector<1x64xf32>
    %c1_300 = arith.constant 1 : index
    %c0_301 = arith.constant 0 : index
    %c0_302 = arith.constant 0 : index
    %749 = vector.load %arg27[%c1_300, %c0_301, %c0_302] : memref<2x64x64xbf16, #tpu.memory_space<vmem>>, vector<1x64x64xbf16>
    %750 = vector.shape_cast %749 : vector<1x64x64xbf16> to vector<64x64xbf16>
    %c1_303 = arith.constant 1 : index
    %c0_304 = arith.constant 0 : index
    %c0_305 = arith.constant 0 : index
    %751 = vector.load %arg28[%c1_303, %c0_304, %c0_305] : memref<2x1x64xf32, #tpu.memory_space<vmem>>, vector<1x1x64xf32>
    %752 = vector.shape_cast %751 : vector<1x1x64xf32> to vector<1x64xf32>
    %c1_306 = arith.constant 1 : index
    %c0_307 = arith.constant 0 : index
    %c0_308 = arith.constant 0 : index
    %753 = vector.load %arg29[%c1_306, %c0_307, %c0_308] : memref<2x64x128xbf16, #tpu.memory_space<vmem>>, vector<1x64x128xbf16>
    %754 = vector.shape_cast %753 : vector<1x64x128xbf16> to vector<64x128xbf16>
    %c1_309 = arith.constant 1 : index
    %c0_310 = arith.constant 0 : index
    %c0_311 = arith.constant 0 : index
    %755 = vector.load %arg30[%c1_309, %c0_310, %c0_311] : memref<2x1x128xf32, #tpu.memory_space<vmem>>, vector<1x1x128xf32>
    %756 = vector.shape_cast %755 : vector<1x1x128xf32> to vector<1x128xf32>
    %c1_312 = arith.constant 1 : index
    %c0_313 = arith.constant 0 : index
    %c0_314 = arith.constant 0 : index
    %757 = vector.load %arg31[%c1_312, %c0_313, %c0_314] : memref<2x64x64xbf16, #tpu.memory_space<vmem>>, vector<1x64x64xbf16>
    %758 = vector.shape_cast %757 : vector<1x64x64xbf16> to vector<64x64xbf16>
    %c1_315 = arith.constant 1 : index
    %c0_316 = arith.constant 0 : index
    %c0_317 = arith.constant 0 : index
    %759 = vector.load %arg32[%c1_315, %c0_316, %c0_317] : memref<2x1x64xf32, #tpu.memory_space<vmem>>, vector<1x1x64xf32>
    %760 = vector.shape_cast %759 : vector<1x1x64xf32> to vector<1x64xf32>
    %c1_318 = arith.constant 1 : index
    %c0_319 = arith.constant 0 : index
    %c0_320 = arith.constant 0 : index
    %761 = vector.load %arg33[%c1_318, %c0_319, %c0_320] : memref<2x1x64xf32, #tpu.memory_space<vmem>>, vector<1x1x64xf32>
    %762 = vector.shape_cast %761 : vector<1x1x64xf32> to vector<1x64xf32>
    %c1_321 = arith.constant 1 : index
    %c0_322 = arith.constant 0 : index
    %c0_323 = arith.constant 0 : index
    %763 = vector.load %arg34[%c1_321, %c0_322, %c0_323] : memref<2x1x64xf32, #tpu.memory_space<vmem>>, vector<1x1x64xf32>
    %764 = vector.shape_cast %763 : vector<1x1x64xf32> to vector<1x64xf32>
    %c1_324 = arith.constant 1 : index
    %c0_325 = arith.constant 0 : index
    %c0_326 = arith.constant 0 : index
    %765 = vector.load %arg35[%c1_324, %c0_325, %c0_326] : memref<2x64x128xbf16, #tpu.memory_space<vmem>>, vector<1x64x128xbf16>
    %766 = vector.shape_cast %765 : vector<1x64x128xbf16> to vector<64x128xbf16>
    %c1_327 = arith.constant 1 : index
    %c0_328 = arith.constant 0 : index
    %c0_329 = arith.constant 0 : index
    %767 = vector.load %arg36[%c1_327, %c0_328, %c0_329] : memref<2x1x128xf32, #tpu.memory_space<vmem>>, vector<1x1x128xf32>
    %768 = vector.shape_cast %767 : vector<1x1x128xf32> to vector<1x128xf32>
    %c1_330 = arith.constant 1 : index
    %c0_331 = arith.constant 0 : index
    %c0_332 = arith.constant 0 : index
    %769 = vector.load %arg37[%c1_330, %c0_331, %c0_332] : memref<2x128x64xbf16, #tpu.memory_space<vmem>>, vector<1x128x64xbf16>
    %770 = vector.shape_cast %769 : vector<1x128x64xbf16> to vector<128x64xbf16>
    %c1_333 = arith.constant 1 : index
    %c0_334 = arith.constant 0 : index
    %c0_335 = arith.constant 0 : index
    %771 = vector.load %arg38[%c1_333, %c0_334, %c0_335] : memref<2x1x64xf32, #tpu.memory_space<vmem>>, vector<1x1x64xf32>
    %772 = vector.shape_cast %771 : vector<1x1x64xf32> to vector<1x64xf32>
    %c1_336 = arith.constant 1 : index
    %c0_337 = arith.constant 0 : index
    %c0_338 = arith.constant 0 : index
    %773 = vector.load %arg39[%c1_336, %c0_337, %c0_338] : memref<2x1x64xf32, #tpu.memory_space<vmem>>, vector<1x1x64xf32>
    %774 = vector.shape_cast %773 : vector<1x1x64xf32> to vector<1x64xf32>
    %c1_339 = arith.constant 1 : index
    %c0_340 = arith.constant 0 : index
    %c0_341 = arith.constant 0 : index
    %775 = vector.load %arg40[%c1_339, %c0_340, %c0_341] : memref<2x1x64xf32, #tpu.memory_space<vmem>>, vector<1x1x64xf32>
    %776 = vector.shape_cast %775 : vector<1x1x64xf32> to vector<1x64xf32>
    %777 = arith.truncf %736 : vector<16x64xf32> to vector<16x64xbf16>
    %cst_342 = arith.constant dense<0.000000e+00> : vector<16x192xf32>
    %778 = tpu.matmul %777, %738, %cst_342 {dimension_numbers = #tpu.dot_dimension_numbers<[1], [0], [0], [1], [0, 0, 1, 1], [], []>} : vector<16x64xbf16>, vector<64x192xbf16>, vector<16x192xf32> -> vector<16x192xf32>
    %779 = vector.broadcast %740 : vector<1x192xf32> to vector<16x192xf32>
    %780 = arith.addf %778, %779 : vector<16x192xf32>
    %781 = vector.extract_strided_slice %780 {offsets = [0, 0], sizes = [16, 64], strides = [1, 1]} : vector<16x192xf32> to vector<16x64xf32>
    %782 = vector.extract_strided_slice %780 {offsets = [0, 64], sizes = [16, 64], strides = [1, 1]} : vector<16x192xf32> to vector<16x64xf32>
    %783 = vector.extract_strided_slice %780 {offsets = [0, 128], sizes = [16, 64], strides = [1, 1]} : vector<16x192xf32> to vector<16x64xf32>
    %784 = vector.extract_strided_slice %781 {offsets = [0, 0], sizes = [16, 16], strides = [1, 1]} : vector<16x64xf32> to vector<16x16xf32>
    %785 = arith.truncf %784 : vector<16x16xf32> to vector<16x16xbf16>
    %786 = vector.extract_strided_slice %782 {offsets = [0, 0], sizes = [16, 16], strides = [1, 1]} : vector<16x64xf32> to vector<16x16xf32>
    %787 = arith.truncf %786 : vector<16x16xf32> to vector<16x16xbf16>
    "tpu.trace_start"() <{level = 10 : i32, message = "qd,kd->qk"}> : () -> ()
    %cst_343 = arith.constant dense<0.000000e+00> : vector<16x16xf32>
    %788 = tpu.matmul %785, %787, %cst_343 {dimension_numbers = #tpu.dot_dimension_numbers<[1], [1], [0], [0], [0, 0, 1, 0], [], []>} : vector<16x16xbf16>, vector<16x16xbf16>, vector<16x16xf32> -> vector<16x16xf32>
    "tpu.trace_stop"() : () -> ()
    %789 = arith.addf %788, %1 : vector<16x16xf32>
    %cst_344 = arith.constant dense<0xFF800000> : vector<16xf32>
    %790 = vector.multi_reduction <maximumf>, %789, %cst_344 [1] : vector<16x16xf32> to vector<16xf32>
    %791 = vector.shape_cast %790 : vector<16xf32> to vector<16x1xf32>
    %792 = vector.broadcast %791 : vector<16x1xf32> to vector<16x16xf32>
    %793 = arith.subf %789, %792 : vector<16x16xf32>
    %794 = math.exp %793 : vector<16x16xf32>
    %cst_345 = arith.constant dense<0.000000e+00> : vector<16xf32>
    %795 = vector.multi_reduction <add>, %794, %cst_345 [1] : vector<16x16xf32> to vector<16xf32>
    %796 = vector.shape_cast %795 : vector<16xf32> to vector<16x1xf32>
    %797 = tpu.reciprocal %796 {approx = true} : vector<16x1xf32> -> vector<16x1xf32>
    %798 = vector.broadcast %797 : vector<16x1xf32> to vector<16x16xf32>
    %799 = arith.mulf %794, %798 : vector<16x16xf32>
    %800 = arith.truncf %799 : vector<16x16xf32> to vector<16x16xbf16>
    %801 = vector.extract_strided_slice %783 {offsets = [0, 0], sizes = [16, 16], strides = [1, 1]} : vector<16x64xf32> to vector<16x16xf32>
    %802 = arith.truncf %801 : vector<16x16xf32> to vector<16x16xbf16>
    %cst_346 = arith.constant dense<0.000000e+00> : vector<16x16xf32>
    %803 = tpu.matmul %800, %802, %cst_346 {dimension_numbers = #tpu.dot_dimension_numbers<[1], [0], [0], [1], [0, 0, 1, 1], [], []>} : vector<16x16xbf16>, vector<16x16xbf16>, vector<16x16xf32> -> vector<16x16xf32>
    %804 = arith.truncf %803 : vector<16x16xf32> to vector<16x16xbf16>
    %805 = vector.extract_strided_slice %742 {offsets = [0, 0], sizes = [16, 64], strides = [1, 1]} : vector<64x64xbf16> to vector<16x64xbf16>
    %cst_347 = arith.constant dense<0.000000e+00> : vector<16x64xf32>
    %806 = tpu.matmul %804, %805, %cst_347 {dimension_numbers = #tpu.dot_dimension_numbers<[1], [0], [0], [1], [0, 0, 1, 1], [], []>} : vector<16x16xbf16>, vector<16x64xbf16>, vector<16x64xf32> -> vector<16x64xf32>
    %807 = vector.extract_strided_slice %781 {offsets = [0, 16], sizes = [16, 16], strides = [1, 1]} : vector<16x64xf32> to vector<16x16xf32>
    %808 = arith.truncf %807 : vector<16x16xf32> to vector<16x16xbf16>
    %809 = vector.extract_strided_slice %782 {offsets = [0, 16], sizes = [16, 16], strides = [1, 1]} : vector<16x64xf32> to vector<16x16xf32>
    %810 = arith.truncf %809 : vector<16x16xf32> to vector<16x16xbf16>
    "tpu.trace_start"() <{level = 10 : i32, message = "qd,kd->qk"}> : () -> ()
    %cst_348 = arith.constant dense<0.000000e+00> : vector<16x16xf32>
    %811 = tpu.matmul %808, %810, %cst_348 {dimension_numbers = #tpu.dot_dimension_numbers<[1], [1], [0], [0], [0, 0, 1, 0], [], []>} : vector<16x16xbf16>, vector<16x16xbf16>, vector<16x16xf32> -> vector<16x16xf32>
    "tpu.trace_stop"() : () -> ()
    %812 = arith.addf %811, %1 : vector<16x16xf32>
    %cst_349 = arith.constant dense<0xFF800000> : vector<16xf32>
    %813 = vector.multi_reduction <maximumf>, %812, %cst_349 [1] : vector<16x16xf32> to vector<16xf32>
    %814 = vector.shape_cast %813 : vector<16xf32> to vector<16x1xf32>
    %815 = vector.broadcast %814 : vector<16x1xf32> to vector<16x16xf32>
    %816 = arith.subf %812, %815 : vector<16x16xf32>
    %817 = math.exp %816 : vector<16x16xf32>
    %cst_350 = arith.constant dense<0.000000e+00> : vector<16xf32>
    %818 = vector.multi_reduction <add>, %817, %cst_350 [1] : vector<16x16xf32> to vector<16xf32>
    %819 = vector.shape_cast %818 : vector<16xf32> to vector<16x1xf32>
    %820 = tpu.reciprocal %819 {approx = true} : vector<16x1xf32> -> vector<16x1xf32>
    %821 = vector.broadcast %820 : vector<16x1xf32> to vector<16x16xf32>
    %822 = arith.mulf %817, %821 : vector<16x16xf32>
    %823 = arith.truncf %822 : vector<16x16xf32> to vector<16x16xbf16>
    %824 = vector.extract_strided_slice %783 {offsets = [0, 16], sizes = [16, 16], strides = [1, 1]} : vector<16x64xf32> to vector<16x16xf32>
    %825 = arith.truncf %824 : vector<16x16xf32> to vector<16x16xbf16>
    %cst_351 = arith.constant dense<0.000000e+00> : vector<16x16xf32>
    %826 = tpu.matmul %823, %825, %cst_351 {dimension_numbers = #tpu.dot_dimension_numbers<[1], [0], [0], [1], [0, 0, 1, 1], [], []>} : vector<16x16xbf16>, vector<16x16xbf16>, vector<16x16xf32> -> vector<16x16xf32>
    %827 = arith.truncf %826 : vector<16x16xf32> to vector<16x16xbf16>
    %828 = vector.extract_strided_slice %742 {offsets = [16, 0], sizes = [16, 64], strides = [1, 1]} : vector<64x64xbf16> to vector<16x64xbf16>
    %cst_352 = arith.constant dense<0.000000e+00> : vector<16x64xf32>
    %829 = tpu.matmul %827, %828, %cst_352 {dimension_numbers = #tpu.dot_dimension_numbers<[1], [0], [0], [1], [0, 0, 1, 1], [], []>} : vector<16x16xbf16>, vector<16x64xbf16>, vector<16x64xf32> -> vector<16x64xf32>
    %830 = arith.addf %806, %829 : vector<16x64xf32>
    %831 = vector.extract_strided_slice %781 {offsets = [0, 32], sizes = [16, 16], strides = [1, 1]} : vector<16x64xf32> to vector<16x16xf32>
    %832 = arith.truncf %831 : vector<16x16xf32> to vector<16x16xbf16>
    %833 = vector.extract_strided_slice %782 {offsets = [0, 32], sizes = [16, 16], strides = [1, 1]} : vector<16x64xf32> to vector<16x16xf32>
    %834 = arith.truncf %833 : vector<16x16xf32> to vector<16x16xbf16>
    "tpu.trace_start"() <{level = 10 : i32, message = "qd,kd->qk"}> : () -> ()
    %cst_353 = arith.constant dense<0.000000e+00> : vector<16x16xf32>
    %835 = tpu.matmul %832, %834, %cst_353 {dimension_numbers = #tpu.dot_dimension_numbers<[1], [1], [0], [0], [0, 0, 1, 0], [], []>} : vector<16x16xbf16>, vector<16x16xbf16>, vector<16x16xf32> -> vector<16x16xf32>
    "tpu.trace_stop"() : () -> ()
    %836 = arith.addf %835, %1 : vector<16x16xf32>
    %cst_354 = arith.constant dense<0xFF800000> : vector<16xf32>
    %837 = vector.multi_reduction <maximumf>, %836, %cst_354 [1] : vector<16x16xf32> to vector<16xf32>
    %838 = vector.shape_cast %837 : vector<16xf32> to vector<16x1xf32>
    %839 = vector.broadcast %838 : vector<16x1xf32> to vector<16x16xf32>
    %840 = arith.subf %836, %839 : vector<16x16xf32>
    %841 = math.exp %840 : vector<16x16xf32>
    %cst_355 = arith.constant dense<0.000000e+00> : vector<16xf32>
    %842 = vector.multi_reduction <add>, %841, %cst_355 [1] : vector<16x16xf32> to vector<16xf32>
    %843 = vector.shape_cast %842 : vector<16xf32> to vector<16x1xf32>
    %844 = tpu.reciprocal %843 {approx = true} : vector<16x1xf32> -> vector<16x1xf32>
    %845 = vector.broadcast %844 : vector<16x1xf32> to vector<16x16xf32>
    %846 = arith.mulf %841, %845 : vector<16x16xf32>
    %847 = arith.truncf %846 : vector<16x16xf32> to vector<16x16xbf16>
    %848 = vector.extract_strided_slice %783 {offsets = [0, 32], sizes = [16, 16], strides = [1, 1]} : vector<16x64xf32> to vector<16x16xf32>
    %849 = arith.truncf %848 : vector<16x16xf32> to vector<16x16xbf16>
    %cst_356 = arith.constant dense<0.000000e+00> : vector<16x16xf32>
    %850 = tpu.matmul %847, %849, %cst_356 {dimension_numbers = #tpu.dot_dimension_numbers<[1], [0], [0], [1], [0, 0, 1, 1], [], []>} : vector<16x16xbf16>, vector<16x16xbf16>, vector<16x16xf32> -> vector<16x16xf32>
    %851 = arith.truncf %850 : vector<16x16xf32> to vector<16x16xbf16>
    %852 = vector.extract_strided_slice %742 {offsets = [32, 0], sizes = [16, 64], strides = [1, 1]} : vector<64x64xbf16> to vector<16x64xbf16>
    %cst_357 = arith.constant dense<0.000000e+00> : vector<16x64xf32>
    %853 = tpu.matmul %851, %852, %cst_357 {dimension_numbers = #tpu.dot_dimension_numbers<[1], [0], [0], [1], [0, 0, 1, 1], [], []>} : vector<16x16xbf16>, vector<16x64xbf16>, vector<16x64xf32> -> vector<16x64xf32>
    %854 = arith.addf %830, %853 : vector<16x64xf32>
    %855 = vector.extract_strided_slice %781 {offsets = [0, 48], sizes = [16, 16], strides = [1, 1]} : vector<16x64xf32> to vector<16x16xf32>
    %856 = arith.truncf %855 : vector<16x16xf32> to vector<16x16xbf16>
    %857 = vector.extract_strided_slice %782 {offsets = [0, 48], sizes = [16, 16], strides = [1, 1]} : vector<16x64xf32> to vector<16x16xf32>
    %858 = arith.truncf %857 : vector<16x16xf32> to vector<16x16xbf16>
    "tpu.trace_start"() <{level = 10 : i32, message = "qd,kd->qk"}> : () -> ()
    %cst_358 = arith.constant dense<0.000000e+00> : vector<16x16xf32>
    %859 = tpu.matmul %856, %858, %cst_358 {dimension_numbers = #tpu.dot_dimension_numbers<[1], [1], [0], [0], [0, 0, 1, 0], [], []>} : vector<16x16xbf16>, vector<16x16xbf16>, vector<16x16xf32> -> vector<16x16xf32>
    "tpu.trace_stop"() : () -> ()
    %860 = arith.addf %859, %1 : vector<16x16xf32>
    %cst_359 = arith.constant dense<0xFF800000> : vector<16xf32>
    %861 = vector.multi_reduction <maximumf>, %860, %cst_359 [1] : vector<16x16xf32> to vector<16xf32>
    %862 = vector.shape_cast %861 : vector<16xf32> to vector<16x1xf32>
    %863 = vector.broadcast %862 : vector<16x1xf32> to vector<16x16xf32>
    %864 = arith.subf %860, %863 : vector<16x16xf32>
    %865 = math.exp %864 : vector<16x16xf32>
    %cst_360 = arith.constant dense<0.000000e+00> : vector<16xf32>
    %866 = vector.multi_reduction <add>, %865, %cst_360 [1] : vector<16x16xf32> to vector<16xf32>
    %867 = vector.shape_cast %866 : vector<16xf32> to vector<16x1xf32>
    %868 = tpu.reciprocal %867 {approx = true} : vector<16x1xf32> -> vector<16x1xf32>
    %869 = vector.broadcast %868 : vector<16x1xf32> to vector<16x16xf32>
    %870 = arith.mulf %865, %869 : vector<16x16xf32>
    %871 = arith.truncf %870 : vector<16x16xf32> to vector<16x16xbf16>
    %872 = vector.extract_strided_slice %783 {offsets = [0, 48], sizes = [16, 16], strides = [1, 1]} : vector<16x64xf32> to vector<16x16xf32>
    %873 = arith.truncf %872 : vector<16x16xf32> to vector<16x16xbf16>
    %cst_361 = arith.constant dense<0.000000e+00> : vector<16x16xf32>
    %874 = tpu.matmul %871, %873, %cst_361 {dimension_numbers = #tpu.dot_dimension_numbers<[1], [0], [0], [1], [0, 0, 1, 1], [], []>} : vector<16x16xbf16>, vector<16x16xbf16>, vector<16x16xf32> -> vector<16x16xf32>
    %875 = arith.truncf %874 : vector<16x16xf32> to vector<16x16xbf16>
    %876 = vector.extract_strided_slice %742 {offsets = [48, 0], sizes = [16, 64], strides = [1, 1]} : vector<64x64xbf16> to vector<16x64xbf16>
    %cst_362 = arith.constant dense<0.000000e+00> : vector<16x64xf32>
    %877 = tpu.matmul %875, %876, %cst_362 {dimension_numbers = #tpu.dot_dimension_numbers<[1], [0], [0], [1], [0, 0, 1, 1], [], []>} : vector<16x16xbf16>, vector<16x64xbf16>, vector<16x64xf32> -> vector<16x64xf32>
    %878 = arith.addf %854, %877 : vector<16x64xf32>
    %879 = vector.broadcast %744 : vector<1x64xf32> to vector<16x64xf32>
    %880 = arith.addf %878, %879 : vector<16x64xf32>
    %881 = arith.addf %736, %880 : vector<16x64xf32>
    %cst_363 = arith.constant dense<0.000000e+00> : vector<16xf32>
    %882 = vector.multi_reduction <add>, %881, %cst_363 [1] : vector<16x64xf32> to vector<16xf32>
    %883 = vector.shape_cast %882 : vector<16xf32> to vector<16x1xf32>
    %cst_364 = arith.constant 6.400000e+01 : f32
    %884 = vector.broadcast %cst_364 : f32 to vector<16x1xf32>
    %885 = arith.divf %883, %884 : vector<16x1xf32>
    %886 = vector.broadcast %885 : vector<16x1xf32> to vector<16x64xf32>
    %887 = arith.subf %881, %886 : vector<16x64xf32>
    %888 = arith.mulf %887, %887 : vector<16x64xf32>
    %cst_365 = arith.constant dense<0.000000e+00> : vector<16xf32>
    %889 = vector.multi_reduction <add>, %888, %cst_365 [1] : vector<16x64xf32> to vector<16xf32>
    %890 = vector.shape_cast %889 : vector<16xf32> to vector<16x1xf32>
    %cst_366 = arith.constant 6.400000e+01 : f32
    %891 = vector.broadcast %cst_366 : f32 to vector<16x1xf32>
    %892 = arith.divf %890, %891 : vector<16x1xf32>
    %893 = vector.broadcast %885 : vector<16x1xf32> to vector<16x64xf32>
    %894 = arith.subf %881, %893 : vector<16x64xf32>
    %cst_367 = arith.constant 9.99999974E-6 : f32
    %895 = vector.broadcast %cst_367 : f32 to vector<16x1xf32>
    %896 = arith.addf %892, %895 : vector<16x1xf32>
    %897 = math.rsqrt %896 : vector<16x1xf32>
    %898 = vector.broadcast %897 : vector<16x1xf32> to vector<16x64xf32>
    %899 = arith.mulf %894, %898 : vector<16x64xf32>
    %900 = vector.broadcast %746 : vector<1x64xf32> to vector<16x64xf32>
    %901 = arith.mulf %899, %900 : vector<16x64xf32>
    %902 = vector.broadcast %748 : vector<1x64xf32> to vector<16x64xf32>
    %903 = arith.addf %901, %902 : vector<16x64xf32>
    %904 = arith.truncf %903 : vector<16x64xf32> to vector<16x64xbf16>
    %cst_368 = arith.constant dense<0.000000e+00> : vector<16x64xf32>
    %905 = tpu.matmul %904, %750, %cst_368 {dimension_numbers = #tpu.dot_dimension_numbers<[1], [0], [0], [1], [0, 0, 1, 1], [], []>} : vector<16x64xbf16>, vector<64x64xbf16>, vector<16x64xf32> -> vector<16x64xf32>
    %906 = vector.broadcast %752 : vector<1x64xf32> to vector<16x64xf32>
    %907 = arith.addf %905, %906 : vector<16x64xf32>
    %cst_369 = arith.constant dense<0.000000e+00> : vector<16x128xf32>
    %908 = tpu.matmul %394, %754, %cst_369 {dimension_numbers = #tpu.dot_dimension_numbers<[1], [0], [0], [1], [0, 0, 1, 1], [], []>} : vector<16x64xbf16>, vector<64x128xbf16>, vector<16x128xf32> -> vector<16x128xf32>
    %909 = vector.broadcast %756 : vector<1x128xf32> to vector<16x128xf32>
    %910 = arith.addf %908, %909 : vector<16x128xf32>
    %911 = vector.extract_strided_slice %910 {offsets = [0, 0], sizes = [16, 64], strides = [1, 1]} : vector<16x128xf32> to vector<16x64xf32>
    %912 = vector.extract_strided_slice %910 {offsets = [0, 64], sizes = [16, 64], strides = [1, 1]} : vector<16x128xf32> to vector<16x64xf32>
    %913 = vector.extract_strided_slice %907 {offsets = [0, 0], sizes = [16, 16], strides = [1, 1]} : vector<16x64xf32> to vector<16x16xf32>
    %914 = arith.truncf %913 : vector<16x16xf32> to vector<16x16xbf16>
    %915 = vector.extract_strided_slice %911 {offsets = [0, 0], sizes = [16, 16], strides = [1, 1]} : vector<16x64xf32> to vector<16x16xf32>
    %916 = arith.truncf %915 : vector<16x16xf32> to vector<16x16xbf16>
    "tpu.trace_start"() <{level = 10 : i32, message = "qd,kd->qk"}> : () -> ()
    %cst_370 = arith.constant dense<0.000000e+00> : vector<16x16xf32>
    %917 = tpu.matmul %914, %916, %cst_370 {dimension_numbers = #tpu.dot_dimension_numbers<[1], [1], [0], [0], [0, 0, 1, 0], [], []>} : vector<16x16xbf16>, vector<16x16xbf16>, vector<16x16xf32> -> vector<16x16xf32>
    "tpu.trace_stop"() : () -> ()
    %918 = arith.addf %917, %2 : vector<16x16xf32>
    %cst_371 = arith.constant dense<0xFF800000> : vector<16xf32>
    %919 = vector.multi_reduction <maximumf>, %918, %cst_371 [1] : vector<16x16xf32> to vector<16xf32>
    %920 = vector.shape_cast %919 : vector<16xf32> to vector<16x1xf32>
    %921 = vector.broadcast %920 : vector<16x1xf32> to vector<16x16xf32>
    %922 = arith.subf %918, %921 : vector<16x16xf32>
    %923 = math.exp %922 : vector<16x16xf32>
    %cst_372 = arith.constant dense<0.000000e+00> : vector<16xf32>
    %924 = vector.multi_reduction <add>, %923, %cst_372 [1] : vector<16x16xf32> to vector<16xf32>
    %925 = vector.shape_cast %924 : vector<16xf32> to vector<16x1xf32>
    %926 = tpu.reciprocal %925 {approx = true} : vector<16x1xf32> -> vector<16x1xf32>
    %927 = vector.broadcast %926 : vector<16x1xf32> to vector<16x16xf32>
    %928 = arith.mulf %923, %927 : vector<16x16xf32>
    %929 = arith.truncf %928 : vector<16x16xf32> to vector<16x16xbf16>
    %930 = vector.extract_strided_slice %912 {offsets = [0, 0], sizes = [16, 16], strides = [1, 1]} : vector<16x64xf32> to vector<16x16xf32>
    %931 = arith.truncf %930 : vector<16x16xf32> to vector<16x16xbf16>
    %cst_373 = arith.constant dense<0.000000e+00> : vector<16x16xf32>
    %932 = tpu.matmul %929, %931, %cst_373 {dimension_numbers = #tpu.dot_dimension_numbers<[1], [0], [0], [1], [0, 0, 1, 1], [], []>} : vector<16x16xbf16>, vector<16x16xbf16>, vector<16x16xf32> -> vector<16x16xf32>
    %933 = arith.truncf %932 : vector<16x16xf32> to vector<16x16xbf16>
    %934 = vector.extract_strided_slice %758 {offsets = [0, 0], sizes = [16, 64], strides = [1, 1]} : vector<64x64xbf16> to vector<16x64xbf16>
    %cst_374 = arith.constant dense<0.000000e+00> : vector<16x64xf32>
    %935 = tpu.matmul %933, %934, %cst_374 {dimension_numbers = #tpu.dot_dimension_numbers<[1], [0], [0], [1], [0, 0, 1, 1], [], []>} : vector<16x16xbf16>, vector<16x64xbf16>, vector<16x64xf32> -> vector<16x64xf32>
    %936 = vector.extract_strided_slice %907 {offsets = [0, 16], sizes = [16, 16], strides = [1, 1]} : vector<16x64xf32> to vector<16x16xf32>
    %937 = arith.truncf %936 : vector<16x16xf32> to vector<16x16xbf16>
    %938 = vector.extract_strided_slice %911 {offsets = [0, 16], sizes = [16, 16], strides = [1, 1]} : vector<16x64xf32> to vector<16x16xf32>
    %939 = arith.truncf %938 : vector<16x16xf32> to vector<16x16xbf16>
    "tpu.trace_start"() <{level = 10 : i32, message = "qd,kd->qk"}> : () -> ()
    %cst_375 = arith.constant dense<0.000000e+00> : vector<16x16xf32>
    %940 = tpu.matmul %937, %939, %cst_375 {dimension_numbers = #tpu.dot_dimension_numbers<[1], [1], [0], [0], [0, 0, 1, 0], [], []>} : vector<16x16xbf16>, vector<16x16xbf16>, vector<16x16xf32> -> vector<16x16xf32>
    "tpu.trace_stop"() : () -> ()
    %941 = arith.addf %940, %2 : vector<16x16xf32>
    %cst_376 = arith.constant dense<0xFF800000> : vector<16xf32>
    %942 = vector.multi_reduction <maximumf>, %941, %cst_376 [1] : vector<16x16xf32> to vector<16xf32>
    %943 = vector.shape_cast %942 : vector<16xf32> to vector<16x1xf32>
    %944 = vector.broadcast %943 : vector<16x1xf32> to vector<16x16xf32>
    %945 = arith.subf %941, %944 : vector<16x16xf32>
    %946 = math.exp %945 : vector<16x16xf32>
    %cst_377 = arith.constant dense<0.000000e+00> : vector<16xf32>
    %947 = vector.multi_reduction <add>, %946, %cst_377 [1] : vector<16x16xf32> to vector<16xf32>
    %948 = vector.shape_cast %947 : vector<16xf32> to vector<16x1xf32>
    %949 = tpu.reciprocal %948 {approx = true} : vector<16x1xf32> -> vector<16x1xf32>
    %950 = vector.broadcast %949 : vector<16x1xf32> to vector<16x16xf32>
    %951 = arith.mulf %946, %950 : vector<16x16xf32>
    %952 = arith.truncf %951 : vector<16x16xf32> to vector<16x16xbf16>
    %953 = vector.extract_strided_slice %912 {offsets = [0, 16], sizes = [16, 16], strides = [1, 1]} : vector<16x64xf32> to vector<16x16xf32>
    %954 = arith.truncf %953 : vector<16x16xf32> to vector<16x16xbf16>
    %cst_378 = arith.constant dense<0.000000e+00> : vector<16x16xf32>
    %955 = tpu.matmul %952, %954, %cst_378 {dimension_numbers = #tpu.dot_dimension_numbers<[1], [0], [0], [1], [0, 0, 1, 1], [], []>} : vector<16x16xbf16>, vector<16x16xbf16>, vector<16x16xf32> -> vector<16x16xf32>
    %956 = arith.truncf %955 : vector<16x16xf32> to vector<16x16xbf16>
    %957 = vector.extract_strided_slice %758 {offsets = [16, 0], sizes = [16, 64], strides = [1, 1]} : vector<64x64xbf16> to vector<16x64xbf16>
    %cst_379 = arith.constant dense<0.000000e+00> : vector<16x64xf32>
    %958 = tpu.matmul %956, %957, %cst_379 {dimension_numbers = #tpu.dot_dimension_numbers<[1], [0], [0], [1], [0, 0, 1, 1], [], []>} : vector<16x16xbf16>, vector<16x64xbf16>, vector<16x64xf32> -> vector<16x64xf32>
    %959 = arith.addf %935, %958 : vector<16x64xf32>
    %960 = vector.extract_strided_slice %907 {offsets = [0, 32], sizes = [16, 16], strides = [1, 1]} : vector<16x64xf32> to vector<16x16xf32>
    %961 = arith.truncf %960 : vector<16x16xf32> to vector<16x16xbf16>
    %962 = vector.extract_strided_slice %911 {offsets = [0, 32], sizes = [16, 16], strides = [1, 1]} : vector<16x64xf32> to vector<16x16xf32>
    %963 = arith.truncf %962 : vector<16x16xf32> to vector<16x16xbf16>
    "tpu.trace_start"() <{level = 10 : i32, message = "qd,kd->qk"}> : () -> ()
    %cst_380 = arith.constant dense<0.000000e+00> : vector<16x16xf32>
    %964 = tpu.matmul %961, %963, %cst_380 {dimension_numbers = #tpu.dot_dimension_numbers<[1], [1], [0], [0], [0, 0, 1, 0], [], []>} : vector<16x16xbf16>, vector<16x16xbf16>, vector<16x16xf32> -> vector<16x16xf32>
    "tpu.trace_stop"() : () -> ()
    %965 = arith.addf %964, %2 : vector<16x16xf32>
    %cst_381 = arith.constant dense<0xFF800000> : vector<16xf32>
    %966 = vector.multi_reduction <maximumf>, %965, %cst_381 [1] : vector<16x16xf32> to vector<16xf32>
    %967 = vector.shape_cast %966 : vector<16xf32> to vector<16x1xf32>
    %968 = vector.broadcast %967 : vector<16x1xf32> to vector<16x16xf32>
    %969 = arith.subf %965, %968 : vector<16x16xf32>
    %970 = math.exp %969 : vector<16x16xf32>
    %cst_382 = arith.constant dense<0.000000e+00> : vector<16xf32>
    %971 = vector.multi_reduction <add>, %970, %cst_382 [1] : vector<16x16xf32> to vector<16xf32>
    %972 = vector.shape_cast %971 : vector<16xf32> to vector<16x1xf32>
    %973 = tpu.reciprocal %972 {approx = true} : vector<16x1xf32> -> vector<16x1xf32>
    %974 = vector.broadcast %973 : vector<16x1xf32> to vector<16x16xf32>
    %975 = arith.mulf %970, %974 : vector<16x16xf32>
    %976 = arith.truncf %975 : vector<16x16xf32> to vector<16x16xbf16>
    %977 = vector.extract_strided_slice %912 {offsets = [0, 32], sizes = [16, 16], strides = [1, 1]} : vector<16x64xf32> to vector<16x16xf32>
    %978 = arith.truncf %977 : vector<16x16xf32> to vector<16x16xbf16>
    %cst_383 = arith.constant dense<0.000000e+00> : vector<16x16xf32>
    %979 = tpu.matmul %976, %978, %cst_383 {dimension_numbers = #tpu.dot_dimension_numbers<[1], [0], [0], [1], [0, 0, 1, 1], [], []>} : vector<16x16xbf16>, vector<16x16xbf16>, vector<16x16xf32> -> vector<16x16xf32>
    %980 = arith.truncf %979 : vector<16x16xf32> to vector<16x16xbf16>
    %981 = vector.extract_strided_slice %758 {offsets = [32, 0], sizes = [16, 64], strides = [1, 1]} : vector<64x64xbf16> to vector<16x64xbf16>
    %cst_384 = arith.constant dense<0.000000e+00> : vector<16x64xf32>
    %982 = tpu.matmul %980, %981, %cst_384 {dimension_numbers = #tpu.dot_dimension_numbers<[1], [0], [0], [1], [0, 0, 1, 1], [], []>} : vector<16x16xbf16>, vector<16x64xbf16>, vector<16x64xf32> -> vector<16x64xf32>
    %983 = arith.addf %959, %982 : vector<16x64xf32>
    %984 = vector.extract_strided_slice %907 {offsets = [0, 48], sizes = [16, 16], strides = [1, 1]} : vector<16x64xf32> to vector<16x16xf32>
    %985 = arith.truncf %984 : vector<16x16xf32> to vector<16x16xbf16>
    %986 = vector.extract_strided_slice %911 {offsets = [0, 48], sizes = [16, 16], strides = [1, 1]} : vector<16x64xf32> to vector<16x16xf32>
    %987 = arith.truncf %986 : vector<16x16xf32> to vector<16x16xbf16>
    "tpu.trace_start"() <{level = 10 : i32, message = "qd,kd->qk"}> : () -> ()
    %cst_385 = arith.constant dense<0.000000e+00> : vector<16x16xf32>
    %988 = tpu.matmul %985, %987, %cst_385 {dimension_numbers = #tpu.dot_dimension_numbers<[1], [1], [0], [0], [0, 0, 1, 0], [], []>} : vector<16x16xbf16>, vector<16x16xbf16>, vector<16x16xf32> -> vector<16x16xf32>
    "tpu.trace_stop"() : () -> ()
    %989 = arith.addf %988, %2 : vector<16x16xf32>
    %cst_386 = arith.constant dense<0xFF800000> : vector<16xf32>
    %990 = vector.multi_reduction <maximumf>, %989, %cst_386 [1] : vector<16x16xf32> to vector<16xf32>
    %991 = vector.shape_cast %990 : vector<16xf32> to vector<16x1xf32>
    %992 = vector.broadcast %991 : vector<16x1xf32> to vector<16x16xf32>
    %993 = arith.subf %989, %992 : vector<16x16xf32>
    %994 = math.exp %993 : vector<16x16xf32>
    %cst_387 = arith.constant dense<0.000000e+00> : vector<16xf32>
    %995 = vector.multi_reduction <add>, %994, %cst_387 [1] : vector<16x16xf32> to vector<16xf32>
    %996 = vector.shape_cast %995 : vector<16xf32> to vector<16x1xf32>
    %997 = tpu.reciprocal %996 {approx = true} : vector<16x1xf32> -> vector<16x1xf32>
    %998 = vector.broadcast %997 : vector<16x1xf32> to vector<16x16xf32>
    %999 = arith.mulf %994, %998 : vector<16x16xf32>
    %1000 = arith.truncf %999 : vector<16x16xf32> to vector<16x16xbf16>
    %1001 = vector.extract_strided_slice %912 {offsets = [0, 48], sizes = [16, 16], strides = [1, 1]} : vector<16x64xf32> to vector<16x16xf32>
    %1002 = arith.truncf %1001 : vector<16x16xf32> to vector<16x16xbf16>
    %cst_388 = arith.constant dense<0.000000e+00> : vector<16x16xf32>
    %1003 = tpu.matmul %1000, %1002, %cst_388 {dimension_numbers = #tpu.dot_dimension_numbers<[1], [0], [0], [1], [0, 0, 1, 1], [], []>} : vector<16x16xbf16>, vector<16x16xbf16>, vector<16x16xf32> -> vector<16x16xf32>
    %1004 = arith.truncf %1003 : vector<16x16xf32> to vector<16x16xbf16>
    %1005 = vector.extract_strided_slice %758 {offsets = [48, 0], sizes = [16, 64], strides = [1, 1]} : vector<64x64xbf16> to vector<16x64xbf16>
    %cst_389 = arith.constant dense<0.000000e+00> : vector<16x64xf32>
    %1006 = tpu.matmul %1004, %1005, %cst_389 {dimension_numbers = #tpu.dot_dimension_numbers<[1], [0], [0], [1], [0, 0, 1, 1], [], []>} : vector<16x16xbf16>, vector<16x64xbf16>, vector<16x64xf32> -> vector<16x64xf32>
    %1007 = arith.addf %983, %1006 : vector<16x64xf32>
    %1008 = vector.broadcast %760 : vector<1x64xf32> to vector<16x64xf32>
    %1009 = arith.addf %1007, %1008 : vector<16x64xf32>
    %1010 = arith.addf %903, %1009 : vector<16x64xf32>
    %cst_390 = arith.constant dense<0.000000e+00> : vector<16xf32>
    %1011 = vector.multi_reduction <add>, %1010, %cst_390 [1] : vector<16x64xf32> to vector<16xf32>
    %1012 = vector.shape_cast %1011 : vector<16xf32> to vector<16x1xf32>
    %cst_391 = arith.constant 6.400000e+01 : f32
    %1013 = vector.broadcast %cst_391 : f32 to vector<16x1xf32>
    %1014 = arith.divf %1012, %1013 : vector<16x1xf32>
    %1015 = vector.broadcast %1014 : vector<16x1xf32> to vector<16x64xf32>
    %1016 = arith.subf %1010, %1015 : vector<16x64xf32>
    %1017 = arith.mulf %1016, %1016 : vector<16x64xf32>
    %cst_392 = arith.constant dense<0.000000e+00> : vector<16xf32>
    %1018 = vector.multi_reduction <add>, %1017, %cst_392 [1] : vector<16x64xf32> to vector<16xf32>
    %1019 = vector.shape_cast %1018 : vector<16xf32> to vector<16x1xf32>
    %cst_393 = arith.constant 6.400000e+01 : f32
    %1020 = vector.broadcast %cst_393 : f32 to vector<16x1xf32>
    %1021 = arith.divf %1019, %1020 : vector<16x1xf32>
    %1022 = vector.broadcast %1014 : vector<16x1xf32> to vector<16x64xf32>
    %1023 = arith.subf %1010, %1022 : vector<16x64xf32>
    %cst_394 = arith.constant 9.99999974E-6 : f32
    %1024 = vector.broadcast %cst_394 : f32 to vector<16x1xf32>
    %1025 = arith.addf %1021, %1024 : vector<16x1xf32>
    %1026 = math.rsqrt %1025 : vector<16x1xf32>
    %1027 = vector.broadcast %1026 : vector<16x1xf32> to vector<16x64xf32>
    %1028 = arith.mulf %1023, %1027 : vector<16x64xf32>
    %1029 = vector.broadcast %762 : vector<1x64xf32> to vector<16x64xf32>
    %1030 = arith.mulf %1028, %1029 : vector<16x64xf32>
    %1031 = vector.broadcast %764 : vector<1x64xf32> to vector<16x64xf32>
    %1032 = arith.addf %1030, %1031 : vector<16x64xf32>
    %1033 = arith.truncf %1032 : vector<16x64xf32> to vector<16x64xbf16>
    %cst_395 = arith.constant dense<0.000000e+00> : vector<16x128xf32>
    %1034 = tpu.matmul %1033, %766, %cst_395 {dimension_numbers = #tpu.dot_dimension_numbers<[1], [0], [0], [1], [0, 0, 1, 1], [], []>} : vector<16x64xbf16>, vector<64x128xbf16>, vector<16x128xf32> -> vector<16x128xf32>
    %1035 = vector.broadcast %768 : vector<1x128xf32> to vector<16x128xf32>
    %1036 = arith.addf %1034, %1035 : vector<16x128xf32>
    %cst_396 = arith.constant 0.000000e+00 : f32
    %1037 = vector.broadcast %cst_396 : f32 to vector<16x128xf32>
    %1038 = arith.maximumf %1036, %1037 : vector<16x128xf32>
    %1039 = arith.truncf %1038 : vector<16x128xf32> to vector<16x128xbf16>
    %cst_397 = arith.constant dense<0.000000e+00> : vector<16x64xf32>
    %1040 = tpu.matmul %1039, %770, %cst_397 {dimension_numbers = #tpu.dot_dimension_numbers<[1], [0], [0], [1], [0, 0, 1, 1], [], []>} : vector<16x128xbf16>, vector<128x64xbf16>, vector<16x64xf32> -> vector<16x64xf32>
    %1041 = vector.broadcast %772 : vector<1x64xf32> to vector<16x64xf32>
    %1042 = arith.addf %1040, %1041 : vector<16x64xf32>
    %1043 = arith.addf %1032, %1042 : vector<16x64xf32>
    %cst_398 = arith.constant dense<0.000000e+00> : vector<16xf32>
    %1044 = vector.multi_reduction <add>, %1043, %cst_398 [1] : vector<16x64xf32> to vector<16xf32>
    %1045 = vector.shape_cast %1044 : vector<16xf32> to vector<16x1xf32>
    %cst_399 = arith.constant 6.400000e+01 : f32
    %1046 = vector.broadcast %cst_399 : f32 to vector<16x1xf32>
    %1047 = arith.divf %1045, %1046 : vector<16x1xf32>
    %1048 = vector.broadcast %1047 : vector<16x1xf32> to vector<16x64xf32>
    %1049 = arith.subf %1043, %1048 : vector<16x64xf32>
    %1050 = arith.mulf %1049, %1049 : vector<16x64xf32>
    %cst_400 = arith.constant dense<0.000000e+00> : vector<16xf32>
    %1051 = vector.multi_reduction <add>, %1050, %cst_400 [1] : vector<16x64xf32> to vector<16xf32>
    %1052 = vector.shape_cast %1051 : vector<16xf32> to vector<16x1xf32>
    %cst_401 = arith.constant 6.400000e+01 : f32
    %1053 = vector.broadcast %cst_401 : f32 to vector<16x1xf32>
    %1054 = arith.divf %1052, %1053 : vector<16x1xf32>
    %1055 = vector.broadcast %1047 : vector<16x1xf32> to vector<16x64xf32>
    %1056 = arith.subf %1043, %1055 : vector<16x64xf32>
    %cst_402 = arith.constant 9.99999974E-6 : f32
    %1057 = vector.broadcast %cst_402 : f32 to vector<16x1xf32>
    %1058 = arith.addf %1054, %1057 : vector<16x1xf32>
    %1059 = math.rsqrt %1058 : vector<16x1xf32>
    %1060 = vector.broadcast %1059 : vector<16x1xf32> to vector<16x64xf32>
    %1061 = arith.mulf %1056, %1060 : vector<16x64xf32>
    %1062 = vector.broadcast %774 : vector<1x64xf32> to vector<16x64xf32>
    %1063 = arith.mulf %1061, %1062 : vector<16x64xf32>
    %1064 = vector.broadcast %776 : vector<1x64xf32> to vector<16x64xf32>
    %1065 = arith.addf %1063, %1064 : vector<16x64xf32>
    %1066 = arith.truncf %1065 : vector<16x64xf32> to vector<16x64xbf16>
    %c0_403 = arith.constant 0 : index
    %c0_404 = arith.constant 0 : index
    %1067 = vector.load %arg7[%c0_403, %c0_404] : memref<64x128xbf16, #tpu.memory_space<vmem>>, vector<64x128xbf16>
    %cst_405 = arith.constant dense<0.000000e+00> : vector<16x128xf32>
    %1068 = tpu.matmul %1066, %1067, %cst_405 {dimension_numbers = #tpu.dot_dimension_numbers<[1], [0], [0], [1], [0, 0, 1, 1], [], []>} : vector<16x64xbf16>, vector<64x128xbf16>, vector<16x128xf32> -> vector<16x128xf32>
    %c0_406 = arith.constant 0 : index
    %c0_407 = arith.constant 0 : index
    %1069 = vector.load %arg8[%c0_406, %c0_407] : memref<1x128xf32, #tpu.memory_space<vmem>>, vector<1x128xf32>
    %1070 = vector.broadcast %1069 : vector<1x128xf32> to vector<16x128xf32>
    %1071 = arith.addf %1068, %1070 : vector<16x128xf32>
    %c0_408 = arith.constant 0 : index
    %c0_409 = arith.constant 0 : index
    %1072 = vector.load %arg41[%c0_408, %c0_409] : memref<16x128xf32, #tpu.memory_space<vmem>>, vector<16x128xf32>
    tpu.vector_store %arg41[%c0_408, %c0_409], %1071 {strides = array<i32>} : memref<16x128xf32, #tpu.memory_space<vmem>>, vector<16x128xf32>,
    return
  }
}

</mosaic_0001>

<bundles_post_ra>
// kernel: cptr_forward.1
= control target key start
LH: loop header
LB: loop body
LE: loop exit
PB: predicated region body
PF: predicated region fallthrough
CT: control target
= control target key end

     0   :  { %s9480_s6 = smov 1   ;;  %s9481_s10 = smov 2   ;;  %s11056_s0 = inlined_call_operand.smem [shape: u32[42], index: -1, kind: input, shape index: {}] }
   0x1   :  { %s9572_s5 = sld [smem:[%s11056_s0]]   ;;  %s9482_s14 = smov 3  }
   0x2   :  { %s9577_s9 = sld [smem:[%s11056_s0 + %s9480_s6]]   ;;  %s9483_s18 = smov 4  }
   0x3   :  { %s9582_s13 = sld [smem:[%s11056_s0 + %s9481_s10]]   ;;  %s9484_s22 = smov 5  }
   0x4   :  { %s9587_s17 = sld [smem:[%s11056_s0 + %s9482_s14]]   ;;  %s9485_s26 = smov 6  }
   0x5   :  { %s9592_s21 = sld [smem:[%s11056_s0 + %s9483_s18]]   ;;  %s9486_s30 = smov 7  }
   0x6   :  { %s9597_s25 = sld [smem:[%s11056_s0 + %s9484_s22]]   ;;  %s9487_s4 = smov 8  }
   0x7   :  { %11081 = sst [smem:[#allocation57_spill]] %s9572_s5  ;;  %s9488_s10 = smov 9  }
   0x8   :  { %11082 = sst [smem:[#allocation58_spill]] %s9577_s9  ;;  %s9489_s15 = smov 10  }
   0x9   :  { %11083 = sst [smem:[#allocation59_spill]] %s9582_s13  ;;  %s9490_s20 = smov 11  }
   0xa   :  { %11084 = sst [smem:[#allocation60_spill]] %s9587_s17  ;;  %s9492_s1 = smov 13  }
   0xb   :  { %11085 = sst [smem:[#allocation61_spill]] %s9592_s21  ;;  %s9493_s7 = smov 14  }
   0xc   :  { %s9602_s29 = sld [smem:[%s11056_s0 + %s9485_s26]]   ;;  %s9491_s26 = smov 12  }
   0xd   :  { %s9607_s3 = sld [smem:[%s11056_s0 + %s9486_s30]]   ;;  %s9495_s22 = smov 16  }
   0xe   :  { %s9612_s8 = sld [smem:[%s11056_s0 + %s9487_s4]]   ;;  %s9496_s28 = smov 17  }
   0xf   :  { %s9617_s14 = sld [smem:[%s11056_s0 + %s9488_s10]]  }
  0x10   :  { %s9622_s19 = sld [smem:[%s11056_s0 + %s9489_s15]]   ;;  %s9494_s15 = smov 15  }
  0x11   :  { %s9627_s24 = sld [smem:[%s11056_s0 + %s9490_s20]]  }
  0x12   :  { %s9632_s30 = sld [smem:[%s11056_s0 + %s9491_s26]]  }
  0x13   :  { %11086 = sst [smem:[#allocation62_spill]] %s9607_s3 }
  0x14   :  { %s9637_s6 = sld [smem:[%s11056_s0 + %s9492_s1]]  }
  0x15   :  { %11087 = sst [smem:[#allocation63_spill]] %s9617_s14 }
  0x16   :  { %s9642_s12 = sld [smem:[%s11056_s0 + %s9493_s7]]   ;;  %s9497_s7 = smov 18  }
  0x17   :  { %11088 = sst [smem:[#allocation64_spill]] %s9627_s24 }
  0x18   :  { %11089 = sst [smem:[#allocation65_spill]] %s9632_s30 }
  0x19   :  { %s9647_s20 = sld [smem:[%s11056_s0 + %s9494_s15]]   ;;  %s9498_s15 = smov 19  }
  0x1a   :  { %11090 = sst [smem:[#allocation66_spill]] %s9637_s6 }
  0x1b   :  { %s9652_s27 = sld [smem:[%s11056_s0 + %s9495_s22]]   ;;  %s9499_s22 = smov 20  }
  0x1c   :  { %s9657_s4 = sld [smem:[%s11056_s0 + %s9496_s28]]   ;;  %s9500_s28 = smov 21  }
  0x1d   :  { %s9662_s3 = sld [smem:[%s11056_s0 + %s9497_s7]]   ;;  %s9501_s7 = smov 22  }
  0x1e   :  { %s9667_s13 = sld [smem:[%s11056_s0 + %s9498_s15]]   ;;  %s9502_s15 = smov 23  }
  0x1f   :  { %11091 = sst [smem:[#allocation67_spill]] %s9647_s20 }
  0x20   :  { %s9672_s17 = sld [smem:[%s11056_s0 + %s9499_s22]]   ;;  %s9503_s22 = smov 24  }
  0x21   :  { %s9677_s9 = sld [smem:[%s11056_s0 + %s9500_s28]]   ;;  %s9504_s28 = smov 25  }
  0x22   :  { %11092 = sst [smem:[#allocation68_spill]] %s9657_s4 }
  0x23   :  { %11093 = sst [smem:[#allocation69_spill]] %s9662_s3 }
  0x24   :  { %11094 = sst [smem:[#allocation70_spill]] %s9667_s13 }
  0x25   :  { %s9682_s4 = sld [smem:[%s11056_s0 + %s9501_s7]]   ;;  %s9505_s7 = smov 26  }
  0x26   :  { %s9687_s13 = sld [smem:[%s11056_s0 + %s9502_s15]]   ;;  %s9506_s15 = smov 27  }
  0x27   :  { %11095 = sst [smem:[#allocation71_spill]] %s9677_s9 }
  0x28   :  { %s9692_s6 = sld [smem:[%s11056_s0 + %s9503_s22]]   ;;  %s9507_s22 = smov 28  }
  0x29   :  { %s9697_s9 = sld [smem:[%s11056_s0 + %s9504_s28]]   ;;  %s9508_s28 = smov 29  }
  0x2a   :  { %s9702_s21 = sld [smem:[%s11056_s0 + %s9505_s7]]   ;;  %s9509_s7 = smov 30  }
  0x2b   :  { %11096 = sst [smem:[#allocation72_spill]] %s9682_s4 }
  0x2c   :  { %11097 = sst [smem:[#allocation73_spill]] %s9687_s13 }
  0x2d   :  { %s9707_s13 = sld [smem:[%s11056_s0 + %s9506_s15]]   ;;  %s9510_s15 = smov 31  }
  0x2e   :  { %s9712_s14 = sld [smem:[%s11056_s0 + %s9507_s22]]   ;;  %s9511_s22 = smov 32  }
  0x2f   :  { %11098 = sst [smem:[#allocation74_spill]] %s9697_s9 }
  0x30   :  { %s9717_s24 = sld [smem:[%s11056_s0 + %s9508_s28]]   ;;  %s9512_s28 = smov 33  }
  0x31   :  { %s9722_s5 = sld [smem:[%s11056_s0 + %s9509_s7]]   ;;  %s9513_s7 = smov 34  }
  0x32   :  { %s9732_s9 = sld [smem:[%s11056_s0 + %s9511_s22]]   ;;  %s9515_s22 = smov 36  }
  0x33   :  { %11099 = sst [smem:[#allocation75_spill]] %s9707_s13 }
  0x34   :  { %s9727_s13 = sld [smem:[%s11056_s0 + %s9510_s15]]   ;;  %s9514_s15 = smov 35  }
  0x35   :  { %s9742_s4 = sld [smem:[%s11056_s0 + %s9513_s7]]   ;;  %s9517_s7 = smov 38  }
  0x36   :  { %11100 = sst [smem:[#allocation76_spill]] %s9717_s24 }
  0x37   :  { %s9737_s24 = sld [smem:[%s11056_s0 + %s9512_s28]]   ;;  %s9516_s28 = smov 37  }
  0x38   :  { %s9752_s3 = sld [smem:[%s11056_s0 + %s9515_s22]]   ;;  %s9519_s22 = smov 40  }
  0x39   :  { %s9762_s20 = sld [smem:[%s11056_s0 + %s9517_s7]]  }
  0x3a   :  { %11101 = sst [smem:[#allocation77_spill]] %s9727_s13 }
  0x3b   :  { %s9747_s13 = sld [smem:[%s11056_s0 + %s9514_s15]]   ;;  %s9518_s15 = smov 39  }
  0x3c   :  { %s9772_s30 = sld [smem:[%s11056_s0 + %s9519_s22]]  }
  0x3d   :  { %11102 = sst [smem:[#allocation78_spill]] %s9737_s24 }
  0x3e   :  { %s9757_s24 = sld [smem:[%s11056_s0 + %s9516_s28]]   ;;  %s9520_s28 = smov 41  }
  0x41   :  { %11103 = sst [smem:[#allocation79_spill]] %s9747_s13 }
  0x42   :  { %s9767_s13 = sld [smem:[%s11056_s0 + %s9518_s15]]  }
  0x44   :  { %11104 = sst [smem:[#allocation80_spill]] %s9757_s24 }
  0x45   :  { %s9777_s24 = sld [smem:[%s11056_s0 + %s9520_s28]]  }
  0x46   :  { %88 = vsyncpa [#allocation3], 0 }
  0x47   :  { %89 = vsyncpa [#allocation5], 0 }
  0x48   :  { %90 = vsyncpa [#allocation8], 0 }
  0x49   :  { %91 = vsyncpa [#allocation11], 0 }
  0x4a   :  { %92 = vsyncpa [#allocation14], 0 }
  0x4b   :  { %93 = vsyncpa [#allocation17], 0 }
  0x4c   :  { %94 = vsyncpa [#allocation20], 0 }
  0x4d   :  { %95 = vsyncpa [#allocation23], 0 }
  0x4e   :  { %96 = vsyncpa [#allocation26], 0 }
  0x4f   :  { %97 = vsyncpa [#allocation29], 0 }
  0x50   :  { %98 = vsyncpa [#allocation32], 0 }
  0x51   :  { %99 = vsyncpa [#allocation35], 0 }
  0x52   :  { %100 = vsyncpa [#allocation38], 0 }
  0x53   :  { %101 = vsyncpa [#allocation41], 0  ;;  %s9521_s7 = smov [#allocation4]   ;;  %s9522_s10 = smov [#allocation7]  }
  0x54   :  { %s129_s0 = sshll.u32 %s9521_s7, 4  ;;  %s155_s11 = sshll.u32 %s9522_s10, 4  ;;  %s130_s0 = int_to_ptr.vmem [resolvable:$true] %s129_s0  ;;  %s9779_s11 = int_to_ptr.vmem [resolvable:$true] %s155_s11 }
  0x55   :  { %s8858_s15 = scalar_lea.hbm %s9602_s29, 256 }
  0x56   :  { %p8859_p0 = scmp.ne.s32.totalorder %s9602_s29, %s8858_s15  ;;  %p8862_p1 = scmp.lt.u32.totalorder %s8858_s15, %s9602_s29 }
  0x58   :  { %p8864_p2 = pnand %p8862_p1, %p8859_p0 }
  0x5a   :  { %8867 = shalt.err (!%p8864_p2)
}
  0x5b   :  { %s8868_s16 = scalar_lea.vmem %s130_s0, 256  ;;  %p8873_p4 = scmp.lt.s32.totalorder %s130_s0, %s130_s0 }
  0x5c   :  { %p8869_p3 = scmp.ne.s32.totalorder %s130_s0, %s8868_s16  ;;  %p8874_p5 = scmp.lt.s32.totalorder %s8868_s16, %s8868_s16 }
  0x5e   :  { %p8875_p6 = por %p8874_p5, %p8873_p4 }
  0x60   :  { %p8876_p7 = pnand %p8875_p6, %p8869_p3 }
  0x62   :  { %8879 = shalt.err (!%p8876_p7)
}
  0x63   :  { %s9523_s18 = smov 128   ;;  %s9524_s22 = smov 8  }
  0x64   :  { %135 = dma.hbm_to_vmem [thread:$0]  %s9602_s29, 256, %s130_s0, [#allocation5], %s9523_s18, %s9523_s18, %s9524_s22  }
  0x65   :  { %s8880_s23 = scalar_lea.hbm %s9622_s19, 32 }
  0x66   :  { %p8881_p8 = scmp.ne.s32.totalorder %s9622_s19, %s8880_s23  ;;  %p8884_p9 = scmp.lt.u32.totalorder %s8880_s23, %s9622_s19 }
  0x68   :  { %p8886_p10 = pnand %p8884_p9, %p8881_p8 }
  0x6a   :  { %8889 = shalt.err (!%p8886_p10)
}
  0x6b   :  { %s8890_s26 = scalar_lea.vmem %s9779_s11, 32  ;;  %p8895_p12 = scmp.lt.s32.totalorder %s9779_s11, %s9779_s11 }
  0x6c   :  { %p8891_p11 = scmp.ne.s32.totalorder %s9779_s11, %s8890_s26  ;;  %p8896_p13 = scmp.lt.s32.totalorder %s8890_s26, %s8890_s26 }
  0x6e   :  { %p8897_p0 = por %p8896_p13, %p8895_p12 }
  0x70   :  { %p8898_p1 = pnand %p8897_p0, %p8891_p11 }
  0x72   :  { %8901 = shalt.err (!%p8898_p1)
}
  0x73   :  { %s9525_s28 = smov 16   ;;  %s9526_s29 = smov 1  }
  0x74   :  { %161 = dma.hbm_to_vmem [thread:$0]  %s9622_s19, 32, %s9779_s11, [#allocation8], %s9525_s28, %s9525_s28, %s9526_s29  }
  0x75   :  { %s9527_s1 = smov [#allocation10]   ;;  %s9528_s7 = smov [#allocation13]  }
  0x76   :  { %s183_s2 = sshll.u32 %s9527_s1, 4  ;;  %s207_s0 = sshll.u32 %s9528_s7, 4  ;;  %s184_s2 = int_to_ptr.vmem [resolvable:$true] %s183_s2  ;;  %s9800_s0 = int_to_ptr.vmem [resolvable:$true] %s207_s0 }
  0x77   :  { %s8902_s10 = scalar_lea.hbm %s9642_s12, 32 }
  0x78   :  { %p8903_p2 = scmp.ne.s32.totalorder %s9642_s12, %s8902_s10  ;;  %p8906_p3 = scmp.lt.u32.totalorder %s8902_s10, %s9642_s12 }
  0x7a   :  { %p8908_p4 = pnand %p8906_p3, %p8903_p2 }
  0x7c   :  { %8911 = shalt.err (!%p8908_p4)
}
  0x7d   :  { %s8912_s15 = scalar_lea.vmem %s184_s2, 32  ;;  %p8917_p6 = scmp.lt.s32.totalorder %s184_s2, %s184_s2 }
  0x7e   :  { %p8913_p5 = scmp.ne.s32.totalorder %s184_s2, %s8912_s15  ;;  %p8918_p7 = scmp.lt.s32.totalorder %s8912_s15, %s8912_s15 }
  0x80   :  { %p8919_p8 = por %p8918_p7, %p8917_p6 }
  0x82   :  { %p8920_p9 = pnand %p8919_p8, %p8913_p5 }
  0x84   :  { %8923 = shalt.err (!%p8920_p9)
}
  0x85   :  { %189 = dma.hbm_to_vmem [thread:$0]  %s9642_s12, 32, %s184_s2, [#allocation11], %s9525_s28, %s9525_s28, %s9526_s29  }
  0x86   :  { %s8924_s19 = scalar_lea.hbm %s9652_s27, 32 }
  0x87   :  { %p8925_p10 = scmp.ne.s32.totalorder %s9652_s27, %s8924_s19  ;;  %p8928_p11 = scmp.lt.u32.totalorder %s8924_s19, %s9652_s27 }
  0x89   :  { %p8930_p12 = pnand %p8928_p11, %p8925_p10 }
  0x8b   :  { %8933 = shalt.err (!%p8930_p12)
}
  0x8c   :  { %s8934_s11 = scalar_lea.vmem %s9800_s0, 32  ;;  %p8939_p0 = scmp.lt.s32.totalorder %s9800_s0, %s9800_s0 }
  0x8d   :  { %p8935_p13 = scmp.ne.s32.totalorder %s9800_s0, %s8934_s11  ;;  %p8940_p1 = scmp.lt.s32.totalorder %s8934_s11, %s8934_s11 }
  0x8f   :  { %p8941_p2 = por %p8940_p1, %p8939_p0 }
  0x91   :  { %p8942_p3 = pnand %p8941_p2, %p8935_p13 }
  0x93   :  { %8945 = shalt.err (!%p8942_p3)
}
  0x94   :  { %213 = dma.hbm_to_vmem [thread:$0]  %s9652_s27, 32, %s9800_s0, [#allocation14], %s9525_s28, %s9525_s28, %s9526_s29  }
  0x95   :  { %s9529_s12 = smov [#allocation16]   ;;  %s9530_s23 = smov [#allocation19]  }
  0x96   :  { %s235_s16 = sshll.u32 %s9529_s12, 4  ;;  %s263_s26 = sshll.u32 %s9530_s23, 4  ;;  %s236_s16 = int_to_ptr.vmem [resolvable:$true] %s235_s16  ;;  %s9821_s26 = int_to_ptr.vmem [resolvable:$true] %s263_s26 }
  0x97   :  { %s8946_s1 = scalar_lea.hbm %s9672_s17, 32 }
  0x98   :  { %p8947_p4 = scmp.ne.s32.totalorder %s9672_s17, %s8946_s1  ;;  %p8950_p5 = scmp.lt.u32.totalorder %s8946_s1, %s9672_s17 }
  0x9a   :  { %p8952_p6 = pnand %p8950_p5, %p8947_p4 }
  0x9c   :  { %8955 = shalt.err (!%p8952_p6)
}
  0x9d   :  { %s8956_s2 = scalar_lea.vmem %s236_s16, 32  ;;  %p8961_p8 = scmp.lt.s32.totalorder %s236_s16, %s236_s16 }
  0x9e   :  { %p8957_p7 = scmp.ne.s32.totalorder %s236_s16, %s8956_s2  ;;  %p8962_p9 = scmp.lt.s32.totalorder %s8956_s2, %s8956_s2 }
  0xa0   :  { %p8963_p10 = por %p8962_p9, %p8961_p8 }
  0xa2   :  { %p8964_p11 = pnand %p8963_p10, %p8957_p7 }
  0xa4   :  { %8967 = shalt.err (!%p8964_p11)
}
  0xa5   :  { %241 = dma.hbm_to_vmem [thread:$0]  %s9672_s17, 32, %s236_s16, [#allocation17], %s9525_s28, %s9525_s28, %s9526_s29  }
  0xa6   :  { %s8968_s27 = scalar_lea.hbm %s9692_s6, 32 }
  0xa7   :  { %p8969_p12 = scmp.ne.s32.totalorder %s9692_s6, %s8968_s27  ;;  %p8972_p13 = scmp.lt.u32.totalorder %s8968_s27, %s9692_s6 }
  0xa9   :  { %p8974_p0 = pnand %p8972_p13, %p8969_p12 }
  0xab   :  { %8977 = shalt.err (!%p8974_p0)
}
  0xac   :  { %s8978_s7 = scalar_lea.vmem %s9821_s26, 32  ;;  %p8983_p2 = scmp.lt.s32.totalorder %s9821_s26, %s9821_s26 }
  0xad   :  { %p8979_p1 = scmp.ne.s32.totalorder %s9821_s26, %s8978_s7  ;;  %p8984_p3 = scmp.lt.s32.totalorder %s8978_s7, %s8978_s7 }
  0xaf   :  { %p8985_p4 = por %p8984_p3, %p8983_p2 }
  0xb1   :  { %p8986_p5 = pnand %p8985_p4, %p8979_p1 }
  0xb3   :  { %8989 = shalt.err (!%p8986_p5)
}
  0xb4   :  { %269 = dma.hbm_to_vmem [thread:$0]  %s9692_s6, 32, %s9821_s26, [#allocation20], %s9525_s28, %s9525_s28, %s9526_s29  }
  0xb5   :  { %s9531_s17 = smov [#allocation22]   ;;  %s9532_s10 = smov [#allocation25]  }
  0xb6   :  { %s287_s0 = sshll.u32 %s9531_s17, 4  ;;  %s311_s15 = sshll.u32 %s9532_s10, 4  ;;  %s288_s0 = int_to_ptr.vmem [resolvable:$true] %s287_s0  ;;  %s9842_s15 = int_to_ptr.vmem [resolvable:$true] %s311_s15 }
  0xb7   :  { %s8990_s19 = scalar_lea.hbm %s9702_s21, 32 }
  0xb8   :  { %p8991_p6 = scmp.ne.s32.totalorder %s9702_s21, %s8990_s19  ;;  %p8994_p7 = scmp.lt.u32.totalorder %s8990_s19, %s9702_s21 }
  0xba   :  { %p8996_p8 = pnand %p8994_p7, %p8991_p6 }
  0xbc   :  { %8999 = shalt.err (!%p8996_p8)
}
  0xbd   :  { %s9000_s11 = scalar_lea.vmem %s288_s0, 32  ;;  %p9005_p10 = scmp.lt.s32.totalorder %s288_s0, %s288_s0 }
  0xbe   :  { %p9001_p9 = scmp.ne.s32.totalorder %s288_s0, %s9000_s11  ;;  %p9006_p11 = scmp.lt.s32.totalorder %s9000_s11, %s9000_s11 }
  0xc0   :  { %p9007_p12 = por %p9006_p11, %p9005_p10 }
  0xc2   :  { %p9008_p13 = pnand %p9007_p12, %p9001_p9 }
  0xc4   :  { %9011 = shalt.err (!%p9008_p13)
}
  0xc5   :  { %293 = dma.hbm_to_vmem [thread:$0]  %s9702_s21, 32, %s288_s0, [#allocation23], %s9525_s28, %s9525_s28, %s9526_s29  }
  0xc6   :  { %s9012_s6 = scalar_lea.hbm %s9712_s14, 32 }
  0xc7   :  { %p9013_p0 = scmp.ne.s32.totalorder %s9712_s14, %s9012_s6  ;;  %p9016_p1 = scmp.lt.u32.totalorder %s9012_s6, %s9712_s14 }
  0xc9   :  { %p9018_p2 = pnand %p9016_p1, %p9013_p0 }
  0xcb   :  { %9021 = shalt.err (!%p9018_p2)
}
  0xcc   :  { %s9022_s12 = scalar_lea.vmem %s9842_s15, 32  ;;  %p9027_p4 = scmp.lt.s32.totalorder %s9842_s15, %s9842_s15 }
  0xcd   :  { %p9023_p3 = scmp.ne.s32.totalorder %s9842_s15, %s9022_s12  ;;  %p9028_p5 = scmp.lt.s32.totalorder %s9022_s12, %s9022_s12 }
  0xcf   :  { %p9029_p6 = por %p9028_p5, %p9027_p4 }
  0xd1   :  { %p9030_p7 = pnand %p9029_p6, %p9023_p3 }
  0xd3   :  { %9033 = shalt.err (!%p9030_p7)
}
  0xd4   :  { %317 = dma.hbm_to_vmem [thread:$0]  %s9712_s14, 32, %s9842_s15, [#allocation26], %s9525_s28, %s9525_s28, %s9526_s29  }
  0xd5   :  { %s9533_s21 = smov [#allocation28]   ;;  %s9534_s23 = smov [#allocation31]  }
  0xd6   :  { %s335_s16 = sshll.u32 %s9533_s21, 4  ;;  %s359_s26 = sshll.u32 %s9534_s23, 4  ;;  %s336_s16 = int_to_ptr.vmem [resolvable:$true] %s335_s16  ;;  %s9863_s26 = int_to_ptr.vmem [resolvable:$true] %s359_s26 }
  0xd7   :  { %s9034_s1 = scalar_lea.hbm %s9722_s5, 32 }
  0xd8   :  { %p9035_p8 = scmp.ne.s32.totalorder %s9722_s5, %s9034_s1  ;;  %p9038_p9 = scmp.lt.u32.totalorder %s9034_s1, %s9722_s5 }
  0xda   :  { %p9040_p10 = pnand %p9038_p9, %p9035_p8 }
  0xdc   :  { %9043 = shalt.err (!%p9040_p10)
}
  0xdd   :  { %s9044_s2 = scalar_lea.vmem %s336_s16, 32  ;;  %p9049_p12 = scmp.lt.s32.totalorder %s336_s16, %s336_s16 }
  0xde   :  { %p9045_p11 = scmp.ne.s32.totalorder %s336_s16, %s9044_s2  ;;  %p9050_p13 = scmp.lt.s32.totalorder %s9044_s2, %s9044_s2 }
  0xe0   :  { %p9051_p0 = por %p9050_p13, %p9049_p12 }
  0xe2   :  { %p9052_p1 = pnand %p9051_p0, %p9045_p11 }
  0xe4   :  { %9055 = shalt.err (!%p9052_p1)
}
  0xe5   :  { %341 = dma.hbm_to_vmem [thread:$0]  %s9722_s5, 32, %s336_s16, [#allocation29], %s9525_s28, %s9525_s28, %s9526_s29  }
  0xe6   :  { %s9056_s14 = scalar_lea.hbm %s9732_s9, 32 }
  0xe7   :  { %p9057_p2 = scmp.ne.s32.totalorder %s9732_s9, %s9056_s14  ;;  %p9060_p3 = scmp.lt.u32.totalorder %s9056_s14, %s9732_s9 }
  0xe9   :  { %p9062_p4 = pnand %p9060_p3, %p9057_p2 }
  0xeb   :  { %9065 = shalt.err (!%p9062_p4)
}
  0xec   :  { %s9066_s27 = scalar_lea.vmem %s9863_s26, 32  ;;  %p9071_p6 = scmp.lt.s32.totalorder %s9863_s26, %s9863_s26 }
  0xed   :  { %p9067_p5 = scmp.ne.s32.totalorder %s9863_s26, %s9066_s27  ;;  %p9072_p7 = scmp.lt.s32.totalorder %s9066_s27, %s9066_s27 }
  0xef   :  { %p9073_p8 = por %p9072_p7, %p9071_p6 }
  0xf1   :  { %p9074_p9 = pnand %p9073_p8, %p9067_p5 }
  0xf3   :  { %9077 = shalt.err (!%p9074_p9)
}
  0xf4   :  { %365 = dma.hbm_to_vmem [thread:$0]  %s9732_s9, 32, %s9863_s26, [#allocation32], %s9525_s28, %s9525_s28, %s9526_s29  }
  0xf5   :  { %s9535_s5 = smov [#allocation34]   ;;  %s9536_s17 = smov [#allocation37]  }
  0xf6   :  { %s383_s7 = sshll.u32 %s9535_s5, 4  ;;  %s407_s0 = sshll.u32 %s9536_s17, 4  ;;  %s384_s7 = int_to_ptr.vmem [resolvable:$true] %s383_s7  ;;  %s9884_s0 = int_to_ptr.vmem [resolvable:$true] %s407_s0 }
  0xf7   :  { %s9078_s10 = scalar_lea.hbm %s9742_s4, 32 }
  0xf8   :  { %p9079_p10 = scmp.ne.s32.totalorder %s9742_s4, %s9078_s10  ;;  %p9082_p11 = scmp.lt.u32.totalorder %s9078_s10, %s9742_s4 }
  0xfa   :  { %p9084_p12 = pnand %p9082_p11, %p9079_p10 }
  0xfc   :  { %9087 = shalt.err (!%p9084_p12)
}
  0xfd   :  { %s9088_s15 = scalar_lea.vmem %s384_s7, 32  ;;  %p9093_p0 = scmp.lt.s32.totalorder %s384_s7, %s384_s7 }
  0xfe   :  { %p9089_p13 = scmp.ne.s32.totalorder %s384_s7, %s9088_s15  ;;  %p9094_p1 = scmp.lt.s32.totalorder %s9088_s15, %s9088_s15 }
 0x100   :  { %p9095_p2 = por %p9094_p1, %p9093_p0 }
 0x102   :  { %p9096_p3 = pnand %p9095_p2, %p9089_p13 }
 0x104   :  { %9099 = shalt.err (!%p9096_p3)
}
 0x105   :  { %389 = dma.hbm_to_vmem [thread:$0]  %s9742_s4, 32, %s384_s7, [#allocation35], %s9525_s28, %s9525_s28, %s9526_s29  }
 0x106   :  { %s9100_s9 = scalar_lea.hbm %s9752_s3, 32 }
 0x107   :  { %p9101_p4 = scmp.ne.s32.totalorder %s9752_s3, %s9100_s9  ;;  %p9104_p5 = scmp.lt.u32.totalorder %s9100_s9, %s9752_s3 }
 0x109   :  { %p9106_p6 = pnand %p9104_p5, %p9101_p4 }
 0x10b   :  { %9109 = shalt.err (!%p9106_p6)
}
 0x10c   :  { %s9110_s19 = scalar_lea.vmem %s9884_s0, 32  ;;  %p9115_p8 = scmp.lt.s32.totalorder %s9884_s0, %s9884_s0 }
 0x10d   :  { %p9111_p7 = scmp.ne.s32.totalorder %s9884_s0, %s9110_s19  ;;  %p9116_p9 = scmp.lt.s32.totalorder %s9110_s19, %s9110_s19 }
 0x10f   :  { %p9117_p10 = por %p9116_p9, %p9115_p8 }
 0x111   :  { %p9118_p11 = pnand %p9117_p10, %p9111_p7 }
 0x113   :  { %9121 = shalt.err (!%p9118_p11)
}
 0x114   :  { %413 = dma.hbm_to_vmem [thread:$0]  %s9752_s3, 32, %s9884_s0, [#allocation38], %s9525_s28, %s9525_s28, %s9526_s29  }
 0x115   :  { %s9537_s4 = smov [#allocation40]   ;;  %s9538_s6 = smov [#allocation2]  }
 0x116   :  { %s433_s11 = sshll.u32 %s9537_s4, 4  ;;  %s117_s12 = sshll.u32 %s9538_s6, 4  ;;  %s434_s11 = int_to_ptr.vmem [resolvable:$true] %s433_s11  ;;  %s9905_s12 = int_to_ptr.vmem [resolvable:$true] %s117_s12 }
 0x117   :  { %s9122_s21 = scalar_lea.hbm %s9767_s13, 32 }
 0x118   :  { %p9123_p12 = scmp.ne.s32.totalorder %s9767_s13, %s9122_s21  ;;  %p9126_p13 = scmp.lt.u32.totalorder %s9122_s21, %s9767_s13 }
 0x11a   :  { %p9128_p0 = pnand %p9126_p13, %p9123_p12 }
 0x11c   :  { %9131 = shalt.err (!%p9128_p0)
}
 0x11d   :  { %s9132_s16 = scalar_lea.vmem %s434_s11, 32  ;;  %p9137_p2 = scmp.lt.s32.totalorder %s434_s11, %s434_s11 }
 0x11e   :  { %p9133_p1 = scmp.ne.s32.totalorder %s434_s11, %s9132_s16  ;;  %p9138_p3 = scmp.lt.s32.totalorder %s9132_s16, %s9132_s16 }
 0x120   :  { %p9139_p4 = por %p9138_p3, %p9137_p2 }
 0x122   :  { %p9140_p5 = pnand %p9139_p4, %p9133_p1 }
 0x124   :  { %9143 = shalt.err (!%p9140_p5)
}
 0x125   :  { %439 = dma.hbm_to_vmem [thread:$0]  %s9767_s13, 32, %s434_s11, [#allocation41], %s9525_s28, %s9525_s28, %s9526_s29  }
 0x126   :  { %s9144_s3 = scalar_lea.hbm %s9597_s25, 256 }
 0x127   :  { %p9145_p6 = scmp.ne.s32.totalorder %s9597_s25, %s9144_s3  ;;  %p9148_p7 = scmp.lt.u32.totalorder %s9144_s3, %s9597_s25 }
 0x129   :  { %p9150_p8 = pnand %p9148_p7, %p9145_p6 }
 0x12b   :  { %9153 = shalt.err (!%p9150_p8)
}
 0x12c   :  { %s9154_s23 = scalar_lea.vmem %s9905_s12, 256  ;;  %p9159_p10 = scmp.lt.s32.totalorder %s9905_s12, %s9905_s12 }
 0x12d   :  { %p9155_p9 = scmp.ne.s32.totalorder %s9905_s12, %s9154_s23  ;;  %p9160_p11 = scmp.lt.s32.totalorder %s9154_s23, %s9154_s23 }
 0x12f   :  { %p9161_p12 = por %p9160_p11, %p9159_p10 }
 0x131   :  { %p9162_p13 = pnand %p9161_p12, %p9155_p9 }
 0x133   :  { %9165 = shalt.err (!%p9162_p13)
}
 0x134   :  { %123 = dma.hbm_to_vmem [thread:$0]  %s9597_s25, 256, %s9905_s12, [#allocation3], %s9523_s18, %s9523_s18, %s9524_s22  }
 0x135   :  { %s9539_s13 = smov [#allocation6]   ;;  %s9540_s1 = smov [#allocation9]  }
 0x136   :  { %s144_s26 = sshll.u32 %s9539_s13, 4  ;;  %s169_s2 = sshll.u32 %s9540_s1, 4  ;;  %s145_s26 = int_to_ptr.vmem [resolvable:$true] %s144_s26  ;;  %s9926_s2 = int_to_ptr.vmem [resolvable:$true] %s169_s2 }
 0x137   :  { %s9166_s14 = scalar_lea.hbm %s9612_s8, 16 }
 0x138   :  { %p9167_p0 = scmp.ne.s32.totalorder %s9612_s8, %s9166_s14  ;;  %p9170_p1 = scmp.lt.u32.totalorder %s9166_s14, %s9612_s8 }
 0x13a   :  { %p9172_p2 = pnand %p9170_p1, %p9167_p0 }
 0x13c   :  { %9175 = shalt.err (!%p9172_p2)
}
 0x13d   :  { %s9176_s27 = scalar_lea.vmem %s145_s26, 16  ;;  %s9180_s5 = scalar_lea.vmem %s145_s26, 32 }
 0x13e   :  { %p9177_p3 = scmp.ne.s32.totalorder %s145_s26, %s9176_s27  ;;  %p9181_p4 = scmp.lt.s32.totalorder %s145_s26, %s145_s26 }
 0x13f   :  { %p9182_p5 = scmp.lt.s32.totalorder %s9180_s5, %s9176_s27 }
 0x141   :  { %p9183_p6 = por %p9182_p5, %p9181_p4 }
 0x143   :  { %p9184_p7 = pnand %p9183_p6, %p9177_p3 }
 0x145   :  { %9187 = shalt.err (!%p9184_p7)
}
 0x146   :  { %s11105_s25 = sld [smem:[#allocation65_spill]] }
 0x147   :  { %147 = dma.hbm_to_vmem [thread:$0]  %s9612_s8, 16, %s145_s26, [#allocation5]  }
 0x14c   :  { %s9188_s18 = scalar_lea.hbm %s11105_s25, 64 }
 0x14d   :  { %p9189_p8 = scmp.ne.s32.totalorder %s11105_s25, %s9188_s18  ;;  %p9192_p9 = scmp.lt.u32.totalorder %s9188_s18, %s11105_s25 }
 0x14f   :  { %p9194_p10 = pnand %p9192_p9, %p9189_p8 }
 0x151   :  { %9197 = shalt.err (!%p9194_p10)
}
 0x152   :  { %s9198_s22 = scalar_lea.vmem %s9926_s2, 64  ;;  %p9203_p12 = scmp.lt.s32.totalorder %s9926_s2, %s9926_s2 }
 0x153   :  { %p9199_p11 = scmp.ne.s32.totalorder %s9926_s2, %s9198_s22  ;;  %p9204_p13 = scmp.lt.s32.totalorder %s9198_s22, %s9198_s22 }
 0x155   :  { %p9205_p0 = por %p9204_p13, %p9203_p12 }
 0x157   :  { %p9206_p1 = pnand %p9205_p0, %p9199_p11 }
 0x159   :  { %9209 = shalt.err (!%p9206_p1)
}
 0x15a   :  { %s9541_s7 = smov 32   ;;  %s11106_s8 = sld [smem:[#allocation67_spill]] }
 0x15b   :  { %s9542_s17 = smov 2   ;;  %s9543_s0 = smov [#allocation12]  }
 0x15c   :  { %175 = dma.hbm_to_vmem [thread:$0]  %s11105_s25, 64, %s9926_s2, [#allocation8], %s9541_s7, %s9541_s7, %s9542_s17  }
 0x15d   :  { %s195_s10 = sshll.u32 %s9543_s0, 4  ;;  %s9544_s15 = smov [#allocation15]   ;;  %s196_s10 = int_to_ptr.vmem [resolvable:$true] %s195_s10 }
 0x15e   :  { %s221_s9 = sshll.u32 %s9544_s15, 4  ;;  %s9944_s9 = int_to_ptr.vmem [resolvable:$true] %s221_s9 }
 0x160   :  { %s9210_s19 = scalar_lea.hbm %s11106_s8, 32 }
 0x161   :  { %p9211_p2 = scmp.ne.s32.totalorder %s11106_s8, %s9210_s19  ;;  %p9214_p3 = scmp.lt.u32.totalorder %s9210_s19, %s11106_s8 }
 0x163   :  { %p9216_p4 = pnand %p9214_p3, %p9211_p2 }
 0x165   :  { %9219 = shalt.err (!%p9216_p4)
}
 0x166   :  { %s9220_s4 = scalar_lea.vmem %s196_s10, 32  ;;  %p9225_p6 = scmp.lt.s32.totalorder %s196_s10, %s196_s10 }
 0x167   :  { %p9221_p5 = scmp.ne.s32.totalorder %s196_s10, %s9220_s4  ;;  %p9226_p7 = scmp.lt.s32.totalorder %s9220_s4, %s9220_s4 }
 0x169   :  { %p9227_p8 = por %p9226_p7, %p9225_p6 }
 0x16b   :  { %p9228_p9 = pnand %p9227_p8, %p9221_p5 }
 0x16d   :  { %9231 = shalt.err (!%p9228_p9)
}
 0x16e   :  { %s11107_s11 = sld [smem:[#allocation69_spill]] }
 0x16f   :  { %201 = dma.hbm_to_vmem [thread:$0]  %s11106_s8, 32, %s196_s10, [#allocation11], %s9525_s28, %s9525_s28, %s9526_s29  }
 0x174   :  { %s9232_s6 = scalar_lea.hbm %s11107_s11, 32 }
 0x175   :  { %p9233_p10 = scmp.ne.s32.totalorder %s11107_s11, %s9232_s6  ;;  %p9236_p11 = scmp.lt.u32.totalorder %s9232_s6, %s11107_s11 }
 0x177   :  { %p9238_p12 = pnand %p9236_p11, %p9233_p10 }
 0x179   :  { %9241 = shalt.err (!%p9238_p12)
}
 0x17a   :  { %s9242_s12 = scalar_lea.vmem %s9944_s9, 32  ;;  %p9247_p0 = scmp.lt.s32.totalorder %s9944_s9, %s9944_s9 }
 0x17b   :  { %p9243_p13 = scmp.ne.s32.totalorder %s9944_s9, %s9242_s12  ;;  %p9248_p1 = scmp.lt.s32.totalorder %s9242_s12, %s9242_s12 }
 0x17d   :  { %p9249_p2 = por %p9248_p1, %p9247_p0 }
 0x17f   :  { %p9250_p3 = pnand %p9249_p2, %p9243_p13 }
 0x181   :  { %9253 = shalt.err (!%p9250_p3)
}
 0x182   :  { %s11108_s21 = sld [smem:[#allocation72_spill]]  ;;  %s9545_s16 = smov [#allocation18]  }
 0x183   :  { %227 = dma.hbm_to_vmem [thread:$0]  %s11107_s11, 32, %s9944_s9, [#allocation14], %s9525_s28, %s9525_s28, %s9526_s29  }
 0x184   :  { %s249_s3 = sshll.u32 %s9545_s16, 4  ;;  %s9546_s23 = smov [#allocation21]   ;;  %s250_s3 = int_to_ptr.vmem [resolvable:$true] %s249_s3 }
 0x185   :  { %s275_s13 = sshll.u32 %s9546_s23, 4  ;;  %s9965_s13 = int_to_ptr.vmem [resolvable:$true] %s275_s13 }
 0x188   :  { %s9254_s26 = scalar_lea.hbm %s11108_s21, 64 }
 0x189   :  { %p9255_p4 = scmp.ne.s32.totalorder %s11108_s21, %s9254_s26  ;;  %p9258_p5 = scmp.lt.u32.totalorder %s9254_s26, %s11108_s21 }
 0x18b   :  { %p9260_p6 = pnand %p9258_p5, %p9255_p4 }
 0x18d   :  { %9263 = shalt.err (!%p9260_p6)
}
 0x18e   :  { %s9264_s1 = scalar_lea.vmem %s250_s3, 64  ;;  %p9269_p8 = scmp.lt.s32.totalorder %s250_s3, %s250_s3 }
 0x18f   :  { %p9265_p7 = scmp.ne.s32.totalorder %s250_s3, %s9264_s1  ;;  %p9270_p9 = scmp.lt.s32.totalorder %s9264_s1, %s9264_s1 }
 0x191   :  { %p9271_p10 = por %p9270_p9, %p9269_p8 }
 0x193   :  { %p9272_p11 = pnand %p9271_p10, %p9265_p7 }
 0x195   :  { %9275 = shalt.err (!%p9272_p11)
}
 0x196   :  { %s11109_s2 = sld [smem:[#allocation74_spill]] }
 0x197   :  { %255 = dma.hbm_to_vmem [thread:$0]  %s11108_s21, 64, %s250_s3, [#allocation17], %s9541_s7, %s9541_s7, %s9542_s17  }
 0x19c   :  { %s9276_s14 = scalar_lea.hbm %s11109_s2, 32 }
 0x19d   :  { %p9277_p12 = scmp.ne.s32.totalorder %s11109_s2, %s9276_s14  ;;  %p9280_p13 = scmp.lt.u32.totalorder %s9276_s14, %s11109_s2 }
 0x19f   :  { %p9282_p0 = pnand %p9280_p13, %p9277_p12 }
 0x1a1   :  { %9285 = shalt.err (!%p9282_p0)
}
 0x1a2   :  { %s9286_s27 = scalar_lea.vmem %s9965_s13, 32  ;;  %p9291_p2 = scmp.lt.s32.totalorder %s9965_s13, %s9965_s13 }
 0x1a3   :  { %p9287_p1 = scmp.ne.s32.totalorder %s9965_s13, %s9286_s27  ;;  %p9292_p3 = scmp.lt.s32.totalorder %s9286_s27, %s9286_s27 }
 0x1a5   :  { %p9293_p4 = por %p9292_p3, %p9291_p2 }
 0x1a7   :  { %p9294_p5 = pnand %p9293_p4, %p9287_p1 }
 0x1a9   :  { %9297 = shalt.err (!%p9294_p5)
}
 0x1aa   :  { %s11110_s5 = sld [smem:[#allocation75_spill]]  ;;  %s9547_s25 = smov [#allocation24]  }
 0x1ab   :  { %281 = dma.hbm_to_vmem [thread:$0]  %s11109_s2, 32, %s9965_s13, [#allocation20], %s9525_s28, %s9525_s28, %s9526_s29  }
 0x1ac   :  { %s299_s18 = sshll.u32 %s9547_s25, 4  ;;  %s300_s18 = int_to_ptr.vmem [resolvable:$true] %s299_s18 }
 0x1b0   :  { %s9298_s22 = scalar_lea.hbm %s11110_s5, 1024 }
 0x1b1   :  { %p9299_p6 = scmp.ne.s32.totalorder %s11110_s5, %s9298_s22  ;;  %p9302_p7 = scmp.lt.u32.totalorder %s9298_s22, %s11110_s5 }
 0x1b3   :  { %p9304_p8 = pnand %p9302_p7, %p9299_p6 }
 0x1b5   :  { %9307 = shalt.err (!%p9304_p8)
}
 0x1b6   :  { %s9308_s8 = scalar_lea.vmem %s300_s18, 1024  ;;  %p9313_p10 = scmp.lt.s32.totalorder %s300_s18, %s300_s18 }
 0x1b7   :  { %p9309_p9 = scmp.ne.s32.totalorder %s300_s18, %s9308_s8  ;;  %p9314_p11 = scmp.lt.s32.totalorder %s9308_s8, %s9308_s8 }
 0x1b9   :  { %p9315_p12 = por %p9314_p11, %p9313_p10 }
 0x1bb   :  { %p9316_p13 = pnand %p9315_p12, %p9309_p9 }
 0x1bd   :  { %9319 = shalt.err (!%p9316_p13)
}
 0x1be   :  { %s9548_s17 = smov 64   ;;  %s11111_s0 = sld [smem:[#allocation76_spill]] }
 0x1bf   :  { %s9549_s10 = smov 4   ;;  %s9550_s15 = smov [#allocation27]  }
 0x1c0   :  { %305 = dma.hbm_to_vmem [thread:$0]  %s11110_s5, 1024, %s300_s18, [#allocation23], %s9548_s17, %s9548_s17, %s9549_s10  }
 0x1c1   :  { %s323_s9 = sshll.u32 %s9550_s15, 4  ;;  %s9551_s19 = smov [#allocation30]   ;;  %s324_s9 = int_to_ptr.vmem [resolvable:$true] %s323_s9 }
 0x1c2   :  { %s347_s4 = sshll.u32 %s9551_s19, 4  ;;  %s348_s4 = int_to_ptr.vmem [resolvable:$true] %s347_s4 }
 0x1c4   :  { %s9320_s11 = scalar_lea.hbm %s11111_s0, 1024 }
 0x1c5   :  { %p9321_p0 = scmp.ne.s32.totalorder %s11111_s0, %s9320_s11  ;;  %p9324_p1 = scmp.lt.u32.totalorder %s9320_s11, %s11111_s0 }
 0x1c7   :  { %p9326_p2 = pnand %p9324_p1, %p9321_p0 }
 0x1c9   :  { %9329 = shalt.err (!%p9326_p2)
}
 0x1ca   :  { %s9330_s6 = scalar_lea.vmem %s324_s9, 1024  ;;  %p9335_p4 = scmp.lt.s32.totalorder %s324_s9, %s324_s9 }
 0x1cb   :  { %p9331_p3 = scmp.ne.s32.totalorder %s324_s9, %s9330_s6  ;;  %p9336_p5 = scmp.lt.s32.totalorder %s9330_s6, %s9330_s6 }
 0x1cd   :  { %p9337_p6 = por %p9336_p5, %p9335_p4 }
 0x1cf   :  { %p9338_p7 = pnand %p9337_p6, %p9331_p3 }
 0x1d1   :  { %9341 = shalt.err (!%p9338_p7)
}
 0x1d2   :  { %s11112_s12 = sld [smem:[#allocation77_spill]] }
 0x1d3   :  { %329 = dma.hbm_to_vmem [thread:$0]  %s11111_s0, 1024, %s324_s9, [#allocation26], %s9548_s17, %s9548_s17, %s9549_s10  }
 0x1d8   :  { %s9342_s21 = scalar_lea.hbm %s11112_s12, 1024 }
 0x1d9   :  { %p9343_p8 = scmp.ne.s32.totalorder %s11112_s12, %s9342_s21  ;;  %p9346_p9 = scmp.lt.u32.totalorder %s9342_s21, %s11112_s12 }
 0x1db   :  { %p9348_p10 = pnand %p9346_p9, %p9343_p8 }
 0x1dd   :  { %9351 = shalt.err (!%p9348_p10)
}
 0x1de   :  { %s9352_s16 = scalar_lea.vmem %s348_s4, 1024  ;;  %p9357_p12 = scmp.lt.s32.totalorder %s348_s4, %s348_s4 }
 0x1df   :  { %p9353_p11 = scmp.ne.s32.totalorder %s348_s4, %s9352_s16  ;;  %p9358_p13 = scmp.lt.s32.totalorder %s9352_s16, %s9352_s16 }
 0x1e1   :  { %p9359_p0 = por %p9358_p13, %p9357_p12 }
 0x1e3   :  { %p9360_p1 = pnand %p9359_p0, %p9353_p11 }
 0x1e5   :  { %9363 = shalt.err (!%p9360_p1)
}
 0x1e6   :  { %s11113_s3 = sld [smem:[#allocation78_spill]]  ;;  %s9552_s23 = smov [#allocation33]  }
 0x1e7   :  { %353 = dma.hbm_to_vmem [thread:$0]  %s11112_s12, 1024, %s348_s4, [#allocation29], %s9548_s17, %s9548_s17, %s9549_s10  }
 0x1e8   :  { %s371_s13 = sshll.u32 %s9552_s23, 4  ;;  %s9553_s26 = smov [#allocation36]   ;;  %s372_s13 = int_to_ptr.vmem [resolvable:$true] %s371_s13 }
 0x1e9   :  { %s395_s1 = sshll.u32 %s9553_s26, 4  ;;  %s396_s1 = int_to_ptr.vmem [resolvable:$true] %s395_s1 }
 0x1ec   :  { %s9364_s2 = scalar_lea.hbm %s11113_s3, 32 }
 0x1ed   :  { %p9365_p2 = scmp.ne.s32.totalorder %s11113_s3, %s9364_s2  ;;  %p9368_p3 = scmp.lt.u32.totalorder %s9364_s2, %s11113_s3 }
 0x1ef   :  { %p9370_p4 = pnand %p9368_p3, %p9365_p2 }
 0x1f1   :  { %9373 = shalt.err (!%p9370_p4)
}
 0x1f2   :  { %s9374_s14 = scalar_lea.vmem %s372_s13, 32  ;;  %p9379_p6 = scmp.lt.s32.totalorder %s372_s13, %s372_s13 }
 0x1f3   :  { %p9375_p5 = scmp.ne.s32.totalorder %s372_s13, %s9374_s14  ;;  %p9380_p7 = scmp.lt.s32.totalorder %s9374_s14, %s9374_s14 }
 0x1f5   :  { %p9381_p8 = por %p9380_p7, %p9379_p6 }
 0x1f7   :  { %p9382_p9 = pnand %p9381_p8, %p9375_p5 }
 0x1f9   :  { %9385 = shalt.err (!%p9382_p9)
}
 0x1fa   :  { %s11114_s27 = sld [smem:[#allocation79_spill]] }
 0x1fb   :  { %377 = dma.hbm_to_vmem [thread:$0]  %s11113_s3, 32, %s372_s13, [#allocation32], %s9525_s28, %s9525_s28, %s9526_s29  }
 0x200   :  { %s9386_s5 = scalar_lea.hbm %s11114_s27, 1024 }
 0x201   :  { %p9387_p10 = scmp.ne.s32.totalorder %s11114_s27, %s9386_s5  ;;  %p9390_p11 = scmp.lt.u32.totalorder %s9386_s5, %s11114_s27 }
 0x203   :  { %p9392_p12 = pnand %p9390_p11, %p9387_p10 }
 0x205   :  { %9395 = shalt.err (!%p9392_p12)
}
 0x206   :  { %s9396_s25 = scalar_lea.vmem %s396_s1, 1024  ;;  %p9401_p0 = scmp.lt.s32.totalorder %s396_s1, %s396_s1 }
 0x207   :  { %p9397_p13 = scmp.ne.s32.totalorder %s396_s1, %s9396_s25  ;;  %p9402_p1 = scmp.lt.s32.totalorder %s9396_s25, %s9396_s25 }
 0x209   :  { %p9403_p2 = por %p9402_p1, %p9401_p0 }
 0x20b   :  { %p9404_p3 = pnand %p9403_p2, %p9397_p13 }
 0x20d   :  { %9407 = shalt.err (!%p9404_p3)
}
 0x20e   :  { %401 = dma.hbm_to_vmem [thread:$0]  %s11114_s27, 1024, %s396_s1, [#allocation35], %s9548_s17, %s9548_s17, %s9549_s10  }
 0x20f   :  { %s9554_s18 = smov [#allocation39]   ;;  %s9555_s8 = smov [#allocation42]  }
 0x210   :  { %s421_s22 = sshll.u32 %s9554_s18, 4  ;;  %s445_s0 = sshll.u32 %s9555_s8, 4  ;;  %s422_s22 = int_to_ptr.vmem [resolvable:$true] %s421_s22  ;;  %s446_s0 = int_to_ptr.vmem [resolvable:$true] %s445_s0 }
 0x211   :  { %s9408_s15 = scalar_lea.hbm %s9762_s20, 32 }
 0x212   :  { %p9409_p4 = scmp.ne.s32.totalorder %s9762_s20, %s9408_s15  ;;  %p9412_p5 = scmp.lt.u32.totalorder %s9408_s15, %s9762_s20 }
 0x214   :  { %p9414_p6 = pnand %p9412_p5, %p9409_p4 }
 0x216   :  { %9417 = shalt.err (!%p9414_p6)
}
 0x217   :  { %s9418_s9 = scalar_lea.vmem %s422_s22, 32  ;;  %p9423_p8 = scmp.lt.s32.totalorder %s422_s22, %s422_s22 }
 0x218   :  { %p9419_p7 = scmp.ne.s32.totalorder %s422_s22, %s9418_s9  ;;  %p9424_p9 = scmp.lt.s32.totalorder %s9418_s9, %s9418_s9 }
 0x21a   :  { %p9425_p10 = por %p9424_p9, %p9423_p8 }
 0x21c   :  { %p9426_p11 = pnand %p9425_p10, %p9419_p7 }
 0x21e   :  { %9429 = shalt.err (!%p9426_p11)
}
 0x21f   :  { %427 = dma.hbm_to_vmem [thread:$0]  %s9762_s20, 32, %s422_s22, [#allocation38], %s9525_s28, %s9525_s28, %s9526_s29  }
 0x220   :  { %s9430_s10 = scalar_lea.hbm %s9772_s30, 32 }
 0x221   :  { %p9431_p12 = scmp.ne.s32.totalorder %s9772_s30, %s9430_s10  ;;  %p9434_p13 = scmp.lt.u32.totalorder %s9430_s10, %s9772_s30 }
 0x223   :  { %p9436_p0 = pnand %p9434_p13, %p9431_p12 }
 0x225   :  { %9439 = shalt.err (!%p9436_p0)
}
 0x226   :  { %s9440_s19 = scalar_lea.vmem %s446_s0, 32  ;;  %p9445_p2 = scmp.lt.s32.totalorder %s446_s0, %s446_s0 }
 0x227   :  { %p9441_p1 = scmp.ne.s32.totalorder %s446_s0, %s9440_s19  ;;  %p9446_p3 = scmp.lt.s32.totalorder %s9440_s19, %s9440_s19 }
 0x229   :  { %p9447_p4 = por %p9446_p3, %p9445_p2 }
 0x22b   :  { %p9448_p5 = pnand %p9447_p4, %p9441_p1 }
 0x22d   :  { %9451 = shalt.err (!%p9448_p5)
}
 0x22e   :  { %451 = dma.hbm_to_vmem [thread:$0]  %s9772_s30, 32, %s446_s0, [#allocation41], %s9525_s28, %s9525_s28, %s9526_s29  }
 0x22f   :  { %9452 = dma.done.wait [#allocation3], 256  }
 0x230   :  { %9453 = vsyncadd [#allocation3], 4294967040 }
 0x231   :  { %9454 = dma.done.wait [#allocation5], 272  }
 0x232   :  { %9455 = vsyncadd [#allocation5], 4294967024 }
 0x233   :  { %9456 = dma.done.wait [#allocation8], 96  }
 0x234   :  { %9457 = vsyncadd [#allocation8], 4294967200 }
 0x235   :  { %9458 = dma.done.wait [#allocation11], 64  }
 0x236   :  { %9459 = vsyncadd [#allocation11], 4294967232 }
 0x237   :  { %9460 = dma.done.wait [#allocation14], 64  }
 0x238   :  { %9461 = vsyncadd [#allocation14], 4294967232 }
 0x239   :  { %9462 = dma.done.wait [#allocation17], 96  }
 0x23a   :  { %9463 = vsyncadd [#allocation17], 4294967200 }
 0x23b   :  { %9464 = dma.done.wait [#allocation20], 64  }
 0x23c   :  { %9465 = vsyncadd [#allocation20], 4294967232 }
 0x23d   :  { %9466 = dma.done.wait [#allocation23], 1056  }
 0x23e   :  { %9467 = vsyncadd [#allocation23], 4294966240 }
 0x23f   :  { %9468 = dma.done.wait [#allocation26], 1056  }
 0x240   :  { %9469 = vsyncadd [#allocation26], 4294966240 }
 0x241   :  { %9470 = dma.done.wait [#allocation29], 1056  }
 0x242   :  { %9471 = vsyncadd [#allocation29], 4294966240 }
 0x243   :  { %9472 = dma.done.wait [#allocation32], 64  }
 0x244   :  { %9473 = vsyncadd [#allocation32], 4294967232 }
 0x245   :  { %9474 = dma.done.wait [#allocation35], 1056  }
 0x246   :  { %9475 = vsyncadd [#allocation35], 4294966240 }
 0x247   :  { %9476 = dma.done.wait [#allocation38], 64  }
 0x248   :  { %9477 = vsyncadd [#allocation38], 4294967232 }
 0x249   :  { %9478 = dma.done.wait [#allocation41], 64  }
 0x24a   :  { %9479 = vsyncadd [#allocation41], 4294967232  ;;  %s11115_s30 = sld [smem:[#allocation57_spill]]  ;;  %vm590_vm0 = vcmask 523264   ;;  %s11116_s20 = sld [smem:[#allocation64_spill]]  ;;  %v9556_v18 = vmov 0   ;;  %v636_v40 = vlaneseq }
 0x24b   :  { %721 = vmatprep.mubr.bf16.mxu0 %v9556_v18  ;;  %8468 = vset.pattern.permute.xlu1 %v9556_v18  ;;  %s11117_s29 = sld [smem:[#allocation63_spill]]  ;;  %v7132_v35 = vld [vmem:[#allocation7] ss:$0 sm:$0xff]  ;;  %v9557_v42 = vmov 0.0   ;;  %v552_v44 = vld [vmem:[#allocation9] sm:$0x3] }
 0x24c   :  { %8469 = vset.pattern.permute.xlu0 %v9556_v18  ;;  %v637_v41 = vshrl.u32 %v636_v40, 7  ;;  %7697 = vmatprep.subr.bf16.mxu1 %v9557_v42  ;;  %vm9558_vm1 = vmmov 0   ;;  %s9559_s4 = smov 48   ;;  %s9560_s11 = smov 112   ;;  %vm736_vm2 = vcmask 130048  }
 0x24d   :  { %7699 = vmatprep.mubr.msk.bf16.mxu1 %vm9558_vm1, %v9557_v42  ;;  %s11118_s6 = sld [smem:[#allocation61_spill]]  ;;  %s9561_s12 = smov 96  }
 0x24e   :  { %v10057_v43 = vsub.s32 0, %v637_v41  ;;  %v10059_v45 = vsub.s32 1, %v637_v41  ;;  %s11119_s21 = sld [smem:[#allocation66_spill]]  ;;  %s9562_s16 = smov 80  }
 0x24f   :  { %s11120_s3 = sld [smem:[#allocation68_spill]]  ;;  %s11121_s23 = sld [smem:[#allocation70_spill]] }
 0x250   :  { %v540_v0 = vld [vmem:[%s11115_s30] sm:$0xff]  ;;  %v541_v1 = vld [vmem:[%s11115_s30 + $0x8] sm:$0xff]  ;;  %v8473_v16 = vld [vmem:[%s11116_s20 + $0x14] ss:$8 sps:$4 sm:$0xff]   ;;  %v639_v46 = vrot.slane %v552_v44, %v10057_v43  ;;  %v643_v48 = vrot.slane %v552_v44, %v10059_v45  ;;  %s11122_s13 = sld [smem:[#allocation58_spill]]  ;;  %s11123_s26 = sld [smem:[#allocation60_spill]] }
 0x251   :  { %v591_v2 = vsel %vm590_vm0, %v540_v0, 0.0  ;;  %v594_v3 = vsel %vm590_vm0, %v541_v1, 0.0  ;;  %v8470_v14 = vld [vmem:[%s11116_s20 + $0x4] ss:$8 sps:$4 sm:$0xff]   ;;  %v8472_v15 = vld [vmem:[%s11116_s20] ss:$8 sps:$4 sm:$0xff]  }
 0x252   :  { %592 = vadd.xlane.f32.xlu0 %v591_v2  ;;  %689 = vmatprep.subr.bf16.mxu0 %v8470_v14  ;;  %v8475_v17 = vld [vmem:[%s11116_s20 + $0x10] ss:$8 sps:$4 sm:$0xff]   ;;  %v8476_v19 = vld [vmem:[%s11116_s20 + $0x24] ss:$8 sps:$4 sm:$0xff]   ;;  %v8478_v20 = vld [vmem:[%s11116_s20 + $0x20] ss:$8 sps:$4 sm:$0xff]  }
 0x253   :  { %690 = vmatpush1.bf16.msra.mxu0 %v8472_v15  ;;  %v8479_v21 = vld [vmem:[%s11116_s20 + $0x34] ss:$8 sps:$4 sm:$0xff]   ;;  %v8481_v22 = vld [vmem:[%s11116_s20 + $0x30] ss:$8 sps:$4 sm:$0xff]   ;;  %v7131_v31 = vld [vmem:[%s11117_s29] ss:$0 sm:$0xff] }
 0x254   :  { %691 = vmatprep.subr.bf16.mxu0 %v8473_v16  ;;  %v10091_v63 = vld [vmem:[%s11118_s6] sm:$0xff]  ;;  %v10094_v2 = vld [vmem:[%s11118_s6 + $0x8] sm:$0xff]  ;;  %s11124_s1 = sld [smem:[#allocation71_spill]]  ;;  %s11125_s2 = sld [smem:[#allocation59_spill]] }
 0x255   :  { %s11126_s14 = sld [smem:[#allocation73_spill]]  ;;  %s11127_s27 = sld [smem:[#allocation80_spill]] }
 0x256   :  { %595 = vadd.xlane.f32.xlu0 %v594_v3 }
 0x257   :  { %692 = vmatpush1.bf16.msra.mxu0 %v8475_v17 }
 0x258   :  { %693 = vmatprep.subr.bf16.mxu0 %v8476_v19 }
 0x25b   :  { %694 = vmatpush1.bf16.msra.mxu0 %v8478_v20 }
 0x25c   :  { %695 = vmatprep.subr.bf16.mxu0 %v8479_v21 }
 0x25f   :  { %696 = vmatpush1.bf16.msra.mxu0 %v8481_v22 }
 0x260   :  { %7709 = vmatprep.subr.bf16.mxu0 %v9557_v42 }
 0x2df   :  { %v593_v4 = vpop.xlane.xlu0 %592 }
 0x2e0   :  { %v598_v5 = vmul.f32 0.015625, %v593_v4 }
 0x2e2   :  { %v600_v6 = vsub.f32 %v540_v0, %v598_v5 }
 0x2e3   :  { %v596_v7 = vpop.xlane.xlu0 %595 }
 0x2e4   :  { %v599_v8 = vmul.f32 0.015625, %v596_v7  ;;  %v602_v9 = vmul.f32 %v600_v6, %v600_v6 }
 0x2e6   :  { %v601_v10 = vsub.f32 %v541_v1, %v599_v8  ;;  %v604_v11 = vsel %vm590_vm0, %v602_v9, 0.0 }
 0x2e7   :  { %605 = vadd.xlane.f32.xlu1 %v604_v11 }
 0x2e8   :  { %v603_v12 = vmul.f32 %v601_v10, %v601_v10 }
 0x2ea   :  { %v607_v13 = vsel %vm590_vm0, %v603_v12, 0.0 }
 0x2eb   :  { %608 = vadd.xlane.f32.xlu1 %v607_v13 }
 0x374   :  { %v606_v23 = vpop.xlane.xlu1 %605 }
 0x375   :  { %v610_v24 = vmul.f32 0.015625, %v606_v23 }
 0x377   :  { %v612_v25 = vadd.f32 1e-12, %v610_v24 }
 0x378   :  { %v609_v26 = vpop.xlane.xlu1 %608 }
 0x379   :  { %8610 = vrsqrt.f32 %v612_v25  ;;  %v611_v27 = vmul.f32 0.015625, %v609_v26 }
 0x37b   :  { %v613_v28 = vadd.f32 1e-12, %v611_v27 }
 0x37d   :  { %8612 = vrsqrt.f32 %v613_v28 }
 0x383   :  { %v8611_v29 = vpop.eup %8610 }
 0x384   :  { %v616_v30 = vmul.f32 %v8611_v29, %v600_v6 }
 0x386   :  { %v624_v34 = vmul.f32 %v7131_v31, %v616_v30 }
 0x387   :  { %v8613_v32 = vpop.eup %8612 }
 0x388   :  { %v617_v33 = vmul.f32 %v8613_v32, %v601_v10  ;;  %v632_v37 = vadd.f32 %v7132_v35, %v624_v34 }
 0x38a   :  { %v625_v36 = vmul.f32 %v7131_v31, %v617_v33 }
 0x38c   :  { %v633_v38 = vadd.f32 %v7132_v35, %v625_v36 }
 0x38e   :  { %v634_v39 = vpack.c.bf16 %v633_v38, %v632_v37 }
 0x390   :  { %7141 = vmatmul.mubr.msk.bf16.vlgmr.msra.gmra.mrb[0].mxu0 %vm590_vm0, %v634_v39 }
 0x391   :  { %7711 = vmatprep.mubr.msk.bf16.mxu0 %vm9558_vm1, %v9557_v42 }
 0x463   :  { %v723_v47 = vpop.f32.mrb[0].mxu0 }
 0x464   :  { %v725_v49 = vpop.f32.mrb[1].mxu0  ;;  %v724_v51 = vadd.f32 %v723_v47, %v639_v46 }
 0x465   :  { %v727_v50 = vpop.f32.mrb[2].mxu0  ;;  %v726_v54 = vadd.f32 %v725_v49, %v643_v48 }
 0x466   :  { %v728_v52 = vadd.f32 %v727_v50, %v639_v46  ;;  %v729_v53 = vpop.f32.mrb[3].mxu0 }
 0x467   :  { %v730_v55 = vadd.f32 %v729_v53, %v643_v48 }
 0x468   :  { %v10067_v56 = vpack.c.bf16 %v728_v52, %v724_v51 }
 0x469   :  { %v10069_v57 = vpack.c.bf16 %v730_v55, %v726_v54 }
 0x46a   :  { %855 = vrot.lane.b32.xlu1 %v10067_v56, %s9559_s4  ;;  %734 = vrot.lane.b32.xlu0 %v10067_v56, %s9548_s17 }
 0x46e   :  { %853 = vrot.lane.b32.xlu1 %v10067_v56, %s9560_s11 }
 0x4dc   :  { %v856_v58 = vpop.permute.xlu1 %855  ;;  %v735_v59 = vpop.permute.xlu0 %734 }
 0x4dd   :  { %v861_v60 = vsel %vm736_vm2, %v856_v58, 0  ;;  %v741_v61 = vsel %vm736_vm2, %v735_v59, 0  ;;  %v8482_v59 = vld [vmem:[%s11119_s21] sm:$0xff]  }
 0x4de   :  { %7698 = vmatpush3.bf16.xpose.msra.mxu1 %v741_v61  ;;  %7710 = vmatpush3.bf16.xpose.msra.mxu0 %v861_v60  ;;  %v8483_v60 = vld [vmem:[%s11119_s21 + $0x8] sm:$0xff]  }
 0x4df   :  { %7703 = vmatprep.subr.bf16.mxu1 %v9557_v42  ;;  %7721 = vmatprep.subr.bf16.mxu0 %v9557_v42 }
 0x4e0   :  { %v854_v62 = vpop.permute.xlu1 %853 }
 0x4e5   :  { %7700 = vmatmul.mubr.msk.bf16.vlgmr.msra.gmra.mrb[0].mxu1 %vm736_vm2, %v10067_v56  ;;  %7712 = vmatmul.mubr.msk.bf16.vlgmr.msra.gmra.mrb[4].mxu0 %vm736_vm2, %v854_v62 }
 0x4e6   :  { %7704 = vmatpush3.bf16.msra.mxu1 %v10069_v57  ;;  %7705 = vmatprep.mubr.msk.bf16.mxu1 %vm9558_vm1, %v9557_v42 }
 0x4e7   :  { %7715 = vmatprep.subr.bf16.mxu1 %v9557_v42  ;;  %7723 = vmatprep.mubr.msk.bf16.mxu0 %vm9558_vm1, %v9557_v42 }
 0x4e8   :  { %7722 = vmatpush3.bf16.msra.mxu0 %v8483_v60 }
 0x4e9   :  { %7733 = vmatprep.subr.bf16.mxu0 %v9557_v42 }
 0x5b8   :  { %v777_v0 = vpop.f32.mrb[0].mxu1  ;;  %v897_v1 = vpop.f32.mrb[4].mxu0 }
 0x5b9   :  { %v778_v3 = vadd.f32 %v777_v0, %v10091_v63  ;;  %v7701_v4 = vpop.f32.mrb[1].mxu1  ;;  %v7713_v5 = vpop.f32.mrb[5].mxu0  ;;  %v898_v12 = vadd.f32 %v897_v1, %v10091_v63 }
 0x5ba   :  { %v780_v6 = vpop.f32.mrb[2].mxu1  ;;  %v900_v7 = vpop.f32.mrb[6].mxu0 }
 0x5bb   :  { %v781_v8 = vadd.f32 %v780_v6, %v10094_v2  ;;  %v7702_v9 = vpop.f32.mrb[3].mxu1  ;;  %v7714_v10 = vpop.f32.mrb[7].mxu0  ;;  %v784_v11 = vsel %vm736_vm2, %v778_v3, -inf  ;;  %v901_v14 = vadd.f32 %v900_v7, %v10094_v2  ;;  %v904_v15 = vsel %vm736_vm2, %v898_v12, -inf }
 0x5bc   :  { %785 = vmax.xlane.f32.xlu1 %v784_v11 }
 0x5bd   :  { %v787_v13 = vsel %vm736_vm2, %v781_v8, -inf  ;;  %v907_v16 = vsel %vm736_vm2, %v901_v14, -inf }
 0x5be   :  { %788 = vmax.xlane.f32.xlu0 %v787_v13 }
 0x5c2   :  { %905 = vmax.xlane.f32.xlu0 %v904_v15 }
 0x5c6   :  { %908 = vmax.xlane.f32.xlu0 %v907_v16 }
 0x649   :  { %v786_v17 = vpop.xlane.xlu1 %785 }
 0x64a   :  { %v790_v19 = vsub.f32 %v778_v3, %v786_v17 }
 0x64b   :  { %v789_v20 = vpop.xlane.xlu0 %788 }
 0x64c   :  { %v792_v21 = vmul.f32 1.442695, %v790_v19  ;;  %v791_v22 = vsub.f32 %v781_v8, %v789_v20 }
 0x64e   :  { %8614 = vpow2.f32 %v792_v21  ;;  %v794_v23 = vmul.f32 1.442695, %v791_v22 }
 0x64f   :  { %v906_v24 = vpop.xlane.xlu0 %905 }
 0x650   :  { %8616 = vpow2.f32 %v794_v23  ;;  %v910_v25 = vsub.f32 %v898_v12, %v906_v24 }
 0x652   :  { %v912_v26 = vmul.f32 1.442695, %v910_v25 }
 0x653   :  { %v909_v27 = vpop.xlane.xlu0 %908 }
 0x654   :  { %8618 = vpow2.f32 %v912_v26  ;;  %v911_v28 = vsub.f32 %v901_v14, %v909_v27 }
 0x656   :  { %v914_v29 = vmul.f32 1.442695, %v911_v28 }
 0x658   :  { %v8615_v30 = vpop.eup %8614  ;;  %8620 = vpow2.f32 %v914_v29 }
 0x659   :  { %v796_v31 = vsel %vm736_vm2, %v8615_v30, 0.0 }
 0x65a   :  { %v8617_v32 = vpop.eup %8616  ;;  %797 = vadd.xlane.f32.xlu1 %v796_v31 }
 0x65b   :  { %v799_v33 = vsel %vm736_vm2, %v8617_v32, 0.0 }
 0x65c   :  { %800 = vadd.xlane.f32.xlu0 %v799_v33 }
 0x65e   :  { %v8619_v34 = vpop.eup %8618 }
 0x65f   :  { %v916_v35 = vsel %vm736_vm2, %v8619_v34, 0.0 }
 0x660   :  { %917 = vadd.xlane.f32.xlu1 %v916_v35 }
 0x662   :  { %v8621_v36 = vpop.eup %8620 }
 0x663   :  { %v919_v37 = vsel %vm736_vm2, %v8621_v36, 0.0 }
 0x664   :  { %920 = vadd.xlane.f32.xlu0 %v919_v37 }
 0x671   :  { %928 = vrot.lane.b32.xlu1 %v10069_v57, %s9560_s11 }
 0x675   :  { %1076 = vrot.lane.b32.xlu1 %v10067_v56, %s9561_s12 }
 0x67a   :  { %1078 = vrot.lane.b32.xlu0 %v10067_v56, %s9541_s7 }
 0x6e7   :  { %v798_v38 = vpop.xlane.xlu1 %797 }
 0x6e8   :  { %8622 = vrcp.f32 %v798_v38 }
 0x6e9   :  { %v801_v39 = vpop.xlane.xlu0 %800 }
 0x6ea   :  { %8624 = vrcp.f32 %v801_v39 }
 0x6ed   :  { %v918_v41 = vpop.xlane.xlu1 %917 }
 0x6ee   :  { %8626 = vrcp.f32 %v918_v41 }
 0x6f1   :  { %v921_v44 = vpop.xlane.xlu0 %920  ;;  %v929_v51 = vpop.permute.xlu1 %928 }
 0x6f2   :  { %v8623_v46 = vpop.eup %8622  ;;  %8628 = vrcp.f32 %v921_v44 }
 0x6f3   :  { %v804_v48 = vmul.f32 %v8623_v46, %v8615_v30 }
 0x6f4   :  { %v8625_v47 = vpop.eup %8624 }
 0x6f5   :  { %v805_v49 = vmul.f32 %v8625_v47, %v8617_v32  ;;  %v1079_v6 = vpop.permute.xlu0 %1078  ;;  %v1077_v11 = vpop.permute.xlu1 %1076 }
 0x6f6   :  { %v1084_v10 = vsel %vm736_vm2, %v1079_v6, 0 }
 0x6f7   :  { %v806_v50 = vpack.c.bf16 %v805_v49, %v804_v48 }
 0x6f8   :  { %v8627_v52 = vpop.eup %8626 }
 0x6f9   :  { %7706 = vmatmul.mubr.msk.bf16.vlgmr.msra.gmra.mrb[4].mxu1 %vm736_vm2, %v806_v50  ;;  %v924_v54 = vmul.f32 %v8627_v52, %v8619_v34 }
 0x6fa   :  { %7716 = vmatpush3.bf16.msra.mxu1 %v929_v51  ;;  %7717 = vmatprep.mubr.msk.bf16.mxu1 %vm9558_vm1, %v9557_v42 }
 0x6fb   :  { %7727 = vmatprep.subr.bf16.mxu1 %v9557_v42 }
 0x6fc   :  { %v8629_v53 = vpop.eup %8628 }
 0x6fd   :  { %v925_v55 = vmul.f32 %v8629_v53, %v8621_v36 }
 0x6ff   :  { %v926_v58 = vpack.c.bf16 %v925_v55, %v924_v54  ;;  %v8484_v55 = vld [vmem:[%s11119_s21 + $0x10] sm:$0xff]  }
 0x701   :  { %7718 = vmatmul.mubr.msk.bf16.vlgmr.msra.gmra.mrb[8].mxu1 %vm736_vm2, %v926_v58 }
 0x702   :  { %7729 = vmatprep.mubr.msk.bf16.mxu1 %vm9558_vm1, %v9557_v42  ;;  %7728 = vmatpush3.bf16.msra.mxu1 %v8482_v59 }
 0x703   :  { %7739 = vmatprep.subr.bf16.mxu1 %v9557_v42 }
 0x7cc   :  { %v845_v61 = vpop.f32.mrb[4].mxu1 }
 0x7cd   :  { %v7707_v62 = vpop.f32.mrb[5].mxu1 }
 0x7ce   :  { %v848_v0 = vpop.f32.mrb[6].mxu1 }
 0x7cf   :  { %v852_v1 = vpack.c.bf16 %v848_v0, %v845_v61  ;;  %v7708_v3 = vpop.f32.mrb[7].mxu1 }
 0x7d1   :  { %7730 = vmatmul.mubr.msk.bf16.vlgmr.msra.gmra.mrb[12].mxu1 %vm736_vm2, %v852_v1 }
 0x7d2   :  { %7741 = vmatprep.mubr.msk.bf16.mxu1 %vm9558_vm1, %v9557_v42 }
 0x7d4   :  { %v968_v4 = vpop.f32.mrb[8].mxu1 }
 0x7d5   :  { %v7719_v5 = vpop.f32.mrb[9].mxu1 }
 0x7d6   :  { %v971_v7 = vpop.f32.mrb[10].mxu1 }
 0x7d7   :  { %v975_v8 = vpack.c.bf16 %v971_v7, %v968_v4  ;;  %v7720_v9 = vpop.f32.mrb[11].mxu1 }
 0x7d9   :  { %7724 = vmatmul.mubr.msk.bf16.vlgmr.msra.gmra.mrb[8].mxu0 %vm736_vm2, %v975_v8 }
 0x7da   :  { %7734 = vmatpush3.bf16.xpose.msra.mxu0 %v1084_v10  ;;  %7735 = vmatprep.mubr.msk.bf16.mxu0 %vm9558_vm1, %v9557_v42 }
 0x7db   :  { %7745 = vmatprep.subr.bf16.mxu0 %v9557_v42 }
 0x7e1   :  { %7736 = vmatmul.mubr.msk.bf16.vlgmr.msra.gmra.mrb[12].mxu0 %vm736_vm2, %v1077_v11 }
 0x7e2   :  { %7747 = vmatprep.mubr.msk.bf16.mxu0 %vm9558_vm1, %v9557_v42  ;;  %7746 = vmatpush3.bf16.msra.mxu0 %v8484_v55 }
 0x7e3   :  { %7757 = vmatprep.subr.bf16.mxu0 %v9557_v42 }
 0x8a4   :  { %v1069_v12 = vpop.f32.mrb[12].mxu1 }
 0x8a5   :  { %v7731_v13 = vpop.f32.mrb[13].mxu1 }
 0x8a6   :  { %v1072_v14 = vpop.f32.mrb[14].mxu1 }
 0x8a7   :  { %v7732_v15 = vpop.f32.mrb[15].mxu1 }
 0x8ac   :  { %v1019_v16 = vpop.f32.mrb[8].mxu0 }
 0x8ad   :  { %v10136_v17 = vadd.f32 %v1069_v12, %v1019_v16  ;;  %v7725_v19 = vpop.f32.mrb[9].mxu0 }
 0x8ae   :  { %v1022_v20 = vpop.f32.mrb[10].mxu0 }
 0x8af   :  { %v10138_v21 = vadd.f32 %v1072_v14, %v1022_v20  ;;  %v7726_v22 = vpop.f32.mrb[11].mxu0 }
 0x8b0   :  { %v8485_v22 = vld [vmem:[%s11119_s21 + $0x18] sm:$0xff]  }
 0x8b4   :  { %v1120_v23 = vpop.f32.mrb[12].mxu0 }
 0x8b5   :  { %v1121_v24 = vadd.f32 %v1120_v23, %v10091_v63  ;;  %v7737_v25 = vpop.f32.mrb[13].mxu0 }
 0x8b6   :  { %v1123_v26 = vpop.f32.mrb[14].mxu0 }
 0x8b7   :  { %v1124_v27 = vadd.f32 %v1123_v26, %v10094_v2  ;;  %v7738_v28 = vpop.f32.mrb[15].mxu0  ;;  %v1127_v29 = vsel %vm736_vm2, %v1121_v24, -inf }
 0x8b8   :  { %1128 = vmax.xlane.f32.xlu1 %v1127_v29 }
 0x8b9   :  { %v1130_v30 = vsel %vm736_vm2, %v1124_v27, -inf }
 0x8ba   :  { %1131 = vmax.xlane.f32.xlu0 %v1130_v30 }
 0x945   :  { %v1129_v31 = vpop.xlane.xlu1 %1128 }
 0x946   :  { %v1133_v32 = vsub.f32 %v1121_v24, %v1129_v31 }
 0x947   :  { %v1132_v33 = vpop.xlane.xlu0 %1131 }
 0x948   :  { %v1135_v34 = vmul.f32 1.442695, %v1133_v32  ;;  %v1134_v35 = vsub.f32 %v1124_v27, %v1132_v33 }
 0x94a   :  { %8630 = vpow2.f32 %v1135_v34  ;;  %v1137_v36 = vmul.f32 1.442695, %v1134_v35 }
 0x94c   :  { %8632 = vpow2.f32 %v1137_v36 }
 0x954   :  { %v8631_v37 = vpop.eup %8630 }
 0x955   :  { %v1139_v38 = vsel %vm736_vm2, %v8631_v37, 0.0 }
 0x956   :  { %v8633_v39 = vpop.eup %8632  ;;  %1140 = vadd.xlane.f32.xlu0 %v1139_v38 }
 0x957   :  { %v1142_v41 = vsel %vm736_vm2, %v8633_v39, 0.0 }
 0x958   :  { %1143 = vadd.xlane.f32.xlu1 %v1142_v41 }
 0x969   :  { %1252 = vrot.lane.b32.xlu1 %v10067_v56, %s9525_s28 }
 0x96c   :  { %1150 = vrot.lane.b32.xlu0 %v10069_v57, %s9561_s12 }
 0x96d   :  { %1250 = vrot.lane.b32.xlu1 %v10067_v56, %s9562_s16 }
 0x9e3   :  { %v1141_v44 = vpop.xlane.xlu0 %1140 }
 0x9e4   :  { %8634 = vrcp.f32 %v1141_v44 }
 0x9e5   :  { %v1144_v46 = vpop.xlane.xlu1 %1143 }
 0x9e6   :  { %8636 = vrcp.f32 %v1144_v46 }
 0x9e7   :  { %v1151_v47 = vpop.permute.xlu0 %1150 }
 0x9e8   :  { %7740 = vmatpush3.bf16.msra.mxu1 %v1151_v47 }
 0x9e9   :  { %7751 = vmatprep.subr.bf16.mxu1 %v9557_v42  ;;  %v1253_v52 = vpop.permute.xlu1 %1252 }
 0x9ea   :  { %v1258_v54 = vsel %vm736_vm2, %v1253_v52, 0 }
 0x9ed   :  { %v1251_v56 = vpop.permute.xlu1 %1250 }
 0x9ee   :  { %v8635_v48 = vpop.eup %8634 }
 0x9ef   :  { %v1147_v50 = vmul.f32 %v8635_v48, %v8631_v37 }
 0x9f0   :  { %v8637_v49 = vpop.eup %8636 }
 0x9f1   :  { %v1148_v51 = vmul.f32 %v8637_v49, %v8633_v39  ;;  %v7158_v39 = vld [vmem:[#allocation10] ss:$0 sm:$0xff] }
 0x9f3   :  { %v1149_v53 = vpack.c.bf16 %v1148_v51, %v1147_v50  ;;  %v8850_v51 = vld [vmem:[%s11115_s30] sm:$0xff] }
 0x9f5   :  { %7742 = vmatmul.mubr.msk.bf16.vlgmr.msra.gmra.mrb[16].mxu1 %vm736_vm2, %v1149_v53 }
 0x9f6   :  { %7752 = vmatpush3.bf16.xpose.msra.mxu1 %v1258_v54  ;;  %7753 = vmatprep.mubr.msk.bf16.mxu1 %vm9558_vm1, %v9557_v42  ;;  %v8851_v54 = vld [vmem:[%s11115_s30 + $0x8] sm:$0xff] }
 0x9f7   :  { %7763 = vmatprep.subr.bf16.mxu1 %v9557_v42 }
 0x9fd   :  { %7754 = vmatmul.mubr.msk.bf16.vlgmr.msra.gmra.mrb[20].mxu1 %vm736_vm2, %v1251_v56 }
 0x9fe   :  { %7765 = vmatprep.mubr.msk.bf16.mxu1 %vm9558_vm1, %v9557_v42  ;;  %7764 = vmatpush3.bf16.msra.mxu1 %v8485_v22 }
 0x9ff   :  { %7781 = vmatprep.subr.bf16.mxu1 %v9557_v42 }
 0xac8   :  { %v1190_v58 = vpop.f32.mrb[16].mxu1 }
 0xac9   :  { %v7743_v59 = vpop.f32.mrb[17].mxu1 }
 0xaca   :  { %v1193_v60 = vpop.f32.mrb[18].mxu1 }
 0xacb   :  { %v1197_v61 = vpack.c.bf16 %v1193_v60, %v1190_v58  ;;  %v7744_v62 = vpop.f32.mrb[19].mxu1 }
 0xacd   :  { %7748 = vmatmul.mubr.msk.bf16.vlgmr.msra.gmra.mrb[16].mxu0 %vm736_vm2, %v1197_v61 }
 0xace   :  { %7759 = vmatprep.mubr.msk.bf16.mxu0 %vm9558_vm1, %v9557_v42 }
 0xad0   :  { %v1294_v0 = vpop.f32.mrb[20].mxu1 }
 0xad1   :  { %v1295_v1 = vadd.f32 %v1294_v0, %v10091_v63  ;;  %v7755_v3 = vpop.f32.mrb[21].mxu1 }
 0xad2   :  { %v1297_v4 = vpop.f32.mrb[22].mxu1 }
 0xad3   :  { %v1298_v5 = vadd.f32 %v1297_v4, %v10094_v2  ;;  %v7756_v6 = vpop.f32.mrb[23].mxu1  ;;  %v1301_v7 = vsel %vm736_vm2, %v1295_v1, -inf }
 0xad4   :  { %1302 = vmax.xlane.f32.xlu1 %v1301_v7  ;;  %v8486_v7 = vld [vmem:[%s11120_s3] sm:$0xff]  }
 0xad5   :  { %v1304_v8 = vsel %vm736_vm2, %v1298_v5, -inf }
 0xad6   :  { %1305 = vmax.xlane.f32.xlu0 %v1304_v8  ;;  %v8487_v8 = vld [vmem:[%s11120_s3 + $0x8] sm:$0xff]  }
 0xae5   :  { %1324 = vrot.lane.b32.xlu1 %v10069_v57, %s9562_s16 }
 0xb61   :  { %v1303_v9 = vpop.xlane.xlu1 %1302 }
 0xb62   :  { %v1307_v10 = vsub.f32 %v1295_v1, %v1303_v9  ;;  %v8488_v9 = vld [vmem:[%s11120_s3 + $0x10] sm:$0xff]  }
 0xb63   :  { %v1306_v11 = vpop.xlane.xlu0 %1305 }
 0xb64   :  { %v1309_v12 = vmul.f32 1.442695, %v1307_v10  ;;  %v1308_v13 = vsub.f32 %v1298_v5, %v1306_v11  ;;  %v8489_v10 = vld [vmem:[%s11120_s3 + $0x18] sm:$0xff]  }
 0xb65   :  { %v1325_v14 = vpop.permute.xlu1 %1324 }
 0xb66   :  { %8638 = vpow2.f32 %v1309_v12  ;;  %v1311_v15 = vmul.f32 1.442695, %v1308_v13  ;;  %7758 = vmatpush3.bf16.msra.mxu0 %v1325_v14 }
 0xb67   :  { %7769 = vmatprep.subr.bf16.mxu0 %v9557_v42 }
 0xb68   :  { %8640 = vpow2.f32 %v1311_v15 }
 0xb70   :  { %v8639_v16 = vpop.eup %8638 }
 0xb71   :  { %v1313_v19 = vsel %vm736_vm2, %v8639_v16, 0.0 }
 0xb72   :  { %v8641_v20 = vpop.eup %8640  ;;  %1314 = vadd.xlane.f32.xlu0 %v1313_v19 }
 0xb73   :  { %v1316_v57 = vsel %vm736_vm2, %v8641_v20, 0.0 }
 0xb76   :  { %1317 = vadd.xlane.f32.xlu0 %v1316_v57  ;;  %v7159_v57 = vld [vmem:[#allocation12] ss:$0 sm:$0xff] }
 0xba0   :  { %v1241_v23 = vpop.f32.mrb[16].mxu0 }
 0xba1   :  { %v1248_v24 = vadd.f32 %v1241_v23, %v10136_v17  ;;  %v7749_v25 = vpop.f32.mrb[17].mxu0 }
 0xba2   :  { %v1244_v26 = vpop.f32.mrb[18].mxu0  ;;  %v7160_v25 = vld [vmem:[#allocation13] ss:$0 sm:$0xff] }
 0xba3   :  { %v1249_v27 = vadd.f32 %v1244_v26, %v10138_v21  ;;  %v7750_v28 = vpop.f32.mrb[19].mxu0 }
 0xbff   :  { %v1315_v29 = vpop.xlane.xlu0 %1314 }
 0xc00   :  { %8642 = vrcp.f32 %v1315_v29 }
 0xc03   :  { %v1318_v30 = vpop.xlane.xlu0 %1317 }
 0xc04   :  { %8644 = vrcp.f32 %v1318_v30  ;;  %v8490_v30 = vld [vmem:[%s11121_s23] sm:$0xff]  }
 0xc0a   :  { %v8643_v31 = vpop.eup %8642 }
 0xc0b   :  { %v1321_v33 = vmul.f32 %v8643_v31, %v8639_v16  ;;  %v8491_v31 = vld [vmem:[%s11121_s23 + $0x8] sm:$0xff]  }
 0xc0e   :  { %v8645_v32 = vpop.eup %8644 }
 0xc0f   :  { %v1322_v34 = vmul.f32 %v8645_v32, %v8641_v20  ;;  %v8492_v32 = vld [vmem:[%s11121_s23 + $0x10] sm:$0xff]  }
 0xc11   :  { %v1323_v35 = vpack.c.bf16 %v1322_v34, %v1321_v33  ;;  %v8493_v33 = vld [vmem:[%s11121_s23 + $0x18] sm:$0xff]   ;;  %v8494_v34 = vld [vmem:[%s11121_s23 + $0x20] sm:$0xff]  }
 0xc13   :  { %7760 = vmatmul.mubr.msk.bf16.vlgmr.msra.gmra.mrb[20].mxu0 %vm736_vm2, %v1323_v35  ;;  %v8495_v35 = vld [vmem:[%s11121_s23 + $0x28] sm:$0xff]  }
 0xc14   :  { %7777 = vmatprep.mubr.msk.bf16.mxu0 %vm9558_vm1, %v9557_v42  ;;  %7770 = vmatpush3.bf16.msra.mxu0 %v8486_v7  ;;  %v7167_v7 = vld [vmem:[#allocation16] ss:$0 sm:$0xff] }
 0xc15   :  { %7771 = vmatprep.subr.bf16.mxu0 %v9557_v42 }
 0xc18   :  { %7772 = vmatpush3.bf16.msra.mxu0 %v8487_v8 }
 0xc19   :  { %7773 = vmatprep.subr.bf16.mxu0 %v9557_v42 }
 0xc1c   :  { %7774 = vmatpush3.bf16.msra.mxu0 %v8488_v9 }
 0xc1d   :  { %7775 = vmatprep.subr.bf16.mxu0 %v9557_v42 }
 0xc20   :  { %7776 = vmatpush3.bf16.msra.mxu0 %v8489_v10 }
 0xce6   :  { %v1364_v17 = vpop.f32.mrb[20].mxu0 }
 0xce7   :  { %v7761_v36 = vpop.f32.mrb[21].mxu0 }
 0xce8   :  { %v1367_v37 = vpop.f32.mrb[22].mxu0  ;;  %v8497_v36 = vld [vmem:[%s11121_s23 + $0x38] sm:$0xff]  }
 0xce9   :  { %v1371_v21 = vpack.c.bf16 %v1367_v37, %v1364_v17  ;;  %v7762_v38 = vpop.f32.mrb[23].mxu0  ;;  %v8496_v17 = vld [vmem:[%s11121_s23 + $0x30] sm:$0xff]   ;;  %v7161_v37 = vld [vmem:[#allocation15] ss:$0 sm:$0xff] }
 0xceb   :  { %7766 = vmatmul.mubr.msk.bf16.vlgmr.msra.gmra.mrb[24].mxu1 %vm736_vm2, %v1371_v21 }
 0xcec   :  { %7797 = vmatprep.mubr.msk.bf16.mxu1 %vm9558_vm1, %v9557_v42  ;;  %7782 = vmatpush3.bf16.msra.mxu1 %v8490_v30  ;;  %v8503_v30 = vld [vmem:[%s11116_s20 + $0x54] ss:$8 sps:$4 sm:$0xff]  }
 0xced   :  { %7783 = vmatprep.subr.bf16.mxu1 %v9557_v42 }
 0xcf0   :  { %7784 = vmatpush3.bf16.msra.mxu1 %v8491_v31  ;;  %v8501_v31 = vld [vmem:[%s11116_s20 + $0x50] ss:$8 sps:$4 sm:$0xff]  }
 0xcf1   :  { %7785 = vmatprep.subr.bf16.mxu1 %v9557_v42 }
 0xcf4   :  { %7786 = vmatpush3.bf16.msra.mxu1 %v8492_v32  ;;  %v8506_v32 = vld [vmem:[%s11116_s20 + $0x64] ss:$8 sps:$4 sm:$0xff]  }
 0xcf5   :  { %7787 = vmatprep.subr.bf16.mxu1 %v9557_v42 }
 0xcf8   :  { %7788 = vmatpush3.bf16.msra.mxu1 %v8493_v33  ;;  %v8504_v33 = vld [vmem:[%s11116_s20 + $0x60] ss:$8 sps:$4 sm:$0xff]  }
 0xcf9   :  { %7789 = vmatprep.subr.bf16.mxu1 %v9557_v42 }
 0xcfc   :  { %7790 = vmatpush3.bf16.msra.mxu1 %v8494_v34  ;;  %v8507_v34 = vld [vmem:[%s11116_s20 + $0x70] ss:$8 sps:$4 sm:$0xff]  }
 0xcfd   :  { %7791 = vmatprep.subr.bf16.mxu1 %v9557_v42 }
 0xd00   :  { %7792 = vmatpush3.bf16.msra.mxu1 %v8495_v35  ;;  %v8509_v35 = vld [vmem:[%s11116_s20 + $0x74] ss:$8 sps:$4 sm:$0xff]  }
 0xd01   :  { %7793 = vmatprep.subr.bf16.mxu1 %v9557_v42 }
 0xd04   :  { %7794 = vmatpush3.bf16.msra.mxu1 %v8496_v17 }
 0xd05   :  { %7795 = vmatprep.subr.bf16.mxu1 %v9557_v42 }
 0xd08   :  { %7796 = vmatpush3.bf16.msra.mxu1 %v8497_v36 }
 0xd09   :  { %7807 = vmatprep.subr.bf16.mxu1 %v9557_v42 }
 0xdbe   :  { %v1415_v41 = vpop.f32.mrb[24].mxu1 }
 0xdbf   :  { %v1422_v44 = vadd.f32 %v1415_v41, %v1248_v24  ;;  %v7767_v46 = vpop.f32.mrb[25].mxu1 }
 0xdc0   :  { %v1418_v47 = vpop.f32.mrb[26].mxu1 }
 0xdc1   :  { %v1430_v48 = vadd.f32 %v7158_v39, %v1422_v44  ;;  %v1423_v49 = vadd.f32 %v1418_v47, %v1249_v27  ;;  %v7768_v50 = vpop.f32.mrb[27].mxu1 }
 0xdc3   :  { %v10186_v52 = vadd.f32 %v8850_v51, %v1430_v48  ;;  %v1431_v53 = vadd.f32 %v7158_v39, %v1423_v49 }
 0xdc5   :  { %v10189_v56 = vadd.f32 %v8851_v54, %v1431_v53  ;;  %v1434_v55 = vsel %vm590_vm0, %v10186_v52, 0.0 }
 0xdc6   :  { %1435 = vadd.xlane.f32.xlu0 %v1434_v55 }
 0xdc7   :  { %v1437_v58 = vsel %vm590_vm0, %v10189_v56, 0.0 }
 0xdca   :  { %1438 = vadd.xlane.f32.xlu0 %v1437_v58 }
 0xe53   :  { %v1436_v59 = vpop.xlane.xlu0 %1435 }
 0xe54   :  { %v1440_v60 = vmul.f32 0.015625, %v1436_v59 }
 0xe56   :  { %v1442_v61 = vsub.f32 %v10186_v52, %v1440_v60 }
 0xe57   :  { %v1439_v62 = vpop.xlane.xlu0 %1438 }
 0xe58   :  { %v1441_v0 = vmul.f32 0.015625, %v1439_v62  ;;  %v1444_v1 = vmul.f32 %v1442_v61, %v1442_v61 }
 0xe5a   :  { %v1443_v3 = vsub.f32 %v10189_v56, %v1441_v0  ;;  %v1446_v4 = vsel %vm590_vm0, %v1444_v1, 0.0 }
 0xe5b   :  { %1447 = vadd.xlane.f32.xlu0 %v1446_v4 }
 0xe5c   :  { %v1445_v5 = vmul.f32 %v1443_v3, %v1443_v3 }
 0xe5e   :  { %v1449_v6 = vsel %vm590_vm0, %v1445_v5, 0.0 }
 0xe5f   :  { %1450 = vadd.xlane.f32.xlu0 %v1449_v6 }
 0xee8   :  { %v1448_v11 = vpop.xlane.xlu0 %1447 }
 0xee9   :  { %v1452_v12 = vmul.f32 0.015625, %v1448_v11 }
 0xeeb   :  { %v1454_v13 = vadd.f32 1e-12, %v1452_v12 }
 0xeec   :  { %v1451_v14 = vpop.xlane.xlu0 %1450 }
 0xeed   :  { %8646 = vrsqrt.f32 %v1454_v13  ;;  %v1453_v15 = vmul.f32 0.015625, %v1451_v14 }
 0xeef   :  { %v1455_v16 = vadd.f32 1e-12, %v1453_v15 }
 0xef1   :  { %8648 = vrsqrt.f32 %v1455_v16 }
 0xef7   :  { %v8647_v19 = vpop.eup %8646 }
 0xef8   :  { %v1458_v20 = vmul.f32 %v8647_v19, %v1442_v61 }
 0xefa   :  { %v1466_v23 = vmul.f32 %v7159_v57, %v1458_v20 }
 0xefb   :  { %v8649_v22 = vpop.eup %8648 }
 0xefc   :  { %v1459_v24 = vmul.f32 %v8649_v22, %v1443_v3  ;;  %v1474_v27 = vadd.f32 %v7160_v25, %v1466_v23 }
 0xefe   :  { %v1467_v26 = vmul.f32 %v7159_v57, %v1459_v24 }
 0xf00   :  { %v1475_v28 = vadd.f32 %v7160_v25, %v1467_v26 }
 0xf02   :  { %v1476_v29 = vpack.c.bf16 %v1475_v28, %v1474_v27  ;;  %v8500_v28 = vld [vmem:[%s11116_s20 + $0x44] ss:$8 sps:$4 sm:$0xff]  }
 0xf03   :  { %1824 = vmatprep.subr.bf16.mxu0 %v8500_v28 }
 0xf04   :  { %7778 = vmatmul.mubr.msk.bf16.vlgmr.msra.gmra.mrb[24].mxu0 %vm590_vm0, %v1476_v29  ;;  %v8498_v29 = vld [vmem:[%s11116_s20 + $0x40] ss:$8 sps:$4 sm:$0xff]  }
 0xf05   :  { %1856 = vmatprep.mubr.bf16.mxu0 %v9556_v18  ;;  %1825 = vmatpush1.bf16.msra.mxu0 %v8498_v29 }
 0xf06   :  { %1826 = vmatprep.subr.bf16.mxu0 %v8503_v30 }
 0xf09   :  { %1827 = vmatpush1.bf16.msra.mxu0 %v8501_v31 }
 0xf0a   :  { %1828 = vmatprep.subr.bf16.mxu0 %v8506_v32 }
 0xf0d   :  { %1829 = vmatpush1.bf16.msra.mxu0 %v8504_v33 }
 0xf0e   :  { %1830 = vmatprep.subr.bf16.mxu0 %v8509_v35 }
 0xf11   :  { %1831 = vmatpush1.bf16.msra.mxu0 %v8507_v34 }
 0xf12   :  { %7801 = vmatprep.subr.bf16.mxu0 %v9557_v42 }
 0xfd7   :  { %v1544_v21 = vpop.f32.mrb[24].mxu0 }
 0xfd8   :  { %v1545_v38 = vadd.f32 %v7161_v37, %v1544_v21  ;;  %v7779_v39 = vpop.f32.mrb[25].mxu0 }
 0xfd9   :  { %v1547_v41 = vpop.f32.mrb[26].mxu0 }
 0xfda   :  { %v1553_v44 = vmul.f32 %v1545_v38, %v1545_v38  ;;  %v1548_v46 = vadd.f32 %v7161_v37, %v1547_v41  ;;  %v7780_v47 = vpop.f32.mrb[27].mxu0  ;;  %v1551_v0 = vmul.f32 0.5, %v1545_v38 }
 0xfdc   :  { %v1555_v48 = vmul.f32 %v1553_v44, %v1545_v38  ;;  %v1554_v49 = vmul.f32 %v1548_v46, %v1548_v46  ;;  %v1552_v1 = vmul.f32 0.5, %v1548_v46 }
 0xfde   :  { %v1557_v50 = vmul.f32 0.044715, %v1555_v48  ;;  %v1556_v51 = vmul.f32 %v1554_v49, %v1548_v46 }
 0xfe0   :  { %v1559_v53 = vadd.f32 %v1557_v50, %v1545_v38  ;;  %v1558_v54 = vmul.f32 0.044715, %v1556_v51  ;;  %v7218_v50 = vld [vmem:[#allocation7 + $0x1] ss:$0 sm:$0xff] }
 0xfe2   :  { %v1561_v55 = vmul.f32 0.7978846, %v1559_v53  ;;  %v1560_v58 = vadd.f32 %v1558_v54, %v1548_v46  ;;  %v7217_v46 = vld [vmem:[%s11117_s29 + $0x1] ss:$0 sm:$0xff] }
 0xfe4   :  { %8650 = vtanh.f32 %v1561_v55  ;;  %v1562_v59 = vmul.f32 0.7978846, %v1560_v58  ;;  %v1681_v58 = vld [vmem:[#allocation9 + $0x2] sm:$0x3] }
 0xfe6   :  { %8652 = vtanh.f32 %v1562_v59  ;;  %v1774_v59 = vrot.slane %v1681_v58, %v10057_v43 }
 0xfee   :  { %v8651_v60 = vpop.eup %8650 }
 0xfef   :  { %v1565_v61 = vadd.f32 1.0, %v8651_v60 }
 0xff0   :  { %v8653_v62 = vpop.eup %8652 }
 0xff1   :  { %v1566_v3 = vadd.f32 1.0, %v8653_v62  ;;  %v1567_v4 = vmul.f32 %v1565_v61, %v1551_v0  ;;  %v1778_v61 = vrot.slane %v1681_v58, %v10059_v45 }
 0xff3   :  { %v1568_v5 = vmul.f32 %v1566_v3, %v1552_v1 }
 0xff5   :  { %v1569_v6 = vpack.c.bf16 %v1568_v5, %v1567_v4 }
 0xff7   :  { %7798 = vmatmul.mubr.bf16.vlgmr.msra.gmra.mrb[28].mxu1 %v1569_v6 }
 0xff8   :  { %7809 = vmatprep.mubr.msk.bf16.mxu1 %vm9558_vm1, %v9557_v42 }
0x10ca   :  { %v1658_v8 = vpop.f32.mrb[28].mxu1 }
0x10cb   :  { %v1659_v9 = vadd.f32 %v7167_v7, %v1658_v8  ;;  %v7799_v10 = vpop.f32.mrb[29].mxu1 }
0x10cc   :  { %v1661_v11 = vpop.f32.mrb[30].mxu1 }
0x10cd   :  { %v10227_v12 = vadd.f32 %v1659_v9, %v10186_v52  ;;  %v1662_v13 = vadd.f32 %v7167_v7, %v1661_v11  ;;  %v7800_v14 = vpop.f32.mrb[31].mxu1 }
0x10cf   :  { %v10230_v15 = vadd.f32 %v1662_v13, %v10189_v56  ;;  %v1727_v16 = vsel %vm590_vm0, %v10227_v12, 0.0 }
0x10d0   :  { %1728 = vadd.xlane.f32.xlu1 %v1727_v16 }
0x10d1   :  { %v1730_v19 = vsel %vm590_vm0, %v10230_v15, 0.0 }
0x10d2   :  { %1731 = vadd.xlane.f32.xlu0 %v1730_v19 }
0x115d   :  { %v1729_v20 = vpop.xlane.xlu1 %1728 }
0x115e   :  { %v1733_v57 = vmul.f32 0.015625, %v1729_v20 }
0x115f   :  { %v1732_v52 = vpop.xlane.xlu0 %1731 }
0x1160   :  { %v1735_v22 = vsub.f32 %v10227_v12, %v1733_v57  ;;  %v1734_v23 = vmul.f32 0.015625, %v1732_v52 }
0x1162   :  { %v1736_v56 = vsub.f32 %v10230_v15, %v1734_v23  ;;  %v1737_v24 = vmul.f32 %v1735_v22, %v1735_v22 }
0x1164   :  { %v1739_v25 = vsel %vm590_vm0, %v1737_v24, 0.0  ;;  %v1738_v26 = vmul.f32 %v1736_v56, %v1736_v56 }
0x1165   :  { %1740 = vadd.xlane.f32.xlu0 %v1739_v25 }
0x1166   :  { %v1742_v27 = vsel %vm590_vm0, %v1738_v26, 0.0 }
0x1169   :  { %1743 = vadd.xlane.f32.xlu0 %v1742_v27 }
0x11f2   :  { %v1741_v17 = vpop.xlane.xlu0 %1740 }
0x11f3   :  { %v1745_v36 = vmul.f32 0.015625, %v1741_v17 }
0x11f5   :  { %v1747_v37 = vadd.f32 1e-12, %v1745_v36 }
0x11f6   :  { %v1744_v21 = vpop.xlane.xlu0 %1743 }
0x11f7   :  { %8654 = vrsqrt.f32 %v1747_v37  ;;  %v1746_v38 = vmul.f32 0.015625, %v1744_v21 }
0x11f9   :  { %v1748_v39 = vadd.f32 1e-12, %v1746_v38 }
0x11fb   :  { %8656 = vrsqrt.f32 %v1748_v39 }
0x1201   :  { %v8655_v41 = vpop.eup %8654 }
0x1202   :  { %v1751_v44 = vmul.f32 %v8655_v41, %v1735_v22 }
0x1204   :  { %v1759_v48 = vmul.f32 %v7217_v46, %v1751_v44 }
0x1205   :  { %v8657_v47 = vpop.eup %8656 }
0x1206   :  { %v1752_v49 = vmul.f32 %v8657_v47, %v1736_v56  ;;  %v1767_v53 = vadd.f32 %v7218_v50, %v1759_v48 }
0x1208   :  { %v1760_v51 = vmul.f32 %v7217_v46, %v1752_v49 }
0x120a   :  { %v1768_v54 = vadd.f32 %v7218_v50, %v1760_v51 }
0x120c   :  { %v1769_v55 = vpack.c.bf16 %v1768_v54, %v1767_v53 }
0x120e   :  { %7227 = vmatmul.mubr.msk.bf16.vlgmr.msra.gmra.mrb[28].mxu0 %vm590_vm0, %v1769_v55 }
0x120f   :  { %7803 = vmatprep.mubr.msk.bf16.mxu0 %vm9558_vm1, %v9557_v42 }
0x12e1   :  { %v1858_v60 = vpop.f32.mrb[28].mxu0 }
0x12e2   :  { %v1860_v62 = vpop.f32.mrb[29].mxu0  ;;  %v1859_v1 = vadd.f32 %v1858_v60, %v1774_v59 }
0x12e3   :  { %v1862_v0 = vpop.f32.mrb[30].mxu0  ;;  %v1861_v5 = vadd.f32 %v1860_v62, %v1778_v61 }
0x12e4   :  { %v1863_v3 = vadd.f32 %v1862_v0, %v1774_v59  ;;  %v1864_v4 = vpop.f32.mrb[31].mxu0 }
0x12e5   :  { %v1865_v6 = vadd.f32 %v1864_v4, %v1778_v61 }
0x12e6   :  { %v10255_v7 = vpack.c.bf16 %v1863_v3, %v1859_v1 }
0x12e7   :  { %v10257_v8 = vpack.c.bf16 %v1865_v6, %v1861_v5 }
0x12e8   :  { %1989 = vrot.lane.b32.xlu1 %v10255_v7, %s9559_s4  ;;  %1869 = vrot.lane.b32.xlu0 %v10255_v7, %s9548_s17 }
0x12e9   :  { %7808 = vmatpush3.bf16.msra.mxu1 %v10257_v8 }
0x12ea   :  { %7819 = vmatprep.subr.bf16.mxu1 %v9557_v42 }
0x12ec   :  { %1987 = vrot.lane.b32.xlu0 %v10255_v7, %s9560_s11 }
0x135a   :  { %v1870_v9 = vpop.permute.xlu0 %1869  ;;  %v1990_v11 = vpop.permute.xlu1 %1989 }
0x135b   :  { %v1875_v10 = vsel %vm736_vm2, %v1870_v9, 0  ;;  %v1995_v13 = vsel %vm736_vm2, %v1990_v11, 0  ;;  %v8511_v11 = vld [vmem:[%s11119_s21 + $0x28] sm:$0xff]  }
0x135c   :  { %7802 = vmatpush3.bf16.xpose.msra.mxu0 %v1875_v10  ;;  %v8510_v10 = vld [vmem:[%s11119_s21 + $0x20] sm:$0xff]  }
0x135d   :  { %7813 = vmatprep.subr.bf16.mxu0 %v9557_v42 }
0x135e   :  { %v1988_v14 = vpop.permute.xlu0 %1987 }
0x1363   :  { %7804 = vmatmul.mubr.msk.bf16.vlgmr.msra.gmra.mrb[32].mxu0 %vm736_vm2, %v10255_v7 }
0x1364   :  { %7814 = vmatpush3.bf16.xpose.msra.mxu0 %v1995_v13  ;;  %7815 = vmatprep.mubr.msk.bf16.mxu0 %vm9558_vm1, %v9557_v42 }
0x1365   :  { %7825 = vmatprep.subr.bf16.mxu0 %v9557_v42 }
0x136b   :  { %7816 = vmatmul.mubr.msk.bf16.vlgmr.msra.gmra.mrb[36].mxu0 %vm736_vm2, %v1988_v14 }
0x136c   :  { %7827 = vmatprep.mubr.msk.bf16.mxu0 %vm9558_vm1, %v9557_v42  ;;  %7826 = vmatpush3.bf16.msra.mxu0 %v8511_v11 }
0x136d   :  { %7837 = vmatprep.subr.bf16.mxu0 %v9557_v42 }
0x1436   :  { %v1911_v16 = vpop.f32.mrb[32].mxu0 }
0x1437   :  { %v1912_v19 = vadd.f32 %v1911_v16, %v10091_v63  ;;  %v7805_v20 = vpop.f32.mrb[33].mxu0 }
0x1438   :  { %v1914_v57 = vpop.f32.mrb[34].mxu0 }
0x1439   :  { %v1915_v52 = vadd.f32 %v1914_v57, %v10094_v2  ;;  %v7806_v22 = vpop.f32.mrb[35].mxu0  ;;  %v1918_v23 = vsel %vm736_vm2, %v1912_v19, -inf }
0x143a   :  { %1919 = vmax.xlane.f32.xlu0 %v1918_v23 }
0x143b   :  { %v1921_v56 = vsel %vm736_vm2, %v1915_v52, -inf }
0x143c   :  { %1922 = vmax.xlane.f32.xlu1 %v1921_v56 }
0x143e   :  { %v2031_v24 = vpop.f32.mrb[36].mxu0 }
0x143f   :  { %v2032_v25 = vadd.f32 %v2031_v24, %v10091_v63  ;;  %v7817_v26 = vpop.f32.mrb[37].mxu0 }
0x1440   :  { %v2034_v27 = vpop.f32.mrb[38].mxu0 }
0x1441   :  { %v2035_v28 = vadd.f32 %v2034_v27, %v10094_v2  ;;  %v7818_v29 = vpop.f32.mrb[39].mxu0  ;;  %v2038_v30 = vsel %vm736_vm2, %v2032_v25, -inf }
0x1442   :  { %2039 = vmax.xlane.f32.xlu0 %v2038_v30 }
0x1443   :  { %v2041_v31 = vsel %vm736_vm2, %v2035_v28, -inf }
0x1446   :  { %2042 = vmax.xlane.f32.xlu0 %v2041_v31 }
0x14c7   :  { %v1920_v32 = vpop.xlane.xlu0 %1919 }
0x14c8   :  { %v1924_v33 = vsub.f32 %v1912_v19, %v1920_v32 }
0x14c9   :  { %v1923_v34 = vpop.xlane.xlu1 %1922 }
0x14ca   :  { %v1926_v35 = vmul.f32 1.442695, %v1924_v33  ;;  %v1925_v17 = vsub.f32 %v1915_v52, %v1923_v34 }
0x14cc   :  { %8658 = vpow2.f32 %v1926_v35  ;;  %v1928_v36 = vmul.f32 1.442695, %v1925_v17 }
0x14ce   :  { %8660 = vpow2.f32 %v1928_v36 }
0x14cf   :  { %v2040_v63 = vpop.xlane.xlu0 %2039 }
0x14d0   :  { %v2044_v37 = vsub.f32 %v2032_v25, %v2040_v63  ;;  %v8852_v63 = vld [vmem:[%s11118_s6] sm:$0xff] }
0x14d2   :  { %v2046_v21 = vmul.f32 1.442695, %v2044_v37 }
0x14d3   :  { %v2043_v38 = vpop.xlane.xlu0 %2042 }
0x14d4   :  { %8662 = vpow2.f32 %v2046_v21  ;;  %v2045_v2 = vsub.f32 %v2035_v28, %v2043_v38 }
0x14d6   :  { %v8659_v39 = vpop.eup %8658  ;;  %v2048_v41 = vmul.f32 1.442695, %v2045_v2  ;;  %v8853_v2 = vld [vmem:[%s11118_s6 + $0x8] sm:$0xff] }
0x14d7   :  { %v1930_v44 = vsel %vm736_vm2, %v8659_v39, 0.0 }
0x14d8   :  { %v8661_v46 = vpop.eup %8660  ;;  %8664 = vpow2.f32 %v2048_v41  ;;  %1931 = vadd.xlane.f32.xlu0 %v1930_v44 }
0x14d9   :  { %v1933_v47 = vsel %vm736_vm2, %v8661_v46, 0.0 }
0x14dc   :  { %1934 = vadd.xlane.f32.xlu0 %v1933_v47 }
0x14de   :  { %v8663_v48 = vpop.eup %8662 }
0x14df   :  { %v2050_v49 = vsel %vm736_vm2, %v8663_v48, 0.0 }
0x14e0   :  { %2051 = vadd.xlane.f32.xlu0 %v2050_v49 }
0x14e2   :  { %v8665_v50 = vpop.eup %8664 }
0x14e3   :  { %v2053_v51 = vsel %vm736_vm2, %v8665_v50, 0.0 }
0x14e4   :  { %2054 = vadd.xlane.f32.xlu1 %v2053_v51 }
0x14f5   :  { %2212 = vrot.lane.b32.xlu1 %v10255_v7, %s9541_s7 }
0x14f6   :  { %2062 = vrot.lane.b32.xlu0 %v10257_v8, %s9560_s11 }
0x14f9   :  { %2210 = vrot.lane.b32.xlu1 %v10255_v7, %s9561_s12 }
0x1565   :  { %v1932_v53 = vpop.xlane.xlu0 %1931 }
0x1566   :  { %8666 = vrcp.f32 %v1932_v53 }
0x1569   :  { %v1935_v54 = vpop.xlane.xlu0 %1934 }
0x156a   :  { %8668 = vrcp.f32 %v1935_v54 }
0x156d   :  { %v2052_v55 = vpop.xlane.xlu0 %2051 }
0x156e   :  { %8670 = vrcp.f32 %v2052_v55 }
0x1570   :  { %v8667_v59 = vpop.eup %8666 }
0x1571   :  { %v2055_v58 = vpop.xlane.xlu1 %2054  ;;  %v1938_v61 = vmul.f32 %v8667_v59, %v8659_v39  ;;  %v2063_v1 = vpop.permute.xlu0 %2062 }
0x1572   :  { %8672 = vrcp.f32 %v2055_v58 }
0x1574   :  { %v8669_v60 = vpop.eup %8668 }
0x1575   :  { %v1939_v62 = vmul.f32 %v8669_v60, %v8661_v46  ;;  %v2213_v22 = vpop.permute.xlu1 %2212 }
0x1576   :  { %v2218_v25 = vsel %vm736_vm2, %v2213_v22, 0 }
0x1577   :  { %v1940_v0 = vpack.c.bf16 %v1939_v62, %v1938_v61 }
0x1578   :  { %v8671_v3 = vpop.eup %8670 }
0x1579   :  { %7810 = vmatmul.mubr.msk.bf16.vlgmr.msra.gmra.mrb[32].mxu1 %vm736_vm2, %v1940_v0  ;;  %v2058_v5 = vmul.f32 %v8671_v3, %v8663_v48  ;;  %v2211_v26 = vpop.permute.xlu1 %2210 }
0x157a   :  { %7820 = vmatpush3.bf16.msra.mxu1 %v2063_v1  ;;  %7821 = vmatprep.mubr.msk.bf16.mxu1 %vm9558_vm1, %v9557_v42 }
0x157b   :  { %7831 = vmatprep.subr.bf16.mxu1 %v9557_v42 }
0x157c   :  { %v8673_v4 = vpop.eup %8672 }
0x157d   :  { %v2059_v6 = vmul.f32 %v8673_v4, %v8665_v50 }
0x157f   :  { %v2060_v9 = vpack.c.bf16 %v2059_v6, %v2058_v5 }
0x1581   :  { %7822 = vmatmul.mubr.msk.bf16.vlgmr.msra.gmra.mrb[36].mxu1 %vm736_vm2, %v2060_v9 }
0x1582   :  { %7833 = vmatprep.mubr.msk.bf16.mxu1 %vm9558_vm1, %v9557_v42  ;;  %7832 = vmatpush3.bf16.msra.mxu1 %v8510_v10  ;;  %v8512_v10 = vld [vmem:[%s11119_s21 + $0x30] sm:$0xff]  }
0x1583   :  { %7843 = vmatprep.subr.bf16.mxu1 %v9557_v42 }
0x164c   :  { %v1979_v13 = vpop.f32.mrb[32].mxu1 }
0x164d   :  { %v7811_v14 = vpop.f32.mrb[33].mxu1 }
0x164e   :  { %v1982_v16 = vpop.f32.mrb[34].mxu1 }
0x164f   :  { %v1986_v19 = vpack.c.bf16 %v1982_v16, %v1979_v13  ;;  %v7812_v20 = vpop.f32.mrb[35].mxu1 }
0x1651   :  { %7834 = vmatmul.mubr.msk.bf16.vlgmr.msra.gmra.mrb[40].mxu1 %vm736_vm2, %v1986_v19 }
0x1652   :  { %7845 = vmatprep.mubr.msk.bf16.mxu1 %vm9558_vm1, %v9557_v42 }
0x1654   :  { %v2102_v57 = vpop.f32.mrb[36].mxu1 }
0x1655   :  { %v7823_v52 = vpop.f32.mrb[37].mxu1 }
0x1656   :  { %v2105_v23 = vpop.f32.mrb[38].mxu1 }
0x1657   :  { %v2109_v56 = vpack.c.bf16 %v2105_v23, %v2102_v57  ;;  %v7824_v24 = vpop.f32.mrb[39].mxu1 }
0x1659   :  { %7828 = vmatmul.mubr.msk.bf16.vlgmr.msra.gmra.mrb[40].mxu0 %vm736_vm2, %v2109_v56 }
0x165a   :  { %7838 = vmatpush3.bf16.xpose.msra.mxu0 %v2218_v25  ;;  %7839 = vmatprep.mubr.msk.bf16.mxu0 %vm9558_vm1, %v9557_v42 }
0x165b   :  { %7849 = vmatprep.subr.bf16.mxu0 %v9557_v42 }
0x1661   :  { %7840 = vmatmul.mubr.msk.bf16.vlgmr.msra.gmra.mrb[44].mxu0 %vm736_vm2, %v2211_v26 }
0x1662   :  { %7851 = vmatprep.mubr.msk.bf16.mxu0 %vm9558_vm1, %v9557_v42  ;;  %7850 = vmatpush3.bf16.msra.mxu0 %v8512_v10  ;;  %v2803_v10 = vld [vmem:[%s11122_s13 + $0x8] sm:$0xff] }
0x1663   :  { %7861 = vmatprep.subr.bf16.mxu0 %v9557_v42 }
0x1724   :  { %v2203_v27 = vpop.f32.mrb[40].mxu1 }
0x1725   :  { %v7835_v28 = vpop.f32.mrb[41].mxu1 }
0x1726   :  { %v2206_v29 = vpop.f32.mrb[42].mxu1 }
0x1727   :  { %v7836_v30 = vpop.f32.mrb[43].mxu1 }
0x172c   :  { %v2153_v31 = vpop.f32.mrb[40].mxu0 }
0x172d   :  { %v10318_v32 = vadd.f32 %v2203_v27, %v2153_v31  ;;  %v7829_v33 = vpop.f32.mrb[41].mxu0 }
0x172e   :  { %v2156_v34 = vpop.f32.mrb[42].mxu0 }
0x172f   :  { %v10320_v35 = vadd.f32 %v2206_v29, %v2156_v34  ;;  %v7830_v17 = vpop.f32.mrb[43].mxu0 }
0x1734   :  { %v2254_v36 = vpop.f32.mrb[44].mxu0 }
0x1735   :  { %v2255_v37 = vadd.f32 %v8852_v63, %v2254_v36  ;;  %v7841_v21 = vpop.f32.mrb[45].mxu0 }
0x1736   :  { %v2257_v38 = vpop.f32.mrb[46].mxu0 }
0x1737   :  { %v2258_v39 = vadd.f32 %v8853_v2, %v2257_v38  ;;  %v7842_v41 = vpop.f32.mrb[47].mxu0  ;;  %v2261_v44 = vsel %vm736_vm2, %v2255_v37, -inf }
0x1738   :  { %2262 = vmax.xlane.f32.xlu0 %v2261_v44 }
0x1739   :  { %v2264_v46 = vsel %vm736_vm2, %v2258_v39, -inf }
0x173a   :  { %2265 = vmax.xlane.f32.xlu1 %v2264_v46 }
0x174b   :  { %2284 = vrot.lane.b32.xlu1 %v10257_v8, %s9561_s12 }
0x174f   :  { %2384 = vrot.lane.b32.xlu1 %v10255_v7, %s9562_s16 }
0x17c5   :  { %v2263_v47 = vpop.xlane.xlu0 %2262 }
0x17c6   :  { %v2267_v48 = vsub.f32 %v2255_v37, %v2263_v47 }
0x17c7   :  { %v2266_v49 = vpop.xlane.xlu1 %2265 }
0x17c8   :  { %v2269_v50 = vmul.f32 1.442695, %v2267_v48  ;;  %v2268_v51 = vsub.f32 %v2258_v39, %v2266_v49 }
0x17ca   :  { %8674 = vpow2.f32 %v2269_v50  ;;  %v2271_v53 = vmul.f32 1.442695, %v2268_v51 }
0x17cb   :  { %v2285_v54 = vpop.permute.xlu1 %2284 }
0x17cc   :  { %8676 = vpow2.f32 %v2271_v53  ;;  %7844 = vmatpush3.bf16.msra.mxu1 %v2285_v54 }
0x17cd   :  { %7855 = vmatprep.subr.bf16.mxu1 %v9557_v42 }
0x17d4   :  { %v8675_v55 = vpop.eup %8674 }
0x17d5   :  { %v2273_v58 = vsel %vm736_vm2, %v8675_v55, 0.0 }
0x17d6   :  { %v8677_v59 = vpop.eup %8676  ;;  %2274 = vadd.xlane.f32.xlu0 %v2273_v58  ;;  %v7244_v58 = vld [vmem:[#allocation10 + $0x1] ss:$0 sm:$0xff] }
0x17d7   :  { %v2276_v60 = vsel %vm736_vm2, %v8677_v59, 0.0 }
0x17da   :  { %2277 = vadd.xlane.f32.xlu0 %v2276_v60 }
0x17f0   :  { %2386 = vrot.lane.b32.xlu0 %v10255_v7, %s9525_s28  ;;  %v2385_v7 = vpop.permute.xlu1 %2384 }
0x1863   :  { %v2275_v61 = vpop.xlane.xlu0 %2274 }
0x1864   :  { %8678 = vrcp.f32 %v2275_v61 }
0x1867   :  { %v2278_v62 = vpop.xlane.xlu0 %2277 }
0x1868   :  { %8680 = vrcp.f32 %v2278_v62 }
0x186b   :  { %v2387_v5 = vpop.permute.xlu0 %2386 }
0x186c   :  { %v2392_v9 = vsel %vm736_vm2, %v2387_v5, 0 }
0x186e   :  { %v8679_v0 = vpop.eup %8678 }
0x186f   :  { %v2281_v3 = vmul.f32 %v8679_v0, %v8675_v55 }
0x1872   :  { %v8681_v1 = vpop.eup %8680 }
0x1873   :  { %v2282_v4 = vmul.f32 %v8681_v1, %v8677_v59 }
0x1875   :  { %v2283_v6 = vpack.c.bf16 %v2282_v4, %v2281_v3 }
0x1877   :  { %7846 = vmatmul.mubr.msk.bf16.vlgmr.msra.gmra.mrb[44].mxu1 %vm736_vm2, %v2283_v6 }
0x1878   :  { %7856 = vmatpush3.bf16.xpose.msra.mxu1 %v2392_v9  ;;  %7857 = vmatprep.mubr.msk.bf16.mxu1 %vm9558_vm1, %v9557_v42 }
0x1879   :  { %7867 = vmatprep.subr.bf16.mxu1 %v9557_v42 }
0x187f   :  { %7858 = vmatmul.mubr.msk.bf16.vlgmr.msra.gmra.mrb[48].mxu1 %vm736_vm2, %v2385_v7 }
0x1880   :  { %7869 = vmatprep.mubr.msk.bf16.mxu1 %vm9558_vm1, %v9557_v42 }
0x194a   :  { %v2324_v11 = vpop.f32.mrb[44].mxu1 }
0x194b   :  { %v7847_v13 = vpop.f32.mrb[45].mxu1 }
0x194c   :  { %v2327_v14 = vpop.f32.mrb[46].mxu1 }
0x194d   :  { %v2331_v16 = vpack.c.bf16 %v2327_v14, %v2324_v11  ;;  %v7848_v19 = vpop.f32.mrb[47].mxu1 }
0x194f   :  { %7852 = vmatmul.mubr.msk.bf16.vlgmr.msra.gmra.mrb[48].mxu0 %vm736_vm2, %v2331_v16 }
0x1950   :  { %7863 = vmatprep.mubr.msk.bf16.mxu0 %vm9558_vm1, %v9557_v42 }
0x1952   :  { %v2428_v20 = vpop.f32.mrb[48].mxu1 }
0x1953   :  { %v2429_v57 = vadd.f32 %v8852_v63, %v2428_v20  ;;  %v7859_v52 = vpop.f32.mrb[49].mxu1  ;;  %v8513_v63 = vld [vmem:[%s11119_s21 + $0x38] sm:$0xff]  }
0x1954   :  { %v2431_v22 = vpop.f32.mrb[50].mxu1  ;;  %7868 = vmatpush3.bf16.msra.mxu1 %v8513_v63 }
0x1955   :  { %v2432_v23 = vadd.f32 %v8853_v2, %v2431_v22  ;;  %v7860_v56 = vpop.f32.mrb[51].mxu1  ;;  %v2435_v24 = vsel %vm736_vm2, %v2429_v57, -inf  ;;  %7885 = vmatprep.subr.bf16.mxu1 %v9557_v42  ;;  %v2802_v22 = vld [vmem:[%s11122_s13] sm:$0xff] }
0x1956   :  { %2436 = vmax.xlane.f32.xlu1 %v2435_v24  ;;  %v8515_v56 = vld [vmem:[%s11120_s3 + $0x28] sm:$0xff]   ;;  %v8516_v24 = vld [vmem:[%s11120_s3 + $0x30] sm:$0xff]  }
0x1957   :  { %v2438_v25 = vsel %vm736_vm2, %v2432_v23, -inf }
0x1958   :  { %2439 = vmax.xlane.f32.xlu0 %v2438_v25  ;;  %v8517_v25 = vld [vmem:[%s11120_s3 + $0x38] sm:$0xff]  }
0x19e3   :  { %v2437_v26 = vpop.xlane.xlu1 %2436 }
0x19e4   :  { %v2441_v27 = vsub.f32 %v2429_v57, %v2437_v26  ;;  %v2816_v26 = vld [vmem:[%s11123_s26] sm:$0xff] }
0x19e5   :  { %v2440_v28 = vpop.xlane.xlu0 %2439 }
0x19e6   :  { %v2443_v29 = vmul.f32 1.442695, %v2441_v27  ;;  %v2442_v30 = vsub.f32 %v2432_v23, %v2440_v28  ;;  %v8514_v23 = vld [vmem:[%s11120_s3 + $0x20] sm:$0xff]   ;;  %v2817_v27 = vld [vmem:[%s11123_s26 + $0x8] sm:$0xff] }
0x19e7   :  { %v8352_v28 = vpack.c.bf16 %v2817_v27, %v2816_v26 }
0x19e8   :  { %8682 = vpow2.f32 %v2443_v29  ;;  %v2445_v31 = vmul.f32 1.442695, %v2442_v30 }
0x19ea   :  { %8684 = vpow2.f32 %v2445_v31 }
0x19f2   :  { %v8683_v33 = vpop.eup %8682 }
0x19f3   :  { %v2447_v34 = vsel %vm736_vm2, %v8683_v33, 0.0 }
0x19f4   :  { %v8685_v17 = vpop.eup %8684  ;;  %2448 = vadd.xlane.f32.xlu0 %v2447_v34 }
0x19f5   :  { %v2450_v36 = vsel %vm736_vm2, %v8685_v17, 0.0 }
0x19f6   :  { %2451 = vadd.xlane.f32.xlu1 %v2450_v36 }
0x1a0a   :  { %2458 = vrot.lane.b32.xlu0 %v10257_v8, %s9562_s16 }
0x1a0e   :  { %2810 = vperm.xlu0 %8469, %v2803_v10   ;;  %v2831_v10 = vld [vmem:[%s11123_s26 + $0x78] sm:$0xff] }
0x1a22   :  { %v2375_v37 = vpop.f32.mrb[48].mxu0 }
0x1a23   :  { %v2382_v21 = vadd.f32 %v2375_v37, %v10318_v32  ;;  %v7853_v38 = vpop.f32.mrb[49].mxu0  ;;  %v7245_v37 = vld [vmem:[#allocation12 + $0x1] ss:$0 sm:$0xff] }
0x1a24   :  { %v2378_v2 = vpop.f32.mrb[50].mxu0 }
0x1a25   :  { %v2383_v39 = vadd.f32 %v2378_v2, %v10320_v35  ;;  %v7854_v41 = vpop.f32.mrb[51].mxu0 }
0x1a81   :  { %v2449_v44 = vpop.xlane.xlu0 %2448 }
0x1a82   :  { %8686 = vrcp.f32 %v2449_v44  ;;  %v2805_v44 = vand.u32 127, %v636_v40  ;;  %v9563_v40 = vmov 1.0  }
0x1a83   :  { %v2452_v46 = vpop.xlane.xlu1 %2451 }
0x1a84   :  { %8688 = vrcp.f32 %v2452_v46  ;;  %v2818_v46 = vld [vmem:[%s11123_s26 + $0x10] sm:$0xff] }
0x1a85   :  { %v2459_v47 = vpop.permute.xlu0 %2458 }
0x1a86   :  { %7862 = vmatpush3.bf16.msra.mxu0 %v2459_v47  ;;  %v2819_v47 = vld [vmem:[%s11123_s26 + $0x18] sm:$0xff] }
0x1a87   :  { %7873 = vmatprep.subr.bf16.mxu0 %v9557_v42 }
0x1a8c   :  { %v8687_v8 = vpop.eup %8686 }
0x1a8d   :  { %v2455_v49 = vmul.f32 %v8687_v8, %v8683_v33 }
0x1a8e   :  { %v8689_v48 = vpop.eup %8688 }
0x1a8f   :  { %v2456_v50 = vmul.f32 %v8689_v48, %v8685_v17 }
0x1a91   :  { %v2457_v51 = vpack.c.bf16 %v2456_v50, %v2455_v49 }
0x1a93   :  { %7864 = vmatmul.mubr.msk.bf16.vlgmr.msra.gmra.mrb[52].mxu0 %vm736_vm2, %v2457_v51  ;;  %v8356_v51 = vpack.c.bf16 %v2819_v47, %v2818_v46 }
0x1a94   :  { %7881 = vmatprep.mubr.msk.bf16.mxu0 %vm9558_vm1, %v9557_v42  ;;  %7874 = vmatpush3.bf16.msra.mxu0 %v8514_v23  ;;  %v7247_v23 = vld [vmem:[#allocation15 + $0x1] ss:$0 sm:$0xff] }
0x1a95   :  { %7875 = vmatprep.subr.bf16.mxu0 %v9557_v42 }
0x1a98   :  { %7876 = vmatpush3.bf16.msra.mxu0 %v8515_v56 }
0x1a99   :  { %7877 = vmatprep.subr.bf16.mxu0 %v9557_v42 }
0x1a9c   :  { %7878 = vmatpush3.bf16.msra.mxu0 %v8516_v24 }
0x1a9d   :  { %7879 = vmatprep.subr.bf16.mxu0 %v9557_v42 }
0x1aa0   :  { %7880 = vmatpush3.bf16.msra.mxu0 %v8517_v25 }
0x1aa1   :  { %8353 = vmatprep.subr.bf16.mxu0 %v8352_v28 }
0x1b66   :  { %v2498_v32 = vpop.f32.mrb[52].mxu0 }
0x1b67   :  { %v7865_v35 = vpop.f32.mrb[53].mxu0 }
0x1b68   :  { %v2501_v53 = vpop.f32.mrb[54].mxu0  ;;  %v2821_v35 = vld [vmem:[%s11123_s26 + $0x28] sm:$0xff] }
0x1b69   :  { %v2505_v54 = vpack.c.bf16 %v2501_v53, %v2498_v32  ;;  %v7866_v55 = vpop.f32.mrb[55].mxu0  ;;  %v2820_v32 = vld [vmem:[%s11123_s26 + $0x20] sm:$0xff] }
0x1b6a   :  { %v8360_v53 = vpack.c.bf16 %v2821_v35, %v2820_v32  ;;  %v2823_v55 = vld [vmem:[%s11123_s26 + $0x38] sm:$0xff] }
0x1b6b   :  { %7870 = vmatmul.mubr.msk.bf16.vlgmr.msra.gmra.mrb[52].mxu1 %vm736_vm2, %v2505_v54  ;;  %v2822_v54 = vld [vmem:[%s11123_s26 + $0x30] sm:$0xff] }
0x1b6c   :  { %7901 = vmatprep.mubr.msk.bf16.mxu1 %vm9558_vm1, %v9557_v42  ;;  %v8529_v32 = vld [vmem:[%s11124_s1 + $0x10] ss:$8 sps:$4 sm:$0xff]  }
0x1c3e   :  { %v2549_v59 = vpop.f32.mrb[52].mxu1 }
0x1c3f   :  { %v2556_v60 = vadd.f32 %v2549_v59, %v2382_v21  ;;  %v7871_v61 = vpop.f32.mrb[53].mxu1  ;;  %v2824_v59 = vld [vmem:[%s11123_s26 + $0x40] sm:$0xff] }
0x1c40   :  { %v2552_v62 = vpop.f32.mrb[54].mxu1 }
0x1c41   :  { %v2564_v0 = vadd.f32 %v7244_v58, %v2556_v60  ;;  %v2557_v1 = vadd.f32 %v2552_v62, %v2383_v39  ;;  %v7872_v3 = vpop.f32.mrb[55].mxu1  ;;  %v7246_v39 = vld [vmem:[#allocation13 + $0x1] ss:$0 sm:$0xff]  ;;  %v2826_v62 = vld [vmem:[%s11123_s26 + $0x50] sm:$0xff] }
0x1c42   :  { %v2825_v60 = vld [vmem:[%s11123_s26 + $0x48] sm:$0xff]  ;;  %v2828_v3 = vld [vmem:[%s11123_s26 + $0x60] sm:$0xff] }
0x1c43   :  { %v10366_v4 = vadd.f32 %v2564_v0, %v10227_v12  ;;  %v2565_v5 = vadd.f32 %v7244_v58, %v2557_v1  ;;  %v8364_v58 = vpack.c.bf16 %v2823_v55, %v2822_v54  ;;  %v8368_v61 = vpack.c.bf16 %v2825_v60, %v2824_v59  ;;  %v2827_v0 = vld [vmem:[%s11123_s26 + $0x58] sm:$0xff]  ;;  %v2910_v55 = vld [vmem:[%s11125_s2 + $0x8] sm:$0xff] }
0x1c44   :  { %v8372_v1 = vpack.c.bf16 %v2827_v0, %v2826_v62  ;;  %v8532_v59 = vld [vmem:[%s11124_s1 + $0x20] ss:$8 sps:$4 sm:$0xff]   ;;  %v8537_v60 = vld [vmem:[%s11124_s1 + $0x34] ss:$8 sps:$4 sm:$0xff]   ;;  %v8535_v0 = vld [vmem:[%s11124_s1 + $0x30] ss:$8 sps:$4 sm:$0xff]  }
0x1c45   :  { %v10369_v6 = vadd.f32 %v2565_v5, %v10230_v15  ;;  %v2568_v9 = vsel %vm590_vm0, %v10366_v4, 0.0  ;;  %v2829_v5 = vld [vmem:[%s11123_s26 + $0x68] sm:$0xff] }
0x1c46   :  { %2569 = vadd.xlane.f32.xlu1 %v2568_v9  ;;  %v8376_v9 = vpack.c.bf16 %v2829_v5, %v2828_v3  ;;  %v7253_v3 = vld [vmem:[#allocation16 + $0x1] ss:$0 sm:$0xff] }
0x1c47   :  { %v2571_v7 = vsel %vm590_vm0, %v10369_v6, 0.0 }
0x1c4a   :  { %2572 = vadd.xlane.f32.xlu1 %v2571_v7  ;;  %v2830_v7 = vld [vmem:[%s11123_s26 + $0x70] sm:$0xff] }
0x1cd3   :  { %v2570_v11 = vpop.xlane.xlu1 %2569 }
0x1cd4   :  { %v2574_v13 = vmul.f32 0.015625, %v2570_v11  ;;  %v8380_v11 = vpack.c.bf16 %v2831_v10, %v2830_v7 }
0x1cd6   :  { %v2576_v12 = vsub.f32 %v10366_v4, %v2574_v13  ;;  %v2811_v13 = vpop.permute.xlu0 %2810 }
0x1cd7   :  { %v2573_v14 = vpop.xlane.xlu1 %2572  ;;  %vm2813_vm4 = vcmp.eq.s32.totalorder %v2811_v13, %v2805_v44 }
0x1cd8   :  { %v2575_v15 = vmul.f32 0.015625, %v2573_v14  ;;  %v2578_v16 = vmul.f32 %v2576_v12, %v2576_v12  ;;  %v8519_v14 = vld [vmem:[%s11121_s23 + $0x48] sm:$0xff]  }
0x1cda   :  { %v2577_v19 = vsub.f32 %v10369_v6, %v2575_v15  ;;  %v2580_v20 = vsel %vm590_vm0, %v2578_v16, 0.0  ;;  %v8520_v15 = vld [vmem:[%s11121_s23 + $0x50] sm:$0xff]   ;;  %v8521_v16 = vld [vmem:[%s11121_s23 + $0x58] sm:$0xff]  }
0x1cdb   :  { %2581 = vadd.xlane.f32.xlu1 %v2580_v20  ;;  %v8523_v20 = vld [vmem:[%s11121_s23 + $0x68] sm:$0xff]  }
0x1cdc   :  { %v2579_v57 = vmul.f32 %v2577_v19, %v2577_v19 }
0x1cde   :  { %v2583_v52 = vsel %vm590_vm0, %v2579_v57, 0.0  ;;  %v8524_v57 = vld [vmem:[%s11121_s23 + $0x70] sm:$0xff]  }
0x1cdf   :  { %2584 = vadd.xlane.f32.xlu1 %v2583_v52  ;;  %v8525_v52 = vld [vmem:[%s11121_s23 + $0x78] sm:$0xff]  }
0x1cf0   :  { %2807 = vperm.xlu1 %8468, %v2802_v22   ;;  %v8528_v22 = vld [vmem:[%s11124_s1 + $0x4] ss:$8 sps:$4 sm:$0xff]  }
0x1d68   :  { %v2582_v29 = vpop.xlane.xlu1 %2581 }
0x1d69   :  { %v2586_v30 = vmul.f32 0.015625, %v2582_v29 }
0x1d6b   :  { %v2588_v31 = vadd.f32 1e-12, %v2586_v30 }
0x1d6c   :  { %v2585_v33 = vpop.xlane.xlu1 %2584 }
0x1d6d   :  { %8690 = vrsqrt.f32 %v2588_v31  ;;  %v2587_v34 = vmul.f32 0.015625, %v2585_v33 }
0x1d6f   :  { %v2589_v17 = vadd.f32 1e-12, %v2587_v34 }
0x1d70   :  { %v2808_v8 = vpop.permute.xlu1 %2807 }
0x1d71   :  { %8692 = vrsqrt.f32 %v2589_v17  ;;  %vm2812_vm3 = vcmp.eq.s32.totalorder %v2808_v8, %v2805_v44 }
0x1d77   :  { %v8691_v36 = vpop.eup %8690 }
0x1d78   :  { %v2592_v63 = vmul.f32 %v8691_v36, %v2576_v12  ;;  %v8518_v12 = vld [vmem:[%s11121_s23 + $0x40] sm:$0xff]  }
0x1d79   :  { %7886 = vmatpush3.bf16.msra.mxu1 %v8518_v12 }
0x1d7a   :  { %v2600_v38 = vmul.f32 %v7245_v37, %v2592_v63  ;;  %7887 = vmatprep.subr.bf16.mxu1 %v9557_v42 }
0x1d7b   :  { %v8693_v21 = vpop.eup %8692 }
0x1d7c   :  { %v2593_v2 = vmul.f32 %v8693_v21, %v2577_v19  ;;  %v2608_v48 = vadd.f32 %v7246_v39, %v2600_v38  ;;  %v8522_v19 = vld [vmem:[%s11121_s23 + $0x60] sm:$0xff]  }
0x1d7d   :  { %7888 = vmatpush3.bf16.msra.mxu1 %v8519_v14 }
0x1d7e   :  { %v2601_v41 = vmul.f32 %v7245_v37, %v2593_v2  ;;  %7889 = vmatprep.subr.bf16.mxu1 %v9557_v42 }
0x1d80   :  { %v2609_v49 = vadd.f32 %v7246_v39, %v2601_v41 }
0x1d81   :  { %7890 = vmatpush3.bf16.msra.mxu1 %v8520_v15 }
0x1d82   :  { %v2610_v50 = vpack.c.bf16 %v2609_v49, %v2608_v48  ;;  %7891 = vmatprep.subr.bf16.mxu1 %v9557_v42  ;;  %v8526_v48 = vld [vmem:[%s11124_s1] ss:$8 sps:$4 sm:$0xff]  }
0x1d84   :  { %7882 = vmatmul.mubr.msk.bf16.vlgmr.msra.gmra.mrb[56].mxu0 %vm590_vm0, %v2610_v50  ;;  %v8531_v50 = vld [vmem:[%s11124_s1 + $0x14] ss:$8 sps:$4 sm:$0xff]  }
0x1d85   :  { %8355 = vmatpush3.bf16.msra.mxu0 %v8352_v28  ;;  %7937 = vmatprep.mubr.msk.f32.mxu0 %vm2812_vm3, %v9563_v40 }
0x1d86   :  { %8357 = vmatprep.subr.bf16.mxu0 %v8356_v51  ;;  %7892 = vmatpush3.bf16.msra.mxu1 %v8521_v16  ;;  %v2921_v16 = vld [vmem:[#allocation18] sm:$0x3] }
0x1d87   :  { %7893 = vmatprep.subr.bf16.mxu1 %v9557_v42 }
0x1d89   :  { %8359 = vmatpush3.bf16.msra.mxu0 %v8356_v51 }
0x1d8a   :  { %8361 = vmatprep.subr.bf16.mxu0 %v8360_v53  ;;  %7894 = vmatpush3.bf16.msra.mxu1 %v8522_v19  ;;  %v2995_v19 = vrot.slane %v2921_v16, %v10057_v43 }
0x1d8b   :  { %7895 = vmatprep.subr.bf16.mxu1 %v9557_v42 }
0x1d8d   :  { %8363 = vmatpush3.bf16.msra.mxu0 %v8360_v53 }
0x1d8e   :  { %8365 = vmatprep.subr.bf16.mxu0 %v8364_v58  ;;  %7896 = vmatpush3.bf16.msra.mxu1 %v8523_v20 }
0x1d8f   :  { %7897 = vmatprep.subr.bf16.mxu1 %v9557_v42 }
0x1d91   :  { %8367 = vmatpush3.bf16.msra.mxu0 %v8364_v58  ;;  %v2909_v58 = vld [vmem:[%s11125_s2] sm:$0xff] }
0x1d92   :  { %8369 = vmatprep.subr.bf16.mxu0 %v8368_v61  ;;  %7898 = vmatpush3.bf16.msra.mxu1 %v8524_v57  ;;  %v2999_v57 = vrot.slane %v2921_v16, %v10059_v45 }
0x1d93   :  { %7899 = vmatprep.subr.bf16.mxu1 %v9557_v42 }
0x1d95   :  { %8371 = vmatpush3.bf16.msra.mxu0 %v8368_v61 }
0x1d96   :  { %8373 = vmatprep.subr.bf16.mxu0 %v8372_v1  ;;  %7900 = vmatpush3.bf16.msra.mxu1 %v8525_v52 }
0x1d97   :  { %3045 = vmatprep.subr.bf16.mxu1 %v8528_v22 }
0x1d99   :  { %8375 = vmatpush3.bf16.msra.mxu0 %v8372_v1 }
0x1d9a   :  { %8377 = vmatprep.subr.bf16.mxu0 %v8376_v9 }
0x1d9d   :  { %8379 = vmatpush3.bf16.msra.mxu0 %v8376_v9 }
0x1d9e   :  { %8381 = vmatprep.subr.bf16.mxu0 %v8380_v11 }
0x1da1   :  { %8383 = vmatpush3.bf16.msra.mxu0 %v8380_v11 }
0x1da2   :  { %7940 = vmatprep.subr.bf16.mxu0 %v9557_v42 }
0x1da4   :  { %7938 = vmatmul.mubr.msk.f32.vlgmr.msra.gmra.mrb[60].mxu0 %vm2813_vm4, %v9563_v40  ;;  %v8534_v40 = vld [vmem:[%s11124_s1 + $0x24] ss:$8 sps:$4 sm:$0xff]  }
0x1da5   :  { %7942 = vmatprep.mubr.msk.bf16.mxu0 %vm9558_vm1, %v9557_v42 }
0x1e57   :  { %v2678_v56 = vpop.f32.mrb[56].mxu0 }
0x1e58   :  { %v2679_v24 = vadd.f32 %v7247_v23, %v2678_v56  ;;  %v7883_v25 = vpop.f32.mrb[57].mxu0 }
0x1e59   :  { %v2681_v26 = vpop.f32.mrb[58].mxu0 }
0x1e5a   :  { %v2687_v27 = vmul.f32 %v2679_v24, %v2679_v24  ;;  %v2682_v28 = vadd.f32 %v7247_v23, %v2681_v26  ;;  %v7884_v29 = vpop.f32.mrb[59].mxu0  ;;  %v2685_v41 = vmul.f32 0.5, %v2679_v24 }
0x1e5c   :  { %v2689_v30 = vmul.f32 %v2687_v27, %v2679_v24  ;;  %v2688_v31 = vmul.f32 %v2682_v28, %v2682_v28  ;;  %v2686_v44 = vmul.f32 0.5, %v2682_v28 }
0x1e5e   :  { %v2691_v33 = vmul.f32 0.044715, %v2689_v30  ;;  %v2690_v34 = vmul.f32 %v2688_v31, %v2682_v28 }
0x1e60   :  { %v2693_v17 = vadd.f32 %v2691_v33, %v2679_v24  ;;  %v2692_v36 = vmul.f32 0.044715, %v2690_v34  ;;  %v10474_v33 = vld [vmem:[#allocation2] sm:$0xff] }
0x1e62   :  { %v2695_v63 = vmul.f32 0.7978846, %v2693_v17  ;;  %v2694_v37 = vadd.f32 %v2692_v36, %v2682_v28  ;;  %v10476_v17 = vld [vmem:[#allocation2 + $0x8] sm:$0xff] }
0x1e64   :  { %8694 = vtanh.f32 %v2695_v63  ;;  %v2696_v21 = vmul.f32 0.7978846, %v2694_v37 }
0x1e66   :  { %8696 = vtanh.f32 %v2696_v21 }
0x1e6e   :  { %v8695_v38 = vpop.eup %8694 }
0x1e6f   :  { %v2699_v2 = vadd.f32 1.0, %v8695_v38 }
0x1e70   :  { %v8697_v39 = vpop.eup %8696 }
0x1e71   :  { %v2700_v46 = vadd.f32 1.0, %v8697_v39  ;;  %v2701_v47 = vmul.f32 %v2699_v2, %v2685_v41 }
0x1e73   :  { %v2702_v8 = vmul.f32 %v2700_v46, %v2686_v44 }
0x1e75   :  { %v2703_v49 = vpack.c.bf16 %v2702_v8, %v2701_v47 }
0x1e77   :  { %7902 = vmatmul.mubr.bf16.vlgmr.msra.gmra.mrb[56].mxu1 %v2703_v49  ;;  %v7939_v51 = vpop.f32.mrb[60].mxu0 }
0x1e78   :  { %3046 = vmatpush1.bf16.msra.mxu1 %v8526_v48  ;;  %v2898_v35 = vpop.f32.mrb[61].mxu0  ;;  %3077 = vmatprep.mubr.bf16.mxu1 %v9556_v18  ;;  %v2908_v53 = vmul.f32 8.0, %v7939_v51 }
0x1e79   :  { %3047 = vmatprep.subr.bf16.mxu1 %v8531_v50  ;;  %v2907_v54 = vmul.f32 8.0, %v2898_v35 }
0x1e7a   :  { %v10434_v61 = vadd.f32 %v2910_v55, %v2908_v53 }
0x1e7b   :  { %v10436_v62 = vadd.f32 %v2909_v58, %v2907_v54 }
0x1e7c   :  { %3048 = vmatpush1.bf16.msra.mxu1 %v8529_v32 }
0x1e7d   :  { %3049 = vmatprep.subr.bf16.mxu1 %v8534_v40  ;;  %v2990_v1 = vpack.c.bf16 %v10434_v61, %v10436_v62 }
0x1e80   :  { %3050 = vmatpush1.bf16.msra.mxu1 %v8532_v59 }
0x1e81   :  { %3051 = vmatprep.subr.bf16.mxu1 %v8537_v60 }
0x1e84   :  { %3052 = vmatpush1.bf16.msra.mxu1 %v8535_v0 }
0x1e85   :  { %7946 = vmatprep.subr.bf16.mxu1 %v9557_v42 }
0x1e87   :  { %7272 = vmatmul.mubr.msk.bf16.vlgmr.msra.gmra.mrb[60].mxu1 %vm590_vm0, %v2990_v1 }
0x1e88   :  { %7948 = vmatprep.mubr.msk.bf16.mxu1 %vm9558_vm1, %v9557_v42 }
0x1f4a   :  { %v2792_v5 = vpop.f32.mrb[56].mxu1 }
0x1f4b   :  { %v2793_v9 = vadd.f32 %v7253_v3, %v2792_v5  ;;  %v7903_v7 = vpop.f32.mrb[57].mxu1 }
0x1f4c   :  { %v2795_v10 = vpop.f32.mrb[58].mxu1 }
0x1f4d   :  { %v2796_v11 = vadd.f32 %v7253_v3, %v2795_v10  ;;  %v7904_v13 = vpop.f32.mrb[59].mxu1  ;;  %v2799_v12 = vadd.f32 %v2793_v9, %v10366_v4 }
0x1f4f   :  { %v2800_v14 = vadd.f32 %v2796_v11, %v10369_v6 }
0x1f51   :  { %v10447_v15 = vpack.c.bf16 %v2800_v14, %v2799_v12 }
0x1f5a   :  { %v3079_v20 = vpop.f32.mrb[60].mxu1 }
0x1f5b   :  { %v3081_v52 = vpop.f32.mrb[61].mxu1  ;;  %v3080_v23 = vadd.f32 %v3079_v20, %v2995_v19 }
0x1f5c   :  { %v3083_v22 = vpop.f32.mrb[62].mxu1  ;;  %v3082_v25 = vadd.f32 %v3081_v52, %v2999_v57 }
0x1f5d   :  { %v3084_v56 = vadd.f32 %v3083_v22, %v2995_v19  ;;  %v3085_v24 = vpop.f32.mrb[63].mxu1 }
0x1f5e   :  { %v3086_v26 = vadd.f32 %v3085_v24, %v2999_v57 }
0x1f5f   :  { %v10451_v27 = vpack.c.bf16 %v3084_v56, %v3080_v23 }
0x1f60   :  { %v10453_v4 = vpack.c.bf16 %v3086_v26, %v3082_v25 }
0x1f61   :  { %3208 = vrot.lane.b32.xlu1 %v10451_v27, %s9560_s11  ;;  %3090 = vrot.lane.b32.xlu0 %v10451_v27, %s9548_s17 }
0x1f62   :  { %7947 = vmatpush3.bf16.msra.mxu1 %v10453_v4 }
0x1f63   :  { %7958 = vmatprep.subr.bf16.mxu1 %v9557_v42 }
0x1f65   :  { %3210 = vrot.lane.b32.xlu0 %v10451_v27, %s9559_s4 }
0x1fd3   :  { %v3091_v6 = vpop.permute.xlu0 %3090  ;;  %v3209_v31 = vpop.permute.xlu1 %3208 }
0x1fd4   :  { %v3096_v28 = vsel %vm736_vm2, %v3091_v6, 0 }
0x1fd5   :  { %7941 = vmatpush3.bf16.xpose.msra.mxu0 %v3096_v28 }
0x1fd6   :  { %7952 = vmatprep.subr.bf16.mxu0 %v9557_v42 }
0x1fd7   :  { %v3211_v29 = vpop.permute.xlu0 %3210 }
0x1fd8   :  { %v3216_v30 = vsel %vm736_vm2, %v3211_v29, 0 }
0x1fdc   :  { %7943 = vmatmul.mubr.msk.bf16.vlgmr.msra.gmra.mrb[64].mxu0 %vm736_vm2, %v10451_v27 }
0x1fdd   :  { %7953 = vmatpush3.bf16.xpose.msra.mxu0 %v3216_v30  ;;  %7954 = vmatprep.mubr.msk.bf16.mxu0 %vm9558_vm1, %v9557_v42  ;;  %v8538_v30 = vld [vmem:[%s11126_s14] sm:$0xff]  }
0x1fde   :  { %7964 = vmatprep.subr.bf16.mxu0 %v9557_v42 }
0x1fe4   :  { %7955 = vmatmul.mubr.msk.bf16.vlgmr.msra.gmra.mrb[68].mxu0 %vm736_vm2, %v3209_v31  ;;  %v8539_v31 = vld [vmem:[%s11126_s14 + $0x8] sm:$0xff]  }
0x1fe5   :  { %7966 = vmatprep.mubr.msk.bf16.mxu0 %vm9558_vm1, %v9557_v42  ;;  %7965 = vmatpush3.bf16.msra.mxu0 %v8539_v31 }
0x1fe6   :  { %7976 = vmatprep.subr.bf16.mxu0 %v9557_v42 }
0x20af   :  { %v3132_v34 = vpop.f32.mrb[64].mxu0 }
0x20b0   :  { %v3133_v36 = vadd.f32 %v3132_v34, %v10474_v33  ;;  %v7944_v63 = vpop.f32.mrb[65].mxu0 }
0x20b1   :  { %v3135_v37 = vpop.f32.mrb[66].mxu0 }
0x20b2   :  { %v3136_v21 = vadd.f32 %v3135_v37, %v10476_v17  ;;  %v7945_v38 = vpop.f32.mrb[67].mxu0  ;;  %v3139_v2 = vsel %vm736_vm2, %v3133_v36, -inf }
0x20b3   :  { %3140 = vmax.xlane.f32.xlu0 %v3139_v2 }
0x20b4   :  { %v3142_v39 = vsel %vm736_vm2, %v3136_v21, -inf }
0x20b5   :  { %3143 = vmax.xlane.f32.xlu1 %v3142_v39 }
0x20b7   :  { %v3252_v41 = vpop.f32.mrb[68].mxu0 }
0x20b8   :  { %v3253_v44 = vadd.f32 %v3252_v41, %v10474_v33  ;;  %v7956_v46 = vpop.f32.mrb[69].mxu0 }
0x20b9   :  { %v3255_v47 = vpop.f32.mrb[70].mxu0 }
0x20ba   :  { %v3256_v8 = vadd.f32 %v3255_v47, %v10476_v17  ;;  %v7957_v48 = vpop.f32.mrb[71].mxu0  ;;  %v3259_v49 = vsel %vm736_vm2, %v3253_v44, -inf }
0x20bb   :  { %3260 = vmax.xlane.f32.xlu0 %v3259_v49 }
0x20bc   :  { %v3262_v50 = vsel %vm736_vm2, %v3256_v8, -inf }
0x20bf   :  { %3263 = vmax.xlane.f32.xlu0 %v3262_v50 }
0x2140   :  { %v3141_v51 = vpop.xlane.xlu0 %3140 }
0x2141   :  { %v3145_v32 = vsub.f32 %v3133_v36, %v3141_v51 }
0x2142   :  { %v3144_v35 = vpop.xlane.xlu1 %3143 }
0x2143   :  { %v3147_v40 = vmul.f32 1.442695, %v3145_v32  ;;  %v3146_v53 = vsub.f32 %v3136_v21, %v3144_v35 }
0x2145   :  { %8698 = vpow2.f32 %v3147_v40  ;;  %v3149_v54 = vmul.f32 1.442695, %v3146_v53 }
0x2147   :  { %8700 = vpow2.f32 %v3149_v54 }
0x2148   :  { %v3261_v55 = vpop.xlane.xlu0 %3260 }
0x2149   :  { %v3265_v58 = vsub.f32 %v3253_v44, %v3261_v55 }
0x214b   :  { %v3267_v59 = vmul.f32 1.442695, %v3265_v58 }
0x214c   :  { %v3264_v60 = vpop.xlane.xlu0 %3263 }
0x214d   :  { %8702 = vpow2.f32 %v3267_v59  ;;  %v3266_v0 = vsub.f32 %v3256_v8, %v3264_v60 }
0x214f   :  { %v8699_v1 = vpop.eup %8698  ;;  %v3269_v3 = vmul.f32 1.442695, %v3266_v0 }
0x2150   :  { %v3151_v5 = vsel %vm736_vm2, %v8699_v1, 0.0 }
0x2151   :  { %v8701_v9 = vpop.eup %8700  ;;  %8704 = vpow2.f32 %v3269_v3  ;;  %3152 = vadd.xlane.f32.xlu1 %v3151_v5 }
0x2152   :  { %v3154_v7 = vsel %vm736_vm2, %v8701_v9, 0.0 }
0x2153   :  { %3155 = vadd.xlane.f32.xlu0 %v3154_v7 }
0x2157   :  { %v8703_v10 = vpop.eup %8702 }
0x2158   :  { %v3271_v11 = vsel %vm736_vm2, %v8703_v10, 0.0 }
0x2159   :  { %3272 = vadd.xlane.f32.xlu1 %v3271_v11 }
0x215b   :  { %v8705_v13 = vpop.eup %8704 }
0x215c   :  { %v3274_v12 = vsel %vm736_vm2, %v8705_v13, 0.0 }
0x215d   :  { %3275 = vadd.xlane.f32.xlu0 %v3274_v12 }
0x216a   :  { %3283 = vrot.lane.b32.xlu1 %v10453_v4, %s9560_s11 }
0x216e   :  { %3431 = vrot.lane.b32.xlu1 %v10451_v27, %s9561_s12 }
0x2173   :  { %3433 = vrot.lane.b32.xlu0 %v10451_v27, %s9541_s7 }
0x21de   :  { %v3153_v14 = vpop.xlane.xlu1 %3152 }
0x21df   :  { %8706 = vrcp.f32 %v3153_v14 }
0x21e0   :  { %v3156_v16 = vpop.xlane.xlu0 %3155 }
0x21e1   :  { %8708 = vrcp.f32 %v3156_v16 }
0x21e6   :  { %v3273_v19 = vpop.xlane.xlu1 %3272 }
0x21e7   :  { %8710 = vrcp.f32 %v3273_v19 }
0x21e9   :  { %v8707_v20 = vpop.eup %8706 }
0x21ea   :  { %v3276_v57 = vpop.xlane.xlu0 %3275  ;;  %v3159_v22 = vmul.f32 %v8707_v20, %v8699_v1  ;;  %v3284_v24 = vpop.permute.xlu1 %3283 }
0x21eb   :  { %v8709_v52 = vpop.eup %8708  ;;  %8712 = vrcp.f32 %v3276_v57 }
0x21ec   :  { %v3160_v23 = vmul.f32 %v8709_v52, %v8701_v9 }
0x21ee   :  { %v3161_v56 = vpack.c.bf16 %v3160_v23, %v3159_v22  ;;  %v3434_v39 = vpop.permute.xlu0 %3433  ;;  %v3432_v8 = vpop.permute.xlu1 %3431 }
0x21ef   :  { %v3439_v47 = vsel %vm736_vm2, %v3434_v39, 0 }
0x21f0   :  { %7949 = vmatmul.mubr.msk.bf16.vlgmr.msra.gmra.mrb[64].mxu1 %vm736_vm2, %v3161_v56 }
0x21f1   :  { %7959 = vmatpush3.bf16.msra.mxu1 %v3284_v24  ;;  %7960 = vmatprep.mubr.msk.bf16.mxu1 %vm9558_vm1, %v9557_v42  ;;  %v8711_v25 = vpop.eup %8710 }
0x21f2   :  { %7970 = vmatprep.subr.bf16.mxu1 %v9557_v42  ;;  %v3279_v6 = vmul.f32 %v8711_v25, %v8703_v10 }
0x21f5   :  { %v8713_v26 = vpop.eup %8712 }
0x21f6   :  { %v3280_v28 = vmul.f32 %v8713_v26, %v8705_v13 }
0x21f8   :  { %v3281_v29 = vpack.c.bf16 %v3280_v28, %v3279_v6 }
0x21fa   :  { %7961 = vmatmul.mubr.msk.bf16.vlgmr.msra.gmra.mrb[68].mxu1 %vm736_vm2, %v3281_v29 }
0x21fb   :  { %7972 = vmatprep.mubr.msk.bf16.mxu1 %vm9558_vm1, %v9557_v42  ;;  %7971 = vmatpush3.bf16.msra.mxu1 %v8538_v30  ;;  %v8540_v30 = vld [vmem:[%s11126_s14 + $0x10] sm:$0xff]  }
0x21fc   :  { %7982 = vmatprep.subr.bf16.mxu1 %v9557_v42 }
0x22c3   :  { %v3200_v34 = vpop.f32.mrb[64].mxu1 }
0x22c4   :  { %v7950_v36 = vpop.f32.mrb[65].mxu1 }
0x22c5   :  { %v3203_v63 = vpop.f32.mrb[66].mxu1 }
0x22c6   :  { %v3207_v37 = vpack.c.bf16 %v3203_v63, %v3200_v34  ;;  %v7951_v21 = vpop.f32.mrb[67].mxu1 }
0x22c8   :  { %7973 = vmatmul.mubr.msk.bf16.vlgmr.msra.gmra.mrb[72].mxu1 %vm736_vm2, %v3207_v37 }
0x22c9   :  { %7984 = vmatprep.mubr.msk.bf16.mxu1 %vm9558_vm1, %v9557_v42 }
0x22cd   :  { %v3323_v38 = vpop.f32.mrb[68].mxu1 }
0x22ce   :  { %v7962_v2 = vpop.f32.mrb[69].mxu1 }
0x22cf   :  { %v3326_v41 = vpop.f32.mrb[70].mxu1 }
0x22d0   :  { %v3330_v44 = vpack.c.bf16 %v3326_v41, %v3323_v38  ;;  %v7963_v46 = vpop.f32.mrb[71].mxu1 }
0x22d2   :  { %7967 = vmatmul.mubr.msk.bf16.vlgmr.msra.gmra.mrb[72].mxu0 %vm736_vm2, %v3330_v44 }
0x22d3   :  { %7977 = vmatpush3.bf16.xpose.msra.mxu0 %v3439_v47  ;;  %7978 = vmatprep.mubr.msk.bf16.mxu0 %vm9558_vm1, %v9557_v42 }
0x22d4   :  { %7988 = vmatprep.subr.bf16.mxu0 %v9557_v42 }
0x22da   :  { %7979 = vmatmul.mubr.msk.bf16.vlgmr.msra.gmra.mrb[76].mxu0 %vm736_vm2, %v3432_v8 }
0x22db   :  { %7990 = vmatprep.mubr.msk.bf16.mxu0 %vm9558_vm1, %v9557_v42  ;;  %7989 = vmatpush3.bf16.msra.mxu0 %v8540_v30 }
0x22dc   :  { %8000 = vmatprep.subr.bf16.mxu0 %v9557_v42 }
0x239b   :  { %v3424_v48 = vpop.f32.mrb[72].mxu1 }
0x239c   :  { %v7974_v49 = vpop.f32.mrb[73].mxu1 }
0x239d   :  { %v3427_v50 = vpop.f32.mrb[74].mxu1 }
0x239e   :  { %v7975_v51 = vpop.f32.mrb[75].mxu1 }
0x23a5   :  { %v3374_v32 = vpop.f32.mrb[72].mxu0 }
0x23a6   :  { %v10518_v35 = vadd.f32 %v3424_v48, %v3374_v32  ;;  %v7968_v40 = vpop.f32.mrb[73].mxu0 }
0x23a7   :  { %v3377_v53 = vpop.f32.mrb[74].mxu0 }
0x23a8   :  { %v10520_v54 = vadd.f32 %v3427_v50, %v3377_v53  ;;  %v7969_v55 = vpop.f32.mrb[75].mxu0 }
0x23a9   :  { %v8541_v55 = vld [vmem:[%s11126_s14 + $0x18] sm:$0xff]  }
0x23ad   :  { %v3475_v58 = vpop.f32.mrb[76].mxu0 }
0x23ae   :  { %v3476_v59 = vadd.f32 %v3475_v58, %v10474_v33  ;;  %v7980_v60 = vpop.f32.mrb[77].mxu0 }
0x23af   :  { %v3478_v0 = vpop.f32.mrb[78].mxu0 }
0x23b0   :  { %v3479_v1 = vadd.f32 %v3478_v0, %v10476_v17  ;;  %v7981_v3 = vpop.f32.mrb[79].mxu0  ;;  %v3482_v5 = vsel %vm736_vm2, %v3476_v59, -inf }
0x23b1   :  { %3483 = vmax.xlane.f32.xlu1 %v3482_v5 }
0x23b2   :  { %v3485_v9 = vsel %vm736_vm2, %v3479_v1, -inf }
0x23b3   :  { %3486 = vmax.xlane.f32.xlu0 %v3485_v9 }
0x243e   :  { %v3484_v7 = vpop.xlane.xlu1 %3483 }
0x243f   :  { %v3488_v10 = vsub.f32 %v3476_v59, %v3484_v7 }
0x2440   :  { %v3487_v11 = vpop.xlane.xlu0 %3486 }
0x2441   :  { %v3490_v13 = vmul.f32 1.442695, %v3488_v10  ;;  %v3489_v12 = vsub.f32 %v3479_v1, %v3487_v11 }
0x2443   :  { %8714 = vpow2.f32 %v3490_v13  ;;  %v3492_v14 = vmul.f32 1.442695, %v3489_v12 }
0x2445   :  { %8716 = vpow2.f32 %v3492_v14 }
0x244d   :  { %v8715_v16 = vpop.eup %8714 }
0x244e   :  { %v3494_v19 = vsel %vm736_vm2, %v8715_v16, 0.0 }
0x244f   :  { %v8717_v20 = vpop.eup %8716  ;;  %3495 = vadd.xlane.f32.xlu0 %v3494_v19  ;;  %v8542_v19 = vld [vmem:[#allocation27] sm:$0xff]  }
0x2450   :  { %v3497_v57 = vsel %vm736_vm2, %v8717_v20, 0.0 }
0x2451   :  { %3498 = vadd.xlane.f32.xlu1 %v3497_v57  ;;  %v8543_v57 = vld [vmem:[#allocation27 + $0x8] sm:$0xff]  }
0x2462   :  { %3607 = vrot.lane.b32.xlu1 %v10451_v27, %s9525_s28 }
0x2465   :  { %3505 = vrot.lane.b32.xlu0 %v10453_v4, %s9561_s12 }
0x2466   :  { %3605 = vrot.lane.b32.xlu1 %v10451_v27, %s9562_s16 }
0x24dc   :  { %v3496_v52 = vpop.xlane.xlu0 %3495 }
0x24dd   :  { %8718 = vrcp.f32 %v3496_v52  ;;  %v8544_v52 = vld [vmem:[#allocation27 + $0x10] sm:$0xff]  }
0x24de   :  { %v3499_v22 = vpop.xlane.xlu1 %3498 }
0x24df   :  { %8720 = vrcp.f32 %v3499_v22  ;;  %v8545_v22 = vld [vmem:[#allocation27 + $0x18] sm:$0xff]  }
0x24e0   :  { %v3506_v23 = vpop.permute.xlu0 %3505 }
0x24e1   :  { %7983 = vmatpush3.bf16.msra.mxu1 %v3506_v23  ;;  %v7289_v23 = vld [vmem:[#allocation19] ss:$0 sm:$0xff] }
0x24e2   :  { %7994 = vmatprep.subr.bf16.mxu1 %v9557_v42  ;;  %v3608_v6 = vpop.permute.xlu1 %3607 }
0x24e3   :  { %v3613_v29 = vsel %vm736_vm2, %v3608_v6, 0 }
0x24e6   :  { %v3606_v27 = vpop.permute.xlu1 %3605 }
0x24e7   :  { %v8719_v56 = vpop.eup %8718 }
0x24e8   :  { %v3502_v25 = vmul.f32 %v8719_v56, %v8715_v16 }
0x24e9   :  { %v8721_v24 = vpop.eup %8720 }
0x24ea   :  { %v3503_v26 = vmul.f32 %v8721_v24, %v8717_v20 }
0x24ec   :  { %v3504_v28 = vpack.c.bf16 %v3503_v26, %v3502_v25 }
0x24ee   :  { %7985 = vmatmul.mubr.msk.bf16.vlgmr.msra.gmra.mrb[76].mxu1 %vm736_vm2, %v3504_v28 }
0x24ef   :  { %7995 = vmatpush3.bf16.xpose.msra.mxu1 %v3613_v29  ;;  %7996 = vmatprep.mubr.msk.bf16.mxu1 %vm9558_vm1, %v9557_v42 }
0x24f0   :  { %8006 = vmatprep.subr.bf16.mxu1 %v9557_v42 }
0x24f6   :  { %7997 = vmatmul.mubr.msk.bf16.vlgmr.msra.gmra.mrb[80].mxu1 %vm736_vm2, %v3606_v27 }
0x24f7   :  { %8008 = vmatprep.mubr.msk.bf16.mxu1 %vm9558_vm1, %v9557_v42  ;;  %8007 = vmatpush3.bf16.msra.mxu1 %v8541_v55 }
0x24f8   :  { %8024 = vmatprep.subr.bf16.mxu1 %v9557_v42 }
0x25c1   :  { %v3545_v31 = vpop.f32.mrb[76].mxu1 }
0x25c2   :  { %v7986_v34 = vpop.f32.mrb[77].mxu1 }
0x25c3   :  { %v3548_v36 = vpop.f32.mrb[78].mxu1 }
0x25c4   :  { %v3552_v63 = vpack.c.bf16 %v3548_v36, %v3545_v31  ;;  %v7987_v37 = vpop.f32.mrb[79].mxu1 }
0x25c6   :  { %7991 = vmatmul.mubr.msk.bf16.vlgmr.msra.gmra.mrb[80].mxu0 %vm736_vm2, %v3552_v63  ;;  %v7298_v63 = vld [vmem:[#allocation28] ss:$0 sm:$0xff] }
0x25c7   :  { %8002 = vmatprep.mubr.msk.bf16.mxu0 %vm9558_vm1, %v9557_v42 }
0x25c9   :  { %v3649_v21 = vpop.f32.mrb[80].mxu1 }
0x25ca   :  { %v3650_v38 = vadd.f32 %v3649_v21, %v10474_v33  ;;  %v7998_v2 = vpop.f32.mrb[81].mxu1 }
0x25cb   :  { %v3652_v39 = vpop.f32.mrb[82].mxu1 }
0x25cc   :  { %v3653_v41 = vadd.f32 %v3652_v39, %v10476_v17  ;;  %v7999_v44 = vpop.f32.mrb[83].mxu1  ;;  %v3656_v46 = vsel %vm736_vm2, %v3650_v38, -inf }
0x25cd   :  { %3657 = vmax.xlane.f32.xlu0 %v3656_v46 }
0x25ce   :  { %v3659_v47 = vsel %vm736_vm2, %v3653_v41, -inf }
0x25cf   :  { %3660 = vmax.xlane.f32.xlu1 %v3659_v47 }
0x25e0   :  { %3679 = vrot.lane.b32.xlu1 %v10453_v4, %s9562_s16 }
0x265a   :  { %v3658_v8 = vpop.xlane.xlu0 %3657 }
0x265b   :  { %v3662_v48 = vsub.f32 %v3650_v38, %v3658_v8 }
0x265c   :  { %v3661_v49 = vpop.xlane.xlu1 %3660 }
0x265d   :  { %v3664_v50 = vmul.f32 1.442695, %v3662_v48  ;;  %v3663_v33 = vsub.f32 %v3653_v41, %v3661_v49 }
0x265f   :  { %8722 = vpow2.f32 %v3664_v50  ;;  %v3666_v51 = vmul.f32 1.442695, %v3663_v33 }
0x2660   :  { %v3680_v32 = vpop.permute.xlu1 %3679 }
0x2661   :  { %8724 = vpow2.f32 %v3666_v51  ;;  %8001 = vmatpush3.bf16.msra.mxu0 %v3680_v32  ;;  %v8546_v32 = vld [vmem:[#allocation24] sm:$0xff]  }
0x2662   :  { %8012 = vmatprep.subr.bf16.mxu0 %v9557_v42 }
0x2669   :  { %v8723_v17 = vpop.eup %8722 }
0x266a   :  { %v3668_v40 = vsel %vm736_vm2, %v8723_v17, 0.0 }
0x266b   :  { %v8725_v53 = vpop.eup %8724  ;;  %3669 = vadd.xlane.f32.xlu0 %v3668_v40  ;;  %v8548_v40 = vld [vmem:[#allocation24 + $0x10] sm:$0xff]  }
0x266c   :  { %v3671_v4 = vsel %vm736_vm2, %v8725_v53, 0.0 }
0x266f   :  { %3672 = vadd.xlane.f32.xlu0 %v3671_v4 }
0x2699   :  { %v3596_v58 = vpop.f32.mrb[80].mxu0 }
0x269a   :  { %v3603_v59 = vadd.f32 %v3596_v58, %v10518_v35  ;;  %v7992_v60 = vpop.f32.mrb[81].mxu0 }
0x269b   :  { %v3599_v0 = vpop.f32.mrb[82].mxu0 }
0x269c   :  { %v3604_v1 = vadd.f32 %v3599_v0, %v10520_v54  ;;  %v7993_v3 = vpop.f32.mrb[83].mxu0 }
0x26f8   :  { %v3670_v5 = vpop.xlane.xlu0 %3669 }
0x26f9   :  { %8726 = vrcp.f32 %v3670_v5  ;;  %v7290_v5 = vld [vmem:[#allocation21] ss:$0 sm:$0xff] }
0x26fc   :  { %v3673_v9 = vpop.xlane.xlu0 %3672 }
0x26fd   :  { %8728 = vrcp.f32 %v3673_v9 }
0x2703   :  { %v8727_v7 = vpop.eup %8726 }
0x2704   :  { %v3676_v11 = vmul.f32 %v8727_v7, %v8723_v17  ;;  %v8547_v17 = vld [vmem:[#allocation24 + $0x8] sm:$0xff]  }
0x2707   :  { %v8729_v10 = vpop.eup %8728 }
0x2708   :  { %v3677_v13 = vmul.f32 %v8729_v10, %v8725_v53  ;;  %v8549_v53 = vld [vmem:[#allocation24 + $0x18] sm:$0xff]  }
0x270a   :  { %v3678_v12 = vpack.c.bf16 %v3677_v13, %v3676_v11  ;;  %v7291_v11 = vld [vmem:[#allocation22] ss:$0 sm:$0xff] }
0x270c   :  { %8003 = vmatmul.mubr.msk.bf16.vlgmr.msra.gmra.mrb[84].mxu0 %vm736_vm2, %v3678_v12 }
0x270d   :  { %8020 = vmatprep.mubr.msk.bf16.mxu0 %vm9558_vm1, %v9557_v42  ;;  %8013 = vmatpush3.bf16.msra.mxu0 %v8546_v32 }
0x270e   :  { %8014 = vmatprep.subr.bf16.mxu0 %v9557_v42 }
0x2711   :  { %8015 = vmatpush3.bf16.msra.mxu0 %v8547_v17 }
0x2712   :  { %8016 = vmatprep.subr.bf16.mxu0 %v9557_v42 }
0x2715   :  { %8017 = vmatpush3.bf16.msra.mxu0 %v8548_v40 }
0x2716   :  { %8018 = vmatprep.subr.bf16.mxu0 %v9557_v42 }
0x2719   :  { %8019 = vmatpush3.bf16.msra.mxu0 %v8549_v53 }
0x271a   :  { %8036 = vmatprep.subr.bf16.mxu0 %v9557_v42 }
0x27df   :  { %v3719_v35 = vpop.f32.mrb[84].mxu0 }
0x27e0   :  { %v8004_v14 = vpop.f32.mrb[85].mxu0 }
0x27e1   :  { %v3722_v16 = vpop.f32.mrb[86].mxu0 }
0x27e2   :  { %v3726_v54 = vpack.c.bf16 %v3722_v16, %v3719_v35  ;;  %v8005_v20 = vpop.f32.mrb[87].mxu0 }
0x27e4   :  { %8009 = vmatmul.mubr.msk.bf16.vlgmr.msra.gmra.mrb[84].mxu1 %vm736_vm2, %v3726_v54 }
0x27e5   :  { %8025 = vmatpush3.bf16.msra.mxu1 %v8542_v19  ;;  %8032 = vmatprep.mubr.msk.bf16.mxu1 %vm9558_vm1, %v9557_v42  ;;  %v7292_v19 = vld [vmem:[#allocation25] ss:$0 sm:$0xff] }
0x27e6   :  { %8026 = vmatprep.subr.bf16.mxu1 %v9557_v42 }
0x27e9   :  { %8027 = vmatpush3.bf16.msra.mxu1 %v8543_v57 }
0x27ea   :  { %8028 = vmatprep.subr.bf16.mxu1 %v9557_v42 }
0x27ed   :  { %8029 = vmatpush3.bf16.msra.mxu1 %v8544_v52 }
0x27ee   :  { %8030 = vmatprep.subr.bf16.mxu1 %v9557_v42 }
0x27f1   :  { %8031 = vmatpush3.bf16.msra.mxu1 %v8545_v22 }
0x27f2   :  { %8042 = vmatprep.subr.bf16.mxu1 %v9557_v42 }
0x27f4   :  { %8033 = vmatmul.mubr.msk.bf16.vlgmr.msra.gmra.mrb[88].mxu1 %vm590_vm0, %v10447_v15 }
0x27f5   :  { %8044 = vmatprep.mubr.msk.bf16.mxu1 %vm9558_vm1, %v9557_v42 }
0x28b7   :  { %v3770_v56 = vpop.f32.mrb[84].mxu1 }
0x28b8   :  { %v3777_v24 = vadd.f32 %v3770_v56, %v3603_v59  ;;  %v8010_v25 = vpop.f32.mrb[85].mxu1 }
0x28b9   :  { %v3773_v26 = vpop.f32.mrb[86].mxu1 }
0x28ba   :  { %v3785_v6 = vadd.f32 %v7289_v23, %v3777_v24  ;;  %v3778_v28 = vadd.f32 %v3773_v26, %v3604_v1  ;;  %v8011_v29 = vpop.f32.mrb[87].mxu1 }
0x28bb   :  { %v10616_v29 = vld [vmem:[#allocation4 + $0x8] sm:$0xff] }
0x28bc   :  { %v3786_v27 = vadd.f32 %v7289_v23, %v3778_v28  ;;  %v3787_v30 = vadd.f32 %v3785_v6, %v10436_v62  ;;  %v10614_v6 = vld [vmem:[#allocation4] sm:$0xff] }
0x28be   :  { %v3789_v31 = vsel %vm590_vm0, %v3787_v30, 0.0  ;;  %v3788_v34 = vadd.f32 %v3786_v27, %v10434_v61 }
0x28bf   :  { %3790 = vadd.xlane.f32.xlu0 %v3789_v31 }
0x28c0   :  { %v3792_v36 = vsel %vm590_vm0, %v3788_v34, 0.0 }
0x28c3   :  { %3793 = vadd.xlane.f32.xlu0 %v3792_v36 }
0x28c7   :  { %v3973_v37 = vpop.f32.mrb[88].mxu1 }
0x28c8   :  { %v8034_v21 = vpop.f32.mrb[89].mxu1  ;;  %v3974_v2 = vadd.f32 %v7298_v63, %v3973_v37 }
0x28c9   :  { %v3976_v38 = vpop.f32.mrb[90].mxu1 }
0x28ca   :  { %v3977_v39 = vadd.f32 %v7298_v63, %v3976_v38  ;;  %v8035_v41 = vpop.f32.mrb[91].mxu1 }
0x28cc   :  { %v10579_v44 = vpack.c.bf16 %v3977_v39, %v3974_v2 }
0x28ce   :  { %4104 = vrot.lane.b32.xlu1 %v10579_v44, %s9560_s11  ;;  %v3986_v16 = vsel %vm736_vm2, %v10579_v44, 0 }
0x2940   :  { %v4105_v56 = vpop.permute.xlu1 %4104 }
0x2941   :  { %v4110_v25 = vsel %vm736_vm2, %v4105_v56, 0 }
0x294c   :  { %v3791_v62 = vpop.xlane.xlu0 %3790 }
0x294d   :  { %v3795_v46 = vmul.f32 0.015625, %v3791_v62 }
0x294f   :  { %v3797_v47 = vsub.f32 %v3787_v30, %v3795_v46 }
0x2950   :  { %v3794_v61 = vpop.xlane.xlu0 %3793 }
0x2951   :  { %v3796_v8 = vmul.f32 0.015625, %v3794_v61  ;;  %v3799_v48 = vmul.f32 %v3797_v47, %v3797_v47 }
0x2953   :  { %v3798_v49 = vsub.f32 %v3788_v34, %v3796_v8  ;;  %v3801_v50 = vsel %vm590_vm0, %v3799_v48, 0.0 }
0x2954   :  { %3802 = vadd.xlane.f32.xlu0 %v3801_v50 }
0x2955   :  { %v3800_v33 = vmul.f32 %v3798_v49, %v3798_v49 }
0x2957   :  { %v3804_v51 = vsel %vm590_vm0, %v3800_v33, 0.0 }
0x2958   :  { %3805 = vadd.xlane.f32.xlu0 %v3804_v51 }
0x29e1   :  { %v3803_v4 = vpop.xlane.xlu0 %3802 }
0x29e2   :  { %v3807_v55 = vmul.f32 0.015625, %v3803_v4 }
0x29e4   :  { %v3809_v58 = vadd.f32 1e-05, %v3807_v55 }
0x29e5   :  { %v3806_v59 = vpop.xlane.xlu0 %3805 }
0x29e6   :  { %8730 = vrsqrt.f32 %v3809_v58  ;;  %v3808_v60 = vmul.f32 0.015625, %v3806_v59 }
0x29e8   :  { %v3810_v0 = vadd.f32 1e-05, %v3808_v60 }
0x29ea   :  { %8732 = vrsqrt.f32 %v3810_v0 }
0x29f0   :  { %v8731_v1 = vpop.eup %8730 }
0x29f1   :  { %v3813_v3 = vmul.f32 %v8731_v1, %v3797_v47 }
0x29f3   :  { %v3821_v7 = vmul.f32 %v7290_v5, %v3813_v3 }
0x29f4   :  { %v8733_v9 = vpop.eup %8732 }
0x29f5   :  { %v3814_v10 = vmul.f32 %v8733_v9, %v3798_v49  ;;  %v10589_v12 = vadd.f32 %v7291_v11, %v3821_v7 }
0x29f7   :  { %v3822_v13 = vmul.f32 %v7290_v5, %v3814_v10 }
0x29f9   :  { %v10591_v35 = vadd.f32 %v7291_v11, %v3822_v13 }
0x29fb   :  { %v3831_v14 = vpack.c.bf16 %v10591_v35, %v10589_v12 }
0x29fd   :  { %8021 = vmatmul.mubr.msk.bf16.vlgmr.msra.gmra.mrb[88].mxu0 %vm590_vm0, %v3831_v14 }
0x29fe   :  { %8037 = vmatpush3.bf16.xpose.msra.mxu0 %v3986_v16  ;;  %8038 = vmatprep.mubr.msk.bf16.mxu0 %vm9558_vm1, %v9557_v42 }
0x29ff   :  { %8048 = vmatprep.subr.bf16.mxu0 %v9557_v42 }
0x2ad0   :  { %v3899_v54 = vpop.f32.mrb[88].mxu0 }
0x2ad1   :  { %v8022_v20 = vpop.f32.mrb[89].mxu0  ;;  %v3900_v52 = vadd.f32 %v7292_v19, %v3899_v54 }
0x2ad2   :  { %v3902_v57 = vpop.f32.mrb[90].mxu0 }
0x2ad3   :  { %v3903_v22 = vadd.f32 %v7292_v19, %v3902_v57  ;;  %v8023_v23 = vpop.f32.mrb[91].mxu0 }
0x2ad5   :  { %v10601_v24 = vpack.c.bf16 %v3903_v22, %v3900_v52 }
0x2ad7   :  { %4102 = vrot.lane.b32.xlu0 %v10601_v24, %s9560_s11  ;;  %8039 = vmatmul.mubr.msk.bf16.vlgmr.msra.gmra.mrb[92].mxu0 %vm736_vm2, %v10601_v24 }
0x2ad8   :  { %8049 = vmatpush3.bf16.xpose.msra.mxu0 %v4110_v25  ;;  %8050 = vmatprep.mubr.msk.bf16.mxu0 %vm9558_vm1, %v9557_v42 }
0x2ad9   :  { %8060 = vmatprep.subr.bf16.mxu0 %v9557_v42 }
0x2b49   :  { %v4103_v26 = vpop.permute.xlu0 %4102 }
0x2b4a   :  { %8051 = vmatmul.mubr.msk.bf16.vlgmr.msra.gmra.mrb[96].mxu0 %vm736_vm2, %v4103_v26  ;;  %v8550_v26 = vld [vmem:[#allocation30] sm:$0xff]  }
0x2b4b   :  { %8062 = vmatprep.mubr.msk.bf16.mxu0 %vm9558_vm1, %v9557_v42 }
0x2baa   :  { %v4022_v28 = vpop.f32.mrb[92].mxu0 }
0x2bab   :  { %v4023_v27 = vadd.f32 %v4022_v28, %v10614_v6  ;;  %v8040_v30 = vpop.f32.mrb[93].mxu0  ;;  %v8551_v28 = vld [vmem:[#allocation30 + $0x8] sm:$0xff]  }
0x2bac   :  { %v4025_v31 = vpop.f32.mrb[94].mxu0  ;;  %8061 = vmatpush3.bf16.msra.mxu0 %v8551_v28 }
0x2bad   :  { %v4026_v34 = vadd.f32 %v4025_v31, %v10616_v29  ;;  %v8041_v36 = vpop.f32.mrb[95].mxu0  ;;  %v4029_v63 = vsel %vm736_vm2, %v4023_v27, -inf  ;;  %8072 = vmatprep.subr.bf16.mxu0 %v9557_v42 }
0x2bae   :  { %4030 = vmax.xlane.f32.xlu1 %v4029_v63 }
0x2baf   :  { %v4032_v37 = vsel %vm736_vm2, %v4026_v34, -inf }
0x2bb0   :  { %4033 = vmax.xlane.f32.xlu0 %v4032_v37 }
0x2c1d   :  { %v4146_v21 = vpop.f32.mrb[96].mxu0 }
0x2c1e   :  { %v4147_v38 = vadd.f32 %v4146_v21, %v10614_v6  ;;  %v8052_v2 = vpop.f32.mrb[97].mxu0 }
0x2c1f   :  { %v4149_v39 = vpop.f32.mrb[98].mxu0 }
0x2c20   :  { %v4150_v41 = vadd.f32 %v4149_v39, %v10616_v29  ;;  %v8053_v62 = vpop.f32.mrb[99].mxu0  ;;  %v4153_v46 = vsel %vm736_vm2, %v4147_v38, -inf }
0x2c21   :  { %4154 = vmax.xlane.f32.xlu1 %v4153_v46 }
0x2c22   :  { %v4156_v47 = vsel %vm736_vm2, %v4150_v41, -inf }
0x2c25   :  { %4157 = vmax.xlane.f32.xlu1 %v4156_v47 }
0x2c3b   :  { %v4031_v61 = vpop.xlane.xlu1 %4030 }
0x2c3c   :  { %v4035_v8 = vsub.f32 %v4023_v27, %v4031_v61 }
0x2c3d   :  { %v4034_v48 = vpop.xlane.xlu0 %4033 }
0x2c3e   :  { %v4037_v49 = vmul.f32 1.442695, %v4035_v8  ;;  %v4036_v50 = vsub.f32 %v4026_v34, %v4034_v48 }
0x2c40   :  { %8734 = vpow2.f32 %v4037_v49  ;;  %v4039_v33 = vmul.f32 1.442695, %v4036_v50 }
0x2c42   :  { %8736 = vpow2.f32 %v4039_v33 }
0x2c4a   :  { %v8735_v51 = vpop.eup %8734 }
0x2c4b   :  { %v4041_v32 = vsel %vm736_vm2, %v8735_v51, 0.0 }
0x2c4c   :  { %v8737_v17 = vpop.eup %8736  ;;  %4042 = vadd.xlane.f32.xlu1 %v4041_v32 }
0x2c4d   :  { %v4044_v40 = vsel %vm736_vm2, %v8737_v17, 0.0 }
0x2c50   :  { %4045 = vadd.xlane.f32.xlu1 %v4044_v40 }
0x2cae   :  { %v4155_v53 = vpop.xlane.xlu1 %4154 }
0x2caf   :  { %v4159_v4 = vsub.f32 %v4147_v38, %v4155_v53 }
0x2cb1   :  { %v4161_v55 = vmul.f32 1.442695, %v4159_v4 }
0x2cb2   :  { %v4158_v58 = vpop.xlane.xlu1 %4157 }
0x2cb3   :  { %8738 = vpow2.f32 %v4161_v55  ;;  %v4160_v59 = vsub.f32 %v4150_v41, %v4158_v58 }
0x2cb5   :  { %v4163_v60 = vmul.f32 1.442695, %v4160_v59 }
0x2cb7   :  { %8740 = vpow2.f32 %v4163_v60 }
0x2cbd   :  { %v8739_v0 = vpop.eup %8738 }
0x2cbe   :  { %v4165_v1 = vsel %vm736_vm2, %v8739_v0, 0.0 }
0x2cbf   :  { %4166 = vadd.xlane.f32.xlu0 %v4165_v1 }
0x2cc1   :  { %v8741_v3 = vpop.eup %8740 }
0x2cc2   :  { %v4168_v5 = vsel %vm736_vm2, %v8741_v3, 0.0 }
0x2cc3   :  { %4169 = vadd.xlane.f32.xlu1 %v4168_v5 }
0x2cd4   :  { %4176 = vrot.lane.b32.xlu1 %v10579_v44, %s9559_s4 }
0x2cd5   :  { %4053 = vrot.lane.b32.xlu0 %v10579_v44, %s9548_s17 }
0x2cd8   :  { %4326 = vrot.lane.b32.xlu1 %v10579_v44, %s9561_s12 }
0x2cd9   :  { %4324 = vrot.lane.b32.xlu0 %v10601_v24, %s9561_s12  ;;  %v4043_v9 = vpop.xlane.xlu1 %4042 }
0x2cdd   :  { %v4046_v7 = vpop.xlane.xlu1 %4045 }
0x2cde   :  { %8742 = vrcp.f32 %v4046_v7 }
0x2cdf   :  { %8744 = vrcp.f32 %v4043_v9 }
0x2ce8   :  { %v8743_v10 = vpop.eup %8742 }
0x2ce9   :  { %v8745_v13 = vpop.eup %8744  ;;  %v4050_v14 = vmul.f32 %v8743_v10, %v8737_v17 }
0x2cea   :  { %v4049_v16 = vmul.f32 %v8745_v13, %v8735_v51 }
0x2cec   :  { %v4051_v20 = vpack.c.bf16 %v4050_v14, %v4049_v16 }
0x2d4c   :  { %v4167_v11 = vpop.xlane.xlu0 %4166 }
0x2d4d   :  { %8746 = vrcp.f32 %v4167_v11 }
0x2d50   :  { %v4054_v19 = vpop.permute.xlu0 %4053  ;;  %v4170_v54 = vpop.xlane.xlu1 %4169 }
0x2d51   :  { %8748 = vrcp.f32 %v4170_v54  ;;  %8043 = vmatpush3.bf16.msra.mxu1 %v4054_v19 }
0x2d52   :  { %8054 = vmatprep.subr.bf16.mxu1 %v9557_v42 }
0x2d54   :  { %8045 = vmatmul.mubr.msk.bf16.vlgmr.msra.gmra.mrb[92].mxu1 %vm736_vm2, %v4051_v20  ;;  %v4177_v57 = vpop.permute.xlu1 %4176  ;;  %v4325_v62 = vpop.permute.xlu0 %4324 }
0x2d55   :  { %8055 = vmatpush3.bf16.msra.mxu1 %v4177_v57  ;;  %8056 = vmatprep.mubr.msk.bf16.mxu1 %vm9558_vm1, %v9557_v42 }
0x2d56   :  { %8066 = vmatprep.subr.bf16.mxu1 %v9557_v42 }
0x2d57   :  { %v8747_v52 = vpop.eup %8746 }
0x2d58   :  { %v4173_v23 = vmul.f32 %v8747_v52, %v8739_v0  ;;  %v4327_v21 = vpop.permute.xlu1 %4326 }
0x2d59   :  { %v4332_v41 = vsel %vm736_vm2, %v4327_v21, 0 }
0x2d5b   :  { %v8749_v22 = vpop.eup %8748 }
0x2d5c   :  { %v4174_v56 = vmul.f32 %v8749_v22, %v8741_v3 }
0x2d5e   :  { %v4175_v25 = vpack.c.bf16 %v4174_v56, %v4173_v23 }
0x2d60   :  { %8057 = vmatmul.mubr.msk.bf16.vlgmr.msra.gmra.mrb[96].mxu1 %vm736_vm2, %v4175_v25 }
0x2d61   :  { %8068 = vmatprep.mubr.msk.bf16.mxu1 %vm9558_vm1, %v9557_v42  ;;  %8067 = vmatpush3.bf16.msra.mxu1 %v8550_v26  ;;  %v8552_v26 = vld [vmem:[#allocation30 + $0x10] sm:$0xff]  }
0x2d62   :  { %8078 = vmatprep.subr.bf16.mxu1 %v9557_v42 }
0x2e27   :  { %v4093_v27 = vpop.f32.mrb[92].mxu1 }
0x2e28   :  { %v8046_v30 = vpop.f32.mrb[93].mxu1 }
0x2e29   :  { %v4096_v31 = vpop.f32.mrb[94].mxu1 }
0x2e2a   :  { %v4100_v34 = vpack.c.bf16 %v4096_v31, %v4093_v27  ;;  %v8047_v36 = vpop.f32.mrb[95].mxu1 }
0x2e2c   :  { %8069 = vmatmul.mubr.msk.bf16.vlgmr.msra.gmra.mrb[100].mxu1 %vm736_vm2, %v4100_v34 }
0x2e2d   :  { %8080 = vmatprep.mubr.msk.bf16.mxu1 %vm9558_vm1, %v9557_v42 }
0x2e33   :  { %v4216_v63 = vpop.f32.mrb[96].mxu1 }
0x2e34   :  { %v8058_v37 = vpop.f32.mrb[97].mxu1 }
0x2e35   :  { %v4219_v38 = vpop.f32.mrb[98].mxu1 }
0x2e36   :  { %v4223_v2 = vpack.c.bf16 %v4219_v38, %v4216_v63  ;;  %v8059_v39 = vpop.f32.mrb[99].mxu1 }
0x2e38   :  { %8063 = vmatmul.mubr.msk.bf16.vlgmr.msra.gmra.mrb[100].mxu0 %vm736_vm2, %v4223_v2 }
0x2e39   :  { %8073 = vmatpush3.bf16.xpose.msra.mxu0 %v4332_v41  ;;  %8074 = vmatprep.mubr.msk.bf16.mxu0 %vm9558_vm1, %v9557_v42 }
0x2e3a   :  { %8084 = vmatprep.subr.bf16.mxu0 %v9557_v42 }
0x2e40   :  { %8075 = vmatmul.mubr.msk.bf16.vlgmr.msra.gmra.mrb[104].mxu0 %vm736_vm2, %v4325_v62 }
0x2e41   :  { %8086 = vmatprep.mubr.msk.bf16.mxu0 %vm9558_vm1, %v9557_v42  ;;  %8085 = vmatpush3.bf16.msra.mxu0 %v8552_v26 }
0x2e42   :  { %8096 = vmatprep.subr.bf16.mxu0 %v9557_v42 }
0x2eff   :  { %v4317_v46 = vpop.f32.mrb[100].mxu1 }
0x2f00   :  { %v8070_v47 = vpop.f32.mrb[101].mxu1 }
0x2f01   :  { %v4320_v61 = vpop.f32.mrb[102].mxu1 }
0x2f02   :  { %v8071_v8 = vpop.f32.mrb[103].mxu1 }
0x2f0b   :  { %v4267_v48 = vpop.f32.mrb[100].mxu0 }
0x2f0c   :  { %v10659_v49 = vadd.f32 %v4317_v46, %v4267_v48  ;;  %v8064_v50 = vpop.f32.mrb[101].mxu0 }
0x2f0d   :  { %v4270_v33 = vpop.f32.mrb[102].mxu0 }
0x2f0e   :  { %v10661_v51 = vadd.f32 %v4320_v61, %v4270_v33  ;;  %v8065_v32 = vpop.f32.mrb[103].mxu0 }
0x2f13   :  { %v4368_v17 = vpop.f32.mrb[104].mxu0 }
0x2f14   :  { %v4369_v40 = vadd.f32 %v4368_v17, %v10614_v6  ;;  %v8076_v53 = vpop.f32.mrb[105].mxu0 }
0x2f15   :  { %v4371_v4 = vpop.f32.mrb[106].mxu0 }
0x2f16   :  { %v4372_v55 = vadd.f32 %v4371_v4, %v10616_v29  ;;  %v8077_v58 = vpop.f32.mrb[107].mxu0  ;;  %v4375_v59 = vsel %vm736_vm2, %v4369_v40, -inf }
0x2f17   :  { %4376 = vmax.xlane.f32.xlu1 %v4375_v59 }
0x2f18   :  { %v4378_v60 = vsel %vm736_vm2, %v4372_v55, -inf }
0x2f19   :  { %4379 = vmax.xlane.f32.xlu0 %v4378_v60 }
0x2fa4   :  { %v4377_v0 = vpop.xlane.xlu1 %4376 }
0x2fa5   :  { %v4381_v1 = vsub.f32 %v4369_v40, %v4377_v0 }
0x2fa6   :  { %v4380_v3 = vpop.xlane.xlu0 %4379 }
0x2fa7   :  { %v4383_v5 = vmul.f32 1.442695, %v4381_v1  ;;  %v4382_v9 = vsub.f32 %v4372_v55, %v4380_v3 }
0x2fa9   :  { %8750 = vpow2.f32 %v4383_v5  ;;  %v4385_v7 = vmul.f32 1.442695, %v4382_v9 }
0x2fab   :  { %8752 = vpow2.f32 %v4385_v7 }
0x2fb3   :  { %v8751_v10 = vpop.eup %8750 }
0x2fb4   :  { %v4387_v11 = vsel %vm736_vm2, %v8751_v10, 0.0 }
0x2fb5   :  { %v8753_v13 = vpop.eup %8752  ;;  %4388 = vadd.xlane.f32.xlu0 %v4387_v11 }
0x2fb6   :  { %v4390_v14 = vsel %vm736_vm2, %v8753_v13, 0.0 }
0x2fb7   :  { %4391 = vadd.xlane.f32.xlu1 %v4390_v14 }
0x2fc8   :  { %4500 = vrot.lane.b32.xlu1 %v10579_v44, %s9562_s16 }
0x2fcb   :  { %4398 = vrot.lane.b32.xlu0 %v10579_v44, %s9541_s7 }
0x2fcc   :  { %4498 = vrot.lane.b32.xlu1 %v10601_v24, %s9562_s16 }
0x3042   :  { %v4389_v16 = vpop.xlane.xlu0 %4388 }
0x3043   :  { %8754 = vrcp.f32 %v4389_v16 }
0x3044   :  { %v4392_v19 = vpop.xlane.xlu1 %4391 }
0x3045   :  { %8756 = vrcp.f32 %v4392_v19 }
0x3046   :  { %v4399_v54 = vpop.permute.xlu0 %4398 }
0x3047   :  { %8079 = vmatpush3.bf16.msra.mxu1 %v4399_v54 }
0x3048   :  { %8090 = vmatprep.subr.bf16.mxu1 %v9557_v42  ;;  %v4501_v23 = vpop.permute.xlu1 %4500 }
0x3049   :  { %v4506_v25 = vsel %vm736_vm2, %v4501_v23, 0 }
0x304c   :  { %v4499_v24 = vpop.permute.xlu1 %4498 }
0x304d   :  { %v8755_v20 = vpop.eup %8754 }
0x304e   :  { %v4395_v52 = vmul.f32 %v8755_v20, %v8751_v10 }
0x304f   :  { %v8757_v57 = vpop.eup %8756 }
0x3050   :  { %v4396_v22 = vmul.f32 %v8757_v57, %v8753_v13  ;;  %v7320_v13 = vld [vmem:[#allocation31] ss:$0 sm:$0xff] }
0x3052   :  { %v4397_v56 = vpack.c.bf16 %v4396_v22, %v4395_v52 }
0x3054   :  { %8081 = vmatmul.mubr.msk.bf16.vlgmr.msra.gmra.mrb[104].mxu1 %vm736_vm2, %v4397_v56 }
0x3055   :  { %8091 = vmatpush3.bf16.xpose.msra.mxu1 %v4506_v25  ;;  %8092 = vmatprep.mubr.msk.bf16.mxu1 %vm9558_vm1, %v9557_v42 }
0x3056   :  { %8102 = vmatprep.subr.bf16.mxu1 %v9557_v42 }
0x305c   :  { %8093 = vmatmul.mubr.msk.bf16.vlgmr.msra.gmra.mrb[108].mxu1 %vm736_vm2, %v4499_v24 }
0x305d   :  { %8104 = vmatprep.mubr.msk.bf16.mxu1 %vm9558_vm1, %v9557_v42 }
0x3127   :  { %v4438_v28 = vpop.f32.mrb[104].mxu1 }
0x3128   :  { %v8082_v27 = vpop.f32.mrb[105].mxu1 }
0x3129   :  { %v4441_v30 = vpop.f32.mrb[106].mxu1 }
0x312a   :  { %v4445_v31 = vpack.c.bf16 %v4441_v30, %v4438_v28  ;;  %v8083_v34 = vpop.f32.mrb[107].mxu1 }
0x312c   :  { %8087 = vmatmul.mubr.msk.bf16.vlgmr.msra.gmra.mrb[108].mxu0 %vm736_vm2, %v4445_v31 }
0x312d   :  { %8098 = vmatprep.mubr.msk.bf16.mxu0 %vm9558_vm1, %v9557_v42 }
0x312f   :  { %v4542_v36 = vpop.f32.mrb[108].mxu1 }
0x3130   :  { %v4543_v63 = vadd.f32 %v4542_v36, %v10614_v6  ;;  %v8094_v37 = vpop.f32.mrb[109].mxu1 }
0x3131   :  { %v4545_v21 = vpop.f32.mrb[110].mxu1 }
0x3132   :  { %v4546_v38 = vadd.f32 %v4545_v21, %v10616_v29  ;;  %v8095_v2 = vpop.f32.mrb[111].mxu1  ;;  %v4549_v39 = vsel %vm736_vm2, %v4543_v63, -inf  ;;  %v8555_v21 = vld [vmem:[#allocation36 + $0x8] sm:$0xff]  }
0x3133   :  { %4550 = vmax.xlane.f32.xlu0 %v4549_v39  ;;  %v8557_v2 = vld [vmem:[#allocation36 + $0x18] sm:$0xff]  }
0x3134   :  { %v4552_v41 = vsel %vm736_vm2, %v4546_v38, -inf  ;;  %v8558_v39 = vld [vmem:[%s11127_s27] sm:$0xff]  }
0x3135   :  { %4553 = vmax.xlane.f32.xlu1 %v4552_v41  ;;  %v8559_v41 = vld [vmem:[%s11127_s27 + $0x8] sm:$0xff]  }
0x3146   :  { %4572 = vrot.lane.b32.xlu1 %v10579_v44, %s9525_s28  ;;  %v8553_v44 = vld [vmem:[#allocation30 + $0x18] sm:$0xff]  }
0x3147   :  { %8103 = vmatpush3.bf16.msra.mxu1 %v8553_v44 }
0x3148   :  { %8120 = vmatprep.subr.bf16.mxu1 %v9557_v42 }
0x31c0   :  { %v4551_v62 = vpop.xlane.xlu0 %4550 }
0x31c1   :  { %v4555_v46 = vsub.f32 %v4543_v63, %v4551_v62  ;;  %v8560_v62 = vld [vmem:[%s11127_s27 + $0x10] sm:$0xff]  }
0x31c2   :  { %v4554_v47 = vpop.xlane.xlu1 %4553 }
0x31c3   :  { %v4557_v61 = vmul.f32 1.442695, %v4555_v46  ;;  %v4556_v8 = vsub.f32 %v4546_v38, %v4554_v47  ;;  %v8556_v38 = vld [vmem:[#allocation36 + $0x10] sm:$0xff]   ;;  %v8562_v47 = vld [vmem:[%s11127_s27 + $0x20] sm:$0xff]  }
0x31c4   :  { %v8561_v46 = vld [vmem:[%s11127_s27 + $0x18] sm:$0xff]  }
0x31c5   :  { %8758 = vpow2.f32 %v4557_v61  ;;  %v4559_v6 = vmul.f32 1.442695, %v4556_v8  ;;  %v8563_v61 = vld [vmem:[%s11127_s27 + $0x28] sm:$0xff]  }
0x31c6   :  { %v4573_v48 = vpop.permute.xlu1 %4572 }
0x31c7   :  { %8760 = vpow2.f32 %v4559_v6  ;;  %8097 = vmatpush3.bf16.msra.mxu0 %v4573_v48 }
0x31c8   :  { %8108 = vmatprep.subr.bf16.mxu0 %v9557_v42 }
0x31cf   :  { %v8759_v29 = vpop.eup %8758 }
0x31d0   :  { %v4561_v50 = vsel %vm736_vm2, %v8759_v29, 0.0 }
0x31d1   :  { %v8761_v33 = vpop.eup %8760  ;;  %4562 = vadd.xlane.f32.xlu0 %v4561_v50 }
0x31d2   :  { %v4564_v32 = vsel %vm736_vm2, %v8761_v33, 0.0 }
0x31d5   :  { %4565 = vadd.xlane.f32.xlu0 %v4564_v32 }
0x31ff   :  { %v4489_v17 = vpop.f32.mrb[108].mxu0 }
0x3200   :  { %v4496_v40 = vadd.f32 %v4489_v17, %v10659_v49  ;;  %v8088_v53 = vpop.f32.mrb[109].mxu0  ;;  %v7321_v17 = vld [vmem:[#allocation33] ss:$0 sm:$0xff] }
0x3201   :  { %v4492_v4 = vpop.f32.mrb[110].mxu0 }
0x3202   :  { %v4497_v55 = vadd.f32 %v4492_v4, %v10661_v51  ;;  %v8089_v58 = vpop.f32.mrb[111].mxu0 }
0x325e   :  { %v4563_v59 = vpop.xlane.xlu0 %4562 }
0x325f   :  { %8762 = vrcp.f32 %v4563_v59 }
0x3262   :  { %v4566_v60 = vpop.xlane.xlu0 %4565 }
0x3263   :  { %8764 = vrcp.f32 %v4566_v60 }
0x3269   :  { %v8763_v0 = vpop.eup %8762 }
0x326a   :  { %v4569_v3 = vmul.f32 %v8763_v0, %v8759_v29 }
0x326d   :  { %v8765_v1 = vpop.eup %8764 }
0x326e   :  { %v4570_v5 = vmul.f32 %v8765_v1, %v8761_v33  ;;  %v8564_v1 = vld [vmem:[%s11127_s27 + $0x30] sm:$0xff]  }
0x3270   :  { %v4571_v9 = vpack.c.bf16 %v4570_v5, %v4569_v3  ;;  %v8565_v3 = vld [vmem:[%s11127_s27 + $0x38] sm:$0xff]   ;;  %v7323_v5 = vld [vmem:[#allocation37] ss:$0 sm:$0xff] }
0x3272   :  { %8099 = vmatmul.mubr.msk.bf16.vlgmr.msra.gmra.mrb[112].mxu0 %vm736_vm2, %v4571_v9 }
0x3273   :  { %8116 = vmatprep.mubr.msk.bf16.mxu0 %vm9558_vm1, %v9557_v42 }
0x3345   :  { %v4612_v49 = vpop.f32.mrb[112].mxu0 }
0x3346   :  { %v8100_v7 = vpop.f32.mrb[113].mxu0 }
0x3347   :  { %v4615_v10 = vpop.f32.mrb[114].mxu0 }
0x3348   :  { %v4619_v11 = vpack.c.bf16 %v4615_v10, %v4612_v49  ;;  %v8101_v51 = vpop.f32.mrb[115].mxu0 }
0x334a   :  { %8105 = vmatmul.mubr.msk.bf16.vlgmr.msra.gmra.mrb[112].mxu1 %vm736_vm2, %v4619_v11 }
0x334b   :  { %8136 = vmatprep.mubr.msk.bf16.mxu1 %vm9558_vm1, %v9557_v42  ;;  %8121 = vmatpush3.bf16.msra.mxu1 %v8558_v39  ;;  %v8574_v39 = vld [vmem:[%s11124_s1 + $0x64] ss:$8 sps:$4 sm:$0xff]  }
0x334c   :  { %8122 = vmatprep.subr.bf16.mxu1 %v9557_v42 }
0x334f   :  { %8123 = vmatpush3.bf16.msra.mxu1 %v8559_v41  ;;  %v8572_v41 = vld [vmem:[%s11124_s1 + $0x60] ss:$8 sps:$4 sm:$0xff]  }
0x3350   :  { %8124 = vmatprep.subr.bf16.mxu1 %v9557_v42 }
0x3353   :  { %8125 = vmatpush3.bf16.msra.mxu1 %v8560_v62  ;;  %v8575_v62 = vld [vmem:[%s11124_s1 + $0x70] ss:$8 sps:$4 sm:$0xff]  }
0x3354   :  { %8126 = vmatprep.subr.bf16.mxu1 %v9557_v42 }
0x3357   :  { %8127 = vmatpush3.bf16.msra.mxu1 %v8561_v46  ;;  %v8577_v46 = vld [vmem:[%s11124_s1 + $0x74] ss:$8 sps:$4 sm:$0xff]  }
0x3358   :  { %8128 = vmatprep.subr.bf16.mxu1 %v9557_v42 }
0x335b   :  { %8129 = vmatpush3.bf16.msra.mxu1 %v8562_v47 }
0x335c   :  { %8130 = vmatprep.subr.bf16.mxu1 %v9557_v42 }
0x335f   :  { %8131 = vmatpush3.bf16.msra.mxu1 %v8563_v61 }
0x3360   :  { %8132 = vmatprep.subr.bf16.mxu1 %v9557_v42 }
0x3363   :  { %8133 = vmatpush3.bf16.msra.mxu1 %v8564_v1 }
0x3364   :  { %8134 = vmatprep.subr.bf16.mxu1 %v9557_v42 }
0x3367   :  { %8135 = vmatpush3.bf16.msra.mxu1 %v8565_v3 }
0x3368   :  { %8146 = vmatprep.subr.bf16.mxu1 %v9557_v42 }
0x341d   :  { %v4663_v14 = vpop.f32.mrb[112].mxu1 }
0x341e   :  { %v4670_v16 = vadd.f32 %v4663_v14, %v4496_v40  ;;  %v8106_v19 = vpop.f32.mrb[113].mxu1 }
0x341f   :  { %v4666_v54 = vpop.f32.mrb[114].mxu1 }
0x3420   :  { %v4678_v20 = vadd.f32 %v7320_v13, %v4670_v16  ;;  %v4671_v57 = vadd.f32 %v4666_v54, %v4497_v55  ;;  %v8107_v52 = vpop.f32.mrb[115].mxu1  ;;  %v7322_v55 = vld [vmem:[#allocation34] ss:$0 sm:$0xff] }
0x3422   :  { %v4679_v22 = vadd.f32 %v7320_v13, %v4671_v57  ;;  %v4680_v23 = vadd.f32 %v4678_v20, %v10589_v12 }
0x3424   :  { %v4682_v56 = vsel %vm590_vm0, %v4680_v23, 0.0  ;;  %v4681_v25 = vadd.f32 %v4679_v22, %v10591_v35  ;;  %v8554_v35 = vld [vmem:[#allocation36] sm:$0xff]  }
0x3425   :  { %4683 = vadd.xlane.f32.xlu0 %v4682_v56  ;;  %8109 = vmatpush3.bf16.msra.mxu0 %v8554_v35  ;;  %v8568_v35 = vld [vmem:[%s11124_s1 + $0x44] ss:$8 sps:$4 sm:$0xff]  }
0x3426   :  { %v4685_v24 = vsel %vm590_vm0, %v4681_v25, 0.0  ;;  %8110 = vmatprep.subr.bf16.mxu0 %v9557_v42 }
0x3429   :  { %4686 = vadd.xlane.f32.xlu0 %v4685_v24  ;;  %8111 = vmatpush3.bf16.msra.mxu0 %v8555_v21  ;;  %v8566_v21 = vld [vmem:[%s11124_s1 + $0x40] ss:$8 sps:$4 sm:$0xff]  }
0x342a   :  { %8112 = vmatprep.subr.bf16.mxu0 %v9557_v42 }
0x342d   :  { %8113 = vmatpush3.bf16.msra.mxu0 %v8556_v38  ;;  %v8571_v38 = vld [vmem:[%s11124_s1 + $0x54] ss:$8 sps:$4 sm:$0xff]  }
0x342e   :  { %8114 = vmatprep.subr.bf16.mxu0 %v9557_v42 }
0x3431   :  { %8115 = vmatpush3.bf16.msra.mxu0 %v8557_v2  ;;  %v8569_v2 = vld [vmem:[%s11124_s1 + $0x50] ss:$8 sps:$4 sm:$0xff]  }
0x3432   :  { %5093 = vmatprep.subr.bf16.mxu0 %v8568_v35 }
0x34b2   :  { %v4684_v26 = vpop.xlane.xlu0 %4683 }
0x34b3   :  { %v4688_v28 = vmul.f32 0.015625, %v4684_v26 }
0x34b5   :  { %v4690_v27 = vsub.f32 %v4680_v23, %v4688_v28 }
0x34b6   :  { %v4687_v30 = vpop.xlane.xlu0 %4686 }
0x34b7   :  { %v4689_v31 = vmul.f32 0.015625, %v4687_v30  ;;  %v4692_v34 = vmul.f32 %v4690_v27, %v4690_v27 }
0x34b9   :  { %v4691_v36 = vsub.f32 %v4681_v25, %v4689_v31  ;;  %v4694_v63 = vsel %vm590_vm0, %v4692_v34, 0.0 }
0x34ba   :  { %4695 = vadd.xlane.f32.xlu0 %v4694_v63 }
0x34bb   :  { %v4693_v12 = vmul.f32 %v4691_v36, %v4691_v36 }
0x34bd   :  { %v4697_v37 = vsel %vm590_vm0, %v4693_v12, 0.0 }
0x34be   :  { %4698 = vadd.xlane.f32.xlu0 %v4697_v37 }
0x3547   :  { %v4696_v8 = vpop.xlane.xlu0 %4695 }
0x3548   :  { %v4700_v6 = vmul.f32 0.015625, %v4696_v8 }
0x354a   :  { %v4702_v48 = vadd.f32 1e-05, %v4700_v6 }
0x354b   :  { %v4699_v29 = vpop.xlane.xlu0 %4698 }
0x354c   :  { %8766 = vrsqrt.f32 %v4702_v48  ;;  %v4701_v50 = vmul.f32 0.015625, %v4699_v29 }
0x354e   :  { %v4703_v33 = vadd.f32 1e-05, %v4701_v50 }
0x3550   :  { %8768 = vrsqrt.f32 %v4703_v33 }
0x3556   :  { %v8767_v32 = vpop.eup %8766 }
0x3557   :  { %v4706_v44 = vmul.f32 %v8767_v32, %v4690_v27  ;;  %v7338_v32 = vld [vmem:[#allocation40] ss:$0 sm:$0xff] }
0x3559   :  { %v4714_v53 = vmul.f32 %v7321_v17, %v4706_v44 }
0x355a   :  { %v8769_v40 = vpop.eup %8768 }
0x355b   :  { %v4707_v4 = vmul.f32 %v8769_v40, %v4691_v36  ;;  %v4722_v59 = vadd.f32 %v7322_v55, %v4714_v53  ;;  %v7339_v53 = vld [vmem:[#allocation42] ss:$0 sm:$0xff] }
0x355d   :  { %v4715_v58 = vmul.f32 %v7321_v17, %v4707_v4 }
0x355f   :  { %v4723_v60 = vadd.f32 %v7322_v55, %v4715_v58 }
0x3561   :  { %v4724_v0 = vpack.c.bf16 %v4723_v60, %v4722_v59 }
0x3563   :  { %8117 = vmatmul.mubr.msk.bf16.vlgmr.msra.gmra.mrb[116].mxu0 %vm590_vm0, %v4724_v0 }
0x3564   :  { %5125 = vmatprep.mubr.bf16.mxu0 %v9556_v18  ;;  %v7329_v18 = vld [vmem:[#allocation39] ss:$0 sm:$0xff]  ;;  %5094 = vmatpush1.bf16.msra.mxu0 %v8566_v21 }
0x3565   :  { %5095 = vmatprep.subr.bf16.mxu0 %v8571_v38 }
0x3568   :  { %5096 = vmatpush1.bf16.msra.mxu0 %v8569_v2 }
0x3569   :  { %5097 = vmatprep.subr.bf16.mxu0 %v8574_v39 }
0x356c   :  { %5098 = vmatpush1.bf16.msra.mxu0 %v8572_v41 }
0x356d   :  { %5099 = vmatprep.subr.bf16.mxu0 %v8577_v46 }
0x3570   :  { %5100 = vmatpush1.bf16.msra.mxu0 %v8575_v62 }
0x3571   :  { %8140 = vmatprep.subr.bf16.mxu0 %v9557_v42 }
0x3636   :  { %v4792_v9 = vpop.f32.mrb[116].mxu0 }
0x3637   :  { %v4793_v49 = vadd.f32 %v7323_v5, %v4792_v9  ;;  %v8118_v7 = vpop.f32.mrb[117].mxu0 }
0x3638   :  { %v4795_v10 = vpop.f32.mrb[118].mxu0 }
0x3639   :  { %v4796_v11 = vadd.f32 %v7323_v5, %v4795_v10  ;;  %v8119_v51 = vpop.f32.mrb[119].mxu0  ;;  %v4799_v13 = vmax.f32 %v4793_v49, 0.0 }
0x363b   :  { %v4800_v14 = vmax.f32 %v4796_v11, 0.0 }
0x363d   :  { %v4801_v16 = vpack.c.bf16 %v4800_v14, %v4799_v13 }
0x363f   :  { %8137 = vmatmul.mubr.bf16.vlgmr.msra.gmra.mrb[116].mxu1 %v4801_v16 }
0x3640   :  { %8148 = vmatprep.mubr.msk.bf16.mxu1 %vm9558_vm1, %v9557_v42 }
0x3712   :  { %v4890_v19 = vpop.f32.mrb[116].mxu1 }
0x3713   :  { %v4891_v54 = vadd.f32 %v7329_v18, %v4890_v19  ;;  %v8138_v20 = vpop.f32.mrb[117].mxu1 }
0x3714   :  { %v4893_v57 = vpop.f32.mrb[118].mxu1  ;;  %v10782_v20 = vld [vmem:[#allocation2] sm:$0xff] }
0x3715   :  { %v4897_v52 = vadd.f32 %v4891_v54, %v4722_v59  ;;  %v4894_v22 = vadd.f32 %v7329_v18, %v4893_v57  ;;  %v8139_v23 = vpop.f32.mrb[119].mxu1 }
0x3716   :  { %v10785_v23 = vld [vmem:[#allocation2 + $0x8] sm:$0xff] }
0x3717   :  { %v4898_v56 = vadd.f32 %v4894_v22, %v4723_v60  ;;  %v4899_v25 = vsel %vm590_vm0, %v4897_v52, 0.0  ;;  %v4951_v60 = vld [vmem:[#allocation18 + $0x2] sm:$0x3] }
0x3718   :  { %4900 = vadd.xlane.f32.xlu1 %v4899_v25  ;;  %v5043_v0 = vrot.slane %v4951_v60, %v10057_v43  ;;  %v5047_v3 = vrot.slane %v4951_v60, %v10059_v45 }
0x3719   :  { %v4902_v24 = vsel %vm590_vm0, %v4898_v56, 0.0 }
0x371a   :  { %4903 = vadd.xlane.f32.xlu0 %v4902_v24 }
0x37a5   :  { %v4901_v26 = vpop.xlane.xlu1 %4900 }
0x37a6   :  { %v4905_v28 = vmul.f32 0.015625, %v4901_v26 }
0x37a7   :  { %v4904_v27 = vpop.xlane.xlu0 %4903 }
0x37a8   :  { %v4907_v30 = vsub.f32 %v4897_v52, %v4905_v28  ;;  %v4906_v31 = vmul.f32 0.015625, %v4904_v27 }
0x37aa   :  { %v4908_v34 = vsub.f32 %v4898_v56, %v4906_v31  ;;  %v4909_v36 = vmul.f32 %v4907_v30, %v4907_v30 }
0x37ac   :  { %v4911_v63 = vsel %vm590_vm0, %v4909_v36, 0.0  ;;  %v4910_v12 = vmul.f32 %v4908_v34, %v4908_v34 }
0x37ad   :  { %4912 = vadd.xlane.f32.xlu0 %v4911_v63 }
0x37ae   :  { %v4914_v37 = vsel %vm590_vm0, %v4910_v12, 0.0 }
0x37b1   :  { %4915 = vadd.xlane.f32.xlu0 %v4914_v37 }
0x383a   :  { %v4913_v47 = vpop.xlane.xlu0 %4912 }
0x383b   :  { %v4917_v61 = vmul.f32 0.015625, %v4913_v47 }
0x383d   :  { %v4919_v8 = vadd.f32 1e-05, %v4917_v61 }
0x383e   :  { %v4916_v6 = vpop.xlane.xlu0 %4915 }
0x383f   :  { %8770 = vrsqrt.f32 %v4919_v8  ;;  %v4918_v48 = vmul.f32 0.015625, %v4916_v6 }
0x3841   :  { %v4920_v29 = vadd.f32 1e-05, %v4918_v48 }
0x3843   :  { %8772 = vrsqrt.f32 %v4920_v29 }
0x3849   :  { %v8771_v50 = vpop.eup %8770 }
0x384a   :  { %v4923_v33 = vmul.f32 %v8771_v50, %v4907_v30 }
0x384c   :  { %v4931_v17 = vmul.f32 %v7338_v32, %v4923_v33 }
0x384d   :  { %v8773_v44 = vpop.eup %8772 }
0x384e   :  { %v4924_v40 = vmul.f32 %v8773_v44, %v4908_v34  ;;  %v10748_v55 = vadd.f32 %v7339_v53, %v4931_v17 }
0x3850   :  { %v4932_v4 = vmul.f32 %v7338_v32, %v4924_v40 }
0x3852   :  { %v10750_v58 = vadd.f32 %v7339_v53, %v4932_v4 }
0x3854   :  { %v5038_v59 = vpack.c.bf16 %v10750_v58, %v10748_v55 }
0x3856   :  { %7380 = vmatmul.mubr.msk.bf16.vlgmr.msra.gmra.mrb[120].mxu0 %vm590_vm0, %v5038_v59 }
0x3857   :  { %8142 = vmatprep.mubr.msk.bf16.mxu0 %vm9558_vm1, %v9557_v42 }
0x3929   :  { %v5127_v1 = vpop.f32.mrb[120].mxu0 }
0x392a   :  { %v5129_v5 = vpop.f32.mrb[121].mxu0  ;;  %v5128_v49 = vadd.f32 %v5127_v1, %v5043_v0 }
0x392b   :  { %v5131_v9 = vpop.f32.mrb[122].mxu0  ;;  %v5130_v11 = vadd.f32 %v5129_v5, %v5047_v3 }
0x392c   :  { %v5132_v7 = vadd.f32 %v5131_v9, %v5043_v0  ;;  %v5133_v10 = vpop.f32.mrb[123].mxu0 }
0x392d   :  { %v5134_v51 = vadd.f32 %v5133_v10, %v5047_v3 }
0x392e   :  { %v10759_v13 = vpack.c.bf16 %v5132_v7, %v5128_v49 }
0x392f   :  { %v10761_v14 = vpack.c.bf16 %v5134_v51, %v5130_v11 }
0x3930   :  { %5256 = vrot.lane.b32.xlu1 %v10759_v13, %s9560_s11  ;;  %5138 = vrot.lane.b32.xlu0 %v10759_v13, %s9548_s17 }
0x3931   :  { %8147 = vmatpush3.bf16.msra.mxu1 %v10761_v14 }
0x3932   :  { %8158 = vmatprep.subr.bf16.mxu1 %v9557_v42 }
0x3934   :  { %5258 = vrot.lane.b32.xlu0 %v10759_v13, %s9559_s4 }
0x39a2   :  { %v5139_v43 = vpop.permute.xlu0 %5138  ;;  %v5257_v19 = vpop.permute.xlu1 %5256 }
0x39a3   :  { %v5144_v45 = vsel %vm736_vm2, %v5139_v43, 0  ;;  %v8578_v43 = vld [vmem:[%s11126_s14 + $0x20] sm:$0xff]  }
0x39a4   :  { %8141 = vmatpush3.bf16.xpose.msra.mxu0 %v5144_v45  ;;  %v8579_v45 = vld [vmem:[%s11126_s14 + $0x28] sm:$0xff]  }
0x39a5   :  { %8152 = vmatprep.subr.bf16.mxu0 %v9557_v42 }
0x39a6   :  { %v5259_v16 = vpop.permute.xlu0 %5258 }
0x39a7   :  { %v5264_v18 = vsel %vm736_vm2, %v5259_v16, 0 }
0x39ab   :  { %8143 = vmatmul.mubr.msk.bf16.vlgmr.msra.gmra.mrb[124].mxu0 %vm736_vm2, %v10759_v13 }
0x39ac   :  { %8153 = vmatpush3.bf16.xpose.msra.mxu0 %v5264_v18  ;;  %8154 = vmatprep.mubr.msk.bf16.mxu0 %vm9558_vm1, %v9557_v42 }
0x39ad   :  { %8164 = vmatprep.subr.bf16.mxu0 %v9557_v42 }
0x39b3   :  { %8155 = vmatmul.mubr.msk.bf16.vlgmr.msra.gmra.mrb[128].mxu0 %vm736_vm2, %v5257_v19 }
0x39b4   :  { %8166 = vmatprep.mubr.msk.bf16.mxu0 %vm9558_vm1, %v9557_v42  ;;  %8165 = vmatpush3.bf16.msra.mxu0 %v8579_v45 }
0x39b5   :  { %8176 = vmatprep.subr.bf16.mxu0 %v9557_v42 }
0x3a7e   :  { %v5180_v54 = vpop.f32.mrb[124].mxu0 }
0x3a7f   :  { %v5181_v57 = vadd.f32 %v10782_v20, %v5180_v54  ;;  %v8144_v52 = vpop.f32.mrb[125].mxu0 }
0x3a80   :  { %v5183_v22 = vpop.f32.mrb[126].mxu0 }
0x3a81   :  { %v5184_v56 = vadd.f32 %v10785_v23, %v5183_v22  ;;  %v8145_v25 = vpop.f32.mrb[127].mxu0  ;;  %v5187_v24 = vsel %vm736_vm2, %v5181_v57, -inf }
0x3a82   :  { %5188 = vmax.xlane.f32.xlu0 %v5187_v24 }
0x3a83   :  { %v5190_v26 = vsel %vm736_vm2, %v5184_v56, -inf }
0x3a84   :  { %5191 = vmax.xlane.f32.xlu1 %v5190_v26 }
0x3a86   :  { %v5300_v28 = vpop.f32.mrb[128].mxu0 }
0x3a87   :  { %v5301_v27 = vadd.f32 %v10782_v20, %v5300_v28  ;;  %v8156_v30 = vpop.f32.mrb[129].mxu0 }
0x3a88   :  { %v5303_v31 = vpop.f32.mrb[130].mxu0 }
0x3a89   :  { %v5304_v34 = vadd.f32 %v10785_v23, %v5303_v31  ;;  %v8157_v36 = vpop.f32.mrb[131].mxu0  ;;  %v5307_v63 = vsel %vm736_vm2, %v5301_v27, -inf }
0x3a8a   :  { %5308 = vmax.xlane.f32.xlu0 %v5307_v63 }
0x3a8b   :  { %v5310_v12 = vsel %vm736_vm2, %v5304_v34, -inf }
0x3a8e   :  { %5311 = vmax.xlane.f32.xlu0 %v5310_v12 }
0x3b0f   :  { %v5189_v37 = vpop.xlane.xlu0 %5188 }
0x3b10   :  { %v5193_v35 = vsub.f32 %v5181_v57, %v5189_v37 }
0x3b11   :  { %v5192_v21 = vpop.xlane.xlu1 %5191 }
0x3b12   :  { %v5195_v38 = vmul.f32 1.442695, %v5193_v35  ;;  %v5194_v2 = vsub.f32 %v5184_v56, %v5192_v21 }
0x3b14   :  { %8774 = vpow2.f32 %v5195_v38  ;;  %v5197_v39 = vmul.f32 1.442695, %v5194_v2 }
0x3b16   :  { %8776 = vpow2.f32 %v5197_v39 }
0x3b17   :  { %v5309_v41 = vpop.xlane.xlu0 %5308 }
0x3b18   :  { %v5313_v62 = vsub.f32 %v5301_v27, %v5309_v41 }
0x3b1a   :  { %v5315_v46 = vmul.f32 1.442695, %v5313_v62 }
0x3b1b   :  { %v5312_v47 = vpop.xlane.xlu0 %5311 }
0x3b1c   :  { %8778 = vpow2.f32 %v5315_v46  ;;  %v5314_v61 = vsub.f32 %v5304_v34, %v5312_v47 }
0x3b1e   :  { %v8775_v8 = vpop.eup %8774  ;;  %v5317_v6 = vmul.f32 1.442695, %v5314_v61 }
0x3b1f   :  { %v5199_v48 = vsel %vm736_vm2, %v8775_v8, 0.0 }
0x3b20   :  { %v8777_v29 = vpop.eup %8776  ;;  %8780 = vpow2.f32 %v5317_v6  ;;  %5200 = vadd.xlane.f32.xlu0 %v5199_v48 }
0x3b21   :  { %v5202_v50 = vsel %vm736_vm2, %v8777_v29, 0.0 }
0x3b24   :  { %5203 = vadd.xlane.f32.xlu0 %v5202_v50 }
0x3b26   :  { %v8779_v33 = vpop.eup %8778 }
0x3b27   :  { %v5319_v32 = vsel %vm736_vm2, %v8779_v33, 0.0 }
0x3b28   :  { %5320 = vadd.xlane.f32.xlu0 %v5319_v32 }
0x3b2a   :  { %v8781_v44 = vpop.eup %8780 }
0x3b2b   :  { %v5322_v17 = vsel %vm736_vm2, %v8781_v44, 0.0 }
0x3b2c   :  { %5323 = vadd.xlane.f32.xlu1 %v5322_v17 }
0x3b3d   :  { %5481 = vrot.lane.b32.xlu1 %v10759_v13, %s9541_s7 }
0x3b3e   :  { %5331 = vrot.lane.b32.xlu0 %v10761_v14, %s9560_s11 }
0x3b41   :  { %5479 = vrot.lane.b32.xlu1 %v10759_v13, %s9561_s12 }
0x3bad   :  { %v5201_v40 = vpop.xlane.xlu0 %5200 }
0x3bae   :  { %8782 = vrcp.f32 %v5201_v40 }
0x3bb1   :  { %v5204_v53 = vpop.xlane.xlu0 %5203 }
0x3bb2   :  { %8784 = vrcp.f32 %v5204_v53 }
0x3bb5   :  { %v5321_v4 = vpop.xlane.xlu0 %5320 }
0x3bb6   :  { %8786 = vrcp.f32 %v5321_v4 }
0x3bb8   :  { %v8783_v60 = vpop.eup %8782 }
0x3bb9   :  { %v5324_v59 = vpop.xlane.xlu1 %5323  ;;  %v5207_v1 = vmul.f32 %v8783_v60, %v8775_v8  ;;  %v5332_v9 = vpop.permute.xlu0 %5331 }
0x3bba   :  { %8788 = vrcp.f32 %v5324_v59 }
0x3bbc   :  { %v8785_v0 = vpop.eup %8784 }
0x3bbd   :  { %v5208_v3 = vmul.f32 %v8785_v0, %v8777_v29  ;;  %v5482_v56 = vpop.permute.xlu1 %5481 }
0x3bbe   :  { %v5487_v28 = vsel %vm736_vm2, %v5482_v56, 0 }
0x3bbf   :  { %v5209_v5 = vpack.c.bf16 %v5208_v3, %v5207_v1 }
0x3bc0   :  { %v8787_v49 = vpop.eup %8786 }
0x3bc1   :  { %8149 = vmatmul.mubr.msk.bf16.vlgmr.msra.gmra.mrb[120].mxu1 %vm736_vm2, %v5209_v5  ;;  %v5327_v10 = vmul.f32 %v8787_v49, %v8779_v33  ;;  %v5480_v27 = vpop.permute.xlu1 %5479 }
0x3bc2   :  { %8159 = vmatpush3.bf16.msra.mxu1 %v5332_v9  ;;  %8160 = vmatprep.mubr.msk.bf16.mxu1 %vm9558_vm1, %v9557_v42 }
0x3bc3   :  { %8170 = vmatprep.subr.bf16.mxu1 %v9557_v42 }
0x3bc4   :  { %v8789_v7 = vpop.eup %8788 }
0x3bc5   :  { %v5328_v11 = vmul.f32 %v8789_v7, %v8781_v44 }
0x3bc7   :  { %v5329_v51 = vpack.c.bf16 %v5328_v11, %v5327_v10  ;;  %v8580_v10 = vld [vmem:[%s11126_s14 + $0x30] sm:$0xff]  }
0x3bc9   :  { %8161 = vmatmul.mubr.msk.bf16.vlgmr.msra.gmra.mrb[124].mxu1 %vm736_vm2, %v5329_v51 }
0x3bca   :  { %8172 = vmatprep.mubr.msk.bf16.mxu1 %vm9558_vm1, %v9557_v42  ;;  %8171 = vmatpush3.bf16.msra.mxu1 %v8578_v43 }
0x3bcb   :  { %8182 = vmatprep.subr.bf16.mxu1 %v9557_v42 }
0x3c94   :  { %v5248_v16 = vpop.f32.mrb[120].mxu1 }
0x3c95   :  { %v8150_v18 = vpop.f32.mrb[121].mxu1 }
0x3c96   :  { %v5251_v19 = vpop.f32.mrb[122].mxu1 }
0x3c97   :  { %v5255_v54 = vpack.c.bf16 %v5251_v19, %v5248_v16  ;;  %v8151_v57 = vpop.f32.mrb[123].mxu1 }
0x3c99   :  { %8173 = vmatmul.mubr.msk.bf16.vlgmr.msra.gmra.mrb[128].mxu1 %vm736_vm2, %v5255_v54 }
0x3c9a   :  { %8184 = vmatprep.mubr.msk.bf16.mxu1 %vm9558_vm1, %v9557_v42 }
0x3c9c   :  { %v5371_v52 = vpop.f32.mrb[124].mxu1 }
0x3c9d   :  { %v8162_v22 = vpop.f32.mrb[125].mxu1 }
0x3c9e   :  { %v5374_v25 = vpop.f32.mrb[126].mxu1 }
0x3c9f   :  { %v5378_v24 = vpack.c.bf16 %v5374_v25, %v5371_v52  ;;  %v8163_v26 = vpop.f32.mrb[127].mxu1 }
0x3ca1   :  { %8167 = vmatmul.mubr.msk.bf16.vlgmr.msra.gmra.mrb[132].mxu0 %vm736_vm2, %v5378_v24 }
0x3ca2   :  { %8177 = vmatpush3.bf16.xpose.msra.mxu0 %v5487_v28  ;;  %8178 = vmatprep.mubr.msk.bf16.mxu0 %vm9558_vm1, %v9557_v42 }
0x3ca3   :  { %8188 = vmatprep.subr.bf16.mxu0 %v9557_v42 }
0x3ca9   :  { %8179 = vmatmul.mubr.msk.bf16.vlgmr.msra.gmra.mrb[136].mxu0 %vm736_vm2, %v5480_v27 }
0x3caa   :  { %8190 = vmatprep.mubr.msk.bf16.mxu0 %vm9558_vm1, %v9557_v42  ;;  %8189 = vmatpush3.bf16.msra.mxu0 %v8580_v10  ;;  %v7406_v10 = vld [vmem:[#allocation28 + $0x1] ss:$0 sm:$0xff] }
0x3cab   :  { %8200 = vmatprep.subr.bf16.mxu0 %v9557_v42 }
0x3d6c   :  { %v5472_v30 = vpop.f32.mrb[128].mxu1 }
0x3d6d   :  { %v8174_v31 = vpop.f32.mrb[129].mxu1 }
0x3d6e   :  { %v5475_v34 = vpop.f32.mrb[130].mxu1 }
0x3d6f   :  { %v8175_v36 = vpop.f32.mrb[131].mxu1 }
0x3d74   :  { %v5422_v63 = vpop.f32.mrb[132].mxu0 }
0x3d75   :  { %v10826_v12 = vadd.f32 %v5472_v30, %v5422_v63  ;;  %v8168_v37 = vpop.f32.mrb[133].mxu0  ;;  %v8581_v63 = vld [vmem:[%s11126_s14 + $0x38] sm:$0xff]  }
0x3d76   :  { %v5425_v35 = vpop.f32.mrb[134].mxu0 }
0x3d77   :  { %v10828_v21 = vadd.f32 %v5475_v34, %v5425_v35  ;;  %v8169_v38 = vpop.f32.mrb[135].mxu0 }
0x3d7c   :  { %v5523_v2 = vpop.f32.mrb[136].mxu0 }
0x3d7d   :  { %v5524_v39 = vadd.f32 %v10782_v20, %v5523_v2  ;;  %v8180_v41 = vpop.f32.mrb[137].mxu0 }
0x3d7e   :  { %v5526_v62 = vpop.f32.mrb[138].mxu0 }
0x3d7f   :  { %v5527_v46 = vadd.f32 %v10785_v23, %v5526_v62  ;;  %v8181_v47 = vpop.f32.mrb[139].mxu0  ;;  %v5530_v61 = vsel %vm736_vm2, %v5524_v39, -inf }
0x3d80   :  { %5531 = vmax.xlane.f32.xlu0 %v5530_v61 }
0x3d81   :  { %v5533_v8 = vsel %vm736_vm2, %v5527_v46, -inf }
0x3d82   :  { %5534 = vmax.xlane.f32.xlu1 %v5533_v8 }
0x3d93   :  { %5553 = vrot.lane.b32.xlu1 %v10761_v14, %s9561_s12 }
0x3d97   :  { %5653 = vrot.lane.b32.xlu1 %v10759_v13, %s9562_s16 }
0x3e0d   :  { %v5532_v6 = vpop.xlane.xlu0 %5531 }
0x3e0e   :  { %v5536_v48 = vsub.f32 %v5524_v39, %v5532_v6 }
0x3e0f   :  { %v5535_v29 = vpop.xlane.xlu1 %5534 }
0x3e10   :  { %v5538_v50 = vmul.f32 1.442695, %v5536_v48  ;;  %v5537_v33 = vsub.f32 %v5527_v46, %v5535_v29 }
0x3e12   :  { %8790 = vpow2.f32 %v5538_v50  ;;  %v5540_v32 = vmul.f32 1.442695, %v5537_v33  ;;  %v8582_v50 = vld [vmem:[#allocation27 + $0x20] sm:$0xff]  }
0x3e13   :  { %v5554_v44 = vpop.permute.xlu1 %5553 }
0x3e14   :  { %8792 = vpow2.f32 %v5540_v32  ;;  %8183 = vmatpush3.bf16.msra.mxu1 %v5554_v44  ;;  %v8583_v44 = vld [vmem:[#allocation27 + $0x28] sm:$0xff]  }
0x3e15   :  { %8194 = vmatprep.subr.bf16.mxu1 %v9557_v42 }
0x3e1c   :  { %v8791_v17 = vpop.eup %8790 }
0x3e1d   :  { %v5542_v40 = vsel %vm736_vm2, %v8791_v17, 0.0 }
0x3e1e   :  { %v8793_v53 = vpop.eup %8792  ;;  %5543 = vadd.xlane.f32.xlu0 %v5542_v40  ;;  %v8585_v40 = vld [vmem:[#allocation27 + $0x38] sm:$0xff]  }
0x3e1f   :  { %v5545_v4 = vsel %vm736_vm2, %v8793_v53, 0.0 }
0x3e22   :  { %5546 = vadd.xlane.f32.xlu0 %v5545_v4 }
0x3e38   :  { %5655 = vrot.lane.b32.xlu0 %v10759_v13, %s9525_s28  ;;  %v5654_v13 = vpop.permute.xlu1 %5653 }
0x3eab   :  { %v5544_v59 = vpop.xlane.xlu0 %5543 }
0x3eac   :  { %8794 = vrcp.f32 %v5544_v59 }
0x3eaf   :  { %v5547_v60 = vpop.xlane.xlu0 %5546 }
0x3eb0   :  { %8796 = vrcp.f32 %v5547_v60 }
0x3eb3   :  { %v5656_v9 = vpop.permute.xlu0 %5655 }
0x3eb4   :  { %v5661_v7 = vsel %vm736_vm2, %v5656_v9, 0 }
0x3eb6   :  { %v8795_v0 = vpop.eup %8794 }
0x3eb7   :  { %v5550_v3 = vmul.f32 %v8795_v0, %v8791_v17  ;;  %v8584_v17 = vld [vmem:[#allocation27 + $0x30] sm:$0xff]  }
0x3eba   :  { %v8797_v1 = vpop.eup %8796 }
0x3ebb   :  { %v5551_v5 = vmul.f32 %v8797_v1, %v8793_v53  ;;  %v7397_v53 = vld [vmem:[#allocation19 + $0x1] ss:$0 sm:$0xff] }
0x3ebd   :  { %v5552_v49 = vpack.c.bf16 %v5551_v5, %v5550_v3 }
0x3ebf   :  { %8185 = vmatmul.mubr.msk.bf16.vlgmr.msra.gmra.mrb[132].mxu1 %vm736_vm2, %v5552_v49 }
0x3ec0   :  { %8195 = vmatpush3.bf16.xpose.msra.mxu1 %v5661_v7  ;;  %8196 = vmatprep.mubr.msk.bf16.mxu1 %vm9558_vm1, %v9557_v42 }
0x3ec1   :  { %8206 = vmatprep.subr.bf16.mxu1 %v9557_v42 }
0x3ec7   :  { %8197 = vmatmul.mubr.msk.bf16.vlgmr.msra.gmra.mrb[136].mxu1 %vm736_vm2, %v5654_v13 }
0x3ec8   :  { %8208 = vmatprep.mubr.msk.bf16.mxu1 %vm9558_vm1, %v9557_v42  ;;  %8207 = vmatpush3.bf16.msra.mxu1 %v8581_v63 }
0x3ec9   :  { %8224 = vmatprep.subr.bf16.mxu1 %v9557_v42 }
0x3f92   :  { %v5593_v11 = vpop.f32.mrb[132].mxu1 }
0x3f93   :  { %v8186_v51 = vpop.f32.mrb[133].mxu1 }
0x3f94   :  { %v5596_v43 = vpop.f32.mrb[134].mxu1 }
0x3f95   :  { %v5600_v45 = vpack.c.bf16 %v5596_v43, %v5593_v11  ;;  %v8187_v16 = vpop.f32.mrb[135].mxu1 }
0x3f97   :  { %8191 = vmatmul.mubr.msk.bf16.vlgmr.msra.gmra.mrb[140].mxu0 %vm736_vm2, %v5600_v45 }
0x3f98   :  { %8202 = vmatprep.mubr.msk.bf16.mxu0 %vm9558_vm1, %v9557_v42 }
0x3f9a   :  { %v5697_v18 = vpop.f32.mrb[136].mxu1 }
0x3f9b   :  { %v5698_v19 = vadd.f32 %v10782_v20, %v5697_v18  ;;  %v8198_v54 = vpop.f32.mrb[137].mxu1 }
0x3f9c   :  { %v5700_v57 = vpop.f32.mrb[138].mxu1 }
0x3f9d   :  { %v5701_v52 = vadd.f32 %v10785_v23, %v5700_v57  ;;  %v8199_v22 = vpop.f32.mrb[139].mxu1  ;;  %v5704_v56 = vsel %vm736_vm2, %v5698_v19, -inf }
0x3f9e   :  { %5705 = vmax.xlane.f32.xlu1 %v5704_v56 }
0x3f9f   :  { %v5707_v25 = vsel %vm736_vm2, %v5701_v52, -inf }
0x3fa0   :  { %5708 = vmax.xlane.f32.xlu0 %v5707_v25 }
0x402b   :  { %v5706_v24 = vpop.xlane.xlu1 %5705 }
0x402c   :  { %v5710_v26 = vsub.f32 %v5698_v19, %v5706_v24 }
0x402d   :  { %v5709_v28 = vpop.xlane.xlu0 %5708 }
0x402e   :  { %v5712_v27 = vmul.f32 1.442695, %v5710_v26  ;;  %v5711_v30 = vsub.f32 %v5701_v52, %v5709_v28  ;;  %v8586_v28 = vld [vmem:[#allocation24 + $0x20] sm:$0xff]  }
0x4030   :  { %8798 = vpow2.f32 %v5712_v27  ;;  %v5714_v31 = vmul.f32 1.442695, %v5711_v30  ;;  %v8587_v27 = vld [vmem:[#allocation24 + $0x28] sm:$0xff]   ;;  %v8588_v30 = vld [vmem:[#allocation24 + $0x30] sm:$0xff]  }
0x4032   :  { %8800 = vpow2.f32 %v5714_v31  ;;  %v8589_v31 = vld [vmem:[#allocation24 + $0x38] sm:$0xff]  }
0x403a   :  { %v8799_v20 = vpop.eup %8798 }
0x403b   :  { %v5716_v34 = vsel %vm736_vm2, %v8799_v20, 0.0 }
0x403c   :  { %v8801_v23 = vpop.eup %8800  ;;  %5717 = vadd.xlane.f32.xlu0 %v5716_v34 }
0x403d   :  { %v5719_v36 = vsel %vm736_vm2, %v8801_v23, 0.0 }
0x403e   :  { %5720 = vadd.xlane.f32.xlu1 %v5719_v36 }
0x4052   :  { %5727 = vrot.lane.b32.xlu0 %v10761_v14, %s9562_s16 }
0x406a   :  { %v5644_v37 = vpop.f32.mrb[140].mxu0 }
0x406b   :  { %v5651_v35 = vadd.f32 %v5644_v37, %v10826_v12  ;;  %v8192_v38 = vpop.f32.mrb[141].mxu0 }
0x406c   :  { %v5647_v2 = vpop.f32.mrb[142].mxu0 }
0x406d   :  { %v5652_v39 = vadd.f32 %v5647_v2, %v10828_v21  ;;  %v8193_v41 = vpop.f32.mrb[143].mxu0  ;;  %v7398_v2 = vld [vmem:[#allocation21 + $0x1] ss:$0 sm:$0xff] }
0x40c9   :  { %v5718_v62 = vpop.xlane.xlu0 %5717 }
0x40ca   :  { %8802 = vrcp.f32 %v5718_v62 }
0x40cb   :  { %v5721_v46 = vpop.xlane.xlu1 %5720 }
0x40cc   :  { %8804 = vrcp.f32 %v5721_v46  ;;  %v7399_v46 = vld [vmem:[#allocation22 + $0x1] ss:$0 sm:$0xff] }
0x40cd   :  { %v5728_v47 = vpop.permute.xlu0 %5727 }
0x40ce   :  { %8201 = vmatpush3.bf16.msra.mxu0 %v5728_v47 }
0x40cf   :  { %8212 = vmatprep.subr.bf16.mxu0 %v9557_v42 }
0x40d4   :  { %v8803_v14 = vpop.eup %8802 }
0x40d5   :  { %v5724_v8 = vmul.f32 %v8803_v14, %v8799_v20 }
0x40d6   :  { %v8805_v61 = vpop.eup %8804 }
0x40d7   :  { %v5725_v6 = vmul.f32 %v8805_v61, %v8801_v23 }
0x40d9   :  { %v5726_v48 = vpack.c.bf16 %v5725_v6, %v5724_v8 }
0x40db   :  { %8203 = vmatmul.mubr.msk.bf16.vlgmr.msra.gmra.mrb[144].mxu0 %vm736_vm2, %v5726_v48  ;;  %v7400_v48 = vld [vmem:[#allocation25 + $0x1] ss:$0 sm:$0xff] }
0x40dc   :  { %8220 = vmatprep.mubr.msk.bf16.mxu0 %vm9558_vm1, %v9557_v42  ;;  %8213 = vmatpush3.bf16.msra.mxu0 %v8586_v28 }
0x40dd   :  { %8214 = vmatprep.subr.bf16.mxu0 %v9557_v42 }
0x40e0   :  { %8215 = vmatpush3.bf16.msra.mxu0 %v8587_v27 }
0x40e1   :  { %8216 = vmatprep.subr.bf16.mxu0 %v9557_v42 }
0x40e4   :  { %8217 = vmatpush3.bf16.msra.mxu0 %v8588_v30 }
0x40e5   :  { %8218 = vmatprep.subr.bf16.mxu0 %v9557_v42 }
0x40e8   :  { %8219 = vmatpush3.bf16.msra.mxu0 %v8589_v31 }
0x40e9   :  { %8236 = vmatprep.subr.bf16.mxu0 %v9557_v42 }
0x41ae   :  { %v5767_v12 = vpop.f32.mrb[144].mxu0 }
0x41af   :  { %v8204_v21 = vpop.f32.mrb[145].mxu0 }
0x41b0   :  { %v5770_v29 = vpop.f32.mrb[146].mxu0 }
0x41b1   :  { %v5774_v33 = vpack.c.bf16 %v5770_v29, %v5767_v12  ;;  %v8205_v32 = vpop.f32.mrb[147].mxu0 }
0x41b3   :  { %8209 = vmatmul.mubr.msk.bf16.vlgmr.msra.gmra.mrb[140].mxu1 %vm736_vm2, %v5774_v33 }
0x41b4   :  { %8225 = vmatpush3.bf16.msra.mxu1 %v8582_v50  ;;  %8232 = vmatprep.mubr.msk.bf16.mxu1 %vm9558_vm1, %v9557_v42 }
0x41b5   :  { %8226 = vmatprep.subr.bf16.mxu1 %v9557_v42 }
0x41b8   :  { %8227 = vmatpush3.bf16.msra.mxu1 %v8583_v44 }
0x41b9   :  { %8228 = vmatprep.subr.bf16.mxu1 %v9557_v42 }
0x41bc   :  { %8229 = vmatpush3.bf16.msra.mxu1 %v8584_v17 }
0x41bd   :  { %8230 = vmatprep.subr.bf16.mxu1 %v9557_v42 }
0x41c0   :  { %8231 = vmatpush3.bf16.msra.mxu1 %v8585_v40 }
0x41c1   :  { %8242 = vmatprep.subr.bf16.mxu1 %v9557_v42 }
0x41c3   :  { %8233 = vmatmul.mubr.msk.bf16.vlgmr.msra.gmra.mrb[144].mxu1 %vm590_vm0, %v10447_v15 }
0x41c4   :  { %8244 = vmatprep.mubr.msk.bf16.mxu1 %vm9558_vm1, %v9557_v42 }
0x4286   :  { %v5818_v4 = vpop.f32.mrb[140].mxu1 }
0x4287   :  { %v5825_v59 = vadd.f32 %v5818_v4, %v5651_v35  ;;  %v8210_v60 = vpop.f32.mrb[141].mxu1 }
0x4288   :  { %v5821_v0 = vpop.f32.mrb[142].mxu1 }
0x4289   :  { %v5833_v1 = vadd.f32 %v7397_v53, %v5825_v59  ;;  %v5826_v3 = vadd.f32 %v5821_v0, %v5652_v39  ;;  %v8211_v5 = vpop.f32.mrb[143].mxu1  ;;  %v10922_v59 = vld [vmem:[#allocation4] sm:$0xff] }
0x428b   :  { %v5834_v9 = vadd.f32 %v7397_v53, %v5826_v3  ;;  %v5835_v49 = vadd.f32 %v5833_v1, %v10748_v55  ;;  %v10925_v3 = vld [vmem:[#allocation4 + $0x8] sm:$0xff] }
0x428d   :  { %v5837_v7 = vsel %vm590_vm0, %v5835_v49, 0.0  ;;  %v5836_v13 = vadd.f32 %v5834_v9, %v10750_v58 }
0x428e   :  { %5838 = vadd.xlane.f32.xlu1 %v5837_v7 }
0x428f   :  { %v5840_v15 = vsel %vm590_vm0, %v5836_v13, 0.0 }
0x4292   :  { %5841 = vadd.xlane.f32.xlu1 %v5840_v15 }
0x4296   :  { %v6018_v11 = vpop.f32.mrb[144].mxu1 }
0x4297   :  { %v8234_v51 = vpop.f32.mrb[145].mxu1  ;;  %v6019_v45 = vadd.f32 %v7406_v10, %v6018_v11 }
0x4298   :  { %v6021_v43 = vpop.f32.mrb[146].mxu1 }
0x4299   :  { %v6022_v16 = vadd.f32 %v7406_v10, %v6021_v43  ;;  %v8235_v18 = vpop.f32.mrb[147].mxu1 }
0x429b   :  { %v10887_v19 = vpack.c.bf16 %v6022_v16, %v6019_v45 }
0x429d   :  { %v6031_v6 = vsel %vm736_vm2, %v10887_v19, 0 }
0x431b   :  { %v5839_v54 = vpop.xlane.xlu1 %5838 }
0x431c   :  { %v5843_v57 = vmul.f32 0.015625, %v5839_v54 }
0x431e   :  { %v5845_v55 = vsub.f32 %v5835_v49, %v5843_v57 }
0x431f   :  { %v5842_v52 = vpop.xlane.xlu1 %5841 }
0x4320   :  { %v5844_v22 = vmul.f32 0.015625, %v5842_v52  ;;  %v5847_v56 = vmul.f32 %v5845_v55, %v5845_v55 }
0x4322   :  { %v5846_v58 = vsub.f32 %v5836_v13, %v5844_v22  ;;  %v5849_v25 = vsel %vm590_vm0, %v5847_v56, 0.0 }
0x4323   :  { %5850 = vadd.xlane.f32.xlu1 %v5849_v25 }
0x4324   :  { %v5848_v24 = vmul.f32 %v5846_v58, %v5846_v58 }
0x4326   :  { %v5852_v26 = vsel %vm590_vm0, %v5848_v24, 0.0 }
0x4327   :  { %5853 = vadd.xlane.f32.xlu1 %v5852_v26 }
0x4338   :  { %6149 = vrot.lane.b32.xlu1 %v10887_v19, %s9560_s11 }
0x43b0   :  { %v5851_v20 = vpop.xlane.xlu1 %5850 }
0x43b1   :  { %v5855_v34 = vmul.f32 0.015625, %v5851_v20 }
0x43b3   :  { %v5857_v23 = vadd.f32 1e-05, %v5855_v34 }
0x43b4   :  { %v5854_v36 = vpop.xlane.xlu1 %5853 }
0x43b5   :  { %8806 = vrsqrt.f32 %v5857_v23  ;;  %v5856_v63 = vmul.f32 0.015625, %v5854_v36 }
0x43b7   :  { %v5858_v37 = vadd.f32 1e-05, %v5856_v63 }
0x43b8   :  { %v6150_v44 = vpop.permute.xlu1 %6149 }
0x43b9   :  { %8808 = vrsqrt.f32 %v5858_v37  ;;  %v6155_v40 = vsel %vm736_vm2, %v6150_v44, 0 }
0x43bf   :  { %v8807_v35 = vpop.eup %8806 }
0x43c0   :  { %v5861_v38 = vmul.f32 %v8807_v35, %v5845_v55 }
0x43c2   :  { %v5869_v41 = vmul.f32 %v7398_v2, %v5861_v38 }
0x43c3   :  { %v8809_v39 = vpop.eup %8808 }
0x43c4   :  { %v5862_v62 = vmul.f32 %v8809_v39, %v5846_v58  ;;  %v10897_v14 = vadd.f32 %v7399_v46, %v5869_v41 }
0x43c6   :  { %v5870_v47 = vmul.f32 %v7398_v2, %v5862_v62 }
0x43c8   :  { %v10899_v61 = vadd.f32 %v7399_v46, %v5870_v47 }
0x43ca   :  { %v5879_v8 = vpack.c.bf16 %v10899_v61, %v10897_v14 }
0x43cc   :  { %8221 = vmatmul.mubr.msk.bf16.vlgmr.msra.gmra.mrb[148].mxu0 %vm590_vm0, %v5879_v8 }
0x43cd   :  { %8237 = vmatpush3.bf16.xpose.msra.mxu0 %v6031_v6  ;;  %8238 = vmatprep.mubr.msk.bf16.mxu0 %vm9558_vm1, %v9557_v42 }
0x43ce   :  { %8248 = vmatprep.subr.bf16.mxu0 %v9557_v42 }
0x449f   :  { %v5947_v12 = vpop.f32.mrb[148].mxu0 }
0x44a0   :  { %v8222_v21 = vpop.f32.mrb[149].mxu0  ;;  %v5948_v50 = vadd.f32 %v7400_v48, %v5947_v12 }
0x44a1   :  { %v5950_v29 = vpop.f32.mrb[150].mxu0 }
0x44a2   :  { %v5951_v33 = vadd.f32 %v7400_v48, %v5950_v29  ;;  %v8223_v32 = vpop.f32.mrb[151].mxu0 }
0x44a3   :  { %v8591_v32 = vld [vmem:[#allocation30 + $0x28] sm:$0xff]  }
0x44a4   :  { %v10909_v17 = vpack.c.bf16 %v5951_v33, %v5948_v50  ;;  %v8590_v33 = vld [vmem:[#allocation30 + $0x20] sm:$0xff]  }
0x44a6   :  { %6147 = vrot.lane.b32.xlu0 %v10909_v17, %s9560_s11  ;;  %8239 = vmatmul.mubr.msk.bf16.vlgmr.msra.gmra.mrb[152].mxu0 %vm736_vm2, %v10909_v17 }
0x44a7   :  { %8249 = vmatpush3.bf16.xpose.msra.mxu0 %v6155_v40  ;;  %8250 = vmatprep.mubr.msk.bf16.mxu0 %vm9558_vm1, %v9557_v42 }
0x44a8   :  { %8260 = vmatprep.subr.bf16.mxu0 %v9557_v42 }
0x4518   :  { %v6148_v53 = vpop.permute.xlu0 %6147 }
0x4519   :  { %8251 = vmatmul.mubr.msk.bf16.vlgmr.msra.gmra.mrb[156].mxu0 %vm736_vm2, %v6148_v53 }
0x451a   :  { %8262 = vmatprep.mubr.msk.bf16.mxu0 %vm9558_vm1, %v9557_v42  ;;  %8261 = vmatpush3.bf16.msra.mxu0 %v8591_v32 }
0x451b   :  { %8272 = vmatprep.subr.bf16.mxu0 %v9557_v42 }
0x4579   :  { %v6067_v4 = vpop.f32.mrb[152].mxu0 }
0x457a   :  { %v6068_v60 = vadd.f32 %v10922_v59, %v6067_v4  ;;  %v8240_v0 = vpop.f32.mrb[153].mxu0 }
0x457b   :  { %v6070_v1 = vpop.f32.mrb[154].mxu0 }
0x457c   :  { %v6071_v5 = vadd.f32 %v10925_v3, %v6070_v1  ;;  %v8241_v9 = vpop.f32.mrb[155].mxu0  ;;  %v6074_v49 = vsel %vm736_vm2, %v6068_v60, -inf }
0x457d   :  { %6075 = vmax.xlane.f32.xlu0 %v6074_v49 }
0x457e   :  { %v6077_v7 = vsel %vm736_vm2, %v6071_v5, -inf }
0x457f   :  { %6078 = vmax.xlane.f32.xlu1 %v6077_v7 }
0x45ec   :  { %v6191_v13 = vpop.f32.mrb[156].mxu0 }
0x45ed   :  { %v6192_v15 = vadd.f32 %v10922_v59, %v6191_v13  ;;  %v8252_v10 = vpop.f32.mrb[157].mxu0 }
0x45ee   :  { %v6194_v11 = vpop.f32.mrb[158].mxu0 }
0x45ef   :  { %v6195_v51 = vadd.f32 %v10925_v3, %v6194_v11  ;;  %v8253_v43 = vpop.f32.mrb[159].mxu0  ;;  %v6198_v45 = vsel %vm736_vm2, %v6192_v15, -inf }
0x45f0   :  { %6199 = vmax.xlane.f32.xlu0 %v6198_v45 }
0x45f1   :  { %v6201_v16 = vsel %vm736_vm2, %v6195_v51, -inf }
0x45f4   :  { %6202 = vmax.xlane.f32.xlu0 %v6201_v16 }
0x460a   :  { %v6076_v18 = vpop.xlane.xlu0 %6075 }
0x460b   :  { %v6080_v54 = vsub.f32 %v6068_v60, %v6076_v18 }
0x460c   :  { %v6079_v57 = vpop.xlane.xlu1 %6078 }
0x460d   :  { %v6082_v55 = vmul.f32 1.442695, %v6080_v54  ;;  %v6081_v52 = vsub.f32 %v6071_v5, %v6079_v57 }
0x460f   :  { %8810 = vpow2.f32 %v6082_v55  ;;  %v6084_v22 = vmul.f32 1.442695, %v6081_v52 }
0x4611   :  { %8812 = vpow2.f32 %v6084_v22 }
0x4619   :  { %v8811_v56 = vpop.eup %8810 }
0x461a   :  { %v6086_v58 = vsel %vm736_vm2, %v8811_v56, 0.0 }
0x461b   :  { %v8813_v25 = vpop.eup %8812  ;;  %6087 = vadd.xlane.f32.xlu0 %v6086_v58 }
0x461c   :  { %v6089_v24 = vsel %vm736_vm2, %v8813_v25, 0.0 }
0x461f   :  { %6090 = vadd.xlane.f32.xlu0 %v6089_v24 }
0x467d   :  { %v6200_v26 = vpop.xlane.xlu0 %6199 }
0x467e   :  { %v6204_v28 = vsub.f32 %v6192_v15, %v6200_v26 }
0x4680   :  { %v6206_v27 = vmul.f32 1.442695, %v6204_v28 }
0x4681   :  { %v6203_v30 = vpop.xlane.xlu0 %6202 }
0x4682   :  { %8814 = vpow2.f32 %v6206_v27  ;;  %v6205_v31 = vsub.f32 %v6195_v51, %v6203_v30 }
0x4684   :  { %v6208_v20 = vmul.f32 1.442695, %v6205_v31 }
0x4686   :  { %8816 = vpow2.f32 %v6208_v20 }
0x468c   :  { %v8815_v34 = vpop.eup %8814 }
0x468d   :  { %v6210_v23 = vsel %vm736_vm2, %v8815_v34, 0.0 }
0x468e   :  { %6211 = vadd.xlane.f32.xlu1 %v6210_v23 }
0x4690   :  { %v8817_v36 = vpop.eup %8816 }
0x4691   :  { %v6213_v63 = vsel %vm736_vm2, %v8817_v36, 0.0 }
0x4692   :  { %6214 = vadd.xlane.f32.xlu0 %v6213_v63 }
0x469f   :  { %6098 = vrot.lane.b32.xlu1 %v10887_v19, %s9548_s17 }
0x46a3   :  { %6371 = vrot.lane.b32.xlu1 %v10887_v19, %s9561_s12 }
0x46a7   :  { %6369 = vrot.lane.b32.xlu1 %v10909_v17, %s9561_s12 }
0x46a8   :  { %6221 = vrot.lane.b32.xlu0 %v10887_v19, %s9559_s4  ;;  %v6088_v37 = vpop.xlane.xlu0 %6087 }
0x46ac   :  { %v6091_v35 = vpop.xlane.xlu0 %6090 }
0x46ad   :  { %8818 = vrcp.f32 %v6091_v35 }
0x46ae   :  { %8820 = vrcp.f32 %v6088_v37 }
0x46b7   :  { %v8819_v38 = vpop.eup %8818 }
0x46b8   :  { %v8821_v39 = vpop.eup %8820  ;;  %v6095_v41 = vmul.f32 %v8819_v38, %v8813_v25 }
0x46b9   :  { %v6094_v62 = vmul.f32 %v8821_v39, %v8811_v56 }
0x46bb   :  { %v6096_v8 = vpack.c.bf16 %v6095_v41, %v6094_v62 }
0x471b   :  { %v6212_v2 = vpop.xlane.xlu1 %6211 }
0x471c   :  { %8822 = vrcp.f32 %v6212_v2 }
0x471f   :  { %v6099_v46 = vpop.permute.xlu1 %6098  ;;  %v6215_v47 = vpop.xlane.xlu0 %6214 }
0x4720   :  { %8824 = vrcp.f32 %v6215_v47  ;;  %8243 = vmatpush3.bf16.msra.mxu1 %v6099_v46 }
0x4721   :  { %8254 = vmatprep.subr.bf16.mxu1 %v9557_v42 }
0x4723   :  { %8245 = vmatmul.mubr.msk.bf16.vlgmr.msra.gmra.mrb[148].mxu1 %vm736_vm2, %v6096_v8  ;;  %v6222_v6 = vpop.permute.xlu0 %6221  ;;  %v6372_v5 = vpop.permute.xlu1 %6371 }
0x4724   :  { %8255 = vmatpush3.bf16.msra.mxu1 %v6222_v6  ;;  %8256 = vmatprep.mubr.msk.bf16.mxu1 %vm9558_vm1, %v9557_v42  ;;  %v6377_v13 = vsel %vm736_vm2, %v6372_v5, 0 }
0x4725   :  { %8266 = vmatprep.subr.bf16.mxu1 %v9557_v42 }
0x4726   :  { %v8823_v48 = vpop.eup %8822 }
0x4727   :  { %v6218_v21 = vmul.f32 %v8823_v48, %v8815_v34  ;;  %v6370_v15 = vpop.permute.xlu1 %6369 }
0x472a   :  { %v8825_v12 = vpop.eup %8824 }
0x472b   :  { %v6219_v29 = vmul.f32 %v8825_v12, %v8817_v36  ;;  %v8592_v12 = vld [vmem:[#allocation30 + $0x30] sm:$0xff]  }
0x472d   :  { %v6220_v50 = vpack.c.bf16 %v6219_v29, %v6218_v21 }
0x472f   :  { %8257 = vmatmul.mubr.msk.bf16.vlgmr.msra.gmra.mrb[152].mxu1 %vm736_vm2, %v6220_v50 }
0x4730   :  { %8268 = vmatprep.mubr.msk.bf16.mxu1 %vm9558_vm1, %v9557_v42  ;;  %8267 = vmatpush3.bf16.msra.mxu1 %v8590_v33 }
0x4731   :  { %8278 = vmatprep.subr.bf16.mxu1 %v9557_v42 }
0x47f6   :  { %v6138_v44 = vpop.f32.mrb[148].mxu1 }
0x47f7   :  { %v8246_v40 = vpop.f32.mrb[149].mxu1 }
0x47f8   :  { %v6141_v53 = vpop.f32.mrb[150].mxu1 }
0x47f9   :  { %v6145_v4 = vpack.c.bf16 %v6141_v53, %v6138_v44  ;;  %v8247_v60 = vpop.f32.mrb[151].mxu1 }
0x47fb   :  { %8269 = vmatmul.mubr.msk.bf16.vlgmr.msra.gmra.mrb[156].mxu1 %vm736_vm2, %v6145_v4 }
0x47fc   :  { %8280 = vmatprep.mubr.msk.bf16.mxu1 %vm9558_vm1, %v9557_v42 }
0x4802   :  { %v6261_v0 = vpop.f32.mrb[152].mxu1 }
0x4803   :  { %v8258_v1 = vpop.f32.mrb[153].mxu1 }
0x4804   :  { %v6264_v9 = vpop.f32.mrb[154].mxu1 }
0x4805   :  { %v6268_v49 = vpack.c.bf16 %v6264_v9, %v6261_v0  ;;  %v8259_v7 = vpop.f32.mrb[155].mxu1 }
0x4807   :  { %8263 = vmatmul.mubr.msk.bf16.vlgmr.msra.gmra.mrb[160].mxu0 %vm736_vm2, %v6268_v49 }
0x4808   :  { %8273 = vmatpush3.bf16.xpose.msra.mxu0 %v6377_v13  ;;  %8274 = vmatprep.mubr.msk.bf16.mxu0 %vm9558_vm1, %v9557_v42 }
0x4809   :  { %8284 = vmatprep.subr.bf16.mxu0 %v9557_v42 }
0x480f   :  { %8275 = vmatmul.mubr.msk.bf16.vlgmr.msra.gmra.mrb[164].mxu0 %vm736_vm2, %v6370_v15 }
0x4810   :  { %8286 = vmatprep.mubr.msk.bf16.mxu0 %vm9558_vm1, %v9557_v42  ;;  %8285 = vmatpush3.bf16.msra.mxu0 %v8592_v12 }
0x4811   :  { %8296 = vmatprep.subr.bf16.mxu0 %v9557_v42 }
0x48ce   :  { %v6362_v10 = vpop.f32.mrb[156].mxu1 }
0x48cf   :  { %v8270_v11 = vpop.f32.mrb[157].mxu1 }
0x48d0   :  { %v6365_v51 = vpop.f32.mrb[158].mxu1 }
0x48d1   :  { %v8271_v43 = vpop.f32.mrb[159].mxu1 }
0x48d2   :  { %v8593_v43 = vld [vmem:[#allocation30 + $0x38] sm:$0xff]  }
0x48da   :  { %v6312_v45 = vpop.f32.mrb[160].mxu0 }
0x48db   :  { %v10967_v16 = vadd.f32 %v6362_v10, %v6312_v45  ;;  %v8264_v18 = vpop.f32.mrb[161].mxu0 }
0x48dc   :  { %v6315_v54 = vpop.f32.mrb[162].mxu0 }
0x48dd   :  { %v10969_v57 = vadd.f32 %v6365_v51, %v6315_v54  ;;  %v8265_v55 = vpop.f32.mrb[163].mxu0 }
0x48e2   :  { %v6413_v52 = vpop.f32.mrb[164].mxu0 }
0x48e3   :  { %v6414_v22 = vadd.f32 %v10922_v59, %v6413_v52  ;;  %v8276_v56 = vpop.f32.mrb[165].mxu0 }
0x48e4   :  { %v6416_v58 = vpop.f32.mrb[166].mxu0 }
0x48e5   :  { %v6417_v25 = vadd.f32 %v10925_v3, %v6416_v58  ;;  %v8277_v24 = vpop.f32.mrb[167].mxu0  ;;  %v6420_v26 = vsel %vm736_vm2, %v6414_v22, -inf }
0x48e6   :  { %6421 = vmax.xlane.f32.xlu0 %v6420_v26 }
0x48e7   :  { %v6423_v28 = vsel %vm736_vm2, %v6417_v25, -inf }
0x48e8   :  { %6424 = vmax.xlane.f32.xlu1 %v6423_v28 }
0x48f9   :  { %6443 = vrot.lane.b32.xlu1 %v10887_v19, %s9541_s7 }
0x48fd   :  { %6543 = vrot.lane.b32.xlu1 %v10909_v17, %s9562_s16 }
0x4973   :  { %v6422_v27 = vpop.xlane.xlu0 %6421 }
0x4974   :  { %v6426_v30 = vsub.f32 %v6414_v22, %v6422_v27 }
0x4975   :  { %v6425_v31 = vpop.xlane.xlu1 %6424 }
0x4976   :  { %v6428_v20 = vmul.f32 1.442695, %v6426_v30  ;;  %v6427_v34 = vsub.f32 %v6417_v25, %v6425_v31 }
0x4978   :  { %8826 = vpow2.f32 %v6428_v20  ;;  %v6430_v23 = vmul.f32 1.442695, %v6427_v34  ;;  %v7428_v34 = vld [vmem:[#allocation31 + $0x1] ss:$0 sm:$0xff] }
0x4979   :  { %v6444_v36 = vpop.permute.xlu1 %6443 }
0x497a   :  { %8828 = vpow2.f32 %v6430_v23  ;;  %8279 = vmatpush3.bf16.msra.mxu1 %v6444_v36 }
0x497b   :  { %8290 = vmatprep.subr.bf16.mxu1 %v9557_v42 }
0x497d   :  { %v6544_v48 = vpop.permute.xlu1 %6543 }
0x4982   :  { %v8827_v63 = vpop.eup %8826 }
0x4983   :  { %v6432_v37 = vsel %vm736_vm2, %v8827_v63, 0.0 }
0x4984   :  { %v8829_v35 = vpop.eup %8828  ;;  %6433 = vadd.xlane.f32.xlu0 %v6432_v37 }
0x4985   :  { %v6435_v38 = vsel %vm736_vm2, %v8829_v35, 0.0 }
0x4988   :  { %6436 = vadd.xlane.f32.xlu0 %v6435_v38 }
0x499e   :  { %6545 = vrot.lane.b32.xlu0 %v10887_v19, %s9562_s16 }
0x4a11   :  { %v6434_v17 = vpop.xlane.xlu0 %6433 }
0x4a12   :  { %8830 = vrcp.f32 %v6434_v17 }
0x4a15   :  { %v6437_v2 = vpop.xlane.xlu0 %6436 }
0x4a16   :  { %8832 = vrcp.f32 %v6437_v2 }
0x4a19   :  { %v6546_v47 = vpop.permute.xlu0 %6545 }
0x4a1a   :  { %v6551_v6 = vsel %vm736_vm2, %v6546_v47, 0 }
0x4a1c   :  { %v8831_v39 = vpop.eup %8830 }
0x4a1d   :  { %v6440_v62 = vmul.f32 %v8831_v39, %v8827_v63 }
0x4a20   :  { %v8833_v41 = vpop.eup %8832 }
0x4a21   :  { %v6441_v46 = vmul.f32 %v8833_v41, %v8829_v35 }
0x4a23   :  { %v6442_v8 = vpack.c.bf16 %v6441_v46, %v6440_v62 }
0x4a25   :  { %8281 = vmatmul.mubr.msk.bf16.vlgmr.msra.gmra.mrb[160].mxu1 %vm736_vm2, %v6442_v8 }
0x4a26   :  { %8291 = vmatpush3.bf16.xpose.msra.mxu1 %v6551_v6  ;;  %8292 = vmatprep.mubr.msk.bf16.mxu1 %vm9558_vm1, %v9557_v42 }
0x4a27   :  { %8302 = vmatprep.subr.bf16.mxu1 %v9557_v42 }
0x4a2d   :  { %8293 = vmatmul.mubr.msk.bf16.vlgmr.msra.gmra.mrb[164].mxu1 %vm736_vm2, %v6544_v48 }
0x4a2e   :  { %8304 = vmatprep.mubr.msk.bf16.mxu1 %vm9558_vm1, %v9557_v42  ;;  %8303 = vmatpush3.bf16.msra.mxu1 %v8593_v43 }
0x4a2f   :  { %8320 = vmatprep.subr.bf16.mxu1 %v9557_v42 }
0x4af8   :  { %v6483_v21 = vpop.f32.mrb[160].mxu1 }
0x4af9   :  { %v8282_v29 = vpop.f32.mrb[161].mxu1 }
0x4afa   :  { %v6486_v50 = vpop.f32.mrb[162].mxu1 }
0x4afb   :  { %v6490_v33 = vpack.c.bf16 %v6486_v50, %v6483_v21  ;;  %v8283_v32 = vpop.f32.mrb[163].mxu1 }
0x4afc   :  { %v8595_v32 = vld [vmem:[#allocation36 + $0x28] sm:$0xff]  }
0x4afd   :  { %8287 = vmatmul.mubr.msk.bf16.vlgmr.msra.gmra.mrb[168].mxu0 %vm736_vm2, %v6490_v33 }
0x4afe   :  { %8298 = vmatprep.mubr.msk.bf16.mxu0 %vm9558_vm1, %v9557_v42 }
0x4b00   :  { %v6587_v44 = vpop.f32.mrb[164].mxu1 }
0x4b01   :  { %v6588_v40 = vadd.f32 %v10922_v59, %v6587_v44  ;;  %v8294_v53 = vpop.f32.mrb[165].mxu1  ;;  %v8596_v44 = vld [vmem:[#allocation36 + $0x30] sm:$0xff]  }
0x4b02   :  { %v6590_v4 = vpop.f32.mrb[166].mxu1  ;;  %v8598_v53 = vld [vmem:[%s11127_s27 + $0x40] sm:$0xff]  }
0x4b03   :  { %v6591_v60 = vadd.f32 %v10925_v3, %v6590_v4  ;;  %v8295_v0 = vpop.f32.mrb[167].mxu1  ;;  %v6594_v1 = vsel %vm736_vm2, %v6588_v40, -inf  ;;  %v8599_v4 = vld [vmem:[%s11127_s27 + $0x48] sm:$0xff]  }
0x4b04   :  { %6595 = vmax.xlane.f32.xlu1 %v6594_v1  ;;  %v8601_v0 = vld [vmem:[%s11127_s27 + $0x58] sm:$0xff]   ;;  %v8602_v1 = vld [vmem:[%s11127_s27 + $0x60] sm:$0xff]  }
0x4b05   :  { %v6597_v5 = vsel %vm736_vm2, %v6591_v60, -inf }
0x4b06   :  { %6598 = vmax.xlane.f32.xlu0 %v6597_v5  ;;  %v8603_v5 = vld [vmem:[%s11127_s27 + $0x68] sm:$0xff]  }
0x4b91   :  { %v6596_v9 = vpop.xlane.xlu1 %6595 }
0x4b92   :  { %v6600_v49 = vsub.f32 %v6588_v40, %v6596_v9  ;;  %v8597_v40 = vld [vmem:[#allocation36 + $0x38] sm:$0xff]  }
0x4b93   :  { %v6599_v7 = vpop.xlane.xlu0 %6598 }
0x4b94   :  { %v6602_v13 = vmul.f32 1.442695, %v6600_v49  ;;  %v6601_v15 = vsub.f32 %v6591_v60, %v6599_v7  ;;  %v8600_v60 = vld [vmem:[%s11127_s27 + $0x50] sm:$0xff]  }
0x4b96   :  { %8834 = vpow2.f32 %v6602_v13  ;;  %v6604_v10 = vmul.f32 1.442695, %v6601_v15 }
0x4b98   :  { %8836 = vpow2.f32 %v6604_v10 }
0x4ba0   :  { %v8835_v59 = vpop.eup %8834 }
0x4ba1   :  { %v6606_v11 = vsel %vm736_vm2, %v8835_v59, 0.0 }
0x4ba2   :  { %v8837_v51 = vpop.eup %8836  ;;  %6607 = vadd.xlane.f32.xlu0 %v6606_v11 }
0x4ba3   :  { %v6609_v3 = vsel %vm736_vm2, %v8837_v51, 0.0 }
0x4ba4   :  { %6610 = vadd.xlane.f32.xlu1 %v6609_v3 }
0x4bb8   :  { %6617 = vrot.lane.b32.xlu0 %v10887_v19, %s9525_s28  ;;  %s11128_s28 = sld [smem:[#allocation62_spill]] }
0x4bd0   :  { %v6534_v45 = vpop.f32.mrb[168].mxu0 }
0x4bd1   :  { %v6541_v18 = vadd.f32 %v6534_v45, %v10967_v16  ;;  %v8288_v54 = vpop.f32.mrb[169].mxu0 }
0x4bd2   :  { %v6537_v55 = vpop.f32.mrb[170].mxu0 }
0x4bd3   :  { %v6542_v52 = vadd.f32 %v6537_v55, %v10969_v57  ;;  %v8289_v22 = vpop.f32.mrb[171].mxu0 }
0x4c2f   :  { %v6608_v56 = vpop.xlane.xlu0 %6607 }
0x4c30   :  { %8838 = vrcp.f32 %v6608_v56  ;;  %v8604_v56 = vld [vmem:[%s11127_s27 + $0x70] sm:$0xff]  }
0x4c31   :  { %v6611_v58 = vpop.xlane.xlu1 %6610 }
0x4c32   :  { %8840 = vrcp.f32 %v6611_v58  ;;  %v8605_v58 = vld [vmem:[%s11127_s27 + $0x78] sm:$0xff]  }
0x4c33   :  { %v6618_v25 = vpop.permute.xlu0 %6617 }
0x4c34   :  { %8297 = vmatpush3.bf16.msra.mxu0 %v6618_v25  ;;  %v7431_v25 = vld [vmem:[#allocation37 + $0x1] ss:$0 sm:$0xff] }
0x4c35   :  { %8308 = vmatprep.subr.bf16.mxu0 %v9557_v42 }
0x4c3a   :  { %v8839_v19 = vpop.eup %8838 }
0x4c3b   :  { %v6614_v26 = vmul.f32 %v8839_v19, %v8835_v59 }
0x4c3c   :  { %v8841_v24 = vpop.eup %8840 }
0x4c3d   :  { %v6615_v28 = vmul.f32 %v8841_v24, %v8837_v51  ;;  %v7429_v51 = vld [vmem:[#allocation33 + $0x1] ss:$0 sm:$0xff] }
0x4c3f   :  { %v6616_v27 = vpack.c.bf16 %v6615_v28, %v6614_v26 }
0x4c41   :  { %8299 = vmatmul.mubr.msk.bf16.vlgmr.msra.gmra.mrb[172].mxu0 %vm736_vm2, %v6616_v27 }
0x4c42   :  { %8316 = vmatprep.mubr.msk.bf16.mxu0 %vm9558_vm1, %v9557_v42 }
0x4d14   :  { %v6657_v16 = vpop.f32.mrb[172].mxu0 }
0x4d15   :  { %v8300_v57 = vpop.f32.mrb[173].mxu0 }
0x4d16   :  { %v6660_v30 = vpop.f32.mrb[174].mxu0 }
0x4d17   :  { %v6664_v31 = vpack.c.bf16 %v6660_v30, %v6657_v16  ;;  %v8301_v20 = vpop.f32.mrb[175].mxu0 }
0x4d18   :  { %v7437_v20 = vld [vmem:[#allocation39 + $0x1] ss:$0 sm:$0xff] }
0x4d19   :  { %8305 = vmatmul.mubr.msk.bf16.vlgmr.msra.gmra.mrb[168].mxu1 %vm736_vm2, %v6664_v31 }
0x4d1a   :  { %8336 = vmatprep.mubr.msk.bf16.mxu1 %vm9558_vm1, %v9557_v42  ;;  %8321 = vmatpush3.bf16.msra.mxu1 %v8598_v53 }
0x4d1b   :  { %8322 = vmatprep.subr.bf16.mxu1 %v9557_v42 }
0x4d1e   :  { %8323 = vmatpush3.bf16.msra.mxu1 %v8599_v4 }
0x4d1f   :  { %8324 = vmatprep.subr.bf16.mxu1 %v9557_v42 }
0x4d22   :  { %8325 = vmatpush3.bf16.msra.mxu1 %v8600_v60 }
0x4d23   :  { %8326 = vmatprep.subr.bf16.mxu1 %v9557_v42 }
0x4d26   :  { %8327 = vmatpush3.bf16.msra.mxu1 %v8601_v0 }
0x4d27   :  { %8328 = vmatprep.subr.bf16.mxu1 %v9557_v42 }
0x4d2a   :  { %8329 = vmatpush3.bf16.msra.mxu1 %v8602_v1 }
0x4d2b   :  { %8330 = vmatprep.subr.bf16.mxu1 %v9557_v42 }
0x4d2e   :  { %8331 = vmatpush3.bf16.msra.mxu1 %v8603_v5  ;;  %v7446_v5 = vld [vmem:[#allocation40 + $0x1] ss:$0 sm:$0xff] }
0x4d2f   :  { %8332 = vmatprep.subr.bf16.mxu1 %v9557_v42 }
0x4d32   :  { %8333 = vmatpush3.bf16.msra.mxu1 %v8604_v56 }
0x4d33   :  { %8334 = vmatprep.subr.bf16.mxu1 %v9557_v42 }
0x4d36   :  { %8335 = vmatpush3.bf16.msra.mxu1 %v8605_v58 }
0x4dec   :  { %v6708_v23 = vpop.f32.mrb[168].mxu1 }
0x4ded   :  { %v6715_v36 = vadd.f32 %v6708_v23, %v6541_v18  ;;  %v8306_v63 = vpop.f32.mrb[169].mxu1  ;;  %v7430_v18 = vld [vmem:[#allocation34 + $0x1] ss:$0 sm:$0xff] }
0x4dee   :  { %v6711_v37 = vpop.f32.mrb[170].mxu1 }
0x4def   :  { %v6723_v35 = vadd.f32 %v7428_v34, %v6715_v36  ;;  %v6716_v38 = vadd.f32 %v6711_v37, %v6542_v52  ;;  %v8307_v17 = vpop.f32.mrb[171].mxu1 }
0x4df1   :  { %v6724_v2 = vadd.f32 %v7428_v34, %v6716_v38  ;;  %v6725_v39 = vadd.f32 %v6723_v35, %v10897_v14 }
0x4df3   :  { %v6727_v41 = vsel %vm590_vm0, %v6725_v39, 0.0  ;;  %v6726_v62 = vadd.f32 %v6724_v2, %v10899_v61  ;;  %v8594_v61 = vld [vmem:[#allocation36 + $0x20] sm:$0xff]  }
0x4df4   :  { %6728 = vadd.xlane.f32.xlu1 %v6727_v41  ;;  %8309 = vmatpush3.bf16.msra.mxu0 %v8594_v61  ;;  %v8609_v61 = vld [vmem:[%s11128_s28 + $0x18] sm:$0xff]  }
0x4df5   :  { %v6730_v46 = vsel %vm590_vm0, %v6726_v62, 0.0  ;;  %8310 = vmatprep.subr.bf16.mxu0 %v9557_v42 }
0x4df8   :  { %6731 = vadd.xlane.f32.xlu1 %v6730_v46  ;;  %8311 = vmatpush3.bf16.msra.mxu0 %v8595_v32 }
0x4df9   :  { %8312 = vmatprep.subr.bf16.mxu0 %v9557_v42 }
0x4dfc   :  { %8313 = vmatpush3.bf16.msra.mxu0 %v8596_v44 }
0x4dfd   :  { %8314 = vmatprep.subr.bf16.mxu0 %v9557_v42 }
0x4e00   :  { %8315 = vmatpush3.bf16.msra.mxu0 %v8597_v40 }
0x4e01   :  { %8340 = vmatprep.subr.bf16.mxu0 %v9557_v42 }
0x4e81   :  { %v6729_v47 = vpop.xlane.xlu1 %6728 }
0x4e82   :  { %v6733_v8 = vmul.f32 0.015625, %v6729_v47 }
0x4e84   :  { %v6735_v6 = vsub.f32 %v6725_v39, %v6733_v8 }
0x4e85   :  { %v6732_v48 = vpop.xlane.xlu1 %6731 }
0x4e86   :  { %v6734_v12 = vmul.f32 0.015625, %v6732_v48  ;;  %v6737_v21 = vmul.f32 %v6735_v6, %v6735_v6 }
0x4e88   :  { %v6736_v29 = vsub.f32 %v6726_v62, %v6734_v12  ;;  %v6739_v50 = vsel %vm590_vm0, %v6737_v21, 0.0 }
0x4e89   :  { %6740 = vadd.xlane.f32.xlu1 %v6739_v50  ;;  %v8606_v50 = vld [vmem:[%s11128_s28] sm:$0xff]  }
0x4e8a   :  { %v6738_v14 = vmul.f32 %v6736_v29, %v6736_v29 }
0x4e8c   :  { %v6742_v33 = vsel %vm590_vm0, %v6738_v14, 0.0  ;;  %v8607_v14 = vld [vmem:[%s11128_s28 + $0x8] sm:$0xff]  }
0x4e8d   :  { %6743 = vadd.xlane.f32.xlu1 %v6742_v33  ;;  %v8608_v33 = vld [vmem:[%s11128_s28 + $0x10] sm:$0xff]  }
0x4f16   :  { %v6741_v9 = vpop.xlane.xlu1 %6740 }
0x4f17   :  { %v6745_v49 = vmul.f32 0.015625, %v6741_v9 }
0x4f19   :  { %v6747_v7 = vadd.f32 1e-05, %v6745_v49 }
0x4f1a   :  { %v6744_v13 = vpop.xlane.xlu1 %6743 }
0x4f1b   :  { %8842 = vrsqrt.f32 %v6747_v7  ;;  %v6746_v15 = vmul.f32 0.015625, %v6744_v13  ;;  %v7447_v13 = vld [vmem:[#allocation42 + $0x1] ss:$0 sm:$0xff] }
0x4f1d   :  { %v6748_v10 = vadd.f32 1e-05, %v6746_v15 }
0x4f1f   :  { %8844 = vrsqrt.f32 %v6748_v10 }
0x4f25   :  { %v8843_v59 = vpop.eup %8842 }
0x4f26   :  { %v6751_v11 = vmul.f32 %v8843_v59, %v6735_v6 }
0x4f28   :  { %v6759_v43 = vmul.f32 %v7429_v51, %v6751_v11  ;;  %v7448_v11 = vld [vmem:[#allocation6] ss:$0 sm:$0xff] }
0x4f29   :  { %v8845_v3 = vpop.eup %8844 }
0x4f2a   :  { %v6752_v45 = vmul.f32 %v8845_v3, %v6736_v29  ;;  %v6767_v55 = vadd.f32 %v7430_v18, %v6759_v43 }
0x4f2c   :  { %v6760_v54 = vmul.f32 %v7429_v51, %v6752_v45 }
0x4f2e   :  { %v6768_v52 = vadd.f32 %v7430_v18, %v6760_v54 }
0x4f30   :  { %v6769_v22 = vpack.c.bf16 %v6768_v52, %v6767_v55 }
0x4f32   :  { %8317 = vmatmul.mubr.msk.bf16.vlgmr.msra.gmra.mrb[176].mxu0 %vm590_vm0, %v6769_v22 }
0x4f33   :  { %8348 = vmatprep.mubr.msk.bf16.mxu0 %vm9558_vm1, %v9557_v42  ;;  %8341 = vmatpush3.bf16.msra.mxu0 %v8606_v50 }
0x4f34   :  { %8342 = vmatprep.subr.bf16.mxu0 %v9557_v42 }
0x4f37   :  { %8343 = vmatpush3.bf16.msra.mxu0 %v8607_v14 }
0x4f38   :  { %8344 = vmatprep.subr.bf16.mxu0 %v9557_v42 }
0x4f3b   :  { %8345 = vmatpush3.bf16.msra.mxu0 %v8608_v33 }
0x4f3c   :  { %8346 = vmatprep.subr.bf16.mxu0 %v9557_v42 }
0x4f3f   :  { %8347 = vmatpush3.bf16.msra.mxu0 %v8609_v61 }
0x5005   :  { %v6837_v19 = vpop.f32.mrb[176].mxu0 }
0x5006   :  { %v6838_v24 = vadd.f32 %v7431_v25, %v6837_v19  ;;  %v8318_v26 = vpop.f32.mrb[177].mxu0 }
0x5007   :  { %v6840_v28 = vpop.f32.mrb[178].mxu0 }
0x5008   :  { %v6841_v27 = vadd.f32 %v7431_v25, %v6840_v28  ;;  %v8319_v16 = vpop.f32.mrb[179].mxu0  ;;  %v6844_v57 = vmax.f32 %v6838_v24, 0.0 }
0x500a   :  { %v6845_v30 = vmax.f32 %v6841_v27, 0.0 }
0x500c   :  { %v6846_v31 = vpack.c.bf16 %v6845_v30, %v6844_v57 }
0x500e   :  { %8337 = vmatmul.mubr.bf16.vlgmr.msra.gmra.mrb[172].mxu1 %v6846_v31 }
0x50e1   :  { %v6935_v34 = vpop.f32.mrb[172].mxu1 }
0x50e2   :  { %v6936_v23 = vadd.f32 %v7437_v20, %v6935_v34  ;;  %v8338_v36 = vpop.f32.mrb[173].mxu1 }
0x50e3   :  { %v6938_v63 = vpop.f32.mrb[174].mxu1 }
0x50e4   :  { %v6942_v37 = vadd.f32 %v6936_v23, %v6767_v55  ;;  %v6939_v35 = vadd.f32 %v7437_v20, %v6938_v63  ;;  %v8339_v38 = vpop.f32.mrb[175].mxu1 }
0x50e6   :  { %v6943_v17 = vadd.f32 %v6939_v35, %v6768_v52  ;;  %v6944_v2 = vsel %vm590_vm0, %v6942_v37, 0.0 }
0x50e7   :  { %6945 = vadd.xlane.f32.xlu1 %v6944_v2 }
0x50e8   :  { %v6947_v39 = vsel %vm590_vm0, %v6943_v17, 0.0 }
0x50e9   :  { %6948 = vadd.xlane.f32.xlu0 %v6947_v39 }
0x5174   :  { %v6946_v41 = vpop.xlane.xlu1 %6945 }
0x5175   :  { %v6950_v62 = vmul.f32 0.015625, %v6946_v41 }
0x5176   :  { %v6949_v46 = vpop.xlane.xlu0 %6948 }
0x5177   :  { %v6952_v47 = vsub.f32 %v6942_v37, %v6950_v62  ;;  %v6951_v8 = vmul.f32 0.015625, %v6949_v46 }
0x5179   :  { %v6953_v6 = vsub.f32 %v6943_v17, %v6951_v8  ;;  %v6954_v48 = vmul.f32 %v6952_v47, %v6952_v47 }
0x517b   :  { %v6956_v12 = vsel %vm590_vm0, %v6954_v48, 0.0  ;;  %v6955_v21 = vmul.f32 %v6953_v6, %v6953_v6 }
0x517c   :  { %6957 = vadd.xlane.f32.xlu1 %v6956_v12 }
0x517d   :  { %v6959_v29 = vsel %vm590_vm0, %v6955_v21, 0.0 }
0x5180   :  { %6960 = vadd.xlane.f32.xlu1 %v6959_v29 }
0x5209   :  { %v6958_v32 = vpop.xlane.xlu1 %6957 }
0x520a   :  { %v6962_v44 = vmul.f32 0.015625, %v6958_v32 }
0x520c   :  { %v6964_v40 = vadd.f32 1e-05, %v6962_v44 }
0x520d   :  { %v6961_v53 = vpop.xlane.xlu1 %6960 }
0x520e   :  { %8846 = vrsqrt.f32 %v6964_v40  ;;  %v6963_v4 = vmul.f32 0.015625, %v6961_v53 }
0x5210   :  { %v6965_v60 = vadd.f32 1e-05, %v6963_v4 }
0x5212   :  { %8848 = vrsqrt.f32 %v6965_v60 }
0x5218   :  { %v8847_v0 = vpop.eup %8846 }
0x5219   :  { %v6968_v1 = vmul.f32 %v8847_v0, %v6952_v47 }
0x521b   :  { %v6976_v49 = vmul.f32 %v7446_v5, %v6968_v1 }
0x521c   :  { %v8849_v9 = vpop.eup %8848 }
0x521d   :  { %v6969_v7 = vmul.f32 %v8849_v9, %v6953_v6  ;;  %v6984_v42 = vadd.f32 %v7447_v13, %v6976_v49 }
0x521f   :  { %v6977_v15 = vmul.f32 %v7446_v5, %v6969_v7 }
0x5221   :  { %v6985_v10 = vadd.f32 %v7447_v13, %v6977_v15 }
0x5223   :  { %v6986_v59 = vpack.c.bf16 %v6985_v10, %v6984_v42 }
0x5225   :  { %8349 = vmatmul.mubr.msk.bf16.vlgmr.msra.gmra.mrb[180].mxu0 %vm590_vm0, %v6986_v59 }
0x52f8   :  { %v7063_v51 = vpop.f32.mrb[180].mxu0 }
0x52f9   :  { %v7064_v3 = vadd.f32 %v7448_v11, %v7063_v51  ;;  %v8350_v43 = vpop.f32.mrb[181].mxu0 }
0x52fa   :  { %v7066_v45 = vpop.f32.mrb[182].mxu0 }
0x52fb   :  { %7070 = vst [vmem:[%s9777_s24] sm:$0xff] %v7064_v3  ;;  %v7067_v18 = vadd.f32 %v7448_v11, %v7066_v45  ;;  %v8351_v54 = vpop.f32.mrb[183].mxu0 }
0x52fd   :  { %7071 = vst [vmem:[%s9777_s24 + $0x8] sm:$0xff] %v7067_v18 }
0x52fe   :  { %7076 = vsyncpa [#allocation3], 1 }
0x52ff   :  { %7077 = vsyncpa [#allocation5], 1 }
0x5300   :  { %7078 = vsyncpa [#allocation8], 1 }
0x5301   :  { %7079 = vsyncpa [#allocation11], 1 }
0x5302   :  { %7080 = vsyncpa [#allocation14], 1 }
0x5303   :  { %7081 = vsyncpa [#allocation17], 1 }
0x5304   :  { %7082 = vsyncpa [#allocation20], 1 }
0x5305   :  { %7083 = vsyncpa [#allocation23], 1 }
0x5306   :  { %7084 = vsyncpa [#allocation26], 1 }
0x5307   :  { %7085 = vsyncpa [#allocation29], 1 }
0x5308   :  { %7086 = vsyncpa [#allocation32], 1 }
0x5309   :  { %7087 = vsyncpa [#allocation35], 1 }
0x530a   :  { %7088 = vsyncpa [#allocation38], 1 }
0x530b   :  { %7089 = vsyncpa [#allocation41], 1 }

</bundles_post_ra>
